<compile_context>
chip_gen: v6e
topology: v6e:2x2x1
jax: 0.10.0
libtpu: 0.0.40
codegen_flags: <defaults>
</compile_context>

<pallas_src>
import functools
import math

import jax
import jax.numpy as jnp
from jax import lax
from jax.experimental import pallas as pl
from jax.experimental.pallas import tpu as pltpu


def _layernorm(x, gamma, beta, eps=1e-5):
    mu = jnp.mean(x, axis=-1, keepdims=True)
    var = jnp.mean((x - mu) ** 2, axis=-1, keepdims=True)
    return (x - mu) * lax.rsqrt(var + eps) * gamma + beta


def gat_layer_kernel(h_ref,
                     ln1_g_ref, ln1_b_ref,
                     wqkv_ref, bqkv_ref,
                     wo_ref, bo_ref,
                     ln2_g_ref, ln2_b_ref,
                     w1_ref, b1_ref,
                     w2_ref, b2_ref,
                     out_ref,
                     qkv_scr, att_scr,
                     *, head_num):
    # h_ref block is (S, D) for one batch element (batch dim squeezed).
    # out_ref block is (tq, D) for one query tile of that batch element.
    tq, D = out_ref.shape
    sub = D // head_num
    scale = 1.0 / math.sqrt(sub)
    qi = pl.program_id(1)

    # ---- once per batch element: LayerNorm + fused QKV projection -> scratch ----
    @pl.when(qi == 0)
    def _():
        x = h_ref[...].astype(jnp.float32)                              # (S, D)
        ln1 = _layernorm(x, ln1_g_ref[...], ln1_b_ref[...])
        qkv = jnp.dot(ln1.astype(jnp.bfloat16), wqkv_ref[...],
                      preferred_element_type=jnp.float32) + bqkv_ref[...]
        qkv_scr[...] = qkv.astype(jnp.bfloat16)                         # (S, 3D)

    row0 = pl.multiple_of(qi * tq, tq)

    # ---- per-head scaled dot-product attention for this query tile ----
    for hh in range(head_num):
        lo, hi = hh * sub, (hh + 1) * sub
        qh = qkv_scr[pl.ds(row0, tq), lo:hi]            # (tq, sub) bf16
        kh = qkv_scr[:, D + lo:D + hi]                  # (S,  sub) bf16
        vh = qkv_scr[:, 2 * D + lo:2 * D + hi]          # (S,  sub) bf16
        # contract last dims directly -> no explicit transpose of K
        scores = lax.dot_general(
            qh, kh, (((1,), (1,)), ((), ())),
            preferred_element_type=jnp.float32) * scale                  # (tq, S)
        scores = scores - jnp.max(scores, axis=-1, keepdims=True)
        p = jnp.exp(scores)
        p = p * pl.reciprocal(jnp.sum(p, axis=-1, keepdims=True), approx=True)
        att_scr[:, lo:hi] = jnp.dot(p.astype(jnp.bfloat16), vh,
                                    preferred_element_type=jnp.float32)

    # ---- output projection + dropout(identity) + head_num scalar ----
    att = jnp.dot(att_scr[...].astype(jnp.bfloat16), wo_ref[...],
                  preferred_element_type=jnp.float32) + bo_ref[...]
    mid = att + jnp.float32(head_num)

    # ---- PositionwiseFeedForward (LN -> linear -> relu -> linear) + residual ----
    ln2 = _layernorm(mid, ln2_g_ref[...], ln2_b_ref[...])
    inter = jnp.maximum(
        jnp.dot(ln2.astype(jnp.bfloat16), w1_ref[...],
                preferred_element_type=jnp.float32) + b1_ref[...], 0.0)
    ffo = jnp.dot(inter.astype(jnp.bfloat16), w2_ref[...],
                  preferred_element_type=jnp.float32) + b2_ref[...]

    out_ref[...] = (ffo + mid).astype(out_ref.dtype)


def _build_call(B, S, D, tq, param_shapes, head_num, out_dtype,
                single_buffer_weights):
    kernel = functools.partial(gat_layer_kernel, head_num=head_num)
    n_qt = S // tq

    # full (S, D) slab per batch element; index map is independent of the
    # q-tile axis so the slab is DMA'd only when the batch index changes.
    in_specs = [pl.BlockSpec((None, S, D), lambda b, qi: (b, 0, 0))]
    for shp in param_shapes:                     # replicated weights / biases
        if single_buffer_weights:
            in_specs.append(pl.BlockSpec(shp, lambda b, qi: (0, 0),
                                         pipeline_mode=pl.Buffered(1)))
        else:
            in_specs.append(pl.BlockSpec(shp, lambda b, qi: (0, 0)))

    return pl.pallas_call(
        kernel,
        out_shape=jax.ShapeDtypeStruct((B, S, D), out_dtype),
        grid=(B, n_qt),
        in_specs=in_specs,
        out_specs=pl.BlockSpec((None, tq, D), lambda b, qi: (b, qi, 0)),
        scratch_shapes=[
            pltpu.VMEM((S, 3 * D), jnp.bfloat16),   # cached fused Q|K|V
            pltpu.VMEM((tq, D), jnp.float32),        # concat-heads attention out
        ],
        compiler_params=pltpu.CompilerParams(
            dimension_semantics=("parallel", "arbitrary")),
    )


def gat_layer(h, params, head_num, *, tq=128):
    """h: (B, S, D) float32.  params: ordered list of 2D arrays (see init_params)."""
    B, S, D = h.shape
    assert D % head_num == 0, "d_model must be divisible by head_num"
    tq = min(tq, S)
    assert S % tq == 0, "seq length must be divisible by the query tile"
    shapes = [p.shape for p in params]
    try:
        fn = _build_call(B, S, D, tq, shapes, head_num, h.dtype,
                         single_buffer_weights=True)
        return fn(h, *params)
    except Exception:
        # pipeline_mode / single-buffering not supported in this jax build:
        # fall back to default (double-buffered) weight specs.
        fn = _build_call(B, S, D, tq, shapes, head_num, h.dtype,
                         single_buffer_weights=False)
        return fn(h, *params)


def init_params(key, d_model):
    """Deterministic synthetic params.

    Linear weights are stored TRANSPOSED vs torch, i.e. (in, out), in bf16
    (matmul operands); biases and LayerNorm params stay f32 as (1, dim) rows.
    Q/K/V weights and biases are concatenated along the output dim.
    """
    keys = jax.random.split(key, 12)
    D = d_model

    def w(k, shape):
        return (jax.random.normal(k, shape, jnp.float32) * 0.1).astype(jnp.bfloat16)

    def b(k, shape):
        return jax.random.normal(k, shape, jnp.float32) * 0.01

    ln1_g = jnp.ones((1, D), jnp.float32)
    ln1_b = jnp.zeros((1, D), jnp.float32)
    w_qkv = jnp.concatenate([w(keys[0], (D, D)), w(keys[1], (D, D)),
                             w(keys[2], (D, D))], axis=1)        # (D, 3D) bf16
    b_qkv = jnp.concatenate([b(keys[3], (1, D)), b(keys[4], (1, D)),
                             b(keys[5], (1, D))], axis=1)        # (1, 3D) f32
    wo, bo = w(keys[6], (D, D)), b(keys[7], (1, D))
    ln2_g = jnp.ones((1, D), jnp.float32)
    ln2_b = jnp.zeros((1, D), jnp.float32)
    w1, b1 = w(keys[8], (D, D)), b(keys[9], (1, D))              # d_ff == d_model
    w2, b2 = w(keys[10], (D, D)), b(keys[11], (1, D))
    return [ln1_g, ln1_b, w_qkv, b_qkv, wo, bo,
            ln2_g, ln2_b, w1, b1, w2, b2]


if __name__ == "__main__":
    head_num = 4
    d_model = 128     # lane-dense (multiple of 128); sub-head dim = 32
    batch = 2
    seq = 128

    key = jax.random.PRNGKey(0)
    k_h, k_p = jax.random.split(key)
    h = jax.random.normal(k_h, (batch, seq, d_model), jnp.float32)
    params = init_params(k_p, d_model)

    out = gat_layer(h, params, head_num)
    out = jax.block_until_ready(out)
    assert out.shape == (batch, seq, d_model)
    assert jnp.isfinite(out).all()
    print("KERNEL_OK")
</pallas_src>

<mosaic_0001>
module attributes {stable_mosaic.version = 11 : i64} {
  func.func @gat_layer_kernel(%arg0: i32, %arg1: i32, %arg2: memref<1x128x128xf32, #tpu.memory_space<vmem>>, %arg3: memref<1x128xf32, #tpu.memory_space<vmem>>, %arg4: memref<1x128xf32, #tpu.memory_space<vmem>>, %arg5: memref<128x384xbf16, #tpu.memory_space<vmem>>, %arg6: memref<1x384xf32, #tpu.memory_space<vmem>>, %arg7: memref<128x128xbf16, #tpu.memory_space<vmem>>, %arg8: memref<1x128xf32, #tpu.memory_space<vmem>>, %arg9: memref<1x128xf32, #tpu.memory_space<vmem>>, %arg10: memref<1x128xf32, #tpu.memory_space<vmem>>, %arg11: memref<128x128xbf16, #tpu.memory_space<vmem>>, %arg12: memref<1x128xf32, #tpu.memory_space<vmem>>, %arg13: memref<128x128xbf16, #tpu.memory_space<vmem>>, %arg14: memref<1x128xf32, #tpu.memory_space<vmem>>, %arg15: memref<1x128x128xf32, #tpu.memory_space<vmem>>, %arg16: memref<128x384xbf16, #tpu.memory_space<vmem>>, %arg17: memref<128x128xf32, #tpu.memory_space<vmem>>) attributes {dimension_semantics = [#tpu.dimension_semantics<parallel>, #tpu.dimension_semantics<arbitrary>], iteration_bounds = array<i64: 2, 1>, scalar_prefetch = 0 : i64, scratch_operands = 2 : i64, tpu.core_type = #tpu.core_type<tc>, window_params = [{transform_indices = @transform_0, window_bounds = array<i64: 1, 128, 128>}, {pipeline_mode = #tpu.pipeline_mode<synchronous>, transform_indices = @transform_1, window_bounds = array<i64: 1, 128>}, {pipeline_mode = #tpu.pipeline_mode<synchronous>, transform_indices = @transform_2, window_bounds = array<i64: 1, 128>}, {pipeline_mode = #tpu.pipeline_mode<synchronous>, transform_indices = @transform_3, window_bounds = array<i64: 128, 384>}, {pipeline_mode = #tpu.pipeline_mode<synchronous>, transform_indices = @transform_4, window_bounds = array<i64: 1, 384>}, {pipeline_mode = #tpu.pipeline_mode<synchronous>, transform_indices = @transform_5, window_bounds = array<i64: 128, 128>}, {pipeline_mode = #tpu.pipeline_mode<synchronous>, transform_indices = @transform_6, window_bounds = array<i64: 1, 128>}, {pipeline_mode = #tpu.pipeline_mode<synchronous>, transform_indices = @transform_7, window_bounds = array<i64: 1, 128>}, {pipeline_mode = #tpu.pipeline_mode<synchronous>, transform_indices = @transform_8, window_bounds = array<i64: 1, 128>}, {pipeline_mode = #tpu.pipeline_mode<synchronous>, transform_indices = @transform_9, window_bounds = array<i64: 128, 128>}, {pipeline_mode = #tpu.pipeline_mode<synchronous>, transform_indices = @transform_10, window_bounds = array<i64: 1, 128>}, {pipeline_mode = #tpu.pipeline_mode<synchronous>, transform_indices = @transform_11, window_bounds = array<i64: 128, 128>}, {pipeline_mode = #tpu.pipeline_mode<synchronous>, transform_indices = @transform_12, window_bounds = array<i64: 1, 128>}, {transform_indices = @transform_13, window_bounds = array<i64: 1, 128, 128>}]} {
    %c0_i32 = arith.constant 0 : i32
    %0 = arith.cmpi eq, %arg1, %c0_i32 : i32
    %1 = arith.extui %0 : i1 to i32
    %c0_i32_0 = arith.constant 0 : i32
    %2 = arith.cmpi ne, %1, %c0_i32_0 : i32
    scf.if %2 {
      %c0_67 = arith.constant 0 : index
      %c0_68 = arith.constant 0 : index
      %c0_69 = arith.constant 0 : index
      %136 = vector.load %arg2[%c0_67, %c0_68, %c0_69] : memref<1x128x128xf32, #tpu.memory_space<vmem>>, vector<1x128x128xf32>
      %137 = vector.shape_cast %136 : vector<1x128x128xf32> to vector<128x128xf32>
      %c0_70 = arith.constant 0 : index
      %c0_71 = arith.constant 0 : index
      %138 = vector.load %arg3[%c0_70, %c0_71] : memref<1x128xf32, #tpu.memory_space<vmem>>, vector<1x128xf32>
      %c0_72 = arith.constant 0 : index
      %c0_73 = arith.constant 0 : index
      %139 = vector.load %arg4[%c0_72, %c0_73] : memref<1x128xf32, #tpu.memory_space<vmem>>, vector<1x128xf32>
      %cst_74 = arith.constant dense<0.000000e+00> : vector<128xf32>
      %140 = vector.multi_reduction <add>, %137, %cst_74 [1] : vector<128x128xf32> to vector<128xf32>
      %141 = vector.shape_cast %140 : vector<128xf32> to vector<128x1xf32>
      %cst_75 = arith.constant 1.280000e+02 : f32
      %142 = vector.broadcast %cst_75 : f32 to vector<128x1xf32>
      %143 = arith.divf %141, %142 : vector<128x1xf32>
      %144 = vector.broadcast %143 : vector<128x1xf32> to vector<128x128xf32>
      %145 = arith.subf %137, %144 : vector<128x128xf32>
      %146 = arith.mulf %145, %145 : vector<128x128xf32>
      %cst_76 = arith.constant dense<0.000000e+00> : vector<128xf32>
      %147 = vector.multi_reduction <add>, %146, %cst_76 [1] : vector<128x128xf32> to vector<128xf32>
      %148 = vector.shape_cast %147 : vector<128xf32> to vector<128x1xf32>
      %cst_77 = arith.constant 1.280000e+02 : f32
      %149 = vector.broadcast %cst_77 : f32 to vector<128x1xf32>
      %150 = arith.divf %148, %149 : vector<128x1xf32>
      %151 = vector.broadcast %143 : vector<128x1xf32> to vector<128x128xf32>
      %152 = arith.subf %137, %151 : vector<128x128xf32>
      %cst_78 = arith.constant 9.99999974E-6 : f32
      %153 = vector.broadcast %cst_78 : f32 to vector<128x1xf32>
      %154 = arith.addf %150, %153 : vector<128x1xf32>
      %155 = math.rsqrt %154 : vector<128x1xf32>
      %156 = vector.broadcast %155 : vector<128x1xf32> to vector<128x128xf32>
      %157 = arith.mulf %152, %156 : vector<128x128xf32>
      %158 = vector.broadcast %138 : vector<1x128xf32> to vector<128x128xf32>
      %159 = arith.mulf %157, %158 : vector<128x128xf32>
      %160 = vector.broadcast %139 : vector<1x128xf32> to vector<128x128xf32>
      %161 = arith.addf %159, %160 : vector<128x128xf32>
      %162 = arith.truncf %161 : vector<128x128xf32> to vector<128x128xbf16>
      %c0_79 = arith.constant 0 : index
      %c0_80 = arith.constant 0 : index
      %163 = vector.load %arg5[%c0_79, %c0_80] : memref<128x384xbf16, #tpu.memory_space<vmem>>, vector<128x384xbf16>
      %cst_81 = arith.constant dense<0.000000e+00> : vector<128x384xf32>
      %164 = tpu.matmul %162, %163, %cst_81 {dimension_numbers = #tpu.dot_dimension_numbers<[1], [0], [0], [1], [0, 0, 1, 1], [], []>} : vector<128x128xbf16>, vector<128x384xbf16>, vector<128x384xf32> -> vector<128x384xf32>
      %c0_82 = arith.constant 0 : index
      %c0_83 = arith.constant 0 : index
      %165 = vector.load %arg6[%c0_82, %c0_83] : memref<1x384xf32, #tpu.memory_space<vmem>>, vector<1x384xf32>
      %166 = vector.broadcast %165 : vector<1x384xf32> to vector<128x384xf32>
      %167 = arith.addf %164, %166 : vector<128x384xf32>
      %168 = arith.truncf %167 : vector<128x384xf32> to vector<128x384xbf16>
      %c0_84 = arith.constant 0 : index
      %c0_85 = arith.constant 0 : index
      %169 = vector.load %arg16[%c0_84, %c0_85] : memref<128x384xbf16, #tpu.memory_space<vmem>>, vector<128x384xbf16>
      tpu.vector_store %arg16[%c0_84, %c0_85], %168 {strides = array<i32>} : memref<128x384xbf16, #tpu.memory_space<vmem>>, vector<128x384xbf16>,
    } else {
    }
    %c128_i32 = arith.constant 128 : i32
    %3 = arith.muli %arg1, %c128_i32 : i32
    %4 = tpu.assume_multiple %3, 128 : i32
    %5 = arith.index_cast %4 : i32 to index
    %c0 = arith.constant 0 : index
    %6 = vector.load %arg16[%5, %c0] : memref<128x384xbf16, #tpu.memory_space<vmem>>, vector<128x32xbf16>
    %c0_1 = arith.constant 0 : index
    %c128 = arith.constant 128 : index
    %7 = vector.load %arg16[%c0_1, %c128] : memref<128x384xbf16, #tpu.memory_space<vmem>>, vector<128x32xbf16>
    %c0_2 = arith.constant 0 : index
    %c256 = arith.constant 256 : index
    %8 = vector.load %arg16[%c0_2, %c256] : memref<128x384xbf16, #tpu.memory_space<vmem>>, vector<128x32xbf16>
    %cst = arith.constant dense<0.000000e+00> : vector<128x128xf32>
    %9 = tpu.matmul %6, %7, %cst {dimension_numbers = #tpu.dot_dimension_numbers<[1], [1], [0], [0], [0, 0, 1, 0], [], []>} : vector<128x32xbf16>, vector<128x32xbf16>, vector<128x128xf32> -> vector<128x128xf32>
    %cst_3 = arith.constant 0.176776692 : f32
    %10 = vector.broadcast %cst_3 : f32 to vector<128x128xf32>
    %11 = arith.mulf %9, %10 : vector<128x128xf32>
    %cst_4 = arith.constant dense<0xFF800000> : vector<128xf32>
    %12 = vector.multi_reduction <maximumf>, %11, %cst_4 [1] : vector<128x128xf32> to vector<128xf32>
    %13 = vector.shape_cast %12 : vector<128xf32> to vector<128x1xf32>
    %14 = vector.broadcast %13 : vector<128x1xf32> to vector<128x128xf32>
    %15 = arith.subf %11, %14 : vector<128x128xf32>
    %16 = math.exp %15 : vector<128x128xf32>
    %cst_5 = arith.constant dense<0.000000e+00> : vector<128xf32>
    %17 = vector.multi_reduction <add>, %16, %cst_5 [1] : vector<128x128xf32> to vector<128xf32>
    %18 = vector.shape_cast %17 : vector<128xf32> to vector<128x1xf32>
    %19 = tpu.reciprocal %18 {approx = true} : vector<128x1xf32> -> vector<128x1xf32>
    %20 = vector.broadcast %19 : vector<128x1xf32> to vector<128x128xf32>
    %21 = arith.mulf %16, %20 : vector<128x128xf32>
    %22 = arith.truncf %21 : vector<128x128xf32> to vector<128x128xbf16>
    %cst_6 = arith.constant dense<0.000000e+00> : vector<128x32xf32>
    %23 = tpu.matmul %22, %8, %cst_6 {dimension_numbers = #tpu.dot_dimension_numbers<[1], [0], [0], [1], [0, 0, 1, 1], [], []>} : vector<128x128xbf16>, vector<128x32xbf16>, vector<128x32xf32> -> vector<128x32xf32>
    %c0_7 = arith.constant 0 : index
    %c0_8 = arith.constant 0 : index
    %24 = vector.load %arg17[%c0_7, %c0_8] : memref<128x128xf32, #tpu.memory_space<vmem>>, vector<128x32xf32>
    tpu.vector_store %arg17[%c0_7, %c0_8], %23 {strides = array<i32>} : memref<128x128xf32, #tpu.memory_space<vmem>>, vector<128x32xf32>,
    %25 = arith.index_cast %4 : i32 to index
    %c32 = arith.constant 32 : index
    %26 = vector.load %arg16[%25, %c32] : memref<128x384xbf16, #tpu.memory_space<vmem>>, vector<128x32xbf16>
    %c0_9 = arith.constant 0 : index
    %c160 = arith.constant 160 : index
    %27 = vector.load %arg16[%c0_9, %c160] : memref<128x384xbf16, #tpu.memory_space<vmem>>, vector<128x32xbf16>
    %c0_10 = arith.constant 0 : index
    %c288 = arith.constant 288 : index
    %28 = vector.load %arg16[%c0_10, %c288] : memref<128x384xbf16, #tpu.memory_space<vmem>>, vector<128x32xbf16>
    %cst_11 = arith.constant dense<0.000000e+00> : vector<128x128xf32>
    %29 = tpu.matmul %26, %27, %cst_11 {dimension_numbers = #tpu.dot_dimension_numbers<[1], [1], [0], [0], [0, 0, 1, 0], [], []>} : vector<128x32xbf16>, vector<128x32xbf16>, vector<128x128xf32> -> vector<128x128xf32>
    %cst_12 = arith.constant 0.176776692 : f32
    %30 = vector.broadcast %cst_12 : f32 to vector<128x128xf32>
    %31 = arith.mulf %29, %30 : vector<128x128xf32>
    %cst_13 = arith.constant dense<0xFF800000> : vector<128xf32>
    %32 = vector.multi_reduction <maximumf>, %31, %cst_13 [1] : vector<128x128xf32> to vector<128xf32>
    %33 = vector.shape_cast %32 : vector<128xf32> to vector<128x1xf32>
    %34 = vector.broadcast %33 : vector<128x1xf32> to vector<128x128xf32>
    %35 = arith.subf %31, %34 : vector<128x128xf32>
    %36 = math.exp %35 : vector<128x128xf32>
    %cst_14 = arith.constant dense<0.000000e+00> : vector<128xf32>
    %37 = vector.multi_reduction <add>, %36, %cst_14 [1] : vector<128x128xf32> to vector<128xf32>
    %38 = vector.shape_cast %37 : vector<128xf32> to vector<128x1xf32>
    %39 = tpu.reciprocal %38 {approx = true} : vector<128x1xf32> -> vector<128x1xf32>
    %40 = vector.broadcast %39 : vector<128x1xf32> to vector<128x128xf32>
    %41 = arith.mulf %36, %40 : vector<128x128xf32>
    %42 = arith.truncf %41 : vector<128x128xf32> to vector<128x128xbf16>
    %cst_15 = arith.constant dense<0.000000e+00> : vector<128x32xf32>
    %43 = tpu.matmul %42, %28, %cst_15 {dimension_numbers = #tpu.dot_dimension_numbers<[1], [0], [0], [1], [0, 0, 1, 1], [], []>} : vector<128x128xbf16>, vector<128x32xbf16>, vector<128x32xf32> -> vector<128x32xf32>
    %c0_16 = arith.constant 0 : index
    %c32_17 = arith.constant 32 : index
    %44 = vector.load %arg17[%c0_16, %c32_17] : memref<128x128xf32, #tpu.memory_space<vmem>>, vector<128x32xf32>
    tpu.vector_store %arg17[%c0_16, %c32_17], %43 {strides = array<i32>} : memref<128x128xf32, #tpu.memory_space<vmem>>, vector<128x32xf32>,
    %45 = arith.index_cast %4 : i32 to index
    %c64 = arith.constant 64 : index
    %46 = vector.load %arg16[%45, %c64] : memref<128x384xbf16, #tpu.memory_space<vmem>>, vector<128x32xbf16>
    %c0_18 = arith.constant 0 : index
    %c192 = arith.constant 192 : index
    %47 = vector.load %arg16[%c0_18, %c192] : memref<128x384xbf16, #tpu.memory_space<vmem>>, vector<128x32xbf16>
    %c0_19 = arith.constant 0 : index
    %c320 = arith.constant 320 : index
    %48 = vector.load %arg16[%c0_19, %c320] : memref<128x384xbf16, #tpu.memory_space<vmem>>, vector<128x32xbf16>
    %cst_20 = arith.constant dense<0.000000e+00> : vector<128x128xf32>
    %49 = tpu.matmul %46, %47, %cst_20 {dimension_numbers = #tpu.dot_dimension_numbers<[1], [1], [0], [0], [0, 0, 1, 0], [], []>} : vector<128x32xbf16>, vector<128x32xbf16>, vector<128x128xf32> -> vector<128x128xf32>
    %cst_21 = arith.constant 0.176776692 : f32
    %50 = vector.broadcast %cst_21 : f32 to vector<128x128xf32>
    %51 = arith.mulf %49, %50 : vector<128x128xf32>
    %cst_22 = arith.constant dense<0xFF800000> : vector<128xf32>
    %52 = vector.multi_reduction <maximumf>, %51, %cst_22 [1] : vector<128x128xf32> to vector<128xf32>
    %53 = vector.shape_cast %52 : vector<128xf32> to vector<128x1xf32>
    %54 = vector.broadcast %53 : vector<128x1xf32> to vector<128x128xf32>
    %55 = arith.subf %51, %54 : vector<128x128xf32>
    %56 = math.exp %55 : vector<128x128xf32>
    %cst_23 = arith.constant dense<0.000000e+00> : vector<128xf32>
    %57 = vector.multi_reduction <add>, %56, %cst_23 [1] : vector<128x128xf32> to vector<128xf32>
    %58 = vector.shape_cast %57 : vector<128xf32> to vector<128x1xf32>
    %59 = tpu.reciprocal %58 {approx = true} : vector<128x1xf32> -> vector<128x1xf32>
    %60 = vector.broadcast %59 : vector<128x1xf32> to vector<128x128xf32>
    %61 = arith.mulf %56, %60 : vector<128x128xf32>
    %62 = arith.truncf %61 : vector<128x128xf32> to vector<128x128xbf16>
    %cst_24 = arith.constant dense<0.000000e+00> : vector<128x32xf32>
    %63 = tpu.matmul %62, %48, %cst_24 {dimension_numbers = #tpu.dot_dimension_numbers<[1], [0], [0], [1], [0, 0, 1, 1], [], []>} : vector<128x128xbf16>, vector<128x32xbf16>, vector<128x32xf32> -> vector<128x32xf32>
    %c0_25 = arith.constant 0 : index
    %c64_26 = arith.constant 64 : index
    %64 = vector.load %arg17[%c0_25, %c64_26] : memref<128x128xf32, #tpu.memory_space<vmem>>, vector<128x32xf32>
    tpu.vector_store %arg17[%c0_25, %c64_26], %63 {strides = array<i32>} : memref<128x128xf32, #tpu.memory_space<vmem>>, vector<128x32xf32>,
    %65 = arith.index_cast %4 : i32 to index
    %c96 = arith.constant 96 : index
    %66 = vector.load %arg16[%65, %c96] : memref<128x384xbf16, #tpu.memory_space<vmem>>, vector<128x32xbf16>
    %c0_27 = arith.constant 0 : index
    %c224 = arith.constant 224 : index
    %67 = vector.load %arg16[%c0_27, %c224] : memref<128x384xbf16, #tpu.memory_space<vmem>>, vector<128x32xbf16>
    %c0_28 = arith.constant 0 : index
    %c352 = arith.constant 352 : index
    %68 = vector.load %arg16[%c0_28, %c352] : memref<128x384xbf16, #tpu.memory_space<vmem>>, vector<128x32xbf16>
    %cst_29 = arith.constant dense<0.000000e+00> : vector<128x128xf32>
    %69 = tpu.matmul %66, %67, %cst_29 {dimension_numbers = #tpu.dot_dimension_numbers<[1], [1], [0], [0], [0, 0, 1, 0], [], []>} : vector<128x32xbf16>, vector<128x32xbf16>, vector<128x128xf32> -> vector<128x128xf32>
    %cst_30 = arith.constant 0.176776692 : f32
    %70 = vector.broadcast %cst_30 : f32 to vector<128x128xf32>
    %71 = arith.mulf %69, %70 : vector<128x128xf32>
    %cst_31 = arith.constant dense<0xFF800000> : vector<128xf32>
    %72 = vector.multi_reduction <maximumf>, %71, %cst_31 [1] : vector<128x128xf32> to vector<128xf32>
    %73 = vector.shape_cast %72 : vector<128xf32> to vector<128x1xf32>
    %74 = vector.broadcast %73 : vector<128x1xf32> to vector<128x128xf32>
    %75 = arith.subf %71, %74 : vector<128x128xf32>
    %76 = math.exp %75 : vector<128x128xf32>
    %cst_32 = arith.constant dense<0.000000e+00> : vector<128xf32>
    %77 = vector.multi_reduction <add>, %76, %cst_32 [1] : vector<128x128xf32> to vector<128xf32>
    %78 = vector.shape_cast %77 : vector<128xf32> to vector<128x1xf32>
    %79 = tpu.reciprocal %78 {approx = true} : vector<128x1xf32> -> vector<128x1xf32>
    %80 = vector.broadcast %79 : vector<128x1xf32> to vector<128x128xf32>
    %81 = arith.mulf %76, %80 : vector<128x128xf32>
    %82 = arith.truncf %81 : vector<128x128xf32> to vector<128x128xbf16>
    %cst_33 = arith.constant dense<0.000000e+00> : vector<128x32xf32>
    %83 = tpu.matmul %82, %68, %cst_33 {dimension_numbers = #tpu.dot_dimension_numbers<[1], [0], [0], [1], [0, 0, 1, 1], [], []>} : vector<128x128xbf16>, vector<128x32xbf16>, vector<128x32xf32> -> vector<128x32xf32>
    %c0_34 = arith.constant 0 : index
    %c96_35 = arith.constant 96 : index
    %84 = vector.load %arg17[%c0_34, %c96_35] : memref<128x128xf32, #tpu.memory_space<vmem>>, vector<128x32xf32>
    tpu.vector_store %arg17[%c0_34, %c96_35], %83 {strides = array<i32>} : memref<128x128xf32, #tpu.memory_space<vmem>>, vector<128x32xf32>,
    %c0_36 = arith.constant 0 : index
    %c0_37 = arith.constant 0 : index
    %85 = vector.load %arg17[%c0_36, %c0_37] : memref<128x128xf32, #tpu.memory_space<vmem>>, vector<128x128xf32>
    %86 = arith.truncf %85 : vector<128x128xf32> to vector<128x128xbf16>
    %c0_38 = arith.constant 0 : index
    %c0_39 = arith.constant 0 : index
    %87 = vector.load %arg7[%c0_38, %c0_39] : memref<128x128xbf16, #tpu.memory_space<vmem>>, vector<128x128xbf16>
    %cst_40 = arith.constant dense<0.000000e+00> : vector<128x128xf32>
    %88 = tpu.matmul %86, %87, %cst_40 {dimension_numbers = #tpu.dot_dimension_numbers<[1], [0], [0], [1], [0, 0, 1, 1], [], []>} : vector<128x128xbf16>, vector<128x128xbf16>, vector<128x128xf32> -> vector<128x128xf32>
    %c0_41 = arith.constant 0 : index
    %c0_42 = arith.constant 0 : index
    %89 = vector.load %arg8[%c0_41, %c0_42] : memref<1x128xf32, #tpu.memory_space<vmem>>, vector<1x128xf32>
    %90 = vector.broadcast %89 : vector<1x128xf32> to vector<128x128xf32>
    %91 = arith.addf %88, %90 : vector<128x128xf32>
    %cst_43 = arith.constant 4.000000e+00 : f32
    %92 = vector.broadcast %cst_43 : f32 to vector<128x128xf32>
    %93 = arith.addf %91, %92 : vector<128x128xf32>
    %c0_44 = arith.constant 0 : index
    %c0_45 = arith.constant 0 : index
    %94 = vector.load %arg9[%c0_44, %c0_45] : memref<1x128xf32, #tpu.memory_space<vmem>>, vector<1x128xf32>
    %c0_46 = arith.constant 0 : index
    %c0_47 = arith.constant 0 : index
    %95 = vector.load %arg10[%c0_46, %c0_47] : memref<1x128xf32, #tpu.memory_space<vmem>>, vector<1x128xf32>
    %cst_48 = arith.constant dense<0.000000e+00> : vector<128xf32>
    %96 = vector.multi_reduction <add>, %93, %cst_48 [1] : vector<128x128xf32> to vector<128xf32>
    %97 = vector.shape_cast %96 : vector<128xf32> to vector<128x1xf32>
    %cst_49 = arith.constant 1.280000e+02 : f32
    %98 = vector.broadcast %cst_49 : f32 to vector<128x1xf32>
    %99 = arith.divf %97, %98 : vector<128x1xf32>
    %100 = vector.broadcast %99 : vector<128x1xf32> to vector<128x128xf32>
    %101 = arith.subf %93, %100 : vector<128x128xf32>
    %102 = arith.mulf %101, %101 : vector<128x128xf32>
    %cst_50 = arith.constant dense<0.000000e+00> : vector<128xf32>
    %103 = vector.multi_reduction <add>, %102, %cst_50 [1] : vector<128x128xf32> to vector<128xf32>
    %104 = vector.shape_cast %103 : vector<128xf32> to vector<128x1xf32>
    %cst_51 = arith.constant 1.280000e+02 : f32
    %105 = vector.broadcast %cst_51 : f32 to vector<128x1xf32>
    %106 = arith.divf %104, %105 : vector<128x1xf32>
    %107 = vector.broadcast %99 : vector<128x1xf32> to vector<128x128xf32>
    %108 = arith.subf %93, %107 : vector<128x128xf32>
    %cst_52 = arith.constant 9.99999974E-6 : f32
    %109 = vector.broadcast %cst_52 : f32 to vector<128x1xf32>
    %110 = arith.addf %106, %109 : vector<128x1xf32>
    %111 = math.rsqrt %110 : vector<128x1xf32>
    %112 = vector.broadcast %111 : vector<128x1xf32> to vector<128x128xf32>
    %113 = arith.mulf %108, %112 : vector<128x128xf32>
    %114 = vector.broadcast %94 : vector<1x128xf32> to vector<128x128xf32>
    %115 = arith.mulf %113, %114 : vector<128x128xf32>
    %116 = vector.broadcast %95 : vector<1x128xf32> to vector<128x128xf32>
    %117 = arith.addf %115, %116 : vector<128x128xf32>
    %118 = arith.truncf %117 : vector<128x128xf32> to vector<128x128xbf16>
    %c0_53 = arith.constant 0 : index
    %c0_54 = arith.constant 0 : index
    %119 = vector.load %arg11[%c0_53, %c0_54] : memref<128x128xbf16, #tpu.memory_space<vmem>>, vector<128x128xbf16>
    %cst_55 = arith.constant dense<0.000000e+00> : vector<128x128xf32>
    %120 = tpu.matmul %118, %119, %cst_55 {dimension_numbers = #tpu.dot_dimension_numbers<[1], [0], [0], [1], [0, 0, 1, 1], [], []>} : vector<128x128xbf16>, vector<128x128xbf16>, vector<128x128xf32> -> vector<128x128xf32>
    %c0_56 = arith.constant 0 : index
    %c0_57 = arith.constant 0 : index
    %121 = vector.load %arg12[%c0_56, %c0_57] : memref<1x128xf32, #tpu.memory_space<vmem>>, vector<1x128xf32>
    %122 = vector.broadcast %121 : vector<1x128xf32> to vector<128x128xf32>
    %123 = arith.addf %120, %122 : vector<128x128xf32>
    %cst_58 = arith.constant 0.000000e+00 : f32
    %124 = vector.broadcast %cst_58 : f32 to vector<128x128xf32>
    %125 = arith.maximumf %123, %124 : vector<128x128xf32>
    %126 = arith.truncf %125 : vector<128x128xf32> to vector<128x128xbf16>
    %c0_59 = arith.constant 0 : index
    %c0_60 = arith.constant 0 : index
    %127 = vector.load %arg13[%c0_59, %c0_60] : memref<128x128xbf16, #tpu.memory_space<vmem>>, vector<128x128xbf16>
    %cst_61 = arith.constant dense<0.000000e+00> : vector<128x128xf32>
    %128 = tpu.matmul %126, %127, %cst_61 {dimension_numbers = #tpu.dot_dimension_numbers<[1], [0], [0], [1], [0, 0, 1, 1], [], []>} : vector<128x128xbf16>, vector<128x128xbf16>, vector<128x128xf32> -> vector<128x128xf32>
    %c0_62 = arith.constant 0 : index
    %c0_63 = arith.constant 0 : index
    %129 = vector.load %arg14[%c0_62, %c0_63] : memref<1x128xf32, #tpu.memory_space<vmem>>, vector<1x128xf32>
    %130 = vector.broadcast %129 : vector<1x128xf32> to vector<128x128xf32>
    %131 = arith.addf %128, %130 : vector<128x128xf32>
    %132 = arith.addf %131, %93 : vector<128x128xf32>
    %c0_64 = arith.constant 0 : index
    %c0_65 = arith.constant 0 : index
    %c0_66 = arith.constant 0 : index
    %133 = vector.load %arg15[%c0_64, %c0_65, %c0_66] : memref<1x128x128xf32, #tpu.memory_space<vmem>>, vector<1x128x128xf32>
    %134 = vector.shape_cast %133 : vector<1x128x128xf32> to vector<128x128xf32>
    %135 = vector.shape_cast %132 : vector<128x128xf32> to vector<1x128x128xf32>
    tpu.vector_store %arg15[%c0_64, %c0_65, %c0_66], %135 {strides = array<i32>} : memref<1x128x128xf32, #tpu.memory_space<vmem>>, vector<1x128x128xf32>,
    return
  }
  func.func @transform_0(%arg0: i32, %arg1: i32) -> (i32, i32, i32) {
    %c0_i32 = arith.constant 0 : i32
    %c0_i32_0 = arith.constant 0 : i32
    %c0_i32_1 = arith.constant 0 : i32
    return %arg0, %c0_i32, %c0_i32_0 : i32, i32, i32
  }
  func.func @transform_1(%arg0: i32, %arg1: i32) -> (i32, i32) {
    %c0_i32 = arith.constant 0 : i32
    %c0_i32_0 = arith.constant 0 : i32
    %c0_i32_1 = arith.constant 0 : i32
    return %c0_i32, %c0_i32_0 : i32, i32
  }
  func.func @transform_2(%arg0: i32, %arg1: i32) -> (i32, i32) {
    %c0_i32 = arith.constant 0 : i32
    %c0_i32_0 = arith.constant 0 : i32
    %c0_i32_1 = arith.constant 0 : i32
    return %c0_i32, %c0_i32_0 : i32, i32
  }
  func.func @transform_3(%arg0: i32, %arg1: i32) -> (i32, i32) {
    %c0_i32 = arith.constant 0 : i32
    %c0_i32_0 = arith.constant 0 : i32
    %c0_i32_1 = arith.constant 0 : i32
    return %c0_i32, %c0_i32_0 : i32, i32
  }
  func.func @transform_4(%arg0: i32, %arg1: i32) -> (i32, i32) {
    %c0_i32 = arith.constant 0 : i32
    %c0_i32_0 = arith.constant 0 : i32
    %c0_i32_1 = arith.constant 0 : i32
    return %c0_i32, %c0_i32_0 : i32, i32
  }
  func.func @transform_5(%arg0: i32, %arg1: i32) -> (i32, i32) {
    %c0_i32 = arith.constant 0 : i32
    %c0_i32_0 = arith.constant 0 : i32
    %c0_i32_1 = arith.constant 0 : i32
    return %c0_i32, %c0_i32_0 : i32, i32
  }
  func.func @transform_6(%arg0: i32, %arg1: i32) -> (i32, i32) {
    %c0_i32 = arith.constant 0 : i32
    %c0_i32_0 = arith.constant 0 : i32
    %c0_i32_1 = arith.constant 0 : i32
    return %c0_i32, %c0_i32_0 : i32, i32
  }
  func.func @transform_7(%arg0: i32, %arg1: i32) -> (i32, i32) {
    %c0_i32 = arith.constant 0 : i32
    %c0_i32_0 = arith.constant 0 : i32
    %c0_i32_1 = arith.constant 0 : i32
    return %c0_i32, %c0_i32_0 : i32, i32
  }
  func.func @transform_8(%arg0: i32, %arg1: i32) -> (i32, i32) {
    %c0_i32 = arith.constant 0 : i32
    %c0_i32_0 = arith.constant 0 : i32
    %c0_i32_1 = arith.constant 0 : i32
    return %c0_i32, %c0_i32_0 : i32, i32
  }
  func.func @transform_9(%arg0: i32, %arg1: i32) -> (i32, i32) {
    %c0_i32 = arith.constant 0 : i32
    %c0_i32_0 = arith.constant 0 : i32
    %c0_i32_1 = arith.constant 0 : i32
    return %c0_i32, %c0_i32_0 : i32, i32
  }
  func.func @transform_10(%arg0: i32, %arg1: i32) -> (i32, i32) {
    %c0_i32 = arith.constant 0 : i32
    %c0_i32_0 = arith.constant 0 : i32
    %c0_i32_1 = arith.constant 0 : i32
    return %c0_i32, %c0_i32_0 : i32, i32
  }
  func.func @transform_11(%arg0: i32, %arg1: i32) -> (i32, i32) {
    %c0_i32 = arith.constant 0 : i32
    %c0_i32_0 = arith.constant 0 : i32
    %c0_i32_1 = arith.constant 0 : i32
    return %c0_i32, %c0_i32_0 : i32, i32
  }
  func.func @transform_12(%arg0: i32, %arg1: i32) -> (i32, i32) {
    %c0_i32 = arith.constant 0 : i32
    %c0_i32_0 = arith.constant 0 : i32
    %c0_i32_1 = arith.constant 0 : i32
    return %c0_i32, %c0_i32_0 : i32, i32
  }
  func.func @transform_13(%arg0: i32, %arg1: i32) -> (i32, i32, i32) {
    %c0_i32 = arith.constant 0 : i32
    %c0_i32_0 = arith.constant 0 : i32
    return %arg0, %arg1, %c0_i32 : i32, i32, i32
  }
}

module attributes {stable_mosaic.version = 11 : i64} {
  func.func @gat_layer_kernel(%arg0: i32, %arg1: i32, %arg2: memref<1x128x128xf32, #tpu.memory_space<vmem>>, %arg3: memref<1x128xf32, #tpu.memory_space<vmem>>, %arg4: memref<1x128xf32, #tpu.memory_space<vmem>>, %arg5: memref<128x384xbf16, #tpu.memory_space<vmem>>, %arg6: memref<1x384xf32, #tpu.memory_space<vmem>>, %arg7: memref<128x128xbf16, #tpu.memory_space<vmem>>, %arg8: memref<1x128xf32, #tpu.memory_space<vmem>>, %arg9: memref<1x128xf32, #tpu.memory_space<vmem>>, %arg10: memref<1x128xf32, #tpu.memory_space<vmem>>, %arg11: memref<128x128xbf16, #tpu.memory_space<vmem>>, %arg12: memref<1x128xf32, #tpu.memory_space<vmem>>, %arg13: memref<128x128xbf16, #tpu.memory_space<vmem>>, %arg14: memref<1x128xf32, #tpu.memory_space<vmem>>, %arg15: memref<1x128x128xf32, #tpu.memory_space<vmem>>, %arg16: memref<128x384xbf16, #tpu.memory_space<vmem>>, %arg17: memref<128x128xf32, #tpu.memory_space<vmem>>) attributes {dimension_semantics = [#tpu.dimension_semantics<parallel>, #tpu.dimension_semantics<arbitrary>], iteration_bounds = array<i64: 2, 1>, scalar_prefetch = 0 : i64, scratch_operands = 2 : i64, tpu.core_type = #tpu.core_type<tc>, window_params = [{transform_indices = @transform_0, window_bounds = array<i64: 1, 128, 128>}, {pipeline_mode = #tpu.pipeline_mode<synchronous>, transform_indices = @transform_1, window_bounds = array<i64: 1, 128>}, {pipeline_mode = #tpu.pipeline_mode<synchronous>, transform_indices = @transform_2, window_bounds = array<i64: 1, 128>}, {pipeline_mode = #tpu.pipeline_mode<synchronous>, transform_indices = @transform_3, window_bounds = array<i64: 128, 384>}, {pipeline_mode = #tpu.pipeline_mode<synchronous>, transform_indices = @transform_4, window_bounds = array<i64: 1, 384>}, {pipeline_mode = #tpu.pipeline_mode<synchronous>, transform_indices = @transform_5, window_bounds = array<i64: 128, 128>}, {pipeline_mode = #tpu.pipeline_mode<synchronous>, transform_indices = @transform_6, window_bounds = array<i64: 1, 128>}, {pipeline_mode = #tpu.pipeline_mode<synchronous>, transform_indices = @transform_7, window_bounds = array<i64: 1, 128>}, {pipeline_mode = #tpu.pipeline_mode<synchronous>, transform_indices = @transform_8, window_bounds = array<i64: 1, 128>}, {pipeline_mode = #tpu.pipeline_mode<synchronous>, transform_indices = @transform_9, window_bounds = array<i64: 128, 128>}, {pipeline_mode = #tpu.pipeline_mode<synchronous>, transform_indices = @transform_10, window_bounds = array<i64: 1, 128>}, {pipeline_mode = #tpu.pipeline_mode<synchronous>, transform_indices = @transform_11, window_bounds = array<i64: 128, 128>}, {pipeline_mode = #tpu.pipeline_mode<synchronous>, transform_indices = @transform_12, window_bounds = array<i64: 1, 128>}, {transform_indices = @transform_13, window_bounds = array<i64: 1, 128, 128>}]} {
    %c0_i32 = arith.constant 0 : i32
    %0 = arith.cmpi eq, %arg1, %c0_i32 : i32
    %1 = arith.extui %0 : i1 to i32
    %c0_i32_0 = arith.constant 0 : i32
    %2 = arith.cmpi ne, %1, %c0_i32_0 : i32
    scf.if %2 {
      %c0_67 = arith.constant 0 : index
      %c0_68 = arith.constant 0 : index
      %c0_69 = arith.constant 0 : index
      %136 = vector.load %arg2[%c0_67, %c0_68, %c0_69] : memref<1x128x128xf32, #tpu.memory_space<vmem>>, vector<1x128x128xf32>
      %137 = vector.shape_cast %136 : vector<1x128x128xf32> to vector<128x128xf32>
      %c0_70 = arith.constant 0 : index
      %c0_71 = arith.constant 0 : index
      %138 = vector.load %arg3[%c0_70, %c0_71] : memref<1x128xf32, #tpu.memory_space<vmem>>, vector<1x128xf32>
      %c0_72 = arith.constant 0 : index
      %c0_73 = arith.constant 0 : index
      %139 = vector.load %arg4[%c0_72, %c0_73] : memref<1x128xf32, #tpu.memory_space<vmem>>, vector<1x128xf32>
      %cst_74 = arith.constant dense<0.000000e+00> : vector<128xf32>
      %140 = vector.multi_reduction <add>, %137, %cst_74 [1] : vector<128x128xf32> to vector<128xf32>
      %141 = vector.shape_cast %140 : vector<128xf32> to vector<128x1xf32>
      %cst_75 = arith.constant 1.280000e+02 : f32
      %142 = vector.broadcast %cst_75 : f32 to vector<128x1xf32>
      %143 = arith.divf %141, %142 : vector<128x1xf32>
      %144 = vector.broadcast %143 : vector<128x1xf32> to vector<128x128xf32>
      %145 = arith.subf %137, %144 : vector<128x128xf32>
      %146 = arith.mulf %145, %145 : vector<128x128xf32>
      %cst_76 = arith.constant dense<0.000000e+00> : vector<128xf32>
      %147 = vector.multi_reduction <add>, %146, %cst_76 [1] : vector<128x128xf32> to vector<128xf32>
      %148 = vector.shape_cast %147 : vector<128xf32> to vector<128x1xf32>
      %cst_77 = arith.constant 1.280000e+02 : f32
      %149 = vector.broadcast %cst_77 : f32 to vector<128x1xf32>
      %150 = arith.divf %148, %149 : vector<128x1xf32>
      %151 = vector.broadcast %143 : vector<128x1xf32> to vector<128x128xf32>
      %152 = arith.subf %137, %151 : vector<128x128xf32>
      %cst_78 = arith.constant 9.99999974E-6 : f32
      %153 = vector.broadcast %cst_78 : f32 to vector<128x1xf32>
      %154 = arith.addf %150, %153 : vector<128x1xf32>
      %155 = math.rsqrt %154 : vector<128x1xf32>
      %156 = vector.broadcast %155 : vector<128x1xf32> to vector<128x128xf32>
      %157 = arith.mulf %152, %156 : vector<128x128xf32>
      %158 = vector.broadcast %138 : vector<1x128xf32> to vector<128x128xf32>
      %159 = arith.mulf %157, %158 : vector<128x128xf32>
      %160 = vector.broadcast %139 : vector<1x128xf32> to vector<128x128xf32>
      %161 = arith.addf %159, %160 : vector<128x128xf32>
      %162 = arith.truncf %161 : vector<128x128xf32> to vector<128x128xbf16>
      %c0_79 = arith.constant 0 : index
      %c0_80 = arith.constant 0 : index
      %163 = vector.load %arg5[%c0_79, %c0_80] : memref<128x384xbf16, #tpu.memory_space<vmem>>, vector<128x384xbf16>
      %cst_81 = arith.constant dense<0.000000e+00> : vector<128x384xf32>
      %164 = tpu.matmul %162, %163, %cst_81 {dimension_numbers = #tpu.dot_dimension_numbers<[1], [0], [0], [1], [0, 0, 1, 1], [], []>} : vector<128x128xbf16>, vector<128x384xbf16>, vector<128x384xf32> -> vector<128x384xf32>
      %c0_82 = arith.constant 0 : index
      %c0_83 = arith.constant 0 : index
      %165 = vector.load %arg6[%c0_82, %c0_83] : memref<1x384xf32, #tpu.memory_space<vmem>>, vector<1x384xf32>
      %166 = vector.broadcast %165 : vector<1x384xf32> to vector<128x384xf32>
      %167 = arith.addf %164, %166 : vector<128x384xf32>
      %168 = arith.truncf %167 : vector<128x384xf32> to vector<128x384xbf16>
      %c0_84 = arith.constant 0 : index
      %c0_85 = arith.constant 0 : index
      %169 = vector.load %arg16[%c0_84, %c0_85] : memref<128x384xbf16, #tpu.memory_space<vmem>>, vector<128x384xbf16>
      tpu.vector_store %arg16[%c0_84, %c0_85], %168 {strides = array<i32>} : memref<128x384xbf16, #tpu.memory_space<vmem>>, vector<128x384xbf16>,
    } else {
    }
    %c128_i32 = arith.constant 128 : i32
    %3 = arith.muli %arg1, %c128_i32 : i32
    %4 = tpu.assume_multiple %3, 128 : i32
    %5 = arith.index_cast %4 : i32 to index
    %c0 = arith.constant 0 : index
    %6 = vector.load %arg16[%5, %c0] : memref<128x384xbf16, #tpu.memory_space<vmem>>, vector<128x32xbf16>
    %c0_1 = arith.constant 0 : index
    %c128 = arith.constant 128 : index
    %7 = vector.load %arg16[%c0_1, %c128] : memref<128x384xbf16, #tpu.memory_space<vmem>>, vector<128x32xbf16>
    %c0_2 = arith.constant 0 : index
    %c256 = arith.constant 256 : index
    %8 = vector.load %arg16[%c0_2, %c256] : memref<128x384xbf16, #tpu.memory_space<vmem>>, vector<128x32xbf16>
    %cst = arith.constant dense<0.000000e+00> : vector<128x128xf32>
    %9 = tpu.matmul %6, %7, %cst {dimension_numbers = #tpu.dot_dimension_numbers<[1], [1], [0], [0], [0, 0, 1, 0], [], []>} : vector<128x32xbf16>, vector<128x32xbf16>, vector<128x128xf32> -> vector<128x128xf32>
    %cst_3 = arith.constant 0.176776692 : f32
    %10 = vector.broadcast %cst_3 : f32 to vector<128x128xf32>
    %11 = arith.mulf %9, %10 : vector<128x128xf32>
    %cst_4 = arith.constant dense<0xFF800000> : vector<128xf32>
    %12 = vector.multi_reduction <maximumf>, %11, %cst_4 [1] : vector<128x128xf32> to vector<128xf32>
    %13 = vector.shape_cast %12 : vector<128xf32> to vector<128x1xf32>
    %14 = vector.broadcast %13 : vector<128x1xf32> to vector<128x128xf32>
    %15 = arith.subf %11, %14 : vector<128x128xf32>
    %16 = math.exp %15 : vector<128x128xf32>
    %cst_5 = arith.constant dense<0.000000e+00> : vector<128xf32>
    %17 = vector.multi_reduction <add>, %16, %cst_5 [1] : vector<128x128xf32> to vector<128xf32>
    %18 = vector.shape_cast %17 : vector<128xf32> to vector<128x1xf32>
    %19 = tpu.reciprocal %18 {approx = true} : vector<128x1xf32> -> vector<128x1xf32>
    %20 = vector.broadcast %19 : vector<128x1xf32> to vector<128x128xf32>
    %21 = arith.mulf %16, %20 : vector<128x128xf32>
    %22 = arith.truncf %21 : vector<128x128xf32> to vector<128x128xbf16>
    %cst_6 = arith.constant dense<0.000000e+00> : vector<128x32xf32>
    %23 = tpu.matmul %22, %8, %cst_6 {dimension_numbers = #tpu.dot_dimension_numbers<[1], [0], [0], [1], [0, 0, 1, 1], [], []>} : vector<128x128xbf16>, vector<128x32xbf16>, vector<128x32xf32> -> vector<128x32xf32>
    %c0_7 = arith.constant 0 : index
    %c0_8 = arith.constant 0 : index
    %24 = vector.load %arg17[%c0_7, %c0_8] : memref<128x128xf32, #tpu.memory_space<vmem>>, vector<128x32xf32>
    tpu.vector_store %arg17[%c0_7, %c0_8], %23 {strides = array<i32>} : memref<128x128xf32, #tpu.memory_space<vmem>>, vector<128x32xf32>,
    %25 = arith.index_cast %4 : i32 to index
    %c32 = arith.constant 32 : index
    %26 = vector.load %arg16[%25, %c32] : memref<128x384xbf16, #tpu.memory_space<vmem>>, vector<128x32xbf16>
    %c0_9 = arith.constant 0 : index
    %c160 = arith.constant 160 : index
    %27 = vector.load %arg16[%c0_9, %c160] : memref<128x384xbf16, #tpu.memory_space<vmem>>, vector<128x32xbf16>
    %c0_10 = arith.constant 0 : index
    %c288 = arith.constant 288 : index
    %28 = vector.load %arg16[%c0_10, %c288] : memref<128x384xbf16, #tpu.memory_space<vmem>>, vector<128x32xbf16>
    %cst_11 = arith.constant dense<0.000000e+00> : vector<128x128xf32>
    %29 = tpu.matmul %26, %27, %cst_11 {dimension_numbers = #tpu.dot_dimension_numbers<[1], [1], [0], [0], [0, 0, 1, 0], [], []>} : vector<128x32xbf16>, vector<128x32xbf16>, vector<128x128xf32> -> vector<128x128xf32>
    %cst_12 = arith.constant 0.176776692 : f32
    %30 = vector.broadcast %cst_12 : f32 to vector<128x128xf32>
    %31 = arith.mulf %29, %30 : vector<128x128xf32>
    %cst_13 = arith.constant dense<0xFF800000> : vector<128xf32>
    %32 = vector.multi_reduction <maximumf>, %31, %cst_13 [1] : vector<128x128xf32> to vector<128xf32>
    %33 = vector.shape_cast %32 : vector<128xf32> to vector<128x1xf32>
    %34 = vector.broadcast %33 : vector<128x1xf32> to vector<128x128xf32>
    %35 = arith.subf %31, %34 : vector<128x128xf32>
    %36 = math.exp %35 : vector<128x128xf32>
    %cst_14 = arith.constant dense<0.000000e+00> : vector<128xf32>
    %37 = vector.multi_reduction <add>, %36, %cst_14 [1] : vector<128x128xf32> to vector<128xf32>
    %38 = vector.shape_cast %37 : vector<128xf32> to vector<128x1xf32>
    %39 = tpu.reciprocal %38 {approx = true} : vector<128x1xf32> -> vector<128x1xf32>
    %40 = vector.broadcast %39 : vector<128x1xf32> to vector<128x128xf32>
    %41 = arith.mulf %36, %40 : vector<128x128xf32>
    %42 = arith.truncf %41 : vector<128x128xf32> to vector<128x128xbf16>
    %cst_15 = arith.constant dense<0.000000e+00> : vector<128x32xf32>
    %43 = tpu.matmul %42, %28, %cst_15 {dimension_numbers = #tpu.dot_dimension_numbers<[1], [0], [0], [1], [0, 0, 1, 1], [], []>} : vector<128x128xbf16>, vector<128x32xbf16>, vector<128x32xf32> -> vector<128x32xf32>
    %c0_16 = arith.constant 0 : index
    %c32_17 = arith.constant 32 : index
    %44 = vector.load %arg17[%c0_16, %c32_17] : memref<128x128xf32, #tpu.memory_space<vmem>>, vector<128x32xf32>
    tpu.vector_store %arg17[%c0_16, %c32_17], %43 {strides = array<i32>} : memref<128x128xf32, #tpu.memory_space<vmem>>, vector<128x32xf32>,
    %45 = arith.index_cast %4 : i32 to index
    %c64 = arith.constant 64 : index
    %46 = vector.load %arg16[%45, %c64] : memref<128x384xbf16, #tpu.memory_space<vmem>>, vector<128x32xbf16>
    %c0_18 = arith.constant 0 : index
    %c192 = arith.constant 192 : index
    %47 = vector.load %arg16[%c0_18, %c192] : memref<128x384xbf16, #tpu.memory_space<vmem>>, vector<128x32xbf16>
    %c0_19 = arith.constant 0 : index
    %c320 = arith.constant 320 : index
    %48 = vector.load %arg16[%c0_19, %c320] : memref<128x384xbf16, #tpu.memory_space<vmem>>, vector<128x32xbf16>
    %cst_20 = arith.constant dense<0.000000e+00> : vector<128x128xf32>
    %49 = tpu.matmul %46, %47, %cst_20 {dimension_numbers = #tpu.dot_dimension_numbers<[1], [1], [0], [0], [0, 0, 1, 0], [], []>} : vector<128x32xbf16>, vector<128x32xbf16>, vector<128x128xf32> -> vector<128x128xf32>
    %cst_21 = arith.constant 0.176776692 : f32
    %50 = vector.broadcast %cst_21 : f32 to vector<128x128xf32>
    %51 = arith.mulf %49, %50 : vector<128x128xf32>
    %cst_22 = arith.constant dense<0xFF800000> : vector<128xf32>
    %52 = vector.multi_reduction <maximumf>, %51, %cst_22 [1] : vector<128x128xf32> to vector<128xf32>
    %53 = vector.shape_cast %52 : vector<128xf32> to vector<128x1xf32>
    %54 = vector.broadcast %53 : vector<128x1xf32> to vector<128x128xf32>
    %55 = arith.subf %51, %54 : vector<128x128xf32>
    %56 = math.exp %55 : vector<128x128xf32>
    %cst_23 = arith.constant dense<0.000000e+00> : vector<128xf32>
    %57 = vector.multi_reduction <add>, %56, %cst_23 [1] : vector<128x128xf32> to vector<128xf32>
    %58 = vector.shape_cast %57 : vector<128xf32> to vector<128x1xf32>
    %59 = tpu.reciprocal %58 {approx = true} : vector<128x1xf32> -> vector<128x1xf32>
    %60 = vector.broadcast %59 : vector<128x1xf32> to vector<128x128xf32>
    %61 = arith.mulf %56, %60 : vector<128x128xf32>
    %62 = arith.truncf %61 : vector<128x128xf32> to vector<128x128xbf16>
    %cst_24 = arith.constant dense<0.000000e+00> : vector<128x32xf32>
    %63 = tpu.matmul %62, %48, %cst_24 {dimension_numbers = #tpu.dot_dimension_numbers<[1], [0], [0], [1], [0, 0, 1, 1], [], []>} : vector<128x128xbf16>, vector<128x32xbf16>, vector<128x32xf32> -> vector<128x32xf32>
    %c0_25 = arith.constant 0 : index
    %c64_26 = arith.constant 64 : index
    %64 = vector.load %arg17[%c0_25, %c64_26] : memref<128x128xf32, #tpu.memory_space<vmem>>, vector<128x32xf32>
    tpu.vector_store %arg17[%c0_25, %c64_26], %63 {strides = array<i32>} : memref<128x128xf32, #tpu.memory_space<vmem>>, vector<128x32xf32>,
    %65 = arith.index_cast %4 : i32 to index
    %c96 = arith.constant 96 : index
    %66 = vector.load %arg16[%65, %c96] : memref<128x384xbf16, #tpu.memory_space<vmem>>, vector<128x32xbf16>
    %c0_27 = arith.constant 0 : index
    %c224 = arith.constant 224 : index
    %67 = vector.load %arg16[%c0_27, %c224] : memref<128x384xbf16, #tpu.memory_space<vmem>>, vector<128x32xbf16>
    %c0_28 = arith.constant 0 : index
    %c352 = arith.constant 352 : index
    %68 = vector.load %arg16[%c0_28, %c352] : memref<128x384xbf16, #tpu.memory_space<vmem>>, vector<128x32xbf16>
    %cst_29 = arith.constant dense<0.000000e+00> : vector<128x128xf32>
    %69 = tpu.matmul %66, %67, %cst_29 {dimension_numbers = #tpu.dot_dimension_numbers<[1], [1], [0], [0], [0, 0, 1, 0], [], []>} : vector<128x32xbf16>, vector<128x32xbf16>, vector<128x128xf32> -> vector<128x128xf32>
    %cst_30 = arith.constant 0.176776692 : f32
    %70 = vector.broadcast %cst_30 : f32 to vector<128x128xf32>
    %71 = arith.mulf %69, %70 : vector<128x128xf32>
    %cst_31 = arith.constant dense<0xFF800000> : vector<128xf32>
    %72 = vector.multi_reduction <maximumf>, %71, %cst_31 [1] : vector<128x128xf32> to vector<128xf32>
    %73 = vector.shape_cast %72 : vector<128xf32> to vector<128x1xf32>
    %74 = vector.broadcast %73 : vector<128x1xf32> to vector<128x128xf32>
    %75 = arith.subf %71, %74 : vector<128x128xf32>
    %76 = math.exp %75 : vector<128x128xf32>
    %cst_32 = arith.constant dense<0.000000e+00> : vector<128xf32>
    %77 = vector.multi_reduction <add>, %76, %cst_32 [1] : vector<128x128xf32> to vector<128xf32>
    %78 = vector.shape_cast %77 : vector<128xf32> to vector<128x1xf32>
    %79 = tpu.reciprocal %78 {approx = true} : vector<128x1xf32> -> vector<128x1xf32>
    %80 = vector.broadcast %79 : vector<128x1xf32> to vector<128x128xf32>
    %81 = arith.mulf %76, %80 : vector<128x128xf32>
    %82 = arith.truncf %81 : vector<128x128xf32> to vector<128x128xbf16>
    %cst_33 = arith.constant dense<0.000000e+00> : vector<128x32xf32>
    %83 = tpu.matmul %82, %68, %cst_33 {dimension_numbers = #tpu.dot_dimension_numbers<[1], [0], [0], [1], [0, 0, 1, 1], [], []>} : vector<128x128xbf16>, vector<128x32xbf16>, vector<128x32xf32> -> vector<128x32xf32>
    %c0_34 = arith.constant 0 : index
    %c96_35 = arith.constant 96 : index
    %84 = vector.load %arg17[%c0_34, %c96_35] : memref<128x128xf32, #tpu.memory_space<vmem>>, vector<128x32xf32>
    tpu.vector_store %arg17[%c0_34, %c96_35], %83 {strides = array<i32>} : memref<128x128xf32, #tpu.memory_space<vmem>>, vector<128x32xf32>,
    %c0_36 = arith.constant 0 : index
    %c0_37 = arith.constant 0 : index
    %85 = vector.load %arg17[%c0_36, %c0_37] : memref<128x128xf32, #tpu.memory_space<vmem>>, vector<128x128xf32>
    %86 = arith.truncf %85 : vector<128x128xf32> to vector<128x128xbf16>
    %c0_38 = arith.constant 0 : index
    %c0_39 = arith.constant 0 : index
    %87 = vector.load %arg7[%c0_38, %c0_39] : memref<128x128xbf16, #tpu.memory_space<vmem>>, vector<128x128xbf16>
    %cst_40 = arith.constant dense<0.000000e+00> : vector<128x128xf32>
    %88 = tpu.matmul %86, %87, %cst_40 {dimension_numbers = #tpu.dot_dimension_numbers<[1], [0], [0], [1], [0, 0, 1, 1], [], []>} : vector<128x128xbf16>, vector<128x128xbf16>, vector<128x128xf32> -> vector<128x128xf32>
    %c0_41 = arith.constant 0 : index
    %c0_42 = arith.constant 0 : index
    %89 = vector.load %arg8[%c0_41, %c0_42] : memref<1x128xf32, #tpu.memory_space<vmem>>, vector<1x128xf32>
    %90 = vector.broadcast %89 : vector<1x128xf32> to vector<128x128xf32>
    %91 = arith.addf %88, %90 : vector<128x128xf32>
    %cst_43 = arith.constant 4.000000e+00 : f32
    %92 = vector.broadcast %cst_43 : f32 to vector<128x128xf32>
    %93 = arith.addf %91, %92 : vector<128x128xf32>
    %c0_44 = arith.constant 0 : index
    %c0_45 = arith.constant 0 : index
    %94 = vector.load %arg9[%c0_44, %c0_45] : memref<1x128xf32, #tpu.memory_space<vmem>>, vector<1x128xf32>
    %c0_46 = arith.constant 0 : index
    %c0_47 = arith.constant 0 : index
    %95 = vector.load %arg10[%c0_46, %c0_47] : memref<1x128xf32, #tpu.memory_space<vmem>>, vector<1x128xf32>
    %cst_48 = arith.constant dense<0.000000e+00> : vector<128xf32>
    %96 = vector.multi_reduction <add>, %93, %cst_48 [1] : vector<128x128xf32> to vector<128xf32>
    %97 = vector.shape_cast %96 : vector<128xf32> to vector<128x1xf32>
    %cst_49 = arith.constant 1.280000e+02 : f32
    %98 = vector.broadcast %cst_49 : f32 to vector<128x1xf32>
    %99 = arith.divf %97, %98 : vector<128x1xf32>
    %100 = vector.broadcast %99 : vector<128x1xf32> to vector<128x128xf32>
    %101 = arith.subf %93, %100 : vector<128x128xf32>
    %102 = arith.mulf %101, %101 : vector<128x128xf32>
    %cst_50 = arith.constant dense<0.000000e+00> : vector<128xf32>
    %103 = vector.multi_reduction <add>, %102, %cst_50 [1] : vector<128x128xf32> to vector<128xf32>
    %104 = vector.shape_cast %103 : vector<128xf32> to vector<128x1xf32>
    %cst_51 = arith.constant 1.280000e+02 : f32
    %105 = vector.broadcast %cst_51 : f32 to vector<128x1xf32>
    %106 = arith.divf %104, %105 : vector<128x1xf32>
    %107 = vector.broadcast %99 : vector<128x1xf32> to vector<128x128xf32>
    %108 = arith.subf %93, %107 : vector<128x128xf32>
    %cst_52 = arith.constant 9.99999974E-6 : f32
    %109 = vector.broadcast %cst_52 : f32 to vector<128x1xf32>
    %110 = arith.addf %106, %109 : vector<128x1xf32>
    %111 = math.rsqrt %110 : vector<128x1xf32>
    %112 = vector.broadcast %111 : vector<128x1xf32> to vector<128x128xf32>
    %113 = arith.mulf %108, %112 : vector<128x128xf32>
    %114 = vector.broadcast %94 : vector<1x128xf32> to vector<128x128xf32>
    %115 = arith.mulf %113, %114 : vector<128x128xf32>
    %116 = vector.broadcast %95 : vector<1x128xf32> to vector<128x128xf32>
    %117 = arith.addf %115, %116 : vector<128x128xf32>
    %118 = arith.truncf %117 : vector<128x128xf32> to vector<128x128xbf16>
    %c0_53 = arith.constant 0 : index
    %c0_54 = arith.constant 0 : index
    %119 = vector.load %arg11[%c0_53, %c0_54] : memref<128x128xbf16, #tpu.memory_space<vmem>>, vector<128x128xbf16>
    %cst_55 = arith.constant dense<0.000000e+00> : vector<128x128xf32>
    %120 = tpu.matmul %118, %119, %cst_55 {dimension_numbers = #tpu.dot_dimension_numbers<[1], [0], [0], [1], [0, 0, 1, 1], [], []>} : vector<128x128xbf16>, vector<128x128xbf16>, vector<128x128xf32> -> vector<128x128xf32>
    %c0_56 = arith.constant 0 : index
    %c0_57 = arith.constant 0 : index
    %121 = vector.load %arg12[%c0_56, %c0_57] : memref<1x128xf32, #tpu.memory_space<vmem>>, vector<1x128xf32>
    %122 = vector.broadcast %121 : vector<1x128xf32> to vector<128x128xf32>
    %123 = arith.addf %120, %122 : vector<128x128xf32>
    %cst_58 = arith.constant 0.000000e+00 : f32
    %124 = vector.broadcast %cst_58 : f32 to vector<128x128xf32>
    %125 = arith.maximumf %123, %124 : vector<128x128xf32>
    %126 = arith.truncf %125 : vector<128x128xf32> to vector<128x128xbf16>
    %c0_59 = arith.constant 0 : index
    %c0_60 = arith.constant 0 : index
    %127 = vector.load %arg13[%c0_59, %c0_60] : memref<128x128xbf16, #tpu.memory_space<vmem>>, vector<128x128xbf16>
    %cst_61 = arith.constant dense<0.000000e+00> : vector<128x128xf32>
    %128 = tpu.matmul %126, %127, %cst_61 {dimension_numbers = #tpu.dot_dimension_numbers<[1], [0], [0], [1], [0, 0, 1, 1], [], []>} : vector<128x128xbf16>, vector<128x128xbf16>, vector<128x128xf32> -> vector<128x128xf32>
    %c0_62 = arith.constant 0 : index
    %c0_63 = arith.constant 0 : index
    %129 = vector.load %arg14[%c0_62, %c0_63] : memref<1x128xf32, #tpu.memory_space<vmem>>, vector<1x128xf32>
    %130 = vector.broadcast %129 : vector<1x128xf32> to vector<128x128xf32>
    %131 = arith.addf %128, %130 : vector<128x128xf32>
    %132 = arith.addf %131, %93 : vector<128x128xf32>
    %c0_64 = arith.constant 0 : index
    %c0_65 = arith.constant 0 : index
    %c0_66 = arith.constant 0 : index
    %133 = vector.load %arg15[%c0_64, %c0_65, %c0_66] : memref<1x128x128xf32, #tpu.memory_space<vmem>>, vector<1x128x128xf32>
    %134 = vector.shape_cast %133 : vector<1x128x128xf32> to vector<128x128xf32>
    %135 = vector.shape_cast %132 : vector<128x128xf32> to vector<1x128x128xf32>
    tpu.vector_store %arg15[%c0_64, %c0_65, %c0_66], %135 {strides = array<i32>} : memref<1x128x128xf32, #tpu.memory_space<vmem>>, vector<1x128x128xf32>,
    return
  }
  func.func @transform_0(%arg0: i32, %arg1: i32) -> (i32, i32, i32) {
    %c0_i32 = arith.constant 0 : i32
    %c0_i32_0 = arith.constant 0 : i32
    %c0_i32_1 = arith.constant 0 : i32
    return %arg0, %c0_i32, %c0_i32_0 : i32, i32, i32
  }
  func.func @transform_1(%arg0: i32, %arg1: i32) -> (i32, i32) {
    %c0_i32 = arith.constant 0 : i32
    %c0_i32_0 = arith.constant 0 : i32
    %c0_i32_1 = arith.constant 0 : i32
    return %c0_i32, %c0_i32_0 : i32, i32
  }
  func.func @transform_2(%arg0: i32, %arg1: i32) -> (i32, i32) {
    %c0_i32 = arith.constant 0 : i32
    %c0_i32_0 = arith.constant 0 : i32
    %c0_i32_1 = arith.constant 0 : i32
    return %c0_i32, %c0_i32_0 : i32, i32
  }
  func.func @transform_3(%arg0: i32, %arg1: i32) -> (i32, i32) {
    %c0_i32 = arith.constant 0 : i32
    %c0_i32_0 = arith.constant 0 : i32
    %c0_i32_1 = arith.constant 0 : i32
    return %c0_i32, %c0_i32_0 : i32, i32
  }
  func.func @transform_4(%arg0: i32, %arg1: i32) -> (i32, i32) {
    %c0_i32 = arith.constant 0 : i32
    %c0_i32_0 = arith.constant 0 : i32
    %c0_i32_1 = arith.constant 0 : i32
    return %c0_i32, %c0_i32_0 : i32, i32
  }
  func.func @transform_5(%arg0: i32, %arg1: i32) -> (i32, i32) {
    %c0_i32 = arith.constant 0 : i32
    %c0_i32_0 = arith.constant 0 : i32
    %c0_i32_1 = arith.constant 0 : i32
    return %c0_i32, %c0_i32_0 : i32, i32
  }
  func.func @transform_6(%arg0: i32, %arg1: i32) -> (i32, i32) {
    %c0_i32 = arith.constant 0 : i32
    %c0_i32_0 = arith.constant 0 : i32
    %c0_i32_1 = arith.constant 0 : i32
    return %c0_i32, %c0_i32_0 : i32, i32
  }
  func.func @transform_7(%arg0: i32, %arg1: i32) -> (i32, i32) {
    %c0_i32 = arith.constant 0 : i32
    %c0_i32_0 = arith.constant 0 : i32
    %c0_i32_1 = arith.constant 0 : i32
    return %c0_i32, %c0_i32_0 : i32, i32
  }
  func.func @transform_8(%arg0: i32, %arg1: i32) -> (i32, i32) {
    %c0_i32 = arith.constant 0 : i32
    %c0_i32_0 = arith.constant 0 : i32
    %c0_i32_1 = arith.constant 0 : i32
    return %c0_i32, %c0_i32_0 : i32, i32
  }
  func.func @transform_9(%arg0: i32, %arg1: i32) -> (i32, i32) {
    %c0_i32 = arith.constant 0 : i32
    %c0_i32_0 = arith.constant 0 : i32
    %c0_i32_1 = arith.constant 0 : i32
    return %c0_i32, %c0_i32_0 : i32, i32
  }
  func.func @transform_10(%arg0: i32, %arg1: i32) -> (i32, i32) {
    %c0_i32 = arith.constant 0 : i32
    %c0_i32_0 = arith.constant 0 : i32
    %c0_i32_1 = arith.constant 0 : i32
    return %c0_i32, %c0_i32_0 : i32, i32
  }
  func.func @transform_11(%arg0: i32, %arg1: i32) -> (i32, i32) {
    %c0_i32 = arith.constant 0 : i32
    %c0_i32_0 = arith.constant 0 : i32
    %c0_i32_1 = arith.constant 0 : i32
    return %c0_i32, %c0_i32_0 : i32, i32
  }
  func.func @transform_12(%arg0: i32, %arg1: i32) -> (i32, i32) {
    %c0_i32 = arith.constant 0 : i32
    %c0_i32_0 = arith.constant 0 : i32
    %c0_i32_1 = arith.constant 0 : i32
    return %c0_i32, %c0_i32_0 : i32, i32
  }
  func.func @transform_13(%arg0: i32, %arg1: i32) -> (i32, i32, i32) {
    %c0_i32 = arith.constant 0 : i32
    %c0_i32_0 = arith.constant 0 : i32
    return %arg0, %arg1, %c0_i32 : i32, i32, i32
  }
}

</mosaic_0001>

<bundles_post_ra>
// kernel: tpu_custom_call.1
= control target key start
LH: loop header
LB: loop body
LE: loop exit
PB: predicated region body
PF: predicated region fallthrough
CT: control target
= control target key end

     0   :  { %s8494_s0 = inlined_call_operand.hbm [shape: f32[2,128,128], index: 0, kind: input, shape index: {}]   ;;  %s8495_s1 = inlined_call_operand.vmem [shape: f32[1,128], index: 1, kind: input, shape index: {}]   ;;  %s8496_s2 = inlined_call_operand.vmem [shape: f32[1,128], index: 2, kind: input, shape index: {}]   ;;  %s8497_s3 = inlined_call_operand.hbm [shape: bf16[128,384], index: 3, kind: input, shape index: {}]   ;;  %s8498_s4 = inlined_call_operand.vmem [shape: f32[1,384], index: 4, kind: input, shape index: {}]   ;;  %s8499_s5 = inlined_call_operand.hbm [shape: bf16[128,128], index: 5, kind: input, shape index: {}]   ;;  %s8500_s6 = inlined_call_operand.vmem [shape: f32[1,128], index: 6, kind: input, shape index: {}]   ;;  %s8501_s7 = inlined_call_operand.vmem [shape: f32[1,128], index: 7, kind: input, shape index: {}]   ;;  %s8502_s8 = inlined_call_operand.vmem [shape: f32[1,128], index: 8, kind: input, shape index: {}]   ;;  %s8503_s9 = inlined_call_operand.hbm [shape: bf16[128,128], index: 9, kind: input, shape index: {}]   ;;  %s8504_s10 = inlined_call_operand.vmem [shape: f32[1,128], index: 10, kind: input, shape index: {}]   ;;  %s8505_s11 = inlined_call_operand.hbm [shape: bf16[128,128], index: 11, kind: input, shape index: {}]   ;;  %s8506_s12 = inlined_call_operand.vmem [shape: f32[1,128], index: 12, kind: input, shape index: {}]   ;;  %s8507_s13 = inlined_call_operand.hbm [shape: f32[2,128,128], index: 13, kind: output, shape index: {}]  }
   0x1   :  { %8513 = sst [smem:[#allocation22_spill]] %s8497_s3 }
   0x2   :  { %8514 = sst [smem:[#allocation23_spill]] %s8499_s5 }
   0x3   :  { %8515 = sst [smem:[#allocation24_spill]] %s8503_s9 }
   0x4   :  { %8516 = sst [smem:[#allocation25_spill]] %s8504_s10 }
   0x5   :  { %8517 = sst [smem:[#allocation26_spill]] %s8506_s12 }
   0x6   :  { %8518 = sst [smem:[#allocation27_spill]] %s8507_s13 }
   0x7   :  { %18 = vsyncpa [#allocation5], 0 }
   0x8   :  { %20 = vsyncpa [#allocation5 + $0x1], 0 }
   0x9   :  { %21 = vsyncpa [#allocation8], 0 }
   0xa   :  { %22 = vsyncpa [#allocation11], 0 }
   0xb   :  { %23 = vsyncpa [#allocation6], 0 }
   0xc   :  { %25 = vsyncpa [#allocation6 + $0x1], 0  ;;  %s6881_s25 = smov 0   ;;  %s6883_s26 = smov 0  }
   0xd   :  { %s6885_s27 = smov 0   ;;  %s6887_s28 = smov 0  }
   0xe   :  { %s6889_s29 = smov 0   ;;  %s6891_s30 = smov 0  }
   0xf LB: > { %8519 = sst [smem:[#allocation18_spill]] %s6771_s25  ;;  %s5088_s14 = sadd.s32 4294967295, %s6791_s30   ;;  %s6791_s30 = sphi %s6891_s30, %s31_s30   ;;  %s6787_s29 = sphi %s6889_s29, %s8549_s29   ;;  %s6783_s28 = sphi %s6887_s28, %s8548_s28   ;;  %s6779_s27 = sphi %s6885_s27, %s8547_s27   ;;  %s6775_s26 = sphi %s6883_s26, %s8546_s26   ;;  %s6771_s25 = sphi %s6881_s25, %s8545_s25  }
  0x10   : > { %8520 = sst [smem:[#allocation19_spill]] %s6783_s28  ;;  %s5089_s15 = sadd.s32 4294967294, %s6791_s30  }
  0x11   : > { %p63_p0 = scmp.ne.s32.totalorder %s6775_s26, %s6771_s25  ;;  %p6915_p1 = scmp.eq.s32.totalorder %s5088_s14, 0 }
  0x12   : > { %p6919_p2 = scmp.eq.s32.totalorder %s5088_s14, 1  ;;  %p347_p3 = scmp.eq.s32.totalorder %s5089_s15, 1 }
  0x13   : > { %s8521_s16 = scalar_select %p6915_p1, 1, 0 }
  0x14   : > { %p6925_p4 = por %p6915_p1, %p63_p0  ;;  %p5090_p5 = scmp.ge.s32.totalorder %s6791_s30, 1 }
  0x15   : > { %p6930_p6 = por %p347_p3, %p63_p0  ;;  %p354_p7 = scmp.lt.s32.totalorder %s6791_s30, 3 }
  0x16   : > { %s6793_s21 = smov [#allocation7]   ;;  %s6794_s24 = smov [#allocation10]  }
  0x17   : > { %s8524_s19 = scalar_select %p6930_p6, 1, 0 }
  0x18   : > { %p6935_p8 = pnand %p5090_p5, %p354_p7  ;;  %s372_s22 = sshll.u32 %s6793_s21, 4  ;;  %s373_s22 = int_to_ptr.vmem [resolvable:$true] %s372_s22 }
  0x19   : > { %8525 = sst [smem:[#allocation20_spill]] %s8524_s19  ;;  %s410_s14 = sshll.u32 %s6794_s24, 4  ;;  %s411_s14 = int_to_ptr.vmem [resolvable:$true] %s410_s14 }
  0x1a   : > { %p6004_p9 = pneg %p6935_p8  ;;  %s6582_s15 = scalar_lea.vmem %s373_s22, 3072 }
  0x1b   : > { %p6583_p13 = scmp.ne.s32.totalorder %s373_s22, %s6582_s15  ;;  %p6590_p5 = scmp.lt.s32.totalorder %s373_s22, %s373_s22 }
  0x1c   : > { %p6944_p11 = pnand %p6004_p9, %p6915_p1  ;;  %p6591_p7 = scmp.lt.s32.totalorder %s6582_s15, %s6582_s15 }
  0x1e   : > { %p6573_p12 = pneg %p6944_p11  ;;  %p6592_p10 = por %p6591_p7, %p6590_p5 }
  0x20   : > { %p6585_p0 = pnand %p6583_p13, %p6573_p12 }
  0x22   : > { %p6586_p3 = pneg %p6585_p0 }
  0x24   : > { %p6593_p6 = pnand %p6592_p10, %p6586_p3 }
  0x26   : > { %6596 = shalt.err (!%p6593_p6)
}
  0x27   : > { %s6795_s21 = smov 192   ;;  %s6796_s19 = smov 12  }
  0x28   : > { %s8528_s3 = sld [smem:[#allocation22_spill]]  ;;  %s6797_s13 = smov [#allocation9]  }
  0x29   : > { %s388_s28 = sshll.u32 %s6797_s13, 4  ;;  %s6608_s12 = scalar_lea.vmem %s411_s14, 1024  ;;  %s389_s28 = int_to_ptr.vmem [resolvable:$true] %s388_s28 }
  0x2a   : > { %p6609_p9 = scmp.ne.s32.totalorder %s411_s14, %s6608_s12  ;;  %p6616_p10 = scmp.lt.s32.totalorder %s411_s14, %s411_s14 }
  0x2b   : > { %p6617_p6 = scmp.lt.s32.totalorder %s6608_s12, %s6608_s12 }
  0x2c   : > { %p6611_p13 = pnand %p6609_p9, %p6573_p12 }
  0x2d   : > { %p6618_p3 = por %p6617_p6, %p6616_p10 }
  0x2e   : > { %6007 = dma.hbm_to_vmem [thread:$0]  (!%p6944_p11), %s8528_s3, 3072, %s373_s22, [#allocation8], %s6795_s21, %s6795_s21, %s6796_s19  }
  0x2f   : > { %p6612_p0 = pneg %p6611_p13 }
  0x31   : > { %p6619_p5 = pnand %p6618_p3, %p6612_p0 }
  0x33   : > { %6622 = shalt.err (!%p6619_p5)
}
  0x34   : > { %s6798_s15 = smov 64   ;;  %s6799_s10 = smov 4  }
  0x35   : > { %s8529_s9 = sld [smem:[#allocation24_spill]]  ;;  %s6634_s13 = scalar_lea.vmem %s389_s28, 1024 }
  0x36   : > { %p6635_p7 = scmp.ne.s32.totalorder %s389_s28, %s6634_s13  ;;  %p6642_p1 = scmp.lt.s32.totalorder %s389_s28, %s389_s28 }
  0x37   : > { %p6643_p10 = scmp.lt.s32.totalorder %s6634_s13, %s6634_s13 }
  0x38   : > { %p6637_p9 = pnand %p6635_p7, %p6573_p12 }
  0x39   : > { %p6644_p0 = por %p6643_p10, %p6642_p1 }
  0x3a   : > { %p6638_p13 = pneg %p6637_p9 }
  0x3b   : > { %6013 = dma.hbm_to_vmem [thread:$0]  (!%p6944_p11), %s8529_s9, 1024, %s411_s14, [#allocation11], %s6798_s15, %s6798_s15, %s6799_s10  }
  0x3c   : > { %p6645_p6 = pnand %p6644_p0, %p6638_p13 }
  0x3e   : > { %6648 = shalt.err (!%p6645_p6)
}
  0x3f   : > { %s8530_s5 = sld [smem:[#allocation23_spill]]  ;;  %s6800_s14 = smov [#allocation12]  }
  0x40   : > { %s426_s21 = sshll.u32 %s6800_s14, 4  ;;  %s427_s21 = int_to_ptr.vmem [resolvable:$true] %s426_s21 }
  0x41   : > { %s6660_s24 = scalar_lea.vmem %s427_s21, 1024  ;;  %p6668_p9 = scmp.lt.s32.totalorder %s427_s21, %s427_s21 }
  0x42   : > { %p6661_p3 = scmp.ne.s32.totalorder %s427_s21, %s6660_s24  ;;  %p6669_p1 = scmp.lt.s32.totalorder %s6660_s24, %s6660_s24 }
  0x44   : > { %p6663_p5 = pnand %p6661_p3, %p6573_p12  ;;  %p6670_p13 = por %p6669_p1, %p6668_p9 }
  0x45   : > { %6010 = dma.hbm_to_vmem [thread:$0]  (!%p6944_p11), %s8530_s5, 1024, %s389_s28, [#allocation8], %s6798_s15, %s6798_s15, %s6799_s10  }
  0x46   : > { %p6664_p7 = pneg %p6663_p5 }
  0x48   : > { %p6671_p10 = pnand %p6670_p13, %p6664_p7 }
  0x4a   : > { %6674 = shalt.err (!%p6671_p10)
}
  0x4b   : > { %6016 = dma.hbm_to_vmem [thread:$0]  (!%p6944_p11), %s8505_s11, 1024, %s427_s21, [#allocation11], %s6798_s15, %s6798_s15, %s6799_s10  }
  0x4c   : > { %s43_s28 = sadd.s32 1, %s6787_s29  ;;  %s50_s13 = sadd.s32 1, %s6779_s27 }
  0x4d   : > { %p45_p12 = scmp.ge.s32.totalorder %s43_s28, 2  ;;  %p57_p0 = scmp.ne.s32.totalorder %s6779_s27, %s6775_s26 }
  0x4e   : > { %p58_p6 = scmp.eq.s32.totalorder %s6791_s30, 0  ;;  %p6029_p3 = scmp.lt.s32.totalorder %s6791_s30, 2 }
  0x4f   : > { %s8551_s28 = smov (%p45_p12, %s43_s28), 0  ;;  %p6992_p7 = por %p6919_p2, %p57_p0 }
  0x50   : > { %p59_p5 = por %p58_p6, %p57_p0  ;;  %s47_s12 = ssub.s32 %s6787_s29, %s8551_s28 }
  0x51   : > { %s443_s22 = sand.u32 1, %s6779_s27   ;;  %p48_p9 = scmp.eq.s32.totalorder %s47_s12, 0 }
  0x52   : > { %s5096_s10 = sshll.u32 %s443_s22, 7  ;;  %s5326_s15 = sshll.u32 %s6787_s29, 11 }
  0x53   : > { %s7001_s14 = scalar_select %p48_p9, %s6779_s27, %s50_s13  }
  0x54   : > { %s453_s25 = scalar_lea.hbm %s8494_s0, %s5326_s15  ;;  %s447_s19 = scalar_lea.vmem [#allocation4], %s5096_s10 }
  0x55   : > { %s454_s3 = sshll.u32 %s447_s19, 4  ;;  %p7008_p11 = pnand %p6029_p3, %p59_p5  ;;  %s455_s3 = int_to_ptr.vmem [resolvable:$true] %s454_s3 }
  0x56   : > { %s444_s5 = scalar_lea.sflag [#allocation5], %s443_s22  ;;  %s6688_s12 = scalar_lea.vmem %s455_s3, 2048 }
  0x57   : > { %p6677_p2 = pneg %p7008_p11  ;;  %p6689_p1 = scmp.ne.s32.totalorder %s455_s3, %s6688_s12 }
  0x58   : > { %s6801_s13 = smov [#allocation4]  }
  0x59   : > { %p6691_p13 = pnand %p6689_p1, %p6677_p2  ;;  %s6693_s9 = sshll.u32 %s6801_s13, 4  ;;  %s6694_s9 = int_to_ptr.vmem [resolvable:$false] %s6693_s9 }
  0x5a   : > { %s6695_s15 = scalar_lea.vmem %s6694_s9, 4096  ;;  %p6696_p12 = scmp.lt.s32.totalorder %s455_s3, %s6694_s9 }
  0x5b   : > { %p6692_p10 = pneg %p6691_p13  ;;  %p6697_p0 = scmp.lt.s32.totalorder %s6695_s15, %s6688_s12 }
  0x5d   : > { %p6698_p6 = por %p6697_p0, %p6696_p12 }
  0x5f   : > { %p6699_p3 = pnand %p6698_p6, %p6692_p10 }
  0x61   : > { %6702 = shalt.err (!%p6699_p3)
}
  0x62   : > { %s6802_s10 = smov 128   ;;  %s6803_s21 = smov 8  }
  0x63   : > { %6020 = dma.hbm_to_vmem [thread:$0]  (!%p7008_p11), %s453_s25, 2048, %s455_s3, %s444_s5, %s6802_s10, %s6802_s10, %s6803_s21  }
  0x64   : > { %466 = sbr.rel (%p6935_p8) target bundleno = 4439 (0x1157), region = 72 }
  0x69   : > { %s7019_s22 = sand.u32 1, %s6775_s26  }
  0x6a   : > { %s5100_s9 = sshll.u32 %s7019_s22, 7  ;;  %s469_s24 = scalar_lea.sflag [#allocation5], %s7019_s22 }
  0x6b   : > { %s7025_s19 = scalar_lea.vmem [#allocation4], %s5100_s9 }
  0x6c   : > { %6754 = dma.done.wait (%p6925_p4), %s469_s24, 2048  }
  0x6d   : > { %6756 = vsyncadd (%p6925_p4), %s469_s24, 4294965248  ;;  %p8533_p5 = scmp.ne.s32.totalorder %s8521_s16, 0 }
  0x6f   : > { %6758 = dma.done.wait (%p8533_p5), [#allocation8], 4096  }
  0x70   : > { %6760 = vsyncadd (%p8533_p5), [#allocation8], 4294963200 }
  0x71   : > { %6762 = dma.done.wait (%p8533_p5), [#allocation11], 2048  }
  0x72   : > { %6764 = vsyncadd (%p8533_p5), [#allocation11], 4294965248  ;;  %v537_v0 = vld [vmem:[%s7025_s19] sm:$0xff]  ;;  %v539_v1 = vld [vmem:[%s7025_s19 + $0x10] sm:$0xff]  ;;  %vm1497_vm0 = vcmask 261120   ;;  %s6805_s17 = smov 96  }
  0x73   : > { %555 = vadd.xlane.f32.xlu0 %v537_v0  ;;  %559 = vadd.xlane.f32.xlu1 %v539_v1  ;;  %v538_v2 = vld [vmem:[%s7025_s19 + $0x8] sm:$0xff]  ;;  %v540_v3 = vld [vmem:[%s7025_s19 + $0x18] sm:$0xff]  ;;  %v541_v4 = vld [vmem:[%s7025_s19 + $0x20] sm:$0xff]  ;;  %s6806_s12 = smov 64   ;;  %s6807_s13 = smov 32   ;;  %vm2670_vm1 = vcmask 523520  }
  0x74   : > { %v542_v5 = vld [vmem:[%s7025_s19 + $0x28] sm:$0xff]  ;;  %v543_v6 = vld [vmem:[%s7025_s19 + $0x30] sm:$0xff]  ;;  %v544_v7 = vld [vmem:[%s7025_s19 + $0x38] sm:$0xff]  ;;  %vm3385_vm2 = vcmask 785920   ;;  %vm4100_vm3 = vcmask 1048320   ;;  %s8536_s18 = sld [smem:[#allocation25_spill]] }
  0x75   : > { %v7048_v8 = vld [vmem:[%s7025_s19 + $0x40] sm:$0xff]  ;;  %v7051_v9 = vld [vmem:[%s7025_s19 + $0x48] sm:$0xff]  ;;  %v7054_v10 = vld [vmem:[%s7025_s19 + $0x50] sm:$0xff]  ;;  %s8539_s24 = sld [smem:[#allocation27_spill]]  ;;  %s4949_s3 = scalar_lea.sflag [#allocation6], %s7019_s22 }
  0x76   : > { %v7057_v11 = vld [vmem:[%s7025_s19 + $0x58] sm:$0xff]  ;;  %v7062_v12 = vld [vmem:[%s7025_s19 + $0x60] sm:$0xff]  ;;  %v7065_v13 = vld [vmem:[%s7025_s19 + $0x68] sm:$0xff]  ;;  %s6808_s16 = smov [#allocation13]  }
  0x77   : > { %557 = vadd.xlane.f32.xlu0 %v538_v2  ;;  %561 = vadd.xlane.f32.xlu1 %v540_v3  ;;  %v7070_v14 = vld [vmem:[%s7025_s19 + $0x70] sm:$0xff]  ;;  %v7073_v15 = vld [vmem:[%s7025_s19 + $0x78] sm:$0xff] }
  0x78   : > { %v6099_v16 = vld [vmem:[#allocation7 + $0xac] ss:$12 sps:$4 sm:$0xff]   ;;  %v6101_v17 = vld [vmem:[#allocation7 + $0xa8] ss:$12 sps:$4 sm:$0xff]   ;;  %v6104_v54 = vld [vmem:[#allocation7 + $0xb0] ss:$12 sps:$4 sm:$0xff]  }
  0x79   : > { %961 = vmatprep.subr.bf16.mxu0 %v6099_v16  ;;  %v6102_v53 = vld [vmem:[#allocation7 + $0x94] ss:$12 sps:$4 sm:$0xff]   ;;  %v6105_v55 = vld [vmem:[#allocation7 + $0x90] ss:$12 sps:$4 sm:$0xff]   ;;  %5552 = vmatprep.subr.bf16.mxu1 %v6104_v54 }
  0x7a   : > { %962 = vmatpush1.bf16.msra.mxu0 %v6101_v17  ;;  %5553 = vmatpush3.bf16.msra.mxu1 %v6104_v54  ;;  %v6110_v17 = vld [vmem:[#allocation7 + $0x64] ss:$12 sps:$4 sm:$0xff]  }
  0x7b   : > { %563 = vadd.xlane.f32.xlu0 %v541_v4  ;;  %565 = vadd.xlane.f32.xlu1 %v542_v5 }
  0x7c   : > { %963 = vmatprep.subr.bf16.mxu0 %v6102_v53 }
  0x7e   : > { %964 = vmatpush1.bf16.msra.mxu0 %v6105_v55 }
  0x7f   : > { %567 = vadd.xlane.f32.xlu0 %v543_v6  ;;  %569 = vadd.xlane.f32.xlu1 %v544_v7 }
  0x83   : > { %571 = vadd.xlane.f32.xlu0 %v7048_v8  ;;  %573 = vadd.xlane.f32.xlu1 %v7051_v9 }
  0x87   : > { %575 = vadd.xlane.f32.xlu0 %v7054_v10  ;;  %577 = vadd.xlane.f32.xlu1 %v7057_v11 }
  0x8b   : > { %579 = vadd.xlane.f32.xlu0 %v7062_v12  ;;  %581 = vadd.xlane.f32.xlu1 %v7065_v13 }
  0x8f   : > { %583 = vadd.xlane.f32.xlu0 %v7070_v14  ;;  %585 = vadd.xlane.f32.xlu1 %v7073_v15 }
  0xfc   : > { %v556_v18 = vpop.xlane.xlu0 %555  ;;  %v560_v19 = vpop.xlane.xlu1 %559 }
  0xfd   : > { %v588_v20 = vmul.f32 0.0078125, %v556_v18  ;;  %v590_v21 = vmul.f32 0.0078125, %v560_v19  ;;  %v6112_v18 = vld [vmem:[#allocation7 + $0x80] ss:$12 sps:$4 sm:$0xff]  }
  0xff   : > { %v7079_v22 = vsub.f32 %v537_v0, %v588_v20  ;;  %v7081_v23 = vsub.f32 %v539_v1, %v590_v21  ;;  %v6106_v0 = vld [vmem:[#allocation7 + $0x7c] ss:$12 sps:$4 sm:$0xff]   ;;  %v6108_v1 = vld [vmem:[#allocation7 + $0x98] ss:$12 sps:$4 sm:$0xff]   ;;  %v6113_v20 = vld [vmem:[#allocation7 + $0x60] ss:$12 sps:$4 sm:$0xff]  }
 0x100   : > { %v558_v24 = vpop.xlane.xlu0 %557  ;;  %v562_v25 = vpop.xlane.xlu1 %561  ;;  %965 = vmatprep.subr.bf16.mxu0 %v6106_v0  ;;  %5554 = vmatprep.subr.bf16.mxu1 %v6108_v1 }
 0x101   : > { %v589_v26 = vmul.f32 0.0078125, %v558_v24  ;;  %v620_v27 = vmul.f32 %v7079_v22, %v7079_v22  ;;  %v591_v28 = vmul.f32 0.0078125, %v562_v25  ;;  %v622_v29 = vmul.f32 %v7081_v23, %v7081_v23  ;;  %5555 = vmatpush3.bf16.msra.mxu1 %v6108_v1 }
 0x102   : > { %5556 = vmatprep.subr.bf16.mxu1 %v6112_v18 }
 0x103   : > { %636 = vadd.xlane.f32.xlu0 %v620_v27  ;;  %v7087_v30 = vsub.f32 %v538_v2, %v589_v26  ;;  %v7089_v31 = vsub.f32 %v540_v3, %v591_v28  ;;  %v6114_v28 = vld [vmem:[#allocation7 + $0x4c] ss:$12 sps:$4 sm:$0xff]  }
 0x104   : > { %v564_v32 = vpop.xlane.xlu0 %563  ;;  %v566_v33 = vpop.xlane.xlu1 %565 }
 0x105   : > { %v592_v34 = vmul.f32 0.0078125, %v564_v32  ;;  %v621_v35 = vmul.f32 %v7087_v30, %v7087_v30  ;;  %v593_v36 = vmul.f32 0.0078125, %v566_v33  ;;  %v623_v37 = vmul.f32 %v7089_v31, %v7089_v31  ;;  %5557 = vmatpush3.bf16.msra.mxu1 %v6112_v18  ;;  %v6117_v33 = vld [vmem:[#allocation7 + $0x48] ss:$12 sps:$4 sm:$0xff]  }
 0x107   : > { %640 = vadd.xlane.f32.xlu0 %v622_v29  ;;  %638 = vadd.xlane.f32.xlu1 %v621_v35  ;;  %v7095_v38 = vsub.f32 %v541_v4, %v592_v34  ;;  %v7097_v39 = vsub.f32 %v542_v5, %v593_v36  ;;  %v6109_v5 = vld [vmem:[#allocation7 + $0x78] ss:$12 sps:$4 sm:$0xff]   ;;  %v6116_v29 = vld [vmem:[#allocation7 + $0x68] ss:$12 sps:$4 sm:$0xff]   ;;  %v6120_v36 = vld [vmem:[#allocation7 + $0x50] ss:$12 sps:$4 sm:$0xff]  }
 0x108   : > { %v568_v40 = vpop.xlane.xlu0 %567  ;;  %v570_v41 = vpop.xlane.xlu1 %569  ;;  %966 = vmatpush1.bf16.msra.mxu0 %v6109_v5  ;;  %5558 = vmatprep.subr.bf16.mxu1 %v6116_v29  ;;  %v6118_v35 = vld [vmem:[#allocation7 + $0x34] ss:$12 sps:$4 sm:$0xff]  }
 0x109   : > { %v594_v42 = vmul.f32 0.0078125, %v568_v40  ;;  %v624_v43 = vmul.f32 %v7095_v38, %v7095_v38  ;;  %v595_v44 = vmul.f32 0.0078125, %v570_v41  ;;  %v625_v45 = vmul.f32 %v7097_v39, %v7097_v39  ;;  %967 = vmatprep.subr.bf16.mxu0 %v6110_v17  ;;  %5559 = vmatpush3.bf16.msra.mxu1 %v6116_v29  ;;  %v6124_v40 = vld [vmem:[#allocation7 + $0x38] ss:$12 sps:$4 sm:$0xff]  }
 0x10a   : > { %5560 = vmatprep.subr.bf16.mxu1 %v6120_v36  ;;  %v6125_v41 = vld [vmem:[#allocation7 + $0x18] ss:$12 sps:$4 sm:$0xff]  }
 0x10b   : > { %642 = vadd.xlane.f32.xlu1 %v623_v37  ;;  %644 = vadd.xlane.f32.xlu0 %v624_v43  ;;  %v7103_v46 = vsub.f32 %v543_v6, %v594_v42  ;;  %v7105_v47 = vsub.f32 %v544_v7, %v595_v44  ;;  %v6126_v42 = vld [vmem:[#allocation7 + $0x4] ss:$12 sps:$4 sm:$0xff]   ;;  %v6128_v43 = vld [vmem:[#allocation7 + $0x20] ss:$12 sps:$4 sm:$0xff]  }
 0x10c   : > { %v572_v48 = vpop.xlane.xlu0 %571  ;;  %v574_v49 = vpop.xlane.xlu1 %573  ;;  %968 = vmatpush1.bf16.msra.mxu0 %v6113_v20  ;;  %v6129_v44 = vld [vmem:[#allocation7] ss:$12 sps:$4 sm:$0xff]  }
 0x10d   : > { %v596_v50 = vmul.f32 0.0078125, %v572_v48  ;;  %v626_v51 = vmul.f32 %v7103_v46, %v7103_v46  ;;  %v597_v52 = vmul.f32 0.0078125, %v574_v49  ;;  %v627_v56 = vmul.f32 %v7105_v47, %v7105_v47  ;;  %969 = vmatprep.subr.bf16.mxu0 %v6114_v28  ;;  %5561 = vmatpush3.bf16.msra.mxu1 %v6120_v36 }
 0x10e   : > { %5562 = vmatprep.subr.bf16.mxu1 %v6124_v40  ;;  %v6804_v48 = vmov 0  }
 0x10f   : > { %646 = vadd.xlane.f32.xlu1 %v625_v45  ;;  %648 = vadd.xlane.f32.xlu0 %v626_v51  ;;  %v7112_v57 = vsub.f32 %v7048_v8, %v596_v50  ;;  %v7115_v58 = vsub.f32 %v7051_v9, %v597_v52  ;;  %v6130_v45 = vld [vmem:[#allocation7 + $0x8] ss:$12 sps:$4 sm:$0xff]  }
 0x110   : > { %v576_v59 = vpop.xlane.xlu0 %575  ;;  %v578_v60 = vpop.xlane.xlu1 %577  ;;  %970 = vmatpush1.bf16.msra.mxu0 %v6117_v33  ;;  %993 = vmatprep.mubr.bf16.mxu0 %v6804_v48 }
 0x111   : > { %v598_v61 = vmul.f32 0.0078125, %v576_v59  ;;  %v628_v62 = vmul.f32 %v7112_v57, %v7112_v57  ;;  %v599_v63 = vmul.f32 0.0078125, %v578_v60  ;;  %v629_v2 = vmul.f32 %v7115_v58, %v7115_v58  ;;  %971 = vmatprep.subr.bf16.mxu0 %v6118_v35  ;;  %5563 = vmatpush3.bf16.msra.mxu1 %v6124_v40 }
 0x112   : > { %5564 = vmatprep.subr.bf16.mxu1 %v6128_v43 }
 0x113   : > { %650 = vadd.xlane.f32.xlu1 %v627_v56  ;;  %652 = vadd.xlane.f32.xlu0 %v628_v62  ;;  %v7122_v3 = vsub.f32 %v7054_v10, %v598_v61  ;;  %v7125_v4 = vsub.f32 %v7057_v11, %v599_v63 }
 0x114   : > { %v580_v6 = vpop.xlane.xlu0 %579  ;;  %v582_v7 = vpop.xlane.xlu1 %581 }
 0x115   : > { %v600_v8 = vmul.f32 0.0078125, %v580_v6  ;;  %v630_v9 = vmul.f32 %v7122_v3, %v7122_v3  ;;  %v601_v16 = vmul.f32 0.0078125, %v582_v7  ;;  %v631_v10 = vmul.f32 %v7125_v4, %v7125_v4  ;;  %5565 = vmatpush3.bf16.msra.mxu1 %v6128_v43 }
 0x116   : > { %5566 = vmatprep.subr.bf16.mxu1 %v6130_v45 }
 0x117   : > { %654 = vadd.xlane.f32.xlu1 %v629_v2  ;;  %656 = vadd.xlane.f32.xlu0 %v630_v9  ;;  %v7132_v11 = vsub.f32 %v7062_v12, %v600_v8  ;;  %v7135_v19 = vsub.f32 %v7065_v13, %v601_v16 }
 0x118   : > { %v584_v21 = vpop.xlane.xlu0 %583  ;;  %v586_v24 = vpop.xlane.xlu1 %585 }
 0x119   : > { %v602_v25 = vmul.f32 0.0078125, %v584_v21  ;;  %v632_v26 = vmul.f32 %v7132_v11, %v7132_v11  ;;  %v603_v27 = vmul.f32 0.0078125, %v586_v24  ;;  %v633_v12 = vmul.f32 %v7135_v19, %v7135_v19  ;;  %5567 = vmatpush3.bf16.msra.mxu1 %v6130_v45 }
 0x11b   : > { %658 = vadd.xlane.f32.xlu1 %v631_v10  ;;  %660 = vadd.xlane.f32.xlu0 %v632_v26  ;;  %v7142_v13 = vsub.f32 %v7070_v14, %v602_v25  ;;  %v7145_v32 = vsub.f32 %v7073_v15, %v603_v27  ;;  %v6121_v14 = vld [vmem:[#allocation7 + $0x30] ss:$12 sps:$4 sm:$0xff]   ;;  %v7155_v25 = vld [vmem:[%s8495_s1] ss:$0 sm:$0xff] }
 0x11c   : > { %972 = vmatpush1.bf16.msra.mxu0 %v6121_v14  ;;  %v6122_v15 = vld [vmem:[#allocation7 + $0x1c] ss:$12 sps:$4 sm:$0xff]   ;;  %v7162_v14 = vld [vmem:[%s8496_s2] ss:$0 sm:$0xff] }
 0x11d   : > { %v634_v34 = vmul.f32 %v7142_v13, %v7142_v13  ;;  %v635_v37 = vmul.f32 %v7145_v32, %v7145_v32  ;;  %973 = vmatprep.subr.bf16.mxu0 %v6122_v15 }
 0x11f   : > { %662 = vadd.xlane.f32.xlu1 %v633_v12  ;;  %664 = vadd.xlane.f32.xlu0 %v634_v34 }
 0x120   : > { %974 = vmatpush1.bf16.msra.mxu0 %v6125_v41 }
 0x121   : > { %975 = vmatprep.subr.bf16.mxu0 %v6126_v42 }
 0x123   : > { %666 = vadd.xlane.f32.xlu1 %v635_v37 }
 0x124   : > { %976 = vmatpush1.bf16.msra.mxu0 %v6129_v44 }
 0x18c   : > { %v637_v49 = vpop.xlane.xlu0 %636 }
 0x18d   : > { %v668_v50 = vmul.f32 0.0078125, %v637_v49 }
 0x18f   : > { %v684_v51 = vadd.f32 1e-05, %v668_v50 }
 0x190   : > { %v639_v52 = vpop.xlane.xlu1 %638  ;;  %v641_v53 = vpop.xlane.xlu0 %640 }
 0x191   : > { %6251 = vrsqrt.f32 %v684_v51  ;;  %v669_v54 = vmul.f32 0.0078125, %v639_v52  ;;  %v670_v55 = vmul.f32 0.0078125, %v641_v53 }
 0x193   : > { %v685_v56 = vadd.f32 1e-05, %v669_v54  ;;  %v686_v59 = vadd.f32 1e-05, %v670_v55 }
 0x194   : > { %v643_v60 = vpop.xlane.xlu1 %642  ;;  %v645_v61 = vpop.xlane.xlu0 %644 }
 0x195   : > { %6253 = vrsqrt.f32 %v685_v56  ;;  %v671_v62 = vmul.f32 0.0078125, %v643_v60  ;;  %v672_v63 = vmul.f32 0.0078125, %v645_v61 }
 0x196   : > { %6255 = vrsqrt.f32 %v686_v59 }
 0x197   : > { %v687_v0 = vadd.f32 1e-05, %v671_v62  ;;  %v688_v1 = vadd.f32 1e-05, %v672_v63 }
 0x198   : > { %v647_v2 = vpop.xlane.xlu1 %646  ;;  %v649_v5 = vpop.xlane.xlu0 %648 }
 0x199   : > { %6257 = vrsqrt.f32 %v687_v0  ;;  %v673_v6 = vmul.f32 0.0078125, %v647_v2  ;;  %v674_v7 = vmul.f32 0.0078125, %v649_v5 }
 0x19a   : > { %6259 = vrsqrt.f32 %v688_v1 }
 0x19b   : > { %v689_v8 = vadd.f32 1e-05, %v673_v6  ;;  %v690_v9 = vadd.f32 1e-05, %v674_v7 }
 0x19c   : > { %v651_v16 = vpop.xlane.xlu1 %650  ;;  %v653_v17 = vpop.xlane.xlu0 %652 }
 0x19d   : > { %6261 = vrsqrt.f32 %v689_v8  ;;  %v675_v18 = vmul.f32 0.0078125, %v651_v16  ;;  %v676_v10 = vmul.f32 0.0078125, %v653_v17 }
 0x19e   : > { %v6252_v20 = vpop.eup %6251  ;;  %6263 = vrsqrt.f32 %v690_v9 }
 0x19f   : > { %v691_v21 = vadd.f32 1e-05, %v675_v18  ;;  %v692_v24 = vadd.f32 1e-05, %v676_v10  ;;  %v716_v26 = vmul.f32 %v6252_v20, %v7079_v22 }
 0x1a0   : > { %v655_v27 = vpop.xlane.xlu1 %654  ;;  %v657_v28 = vpop.xlane.xlu0 %656 }
 0x1a1   : > { %6265 = vrsqrt.f32 %v691_v21  ;;  %v677_v29 = vmul.f32 0.0078125, %v655_v27  ;;  %v678_v12 = vmul.f32 0.0078125, %v657_v28  ;;  %v738_v34 = vmul.f32 %v7155_v25, %v716_v26 }
 0x1a2   : > { %v6254_v33 = vpop.eup %6253  ;;  %6267 = vrsqrt.f32 %v692_v24 }
 0x1a3   : > { %v6256_v35 = vpop.eup %6255  ;;  %v693_v36 = vadd.f32 1e-05, %v677_v29  ;;  %v694_v37 = vadd.f32 1e-05, %v678_v12  ;;  %v717_v15 = vmul.f32 %v6254_v33, %v7087_v30  ;;  %v760_v49 = vadd.f32 %v7162_v14, %v738_v34 }
 0x1a4   : > { %v659_v22 = vpop.xlane.xlu1 %658  ;;  %v661_v40 = vpop.xlane.xlu0 %660  ;;  %v718_v41 = vmul.f32 %v6256_v35, %v7081_v23 }
 0x1a5   : > { %6269 = vrsqrt.f32 %v693_v36  ;;  %v679_v42 = vmul.f32 0.0078125, %v659_v22  ;;  %v680_v43 = vmul.f32 0.0078125, %v661_v40  ;;  %v739_v44 = vmul.f32 %v7155_v25, %v717_v15 }
 0x1a6   : > { %v6258_v45 = vpop.eup %6257  ;;  %6271 = vrsqrt.f32 %v694_v37  ;;  %v740_v23 = vmul.f32 %v7155_v25, %v718_v41 }
 0x1a7   : > { %v6260_v50 = vpop.eup %6259  ;;  %v695_v51 = vadd.f32 1e-05, %v679_v42  ;;  %v696_v52 = vadd.f32 1e-05, %v680_v43  ;;  %v761_v53 = vadd.f32 %v7162_v14, %v739_v44  ;;  %v719_v30 = vmul.f32 %v6258_v45, %v7089_v31 }
 0x1a8   : > { %v663_v54 = vpop.xlane.xlu1 %662  ;;  %v665_v55 = vpop.xlane.xlu0 %664  ;;  %v720_v56 = vmul.f32 %v6260_v50, %v7095_v38  ;;  %v762_v38 = vadd.f32 %v7162_v14, %v740_v23 }
 0x1a9   : > { %6273 = vrsqrt.f32 %v695_v51  ;;  %v681_v59 = vmul.f32 0.0078125, %v663_v54  ;;  %v682_v60 = vmul.f32 0.0078125, %v665_v55  ;;  %v776_v61 = vpack.c.bf16 %v761_v53, %v760_v49 }
 0x1aa   : > { %v6262_v62 = vpop.eup %6261  ;;  %6275 = vrsqrt.f32 %v696_v52  ;;  %v741_v63 = vmul.f32 %v7155_v25, %v719_v30  ;;  %v742_v5 = vmul.f32 %v7155_v25, %v720_v56 }
 0x1ab   : > { %v6264_v0 = vpop.eup %6263  ;;  %v697_v1 = vadd.f32 1e-05, %v681_v59  ;;  %v698_v2 = vadd.f32 1e-05, %v682_v60  ;;  %994 = vmatmul.mubr.bf16.vlgmr.msra.gmra.mxu0 %v776_v61  ;;  %5568 = vmatprep.mubr.bf16.mxu1 %v776_v61  ;;  %v721_v31 = vmul.f32 %v6262_v62, %v7097_v39 }
 0x1ac   : > { %v667_v6 = vpop.xlane.xlu1 %666  ;;  %v763_v7 = vadd.f32 %v7162_v14, %v741_v63  ;;  %1003 = vmatprep.mubr.bf16.mxu0 %v6804_v48  ;;  %v722_v8 = vmul.f32 %v6264_v0, %v7103_v46  ;;  %v764_v21 = vadd.f32 %v7162_v14, %v742_v5 }
 0x1ad   : > { %6277 = vrsqrt.f32 %v697_v1  ;;  %v683_v9 = vmul.f32 0.0078125, %v667_v6  ;;  %v743_v16 = vmul.f32 %v7155_v25, %v721_v31 }
 0x1ae   : > { %v6266_v17 = vpop.eup %6265  ;;  %6279 = vrsqrt.f32 %v698_v2  ;;  %v777_v18 = vpack.c.bf16 %v763_v7, %v762_v38  ;;  %v744_v39 = vmul.f32 %v7155_v25, %v722_v8 }
 0x1af   : > { %v6268_v10 = vpop.eup %6267  ;;  %v699_v20 = vadd.f32 1e-05, %v683_v9  ;;  %v765_v24 = vadd.f32 %v7162_v14, %v743_v16  ;;  %v723_v26 = vmul.f32 %v6266_v17, %v7105_v47 }
 0x1b0   : > { %5569 = vmatmul.mubr.bf16.vlgmr.msra.gmra.mxu1 %v777_v18  ;;  %v724_v46 = vmul.f32 %v6268_v10, %v7112_v57  ;;  %v766_v12 = vadd.f32 %v7162_v14, %v744_v39 }
 0x1b1   : > { %6281 = vrsqrt.f32 %v699_v20  ;;  %v778_v27 = vpack.c.bf16 %v765_v24, %v764_v21  ;;  %v745_v28 = vmul.f32 %v7155_v25, %v723_v26 }
 0x1b2   : > { %v6270_v29 = vpop.eup %6269  ;;  %v746_v36 = vmul.f32 %v7155_v25, %v724_v46 }
 0x1b3   : > { %v6272_v33 = vpop.eup %6271  ;;  %1004 = vmatmul.mubr.bf16.gmra.mxu0 %v777_v18  ;;  %5572 = vmatprep.mubr.bf16.mxu1 %v778_v27  ;;  %v767_v34 = vadd.f32 %v7162_v14, %v745_v28  ;;  %v725_v35 = vmul.f32 %v6270_v29, %v7115_v58 }
 0x1b4   : > { %1013 = vmatprep.mubr.bf16.mxu0 %v6804_v48  ;;  %v726_v47 = vmul.f32 %v6272_v33, %v7122_v3  ;;  %v768_v41 = vadd.f32 %v7162_v14, %v746_v36 }
 0x1b5   : > { %v779_v57 = vpack.c.bf16 %v767_v34, %v766_v12  ;;  %v747_v37 = vmul.f32 %v7155_v25, %v725_v35 }
 0x1b6   : > { %v6274_v15 = vpop.eup %6273  ;;  %v748_v22 = vmul.f32 %v7155_v25, %v726_v47 }
 0x1b7   : > { %v6276_v40 = vpop.eup %6275  ;;  %v769_v42 = vadd.f32 %v7162_v14, %v747_v37  ;;  %v727_v43 = vmul.f32 %v6274_v15, %v7125_v4 }
 0x1b8   : > { %5573 = vmatmul.mubr.bf16.gmra.mxu1 %v779_v57  ;;  %v728_v58 = vmul.f32 %v6276_v40, %v7132_v11  ;;  %v770_v49 = vadd.f32 %v7162_v14, %v748_v22 }
 0x1b9   : > { %v780_v44 = vpack.c.bf16 %v769_v42, %v768_v41  ;;  %v749_v45 = vmul.f32 %v7155_v25, %v727_v43 }
 0x1ba   : > { %v6278_v3 = vpop.eup %6277  ;;  %v750_v53 = vmul.f32 %v7155_v25, %v728_v58 }
 0x1bb   : > { %v6280_v50 = vpop.eup %6279  ;;  %1014 = vmatmul.mubr.bf16.gmra.mxu0 %v778_v27  ;;  %5576 = vmatprep.mubr.bf16.mxu1 %v780_v44  ;;  %v771_v51 = vadd.f32 %v7162_v14, %v749_v45  ;;  %v729_v52 = vmul.f32 %v6278_v3, %v7135_v19 }
 0x1bc   : > { %1023 = vmatprep.mubr.bf16.mxu0 %v6804_v48  ;;  %v730_v4 = vmul.f32 %v6280_v50, %v7142_v13  ;;  %v772_v55 = vadd.f32 %v7162_v14, %v750_v53 }
 0x1bd   : > { %v781_v11 = vpack.c.bf16 %v771_v51, %v770_v49  ;;  %v751_v30 = vmul.f32 %v7155_v25, %v729_v52 }
 0x1be   : > { %v6282_v54 = vpop.eup %6281  ;;  %v752_v59 = vmul.f32 %v7155_v25, %v730_v4 }
 0x1bf   : > { %v773_v23 = vadd.f32 %v7162_v14, %v751_v30  ;;  %v731_v56 = vmul.f32 %v6282_v54, %v7145_v32  ;;  %v818_v32 = vlaneseq }
 0x1c0   : > { %5577 = vmatmul.mubr.bf16.gmra.mxu1 %v781_v11  ;;  %v774_v13 = vadd.f32 %v7162_v14, %v752_v59 }
 0x1c1   : > { %v782_v19 = vpack.c.bf16 %v773_v23, %v772_v55  ;;  %v753_v60 = vmul.f32 %v7155_v25, %v731_v56  ;;  %v819_v25 = vshrl.u32 %v818_v32, 7 }
 0x1c3   : > { %1024 = vmatmul.mubr.bf16.gmra.mxu0 %v779_v57  ;;  %5580 = vmatprep.mubr.bf16.mxu1 %v782_v19  ;;  %v775_v61 = vadd.f32 %v7162_v14, %v753_v60  ;;  %v820_v63 = vsub.s32 0, %v819_v25  ;;  %v824_v0 = vsub.s32 1, %v819_v25  ;;  %v816_v14 = vld [vmem:[%s8498_s4] sm:$0x7]  ;;  %v828_v1 = vsub.s32 2, %v819_v25 }
 0x1c4   : > { %1033 = vmatprep.mubr.bf16.mxu0 %v6804_v48 }
 0x1c5   : > { %v783_v62 = vpack.c.bf16 %v775_v61, %v774_v13  ;;  %v7220_v2 = vrot.slane %v816_v14, %v820_v63  ;;  %v7222_v31 = vrot.slane %v816_v14, %v824_v0  ;;  %v7224_v38 = vrot.slane %v816_v14, %v828_v1 }
 0x1c8   : > { %5581 = vmatmul.mubr.bf16.gmra.mxu1 %v783_v62 }
 0x1cb   : > { %1034 = vmatmul.mubr.bf16.gmra.mxu0 %v780_v44 }
 0x1cc   : > { %1043 = vmatprep.mubr.bf16.mxu0 %v6804_v48 }
 0x1d3   : > { %1044 = vmatmul.mubr.bf16.gmra.mxu0 %v781_v11 }
 0x1d4   : > { %1053 = vmatprep.mubr.bf16.mxu0 %v6804_v48 }
 0x1db   : > { %1054 = vmatmul.mubr.bf16.gmra.mxu0 %v782_v19 }
 0x1dc   : > { %1063 = vmatprep.mubr.bf16.mxu0 %v6804_v48 }
 0x1e3   : > { %1064 = vmatmul.mubr.bf16.gmra.mxu0 %v783_v62 }
 0x26b   : > { %v995_v5 = vpop.f32.mrf.mxu0 }
 0x26c   : > { %v996_v48 = vadd.f32 %v995_v5, %v7220_v2 }
 0x26d   : > { %v997_v6 = vpop.f32.mrf.mxu0 }
 0x26e   : > { %v998_v7 = vadd.f32 %v997_v6, %v7222_v31 }
 0x26f   : > { %v999_v8 = vpop.f32.mrf.mxu0 }
 0x270   : > { %v5327_v9 = vpack.c.bf16 %v998_v7, %v996_v48  ;;  %v5570_v16 = vpop.f32.mrf.mxu1  ;;  %v1000_v39 = vadd.f32 %v999_v8, %v7220_v2 }
 0x271   : > { %v1117_v17 = vadd.f32 %v5570_v16, %v7224_v38  ;;  %v1001_v18 = vpop.f32.mrf.mxu0 }
 0x272   : > { %1331 = vst [vmem:[#allocation2] sm:$0xff] %v5327_v9  ;;  %v1002_v10 = vadd.f32 %v1001_v18, %v7222_v31  ;;  %v1108_v20 = vpop.f32.mrf.mxu1 }
 0x273   : > { %v5332_v21 = vpack.c.bf16 %v1117_v17, %v1117_v17  ;;  %v1109_v24 = vadd.f32 %v1108_v20, %v7224_v38  ;;  %v1005_v26 = vpop.f32.mrf.mxu0 }
 0x274   : > { %v5329_v46 = vpack.c.bf16 %v1002_v10, %v1000_v39  ;;  %v5571_v27 = vpop.f32.mrf.mxu1  ;;  %v1006_v33 = vadd.f32 %v1005_v26, %v7220_v2 }
 0x275   : > { %1336 = vst [vmem:[#allocation2 + $0x20] sm:$0xf] %v5332_v21  ;;  %v5328_v28 = vpack.c.bf16 %v1109_v24, %v1109_v24  ;;  %v1120_v29 = vadd.f32 %v5571_v27, %v7224_v38  ;;  %v1007_v12 = vpop.f32.mrf.mxu0 }
 0x276   : > { %1333 = vst [vmem:[#allocation2 + $0xc] sm:$0xff] %v5329_v46  ;;  %v1008_v34 = vadd.f32 %v1007_v12, %v7222_v31  ;;  %v1111_v35 = vpop.f32.mrf.mxu1 }
 0x277   : > { %1332 = vst [vmem:[#allocation2 + $0x8] sm:$0xf] %v5328_v28  ;;  %v5334_v36 = vpack.c.bf16 %v1120_v29, %v1120_v29  ;;  %v1112_v47 = vadd.f32 %v1111_v35, %v7224_v38  ;;  %v1009_v57 = vpop.f32.mrf.mxu0 }
 0x278   : > { %v5331_v37 = vpack.c.bf16 %v1008_v34, %v1006_v33  ;;  %v5574_v15 = vpop.f32.mrf.mxu1  ;;  %v1010_v42 = vadd.f32 %v1009_v57, %v7220_v2 }
 0x279   : > { %1338 = vst [vmem:[#allocation2 + $0x2c] sm:$0xf] %v5334_v36  ;;  %v5330_v22 = vpack.c.bf16 %v1112_v47, %v1112_v47  ;;  %v1133_v40 = vadd.f32 %v5574_v15, %v7224_v38  ;;  %v1011_v41 = vpop.f32.mrf.mxu0 }
 0x27a   : > { %1335 = vst [vmem:[#allocation2 + $0x18] sm:$0xff] %v5331_v37  ;;  %v1012_v43 = vadd.f32 %v1011_v41, %v7222_v31  ;;  %v1124_v58 = vpop.f32.mrf.mxu1 }
 0x27b   : > { %1334 = vst [vmem:[#allocation2 + $0x14] sm:$0xf] %v5330_v22  ;;  %v5340_v44 = vpack.c.bf16 %v1133_v40, %v1133_v40  ;;  %v1125_v45 = vadd.f32 %v1124_v58, %v7224_v38  ;;  %v1015_v3 = vpop.f32.mrf.mxu0 }
 0x27c   : > { %v5333_v49 = vpack.c.bf16 %v1012_v43, %v1010_v42  ;;  %v5575_v50 = vpop.f32.mrf.mxu1  ;;  %v1016_v11 = vadd.f32 %v1015_v3, %v7220_v2 }
 0x27d   : > { %1344 = vst [vmem:[#allocation2 + $0x50] sm:$0xf] %v5340_v44  ;;  %v5336_v51 = vpack.c.bf16 %v1125_v45, %v1125_v45  ;;  %v1136_v52 = vadd.f32 %v5575_v50, %v7224_v38  ;;  %v1017_v53 = vpop.f32.mrf.mxu0  ;;  %v6131_v4 = vld [vmem:[#allocation2] ss:$12 sps:$4 sm:$0xff]  }
 0x27e   : > { %1337 = vst [vmem:[#allocation2 + $0x24] sm:$0xff] %v5333_v49  ;;  %v1018_v30 = vadd.f32 %v1017_v53, %v7222_v31  ;;  %v1127_v54 = vpop.f32.mrf.mxu1  ;;  %5600 = vmatprep.mubr.msk.bf16.mxu0 %vm1497_vm0, %v6131_v4 }
 0x27f   : > { %1340 = vst [vmem:[#allocation2 + $0x38] sm:$0xf] %v5336_v51  ;;  %v5342_v55 = vpack.c.bf16 %v1136_v52, %v1136_v52  ;;  %v1128_v23 = vadd.f32 %v1127_v54, %v7224_v38  ;;  %v1019_v56 = vpop.f32.mrf.mxu0 }
 0x280   : > { %v5335_v59 = vpack.c.bf16 %v1018_v30, %v1016_v11  ;;  %v5578_v19 = vpop.f32.mrf.mxu1  ;;  %v1020_v62 = vadd.f32 %v1019_v56, %v7220_v2 }
 0x281   : > { %1346 = vst [vmem:[#allocation2 + $0x5c] sm:$0xf] %v5342_v55  ;;  %v5338_v60 = vpack.c.bf16 %v1128_v23, %v1128_v23  ;;  %v1149_v13 = vadd.f32 %v5578_v19, %v7224_v38  ;;  %v1021_v61 = vpop.f32.mrf.mxu0 }
 0x282   : > { %1339 = vst [vmem:[#allocation2 + $0x30] sm:$0xff] %v5335_v59  ;;  %v1022_v32 = vadd.f32 %v1021_v61, %v7222_v31  ;;  %v1140_v25 = vpop.f32.mrf.mxu1 }
 0x283   : > { %1342 = vst [vmem:[#allocation2 + $0x44] sm:$0xf] %v5338_v60  ;;  %v5348_v63 = vpack.c.bf16 %v1149_v13, %v1149_v13  ;;  %v1141_v0 = vadd.f32 %v1140_v25, %v7224_v38  ;;  %v1025_v14 = vpop.f32.mrf.mxu0 }
 0x284   : > { %v5337_v1 = vpack.c.bf16 %v1022_v32, %v1020_v62  ;;  %v5579_v5 = vpop.f32.mrf.mxu1  ;;  %v1026_v8 = vadd.f32 %v1025_v14, %v7220_v2 }
 0x285   : > { %1352 = vst [vmem:[#allocation2 + $0x80] sm:$0xf] %v5348_v63  ;;  %v5344_v6 = vpack.c.bf16 %v1141_v0, %v1141_v0  ;;  %v1152_v48 = vadd.f32 %v5579_v5, %v7224_v38  ;;  %v1027_v7 = vpop.f32.mrf.mxu0 }
 0x286   : > { %1341 = vst [vmem:[#allocation2 + $0x3c] sm:$0xff] %v5337_v1  ;;  %v1028_v9 = vadd.f32 %v1027_v7, %v7222_v31  ;;  %v1143_v16 = vpop.f32.mrf.mxu1 }
 0x287   : > { %1348 = vst [vmem:[#allocation2 + $0x68] sm:$0xf] %v5344_v6  ;;  %v5350_v17 = vpack.c.bf16 %v1152_v48, %v1152_v48  ;;  %v1144_v18 = vadd.f32 %v1143_v16, %v7224_v38  ;;  %v1029_v39 = vpop.f32.mrf.mxu0 }
 0x288   : > { %v5339_v10 = vpack.c.bf16 %v1028_v9, %v1026_v8  ;;  %v5582_v20 = vpop.f32.mrf.mxu1  ;;  %v1030_v46 = vadd.f32 %v1029_v39, %v7220_v2  ;;  %v6136_v8 = vld [vmem:[#allocation2 + $0x50] ss:$12 sps:$4 sm:$0xff]  }
 0x289   : > { %1354 = vst [vmem:[#allocation2 + $0x8c] sm:$0xf] %v5350_v17  ;;  %v5346_v21 = vpack.c.bf16 %v1144_v18, %v1144_v18  ;;  %v1165_v24 = vadd.f32 %v5582_v20, %v7224_v38  ;;  %v1031_v26 = vpop.f32.mrf.mxu0 }
 0x28a   : > { %1343 = vst [vmem:[#allocation2 + $0x48] sm:$0xff] %v5339_v10  ;;  %v1032_v27 = vadd.f32 %v1031_v26, %v7222_v31  ;;  %v1156_v28 = vpop.f32.mrf.mxu1  ;;  %v6137_v17 = vld [vmem:[#allocation2 + $0x38] ss:$12 sps:$4 sm:$0xff]   ;;  %v6140_v26 = vld [vmem:[#allocation2 + $0x8] ss:$12 sps:$4 sm:$0xff]  }
 0x28b   : > { %1350 = vst [vmem:[#allocation2 + $0x74] sm:$0xf] %v5346_v21  ;;  %v5356_v29 = vpack.c.bf16 %v1165_v24, %v1165_v24  ;;  %v1157_v12 = vadd.f32 %v1156_v28, %v7224_v38  ;;  %v1035_v33 = vpop.f32.mrf.mxu0  ;;  %v6139_v24 = vld [vmem:[#allocation2 + $0x20] ss:$12 sps:$4 sm:$0xff]  }
 0x28c   : > { %v5341_v34 = vpack.c.bf16 %v1032_v27, %v1030_v46  ;;  %v5583_v35 = vpop.f32.mrf.mxu1  ;;  %v1036_v37 = vadd.f32 %v1035_v33, %v7220_v2 }
 0x28d   : > { %1360 = vst [vmem:[#allocation2 + $0xb0] sm:$0xf] %v5356_v29  ;;  %v5352_v36 = vpack.c.bf16 %v1157_v12, %v1157_v12  ;;  %v1168_v47 = vadd.f32 %v5583_v35, %v7224_v38  ;;  %v1037_v57 = vpop.f32.mrf.mxu0 }
 0x28e   : > { %1345 = vst [vmem:[#allocation2 + $0x54] sm:$0xff] %v5341_v34  ;;  %v1038_v15 = vadd.f32 %v1037_v57, %v7222_v31  ;;  %v1159_v22 = vpop.f32.mrf.mxu1 }
 0x28f   : > { %1356 = vst [vmem:[#allocation2 + $0x98] sm:$0xf] %v5352_v36  ;;  %v5358_v40 = vpack.c.bf16 %v1168_v47, %v1168_v47  ;;  %v1160_v41 = vadd.f32 %v1159_v22, %v7224_v38  ;;  %v1039_v42 = vpop.f32.mrf.mxu0  ;;  %v6147_v36 = vld [vmem:[#allocation2 + $0x34] ss:$12 sps:$4 sm:$0xff]   ;;  %v6149_v22 = vld [vmem:[#allocation2 + $0x4] ss:$12 sps:$4 sm:$0xff]  }
 0x290   : > { %v5343_v43 = vpack.c.bf16 %v1038_v15, %v1036_v37  ;;  %v1040_v45 = vadd.f32 %v1039_v42, %v7220_v2  ;;  %v6134_v61 = vld [vmem:[#allocation2 + $0x80] ss:$12 sps:$4 sm:$0xff]   ;;  %v1529_v57 = vsel %vm1497_vm0, %v6147_v36, 0  ;;  %v6148_v37 = vld [vmem:[#allocation2 + $0x1c] ss:$12 sps:$4 sm:$0xff]  }
 0x291   : > { %1362 = vst [vmem:[#allocation2 + $0xbc] sm:$0xf] %v5358_v40  ;;  %v5354_v58 = vpack.c.bf16 %v1160_v41, %v1160_v41  ;;  %v1041_v44 = vpop.f32.mrf.mxu0  ;;  %v1526_v15 = vsel %vm1497_vm0, %v6148_v37, 0  ;;  %v1523_v40 = vsel %vm1497_vm0, %v6149_v22, 0  ;;  %v6150_v41 = vld [vmem:[#allocation2 + $0x18] ss:$12 sps:$4 sm:$0xff]  }
 0x292   : > { %1347 = vst [vmem:[#allocation2 + $0x60] sm:$0xff] %v5343_v43  ;;  %v1042_v3 = vadd.f32 %v1041_v44, %v7222_v31  ;;  %v6135_v14 = vld [vmem:[#allocation2 + $0x68] ss:$12 sps:$4 sm:$0xff]   ;;  %v6151_v42 = vld [vmem:[#allocation2 + $0x30] ss:$12 sps:$4 sm:$0xff]  }
 0x293   : > { %1358 = vst [vmem:[#allocation2 + $0xa4] sm:$0xf] %v5354_v58  ;;  %v1045_v49 = vpop.f32.mrf.mxu0 }
 0x294   : > { %v5345_v50 = vpack.c.bf16 %v1042_v3, %v1040_v45  ;;  %v1046_v52 = vadd.f32 %v1045_v49, %v7220_v2 }
 0x295   : > { %v1047_v51 = vpop.f32.mrf.mxu0  ;;  %v6146_v34 = vld [vmem:[#allocation2 + $0x4c] ss:$12 sps:$4 sm:$0xff]   ;;  %v6152_v43 = vld [vmem:[#allocation2 + $0x48] ss:$12 sps:$4 sm:$0xff]  }
 0x296   : > { %1349 = vst [vmem:[#allocation2 + $0x6c] sm:$0xff] %v5345_v50  ;;  %v1048_v53 = vadd.f32 %v1047_v51, %v7222_v31  ;;  %v1532_v47 = vsel %vm1497_vm0, %v6146_v34, 0 }
 0x297   : > { %v1049_v38 = vpop.f32.mrf.mxu0 }
 0x298   : > { %v5347_v4 = vpack.c.bf16 %v1048_v53, %v1046_v52  ;;  %v6132_v11 = vld [vmem:[#allocation2 + $0xb0] ss:$12 sps:$4 sm:$0xff]   ;;  %v1050_v54 = vadd.f32 %v1049_v38, %v7220_v2 }
 0x299   : > { %v1051_v30 = vpop.f32.mrf.mxu0  ;;  %5616 = vmatprep.subr.bf16.mxu1 %v6132_v11 }
 0x29a   : > { %1351 = vst [vmem:[#allocation2 + $0x78] sm:$0xff] %v5347_v4  ;;  %v1052_v55 = vadd.f32 %v1051_v30, %v7222_v31  ;;  %v6133_v23 = vld [vmem:[#allocation2 + $0x98] ss:$12 sps:$4 sm:$0xff]   ;;  %5617 = vmatpush3.bf16.msra.mxu1 %v6132_v11 }
 0x29b   : > { %v1055_v56 = vpop.f32.mrf.mxu0  ;;  %5618 = vmatprep.subr.bf16.mxu1 %v6133_v23 }
 0x29c   : > { %v5349_v59 = vpack.c.bf16 %v1052_v55, %v1050_v54  ;;  %v1056_v60 = vadd.f32 %v1055_v56, %v7220_v2 }
 0x29d   : > { %v1057_v19 = vpop.f32.mrf.mxu0  ;;  %v6145_v12 = vld [vmem:[#allocation2 + $0x64] ss:$12 sps:$4 sm:$0xff]   ;;  %v6153_v58 = vld [vmem:[#allocation2 + $0x60] ss:$12 sps:$4 sm:$0xff]  }
 0x29e   : > { %1353 = vst [vmem:[#allocation2 + $0x84] sm:$0xff] %v5349_v59  ;;  %v1058_v13 = vadd.f32 %v1057_v19, %v7222_v31  ;;  %5619 = vmatpush3.bf16.msra.mxu1 %v6133_v23  ;;  %v1535_v35 = vsel %vm1497_vm0, %v6145_v12, 0 }
 0x29f   : > { %v1059_v62 = vpop.f32.mrf.mxu0  ;;  %5620 = vmatprep.subr.bf16.mxu1 %v6134_v61 }
 0x2a0   : > { %v5351_v32 = vpack.c.bf16 %v1058_v13, %v1056_v60  ;;  %v1060_v63 = vadd.f32 %v1059_v62, %v7220_v2 }
 0x2a1   : > { %v1061_v25 = vpop.f32.mrf.mxu0 }
 0x2a2   : > { %1355 = vst [vmem:[#allocation2 + $0x90] sm:$0xff] %v5351_v32  ;;  %v1062_v0 = vadd.f32 %v1061_v25, %v7222_v31  ;;  %5621 = vmatpush3.bf16.msra.mxu1 %v6134_v61 }
 0x2a3   : > { %v1065_v1 = vpop.f32.mrf.mxu0  ;;  %5622 = vmatprep.subr.bf16.mxu1 %v6135_v14 }
 0x2a4   : > { %v5353_v5 = vpack.c.bf16 %v1062_v0, %v1060_v63  ;;  %v1066_v48 = vadd.f32 %v1065_v1, %v7220_v2 }
 0x2a5   : > { %v1067_v6 = vpop.f32.mrf.mxu0  ;;  %v6144_v28 = vld [vmem:[#allocation2 + $0x7c] ss:$12 sps:$4 sm:$0xff]   ;;  %v6154_v44 = vld [vmem:[#allocation2 + $0x78] ss:$12 sps:$4 sm:$0xff]  }
 0x2a6   : > { %1357 = vst [vmem:[#allocation2 + $0x9c] sm:$0xff] %v5353_v5  ;;  %v1068_v7 = vadd.f32 %v1067_v6, %v7222_v31  ;;  %5623 = vmatpush3.bf16.msra.mxu1 %v6135_v14  ;;  %v1538_v33 = vsel %vm1497_vm0, %v6144_v28, 0 }
 0x2a7   : > { %v1069_v9 = vpop.f32.mrf.mxu0  ;;  %5624 = vmatprep.subr.bf16.mxu1 %v6136_v8 }
 0x2a8   : > { %v5355_v16 = vpack.c.bf16 %v1068_v7, %v1066_v48  ;;  %v1070_v39 = vadd.f32 %v1069_v9, %v7220_v2  ;;  %v6158_v9 = vld [vmem:[#allocation2 + $0x7c] ss:$12 sps:$4 sm:$0xff]  }
 0x2a9   : > { %v1071_v18 = vpop.f32.mrf.mxu0 }
 0x2aa   : > { %1359 = vst [vmem:[#allocation2 + $0xa8] sm:$0xff] %v5355_v16  ;;  %v1072_v10 = vadd.f32 %v1071_v18, %v7222_v31  ;;  %5625 = vmatpush3.bf16.msra.mxu1 %v6136_v8  ;;  %v6157_v8 = vld [vmem:[#allocation2 + $0x64] ss:$12 sps:$4 sm:$0xff]  }
 0x2ab   : > { %5626 = vmatprep.subr.bf16.mxu1 %v6137_v17 }
 0x2ac   : > { %v5357_v20 = vpack.c.bf16 %v1072_v10, %v1070_v39 }
 0x2ad   : > { %v6138_v21 = vld [vmem:[#allocation2 + $0x94] ss:$12 sps:$4 sm:$0xff]   ;;  %v6155_v45 = vld [vmem:[#allocation2 + $0x90] ss:$12 sps:$4 sm:$0xff]  }
 0x2ae   : > { %1361 = vst [vmem:[#allocation2 + $0xb4] sm:$0xff] %v5357_v20  ;;  %5627 = vmatpush3.bf16.msra.mxu1 %v6137_v17  ;;  %2128 = vrot.lane.b32.xlu1 %v6138_v21, %s6805_s17  ;;  %v6143_v31 = vld [vmem:[#allocation2 + $0x94] ss:$12 sps:$4 sm:$0xff]  }
 0x2af   : > { %5628 = vmatprep.subr.bf16.mxu1 %v6139_v24  ;;  %v1541_v29 = vsel %vm1497_vm0, %v6143_v31, 0 }
 0x2b2   : > { %5629 = vmatpush3.bf16.msra.mxu1 %v6139_v24 }
 0x2b3   : > { %5630 = vmatprep.subr.bf16.mxu1 %v6140_v26 }
 0x2b5   : > { %v6141_v46 = vld [vmem:[#allocation2 + $0xac] ss:$12 sps:$4 sm:$0xff]   ;;  %v6156_v3 = vld [vmem:[#allocation2 + $0xa8] ss:$12 sps:$4 sm:$0xff]  }
 0x2b6   : > { %v6142_v27 = vld [vmem:[#allocation2 + $0xac] ss:$12 sps:$4 sm:$0xff]   ;;  %5631 = vmatpush3.bf16.msra.mxu1 %v6140_v26  ;;  %2130 = vrot.lane.b32.xlu0 %v6141_v46, %s6805_s17 }
 0x2b7   : > { %5952 = vmatprep.subr.msk.bf16.mxu0 %vm1497_vm0, %v6142_v27  ;;  %v1544_v2 = vsel %vm1497_vm0, %v6142_v27, 0 }
 0x2b8   : > { %5585 = vmatpush3.bf16.xpose.msra.mxu0 %v1544_v2 }
 0x2b9   : > { %5953 = vmatprep.subr.msk.bf16.mxu0 %vm1497_vm0, %v6143_v31 }
 0x2c0   : > { %5587 = vmatpush3.bf16.xpose.msra.mxu0 %v1541_v29 }
 0x2c1   : > { %5954 = vmatprep.subr.msk.bf16.mxu0 %vm1497_vm0, %v6144_v28 }
 0x2c8   : > { %5589 = vmatpush3.bf16.xpose.msra.mxu0 %v1538_v33 }
 0x2c9   : > { %5955 = vmatprep.subr.msk.bf16.mxu0 %vm1497_vm0, %v6145_v12 }
 0x2d0   : > { %5591 = vmatpush3.bf16.xpose.msra.mxu0 %v1535_v35 }
 0x2d1   : > { %5956 = vmatprep.subr.msk.bf16.mxu0 %vm1497_vm0, %v6146_v34 }
 0x2d8   : > { %5593 = vmatpush3.bf16.xpose.msra.mxu0 %v1532_v47 }
 0x2d9   : > { %5957 = vmatprep.subr.msk.bf16.mxu0 %vm1497_vm0, %v6147_v36 }
 0x2e0   : > { %5595 = vmatpush3.bf16.xpose.msra.mxu0 %v1529_v57 }
 0x2e1   : > { %5958 = vmatprep.subr.msk.bf16.mxu0 %vm1497_vm0, %v6148_v37 }
 0x2e8   : > { %5597 = vmatpush3.bf16.xpose.msra.mxu0 %v1526_v15  ;;  %v6159_v15 = vld [vmem:[#allocation2 + $0x34] ss:$12 sps:$4 sm:$0xff]  }
 0x2e9   : > { %5959 = vmatprep.subr.msk.bf16.mxu0 %vm1497_vm0, %v6149_v22  ;;  %v6160_v22 = vld [vmem:[#allocation2 + $0x4c] ss:$12 sps:$4 sm:$0xff]  }
 0x2f0   : > { %5599 = vmatpush3.bf16.xpose.msra.mxu0 %v1523_v40 }
 0x2f7   : > { %5601 = vmatmul.mubr.msk.bf16.vlgmr.msra.gmra.mxu0 %vm1497_vm0, %v6150_v41 }
 0x2f8   : > { %5604 = vmatprep.mubr.msk.bf16.mxu0 %vm1497_vm0, %v6151_v42 }
 0x2ff   : > { %5605 = vmatmul.mubr.msk.bf16.gmra.mxu0 %vm1497_vm0, %v6152_v43 }
 0x300   : > { %5608 = vmatprep.mubr.msk.bf16.mxu0 %vm1497_vm0, %v6153_v58 }
 0x307   : > { %5609 = vmatmul.mubr.msk.bf16.gmra.mxu0 %vm1497_vm0, %v6154_v44 }
 0x308   : > { %5612 = vmatprep.mubr.msk.bf16.mxu0 %vm1497_vm0, %v6155_v45 }
 0x30f   : > { %5613 = vmatmul.mubr.msk.bf16.gmra.mxu0 %vm1497_vm0, %v6156_v3 }
 0x320   : > { %v7342_v10 = vpop.permute.xlu1 %2128 }
 0x328   : > { %v7300_v49 = vpop.permute.xlu0 %2130 }
 0x329   : > { %5960 = vmatprep.subr.msk.bf16.mxu1 %vm1497_vm0, %v7300_v49 }
 0x3b7   : > { %v5602_v50 = vpop.f32.mrf.mxu0 }
 0x3b8   : > { %v1645_v51 = vmul.f32 0.17677669, %v5602_v50 }
 0x3b9   : > { %v1580_v52 = vpop.f32.mrf.mxu0 }
 0x3ba   : > { %1663 = vmax.xlane.f32.xlu0 %v1645_v51  ;;  %v1643_v38 = vmul.f32 0.17677669, %v1580_v52 }
 0x3bb   : > { %v5603_v53 = vpop.f32.mrf.mxu0 }
 0x3bc   : > { %v1646_v4 = vmul.f32 0.17677669, %v5603_v53 }
 0x3bd   : > { %v1583_v11 = vpop.f32.mrf.mxu0 }
 0x3be   : > { %1659 = vmax.xlane.f32.xlu0 %v1643_v38  ;;  %1665 = vmax.xlane.f32.xlu1 %v1646_v4  ;;  %v1644_v54 = vmul.f32 0.17677669, %v1583_v11 }
 0x3bf   : > { %v5606_v30 = vpop.f32.mrf.mxu0 }
 0x3c0   : > { %v7304_v55 = vmul.f32 0.17677669, %v5606_v30 }
 0x3c1   : > { %v1596_v23 = vpop.f32.mrf.mxu0 }
 0x3c2   : > { %1661 = vmax.xlane.f32.xlu1 %v1644_v54  ;;  %1671 = vmax.xlane.f32.xlu0 %v7304_v55  ;;  %v7307_v59 = vmul.f32 0.17677669, %v1596_v23 }
 0x3c3   : > { %v5607_v56 = vpop.f32.mrf.mxu0 }
 0x3c4   : > { %v7309_v19 = vmul.f32 0.17677669, %v5607_v56 }
 0x3c5   : > { %v1599_v60 = vpop.f32.mrf.mxu0 }
 0x3c6   : > { %1667 = vmax.xlane.f32.xlu0 %v7307_v59  ;;  %1673 = vmax.xlane.f32.xlu1 %v7309_v19  ;;  %v7313_v61 = vmul.f32 0.17677669, %v1599_v60 }
 0x3c7   : > { %v5610_v13 = vpop.f32.mrf.mxu0 }
 0x3c8   : > { %v7315_v62 = vmul.f32 0.17677669, %v5610_v13 }
 0x3c9   : > { %v1612_v32 = vpop.f32.mrf.mxu0 }
 0x3ca   : > { %1669 = vmax.xlane.f32.xlu1 %v7313_v61  ;;  %1679 = vmax.xlane.f32.xlu0 %v7315_v62  ;;  %v7319_v63 = vmul.f32 0.17677669, %v1612_v32 }
 0x3cb   : > { %v5611_v25 = vpop.f32.mrf.mxu0 }
 0x3cc   : > { %v7321_v0 = vmul.f32 0.17677669, %v5611_v25 }
 0x3cd   : > { %v1615_v14 = vpop.f32.mrf.mxu0 }
 0x3ce   : > { %1675 = vmax.xlane.f32.xlu0 %v7319_v63  ;;  %1681 = vmax.xlane.f32.xlu1 %v7321_v0  ;;  %v7325_v5 = vmul.f32 0.17677669, %v1615_v14 }
 0x3cf   : > { %v5614_v1 = vpop.f32.mrf.mxu0 }
 0x3d0   : > { %v7327_v6 = vmul.f32 0.17677669, %v5614_v1 }
 0x3d1   : > { %v1628_v48 = vpop.f32.mrf.mxu0 }
 0x3d2   : > { %1677 = vmax.xlane.f32.xlu1 %v7325_v5  ;;  %1687 = vmax.xlane.f32.xlu0 %v7327_v6  ;;  %v7331_v7 = vmul.f32 0.17677669, %v1628_v48 }
 0x3d3   : > { %v5615_v16 = vpop.f32.mrf.mxu0 }
 0x3d4   : > { %v7336_v17 = vmul.f32 0.17677669, %v5615_v16 }
 0x3d5   : > { %v1631_v18 = vpop.f32.mrf.mxu0 }
 0x3d6   : > { %1683 = vmax.xlane.f32.xlu0 %v7331_v7  ;;  %v7339_v39 = vmul.f32 0.17677669, %v1631_v18 }
 0x3e3   : > { %2124 = vrot.lane.b32.xlu1 %v6157_v8, %s6805_s17 }
 0x3ec   : > { %2126 = vrot.lane.b32.xlu0 %v6158_v9, %s6805_s17 }
 0x407   : > { %1689 = vmax.xlane.f32.xlu1 %v7336_v17 }
 0x40b   : > { %1685 = vmax.xlane.f32.xlu1 %v7339_v39 }
 0x443   : > { %v1664_v20 = vpop.xlane.xlu0 %1663 }
 0x444   : > { %v1693_v21 = vsub.f32 %v1645_v51, %v1664_v20 }
 0x446   : > { %v1711_v24 = vmul.f32 1.442695, %v1693_v21 }
 0x447   : > { %v1660_v26 = vpop.xlane.xlu0 %1659  ;;  %v1666_v46 = vpop.xlane.xlu1 %1665 }
 0x448   : > { %6283 = vpow2.f32 %v1711_v24  ;;  %v1691_v27 = vsub.f32 %v1643_v38, %v1660_v26  ;;  %v1694_v2 = vsub.f32 %v1646_v4, %v1666_v46 }
 0x44a   : > { %v1707_v31 = vmul.f32 1.442695, %v1691_v27  ;;  %v1713_v28 = vmul.f32 1.442695, %v1694_v2  ;;  %v6161_v27 = vld [vmem:[#allocation2 + $0x1c] ss:$12 sps:$4 sm:$0xff]  }
 0x44b   : > { %v1662_v29 = vpop.xlane.xlu1 %1661  ;;  %v1672_v57 = vpop.xlane.xlu0 %1671  ;;  %v6162_v2 = vld [vmem:[#allocation2 + $0x4] ss:$12 sps:$4 sm:$0xff]  }
 0x44c   : > { %6285 = vpow2.f32 %v1707_v31  ;;  %v1692_v12 = vsub.f32 %v1644_v54, %v1662_v29  ;;  %v1697_v43 = vsub.f32 %v7304_v55, %v1672_v57  ;;  %v6163_v31 = vld [vmem:[#allocation2] ss:$12 sps:$4 sm:$0xff]   ;;  %v6165_v29 = vld [vmem:[#allocation2 + $0x30] ss:$12 sps:$4 sm:$0xff]   ;;  %v6168_v57 = vld [vmem:[#allocation2 + $0x78] ss:$12 sps:$4 sm:$0xff]  }
 0x44d   : > { %6287 = vpow2.f32 %v1713_v28  ;;  %v6164_v28 = vld [vmem:[#allocation2 + $0x18] ss:$12 sps:$4 sm:$0xff]  }
 0x44e   : > { %v1709_v33 = vmul.f32 1.442695, %v1692_v12  ;;  %v1719_v45 = vmul.f32 1.442695, %v1697_v43  ;;  %v6166_v12 = vld [vmem:[#allocation2 + $0x48] ss:$12 sps:$4 sm:$0xff]  }
 0x44f   : > { %v1668_v37 = vpop.xlane.xlu0 %1667  ;;  %v1674_v41 = vpop.xlane.xlu1 %1673  ;;  %v6175_v43 = vld [vmem:[#allocation2 + $0x68] ss:$12 sps:$4 sm:$0xff]  }
 0x450   : > { %6289 = vpow2.f32 %v1709_v33  ;;  %v1695_v50 = vsub.f32 %v7307_v59, %v1668_v37  ;;  %v1698_v4 = vsub.f32 %v7309_v19, %v1674_v41  ;;  %v6167_v33 = vld [vmem:[#allocation2 + $0x60] ss:$12 sps:$4 sm:$0xff]   ;;  %v6169_v37 = vld [vmem:[#allocation2 + $0x90] ss:$12 sps:$4 sm:$0xff]  }
 0x451   : > { %6291 = vpow2.f32 %v1719_v45  ;;  %v6173_v41 = vld [vmem:[#allocation2 + $0x80] ss:$12 sps:$4 sm:$0xff]  }
 0x452   : > { %v1715_v38 = vmul.f32 1.442695, %v1695_v50  ;;  %v1721_v55 = vmul.f32 1.442695, %v1698_v4 }
 0x453   : > { %v1680_v40 = vpop.xlane.xlu0 %1679  ;;  %v1670_v58 = vpop.xlane.xlu1 %1669 }
 0x454   : > { %v1696_v3 = vsub.f32 %v7313_v61, %v1670_v58  ;;  %v1701_v23 = vsub.f32 %v7315_v62, %v1680_v40  ;;  %v6172_v40 = vld [vmem:[#allocation2 + $0x98] ss:$12 sps:$4 sm:$0xff]   ;;  %v6176_v58 = vld [vmem:[#allocation2 + $0x8] ss:$12 sps:$4 sm:$0xff]  }
 0x455   : > { %v7344_v34 = vpop.eup %6283 }
 0x456   : > { %1743 = vadd.xlane.f32.xlu0 %v7344_v34  ;;  %v1717_v52 = vmul.f32 1.442695, %v1696_v3  ;;  %v1727_v60 = vmul.f32 1.442695, %v1701_v23 }
 0x457   : > { %v1676_v42 = vpop.xlane.xlu0 %1675  ;;  %v1682_v51 = vpop.xlane.xlu1 %1681 }
 0x458   : > { %6293 = vpow2.f32 %v1717_v52  ;;  %v1699_v13 = vsub.f32 %v7319_v63, %v1676_v42  ;;  %v1702_v25 = vsub.f32 %v7321_v0, %v1682_v51  ;;  %v6174_v42 = vld [vmem:[#allocation2 + $0x38] ss:$12 sps:$4 sm:$0xff]  }
 0x459   : > { %v7347_v35 = vpop.eup %6285  ;;  %6295 = vpow2.f32 %v1715_v38 }
 0x45a   : > { %v7349_v36 = vpop.eup %6287  ;;  %1739 = vadd.xlane.f32.xlu0 %v7347_v35  ;;  %v1723_v32 = vmul.f32 1.442695, %v1699_v13 }
 0x45b   : > { %1745 = vadd.xlane.f32.xlu1 %v7349_v36  ;;  %v1688_v44 = vpop.xlane.xlu0 %1687  ;;  %v1678_v56 = vpop.xlane.xlu1 %1677 }
 0x45c   : > { %v1705_v53 = vsub.f32 %v7327_v6, %v1688_v44  ;;  %v1729_v6 = vmul.f32 1.442695, %v1702_v25  ;;  %v1700_v63 = vsub.f32 %v7325_v5, %v1678_v56  ;;  %v6177_v44 = vld [vmem:[#allocation2 + $0x50] ss:$12 sps:$4 sm:$0xff]  }
 0x45d   : > { %v7353_v47 = vpop.eup %6289 }
 0x45e   : > { %v1735_v30 = vmul.f32 1.442695, %v1705_v53  ;;  %v7368_v19 = vpop.eup %6291  ;;  %v1725_v9 = vmul.f32 1.442695, %v1700_v63 }
 0x45f   : > { %1741 = vadd.xlane.f32.xlu1 %v7353_v47  ;;  %v1684_v11 = vpop.xlane.xlu0 %1683  ;;  %v7366_v61 = vpop.permute.xlu1 %2124 }
 0x460   : > { %v1703_v54 = vsub.f32 %v7331_v7, %v1684_v11  ;;  %6297 = vpow2.f32 %v1735_v30 }
 0x461   : > { %6299 = vpow2.f32 %v1721_v55 }
 0x462   : > { %v1731_v59 = vmul.f32 1.442695, %v1703_v54 }
 0x463   : > { %v2127_v45 = vpop.permute.xlu0 %2126 }
 0x464   : > { %6301 = vpow2.f32 %v1731_v59 }
 0x465   : > { %6303 = vpow2.f32 %v1727_v60  ;;  %v7373_v1 = vpop.eup %6293  ;;  %v2178_v60 = vsel %vm1497_vm0, %v7300_v49, 0  ;;  %v2169_v49 = vsel %vm1497_vm0, %v7366_v61, 0 }
 0x466   : > { %6305 = vpow2.f32 %v1723_v32  ;;  %v7376_v48 = vpop.eup %6295 }
 0x46d   : > { %v7380_v0 = vpop.eup %6297 }
 0x470   : > { %2120 = vrot.lane.b32.xlu1 %v6159_v15, %s6805_s17  ;;  %2122 = vrot.lane.b32.xlu0 %v6160_v22, %s6805_s17  ;;  %v6170_v15 = vld [vmem:[#allocation2 + $0xa8] ss:$12 sps:$4 sm:$0xff]   ;;  %v6171_v22 = vld [vmem:[#allocation2 + $0xb0] ss:$12 sps:$4 sm:$0xff]  }
 0x48f   : > { %1751 = vadd.xlane.f32.xlu0 %v7368_v19 }
 0x490   : > { %v1690_v14 = vpop.xlane.xlu1 %1689 }
 0x491   : > { %v1706_v62 = vsub.f32 %v7336_v17, %v1690_v14  ;;  %v7383_v17 = vpop.eup %6299 }
 0x492   : > { %v7387_v5 = vpop.eup %6301 }
 0x493   : > { %v1737_v7 = vmul.f32 1.442695, %v1706_v62  ;;  %1749 = vadd.xlane.f32.xlu0 %v7373_v1  ;;  %v7389_v20 = vpop.eup %6303 }
 0x494   : > { %1747 = vadd.xlane.f32.xlu1 %v7376_v48  ;;  %v1686_v8 = vpop.xlane.xlu1 %1685  ;;  %v7393_v21 = vpop.eup %6305 }
 0x495   : > { %6307 = vpow2.f32 %v1737_v7  ;;  %v1704_v16 = vsub.f32 %v7339_v39, %v1686_v8 }
 0x496   : > { %6309 = vpow2.f32 %v1729_v6 }
 0x497   : > { %1767 = vadd.xlane.f32.xlu0 %v7380_v0  ;;  %6311 = vpow2.f32 %v1725_v9  ;;  %v1733_v18 = vmul.f32 1.442695, %v1704_v16 }
 0x498   : > { %1753 = vadd.xlane.f32.xlu1 %v7383_v17 }
 0x499   : > { %6313 = vpow2.f32 %v1733_v18 }
 0x49b   : > { %1763 = vadd.xlane.f32.xlu0 %v7387_v5 }
 0x49c   : > { %1759 = vadd.xlane.f32.xlu1 %v7389_v20 }
 0x4a0   : > { %1755 = vadd.xlane.f32.xlu1 %v7393_v21 }
 0x4a2   : > { %v7396_v39 = vpop.eup %6307 }
 0x4a3   : > { %v7398_v24 = vpop.eup %6309  ;;  %1769 = vadd.xlane.f32.xlu0 %v7396_v39 }
 0x4a4   : > { %1761 = vadd.xlane.f32.xlu1 %v7398_v24  ;;  %v7402_v26 = vpop.eup %6311 }
 0x4a6   : > { %v7405_v46 = vpop.eup %6313 }
 0x4a8   : > { %1757 = vadd.xlane.f32.xlu1 %v7402_v26 }
 0x4ac   : > { %1765 = vadd.xlane.f32.xlu1 %v7405_v46 }
 0x4b9   : > { %2118 = vrot.lane.b32.xlu0 %v6161_v27, %s6805_s17 }
 0x4bd   : > { %2116 = vrot.lane.b32.xlu1 %v6162_v2, %s6805_s17  ;;  %2060 = vrot.lane.b32.xlu0 %v6163_v31, %s6805_s17 }
 0x4c1   : > { %2062 = vrot.lane.b32.xlu1 %v6164_v28, %s6805_s17  ;;  %2064 = vrot.lane.b32.xlu0 %v6165_v29, %s6805_s17 }
 0x4c5   : > { %2066 = vrot.lane.b32.xlu1 %v6166_v12, %s6805_s17  ;;  %2068 = vrot.lane.b32.xlu0 %v6167_v33, %s6805_s17 }
 0x4c9   : > { %2070 = vrot.lane.b32.xlu1 %v6168_v57, %s6805_s17  ;;  %2072 = vrot.lane.b32.xlu0 %v6169_v37, %s6805_s17 }
 0x4cd   : > { %2074 = vrot.lane.b32.xlu1 %v6170_v15, %s6805_s17  ;;  %2499 = vrot.lane.b32.xlu0 %v6171_v22, %s6805_s17 }
 0x4d1   : > { %2497 = vrot.lane.b32.xlu1 %v6172_v40, %s6805_s17  ;;  %2495 = vrot.lane.b32.xlu0 %v6173_v41, %s6805_s17 }
 0x4d5   : > { %2489 = vrot.lane.b32.xlu1 %v6174_v42, %s6805_s17  ;;  %2493 = vrot.lane.b32.xlu0 %v6175_v43, %s6805_s17 }
 0x4d9   : > { %2485 = vrot.lane.b32.xlu1 %v6176_v58, %s6805_s17  ;;  %2491 = vrot.lane.b32.xlu0 %v6177_v44, %s6805_s17 }
 0x4df   : > { %v1744_v3 = vpop.xlane.xlu0 %1743 }
 0x4e3   : > { %v1740_v50 = vpop.xlane.xlu0 %1739 }
 0x4e4   : > { %v1746_v51 = vpop.xlane.xlu1 %1745 }
 0x4e5   : > { %6315 = vrcp.f32 %v1746_v51 }
 0x4e6   : > { %6317 = vrcp.f32 %v1740_v50 }
 0x4e7   : > { %6319 = vrcp.f32 %v1744_v3 }
 0x4e8   : > { %v1742_v52 = vpop.xlane.xlu1 %1741 }
 0x4e9   : > { %6321 = vrcp.f32 %v1742_v52 }
 0x4ec   : > { %v2121_v13 = vpop.permute.xlu1 %2120 }
 0x4f2   : > { %v6316_v53 = vpop.eup %6315 }
 0x4f3   : > { %v6318_v38 = vpop.eup %6317  ;;  %v1790_v30 = vmul.f32 %v6316_v53, %v7349_v36  ;;  %v2175_v36 = vsel %vm1497_vm0, %v7342_v10, 0 }
 0x4f4   : > { %v6320_v4 = vpop.eup %6319  ;;  %v1787_v54 = vmul.f32 %v6318_v38, %v7347_v35  ;;  %v2172_v35 = vsel %vm1497_vm0, %v2127_v45, 0 }
 0x4f5   : > { %v1789_v23 = vmul.f32 %v6320_v4, %v7344_v34  ;;  %v2123_v34 = vpop.permute.xlu0 %2122 }
 0x4f6   : > { %v6322_v11 = vpop.eup %6321 }
 0x4f7   : > { %v1788_v55 = vmul.f32 %v6322_v11, %v7353_v47  ;;  %v1804_v59 = vpack.c.bf16 %v1790_v30, %v1789_v23 }
 0x4f9   : > { %v1803_v56 = vpack.c.bf16 %v1788_v55, %v1787_v54 }
 0x4fb   : > { %5632 = vmatprep.mubr.bf16.mxu1 %v1803_v56 }
 0x4fc   : > { %5633 = vmatmul.mubr.bf16.vlgmr.msra.gmra.mxu1 %v1804_v59 }
 0x4fd   : > { %5649 = vmatpush3.bf16.xpose.msra.mxu1 %v2178_v60 }
 0x4fe   : > { %5961 = vmatprep.subr.msk.bf16.mxu1 %vm1497_vm0, %v7342_v10  ;;  %v2166_v10 = vsel %vm1497_vm0, %v2123_v34, 0 }
 0x505   : > { %5651 = vmatpush3.bf16.xpose.msra.mxu1 %v2175_v36 }
 0x506   : > { %5962 = vmatprep.subr.msk.bf16.mxu1 %vm1497_vm0, %v2127_v45 }
 0x50d   : > { %5653 = vmatpush3.bf16.xpose.msra.mxu1 %v2172_v35 }
 0x50e   : > { %5963 = vmatprep.subr.msk.bf16.mxu1 %vm1497_vm0, %v7366_v61  ;;  %v2163_v61 = vsel %vm1497_vm0, %v2121_v13, 0 }
 0x515   : > { %5655 = vmatpush3.bf16.xpose.msra.mxu1 %v2169_v49 }
 0x516   : > { %5964 = vmatprep.subr.msk.bf16.mxu1 %vm1497_vm0, %v2123_v34 }
 0x518   : > { %v1752_v47 = vpop.xlane.xlu0 %1751 }
 0x51c   : > { %v1750_v32 = vpop.xlane.xlu0 %1749 }
 0x51d   : > { %5657 = vmatpush3.bf16.xpose.msra.mxu1 %v2166_v10  ;;  %6323 = vrcp.f32 %v1750_v32  ;;  %v1748_v25 = vpop.xlane.xlu1 %1747 }
 0x51e   : > { %5965 = vmatprep.subr.msk.bf16.mxu1 %vm1497_vm0, %v2121_v13  ;;  %6325 = vrcp.f32 %v1748_v25 }
 0x51f   : > { %6327 = vrcp.f32 %v1752_v47 }
 0x520   : > { %v1768_v62 = vpop.xlane.xlu0 %1767 }
 0x521   : > { %v1754_v14 = vpop.xlane.xlu1 %1753 }
 0x522   : > { %6329 = vrcp.f32 %v1754_v14 }
 0x524   : > { %v1764_v63 = vpop.xlane.xlu0 %1763 }
 0x525   : > { %5659 = vmatpush3.bf16.xpose.msra.mxu1 %v2163_v61  ;;  %v1760_v6 = vpop.xlane.xlu1 %1759 }
 0x529   : > { %v1756_v7 = vpop.xlane.xlu1 %1755 }
 0x52a   : > { %v6324_v8 = vpop.eup %6323 }
 0x52b   : > { %v6326_v9 = vpop.eup %6325  ;;  %v1792_v16 = vmul.f32 %v6324_v8, %v7373_v1 }
 0x52c   : > { %v1770_v18 = vpop.xlane.xlu0 %1769  ;;  %v1791_v27 = vmul.f32 %v6326_v9, %v7376_v48  ;;  %v6328_v2 = vpop.eup %6327 }
 0x52d   : > { %v1762_v31 = vpop.xlane.xlu1 %1761  ;;  %v1793_v33 = vmul.f32 %v6328_v2, %v7368_v19 }
 0x52e   : > { %v1805_v28 = vpack.c.bf16 %v1792_v16, %v1791_v27  ;;  %6331 = vrcp.f32 %v1762_v31 }
 0x52f   : > { %v6330_v29 = vpop.eup %6329  ;;  %6333 = vrcp.f32 %v1756_v7 }
 0x530   : > { %5636 = vmatprep.mubr.bf16.mxu1 %v1805_v28  ;;  %v2119_v12 = vpop.permute.xlu0 %2118  ;;  %v1794_v57 = vmul.f32 %v6330_v29, %v7383_v17  ;;  %6335 = vrcp.f32 %v1760_v6 }
 0x531   : > { %v1758_v37 = vpop.xlane.xlu1 %1757  ;;  %5966 = vmatprep.subr.msk.bf16.mxu1 %vm1497_vm0, %v2119_v12  ;;  %v2160_v1 = vsel %vm1497_vm0, %v2119_v12, 0 }
 0x532   : > { %6337 = vrcp.f32 %v1758_v37  ;;  %5661 = vmatpush3.bf16.xpose.msra.mxu1 %v2160_v1  ;;  %v1806_v48 = vpack.c.bf16 %v1794_v57, %v1793_v33 }
 0x533   : > { %6339 = vrcp.f32 %v1764_v63 }
 0x534   : > { %5637 = vmatmul.mubr.bf16.gmra.mxu1 %v1806_v48  ;;  %v2061_v15 = vpop.permute.xlu0 %2060 }
 0x535   : > { %v1766_v22 = vpop.xlane.xlu1 %1765 }
 0x536   : > { %6341 = vrcp.f32 %v1766_v22 }
 0x537   : > { %6343 = vrcp.f32 %v1770_v18 }
 0x538   : > { %v2065_v40 = vpop.permute.xlu0 %2064  ;;  %6345 = vrcp.f32 %v1768_v62 }
 0x539   : > { %v2117_v19 = vpop.permute.xlu1 %2116 }
 0x53a   : > { %5967 = vmatprep.subr.msk.bf16.mxu1 %vm1497_vm0, %v2117_v19  ;;  %v2157_v17 = vsel %vm1497_vm0, %v2117_v19, 0 }
 0x53b   : > { %5663 = vmatpush3.bf16.xpose.msra.mxu1 %v2157_v17  ;;  %v6332_v41 = vpop.eup %6331 }
 0x53c   : > { %v2069_v42 = vpop.permute.xlu0 %2068  ;;  %v6334_v43 = vpop.eup %6333  ;;  %v1798_v3 = vmul.f32 %v6332_v41, %v7398_v24 }
 0x53d   : > { %v2063_v58 = vpop.permute.xlu1 %2062  ;;  %v6336_v44 = vpop.eup %6335  ;;  %v1795_v51 = vmul.f32 %v6334_v43, %v7393_v21 }
 0x53e   : > { %v1797_v4 = vmul.f32 %v6336_v44, %v7389_v20  ;;  %v6178_v44 = vld [vmem:[#allocation2 + $0x20] ss:$12 sps:$4 sm:$0xff]  }
 0x53f   : > { %v6338_v45 = vpop.eup %6337 }
 0x540   : > { %v2073_v50 = vpop.permute.xlu0 %2072  ;;  %v1796_v52 = vmul.f32 %v6338_v45, %v7402_v26  ;;  %v6340_v53 = vpop.eup %6339  ;;  %v1808_v54 = vpack.c.bf16 %v1798_v3, %v1797_v4  ;;  %v6179_v45 = vld [vmem:[#allocation2 + $0x94] ss:$12 sps:$4 sm:$0xff]   ;;  %v6180_v3 = vld [vmem:[#allocation2 + $0x64] ss:$12 sps:$4 sm:$0xff]  }
 0x541   : > { %v2067_v38 = vpop.permute.xlu1 %2066  ;;  %v1799_v56 = vmul.f32 %v6340_v53, %v7387_v5 }
 0x542   : > { %v1807_v11 = vpack.c.bf16 %v1796_v52, %v1795_v51 }
 0x543   : > { %v6342_v30 = vpop.eup %6341 }
 0x544   : > { %v6344_v55 = vpop.eup %6343  ;;  %5640 = vmatprep.mubr.bf16.mxu1 %v1807_v11  ;;  %v2500_v23 = vpop.permute.xlu0 %2499  ;;  %v1800_v59 = vmul.f32 %v6342_v30, %v7405_v46 }
 0x545   : > { %5641 = vmatmul.mubr.bf16.gmra.mxu1 %v1808_v54  ;;  %v2071_v24 = vpop.permute.xlu1 %2070  ;;  %5680 = vmatprep.subr.bf16.mxu0 %v2500_v23  ;;  %v6346_v21 = vpop.eup %6345  ;;  %v1802_v60 = vmul.f32 %v6344_v55, %v7396_v39 }
 0x546   : > { %5681 = vmatpush3.bf16.msra.mxu0 %v2500_v23  ;;  %v1809_v26 = vpack.c.bf16 %v1800_v59, %v1799_v56  ;;  %v1801_v36 = vmul.f32 %v6346_v21, %v7380_v0  ;;  %v6181_v59 = vld [vmem:[#allocation2 + $0xac] ss:$12 sps:$4 sm:$0xff]  }
 0x547   : > { %v6183_v21 = vld [vmem:[#allocation2 + $0x4c] ss:$12 sps:$4 sm:$0xff]  }
 0x548   : > { %5644 = vmatprep.mubr.bf16.mxu1 %v1809_v26  ;;  %v2496_v35 = vpop.permute.xlu0 %2495  ;;  %v1810_v34 = vpack.c.bf16 %v1802_v60, %v1801_v36 }
 0x549   : > { %v2075_v20 = vpop.permute.xlu1 %2074 }
 0x54c   : > { %v2494_v5 = vpop.permute.xlu0 %2493 }
 0x54d   : > { %5645 = vmatmul.mubr.bf16.gmra.mxu1 %v1810_v34  ;;  %v2498_v49 = vpop.permute.xlu1 %2497 }
 0x54e   : > { %5664 = vmatprep.mubr.msk.bf16.mxu1 %vm1497_vm0, %v2061_v15  ;;  %5682 = vmatprep.subr.bf16.mxu0 %v2498_v49 }
 0x54f   : > { %5683 = vmatpush3.bf16.msra.mxu0 %v2498_v49 }
 0x550   : > { %5684 = vmatprep.subr.bf16.mxu0 %v2496_v35  ;;  %v2492_v39 = vpop.permute.xlu0 %2491 }
 0x551   : > { %v2490_v0 = vpop.permute.xlu1 %2489 }
 0x553   : > { %5685 = vmatpush3.bf16.msra.mxu0 %v2496_v35 }
 0x554   : > { %5686 = vmatprep.subr.bf16.mxu0 %v2494_v5 }
 0x555   : > { %5665 = vmatmul.mubr.msk.bf16.vlgmr.msra.gmra.mxu1 %vm1497_vm0, %v2063_v58 }
 0x556   : > { %5668 = vmatprep.mubr.msk.bf16.mxu1 %vm1497_vm0, %v2065_v40 }
 0x557   : > { %5687 = vmatpush3.bf16.msra.mxu0 %v2494_v5 }
 0x558   : > { %5688 = vmatprep.subr.bf16.mxu0 %v2492_v39 }
 0x55b   : > { %5689 = vmatpush3.bf16.msra.mxu0 %v2492_v39 }
 0x55c   : > { %5690 = vmatprep.subr.bf16.mxu0 %v2490_v0 }
 0x55d   : > { %5669 = vmatmul.mubr.msk.bf16.gmra.mxu1 %vm1497_vm0, %v2067_v38 }
 0x55e   : > { %5672 = vmatprep.mubr.msk.bf16.mxu1 %vm1497_vm0, %v2069_v42 }
 0x55f   : > { %5691 = vmatpush3.bf16.msra.mxu0 %v2490_v0 }
 0x565   : > { %5673 = vmatmul.mubr.msk.bf16.gmra.mxu1 %vm1497_vm0, %v2071_v24  ;;  %v6182_v24 = vld [vmem:[#allocation2 + $0x7c] ss:$12 sps:$4 sm:$0xff]  }
 0x566   : > { %5676 = vmatprep.mubr.msk.bf16.mxu1 %vm1497_vm0, %v2073_v50 }
 0x56d   : > { %5677 = vmatmul.mubr.msk.bf16.gmra.mxu1 %vm1497_vm0, %v2075_v20  ;;  %v2486_v20 = vpop.permute.xlu1 %2485 }
 0x5bc   : > { %v5634_v46 = vpop.f32.mrf.mxu1 }
 0x5bd   : > { %1958 = vst.msk [vmem:[#allocation3 + $0x10] sm:$0xff] %vm1497_vm0, %v5634_v46 }
 0x5be   : > { %v1893_v47 = vpop.f32.mrf.mxu1 }
 0x5bf   : > { %1956 = vst.msk [vmem:[#allocation3] sm:$0xff] %vm1497_vm0, %v1893_v47 }
 0x5c0   : > { %v5635_v13 = vpop.f32.mrf.mxu1 }
 0x5c1   : > { %1959 = vst.msk [vmem:[#allocation3 + $0x18] sm:$0xff] %vm1497_vm0, %v5635_v13 }
 0x5c2   : > { %v1896_v10 = vpop.f32.mrf.mxu1 }
 0x5c3   : > { %1957 = vst.msk [vmem:[#allocation3 + $0x8] sm:$0xff] %vm1497_vm0, %v1896_v10 }
 0x5f4   : > { %v5638_v32 = vpop.f32.mrf.mxu1 }
 0x5f5   : > { %1962 = vst.msk [vmem:[#allocation3 + $0x30] sm:$0xff] %vm1497_vm0, %v5638_v32 }
 0x5f6   : > { %v1909_v25 = vpop.f32.mrf.mxu1 }
 0x5f7   : > { %1960 = vst.msk [vmem:[#allocation3 + $0x20] sm:$0xff] %vm1497_vm0, %v1909_v25 }
 0x5f8   : > { %v5639_v14 = vpop.f32.mrf.mxu1 }
 0x5f9   : > { %1963 = vst.msk [vmem:[#allocation3 + $0x38] sm:$0xff] %vm1497_vm0, %v5639_v14 }
 0x5fa   : > { %v1912_v62 = vpop.f32.mrf.mxu1 }
 0x5fb   : > { %1961 = vst.msk [vmem:[#allocation3 + $0x28] sm:$0xff] %vm1497_vm0, %v1912_v62 }
 0x605   : > { %v5642_v61 = vpop.f32.mrf.mxu1 }
 0x606   : > { %1966 = vst.msk [vmem:[#allocation3 + $0x50] sm:$0xff] %vm1497_vm0, %v5642_v61  ;;  %v6184_v61 = vld [vmem:[#allocation2 + $0x34] ss:$12 sps:$4 sm:$0xff]  }
 0x607   : > { %v1925_v6 = vpop.f32.mrf.mxu1 }
 0x608   : > { %1964 = vst.msk [vmem:[#allocation3 + $0x40] sm:$0xff] %vm1497_vm0, %v1925_v6 }
 0x609   : > { %v5643_v63 = vpop.f32.mrf.mxu1 }
 0x60a   : > { %1967 = vst.msk [vmem:[#allocation3 + $0x58] sm:$0xff] %vm1497_vm0, %v5643_v63 }
 0x60b   : > { %v1928_v7 = vpop.f32.mrf.mxu1 }
 0x60c   : > { %1965 = vst.msk [vmem:[#allocation3 + $0x48] sm:$0xff] %vm1497_vm0, %v1928_v7 }
 0x60d   : > { %v5646_v8 = vpop.f32.mrf.mxu1 }
 0x60e   : > { %1970 = vst.msk [vmem:[#allocation3 + $0x70] sm:$0xff] %vm1497_vm0, %v5646_v8 }
 0x60f   : > { %v1941_v9 = vpop.f32.mrf.mxu1 }
 0x610   : > { %1968 = vst.msk [vmem:[#allocation3 + $0x60] sm:$0xff] %vm1497_vm0, %v1941_v9 }
 0x611   : > { %v5647_v16 = vpop.f32.mrf.mxu1 }
 0x612   : > { %1971 = vst.msk [vmem:[#allocation3 + $0x78] sm:$0xff] %vm1497_vm0, %v5647_v16 }
 0x613   : > { %v1944_v18 = vpop.f32.mrf.mxu1 }
 0x614   : > { %1969 = vst.msk [vmem:[#allocation3 + $0x68] sm:$0xff] %vm1497_vm0, %v1944_v18 }
 0x615   : > { %v5666_v27 = vpop.f32.mrf.mxu1 }
 0x616   : > { %v7485_v2 = vmul.f32 0.17677669, %v5666_v27 }
 0x617   : > { %v2214_v31 = vpop.f32.mrf.mxu1 }
 0x618   : > { %2297 = vmax.xlane.f32.xlu0 %v7485_v2  ;;  %v7488_v29 = vmul.f32 0.17677669, %v2214_v31 }
 0x619   : > { %v5667_v28 = vpop.f32.mrf.mxu1 }
 0x61a   : > { %v7493_v37 = vmul.f32 0.17677669, %v5667_v28 }
 0x61b   : > { %v2217_v12 = vpop.f32.mrf.mxu1 }
 0x61c   : > { %v7490_v33 = vmul.f32 0.17677669, %v2217_v12  ;;  %2293 = vmax.xlane.f32.xlu0 %v7488_v29 }
 0x61d   : > { %v5670_v57 = vpop.f32.mrf.mxu1 }
 0x61e   : > { %2295 = vmax.xlane.f32.xlu1 %v7490_v33  ;;  %v7512_v50 = vmul.f32 0.17677669, %v5670_v57 }
 0x61f   : > { %v2230_v1 = vpop.f32.mrf.mxu1 }
 0x620   : > { %2299 = vmax.xlane.f32.xlu0 %v7493_v37  ;;  %v7515_v51 = vmul.f32 0.17677669, %v2230_v1 }
 0x621   : > { %v5671_v48 = vpop.f32.mrf.mxu1 }
 0x622   : > { %v7497_v15 = vmul.f32 0.17677669, %v5671_v48 }
 0x623   : > { %v2233_v22 = vpop.f32.mrf.mxu1 }
 0x624   : > { %2307 = vmax.xlane.f32.xlu1 %v7497_v15  ;;  %v7500_v19 = vmul.f32 0.17677669, %v2233_v22 }
 0x625   : > { %v5674_v40 = vpop.f32.mrf.mxu1 }
 0x626   : > { %v7518_v52 = vmul.f32 0.17677669, %v5674_v40 }
 0x627   : > { %v2246_v17 = vpop.f32.mrf.mxu1 }
 0x628   : > { %2303 = vmax.xlane.f32.xlu1 %v7500_v19  ;;  %v7521_v38 = vmul.f32 0.17677669, %v2246_v17 }
 0x629   : > { %v5675_v41 = vpop.f32.mrf.mxu1 }
 0x62a   : > { %v7503_v42 = vmul.f32 0.17677669, %v5675_v41 }
 0x62b   : > { %v2249_v43 = vpop.f32.mrf.mxu1 }
 0x62c   : > { %2315 = vmax.xlane.f32.xlu1 %v7503_v42  ;;  %v7506_v58 = vmul.f32 0.17677669, %v2249_v43 }
 0x62d   : > { %v5678_v53 = vpop.f32.mrf.mxu1 }
 0x62e   : > { %v7524_v11 = vmul.f32 0.17677669, %v5678_v53 }
 0x62f   : > { %v2262_v4 = vpop.f32.mrf.mxu1 }
 0x630   : > { %2311 = vmax.xlane.f32.xlu1 %v7506_v58  ;;  %v7527_v54 = vmul.f32 0.17677669, %v2262_v4 }
 0x631   : > { %v5679_v30 = vpop.f32.mrf.mxu1 }
 0x632   : > { %v7529_v55 = vmul.f32 0.17677669, %v5679_v30 }
 0x633   : > { %v2265_v23 = vpop.f32.mrf.mxu1 }
 0x634   : > { %v7533_v56 = vmul.f32 0.17677669, %v2265_v23 }
 0x636   : > { %2487 = vrot.lane.b32.xlu0 %v6178_v44, %s6805_s17 }
 0x641   : > { %2843 = vrot.lane.b32.xlu1 %v6179_v45, %s6806_s12 }
 0x645   : > { %2839 = vrot.lane.b32.xlu1 %v6180_v3, %s6806_s12 }
 0x655   : > { %2305 = vmax.xlane.f32.xlu0 %v7512_v50 }
 0x659   : > { %2301 = vmax.xlane.f32.xlu0 %v7515_v51 }
 0x65d   : > { %2313 = vmax.xlane.f32.xlu0 %v7518_v52 }
 0x661   : > { %2309 = vmax.xlane.f32.xlu0 %v7521_v38 }
 0x665   : > { %2321 = vmax.xlane.f32.xlu0 %v7524_v11 }
 0x669   : > { %2317 = vmax.xlane.f32.xlu0 %v7527_v54  ;;  %2323 = vmax.xlane.f32.xlu1 %v7529_v55 }
 0x66d   : > { %2319 = vmax.xlane.f32.xlu1 %v7533_v56 }
 0x67f   : > { %2845 = vrot.lane.b32.xlu0 %v6181_v59, %s6806_s12 }
 0x683   : > { %2841 = vrot.lane.b32.xlu0 %v6182_v24, %s6806_s12 }
 0x687   : > { %2837 = vrot.lane.b32.xlu0 %v6183_v21, %s6806_s12 }
 0x6a1   : > { %v2298_v26 = vpop.xlane.xlu0 %2297 }
 0x6a2   : > { %v2327_v60 = vsub.f32 %v7485_v2, %v2298_v26 }
 0x6a4   : > { %v2345_v36 = vmul.f32 1.442695, %v2327_v60 }
 0x6a5   : > { %v2294_v35 = vpop.xlane.xlu0 %2293 }
 0x6a6   : > { %6347 = vpow2.f32 %v2345_v36  ;;  %v2325_v34 = vsub.f32 %v7488_v29, %v2294_v35 }
 0x6a7   : > { %v2296_v49 = vpop.xlane.xlu1 %2295 }
 0x6a8   : > { %v2341_v5 = vmul.f32 1.442695, %v2325_v34  ;;  %v2326_v0 = vsub.f32 %v7490_v33, %v2296_v49  ;;  %v6185_v49 = vld [vmem:[#allocation2 + $0x4] ss:$12 sps:$4 sm:$0xff]  }
 0x6a9   : > { %v2300_v39 = vpop.xlane.xlu0 %2299 }
 0x6aa   : > { %6349 = vpow2.f32 %v2341_v5  ;;  %v2328_v46 = vsub.f32 %v7493_v37, %v2300_v39  ;;  %v2343_v10 = vmul.f32 1.442695, %v2326_v0  ;;  %v6186_v5 = vld [vmem:[#allocation2 + $0x18] ss:$12 sps:$4 sm:$0xff]   ;;  %v6187_v39 = vld [vmem:[#allocation2 + $0x1c] ss:$12 sps:$4 sm:$0xff]  }
 0x6ab   : > { %v6188_v0 = vld [vmem:[#allocation2 + $0x48] ss:$12 sps:$4 sm:$0xff]  }
 0x6ac   : > { %v2347_v47 = vmul.f32 1.442695, %v2328_v46  ;;  %v6189_v46 = vld [vmem:[#allocation2] ss:$12 sps:$4 sm:$0xff]  }
 0x6ad   : > { %v2488_v13 = vpop.permute.xlu0 %2487  ;;  %v2308_v6 = vpop.xlane.xlu1 %2307 }
 0x6ae   : > { %6351 = vpow2.f32 %v2347_v47  ;;  %5692 = vmatprep.subr.bf16.mxu0 %v2488_v13  ;;  %v2332_v27 = vsub.f32 %v7497_v15, %v2308_v6  ;;  %v6190_v47 = vld [vmem:[#allocation2 + $0x78] ss:$12 sps:$4 sm:$0xff]  }
 0x6af   : > { %5693 = vmatpush3.bf16.msra.mxu0 %v2488_v13  ;;  %6353 = vpow2.f32 %v2343_v10  ;;  %v6191_v13 = vld [vmem:[#allocation2 + $0x30] ss:$12 sps:$4 sm:$0xff]   ;;  %v6192_v10 = vld [vmem:[#allocation2 + $0xa8] ss:$12 sps:$4 sm:$0xff]   ;;  %v6194_v6 = vld [vmem:[#allocation2 + $0x98] ss:$12 sps:$4 sm:$0xff]  }
 0x6b0   : > { %5694 = vmatprep.subr.bf16.mxu0 %v2486_v20  ;;  %v2355_v33 = vmul.f32 1.442695, %v2332_v27 }
 0x6b1   : > { %v2304_v63 = vpop.xlane.xlu1 %2303 }
 0x6b2   : > { %v2330_v8 = vsub.f32 %v7500_v19, %v2304_v63  ;;  %v6195_v63 = vld [vmem:[#allocation2 + $0x90] ss:$12 sps:$4 sm:$0xff]  }
 0x6b3   : > { %v7543_v32 = vpop.eup %6347  ;;  %5695 = vmatpush3.bf16.msra.mxu0 %v2486_v20 }
 0x6b4   : > { %2377 = vadd.xlane.f32.xlu1 %v7543_v32  ;;  %v2351_v2 = vmul.f32 1.442695, %v2330_v8  ;;  %v6197_v8 = vld [vmem:[#allocation2 + $0xb0] ss:$12 sps:$4 sm:$0xff]  }
 0x6b5   : > { %v2316_v7 = vpop.xlane.xlu1 %2315 }
 0x6b6   : > { %v2336_v22 = vsub.f32 %v7503_v42, %v2316_v7  ;;  %v6196_v7 = vld [vmem:[#allocation2 + $0x38] ss:$12 sps:$4 sm:$0xff]  }
 0x6b7   : > { %v7546_v25 = vpop.eup %6349 }
 0x6b8   : > { %2373 = vadd.xlane.f32.xlu1 %v7546_v25  ;;  %v2363_v17 = vmul.f32 1.442695, %v2336_v22 }
 0x6b9   : > { %v2312_v31 = vpop.xlane.xlu1 %2311 }
 0x6ba   : > { %v2334_v41 = vsub.f32 %v7506_v58, %v2312_v31 }
 0x6bb   : > { %v7549_v14 = vpop.eup %6351 }
 0x6bc   : > { %2379 = vadd.xlane.f32.xlu1 %v7549_v14  ;;  %v7552_v62 = vpop.eup %6353  ;;  %v2359_v42 = vmul.f32 1.442695, %v2334_v41 }
 0x6bd   : > { %v7561_v1 = vpop.permute.xlu1 %2843 }
 0x6c0   : > { %2375 = vadd.xlane.f32.xlu1 %v7552_v62 }
 0x6c1   : > { %v7566_v43 = vpop.permute.xlu1 %2839 }
 0x6d1   : > { %2835 = vrot.lane.b32.xlu1 %v6184_v61, %s6806_s12  ;;  %v6193_v61 = vld [vmem:[#allocation2 + $0x60] ss:$12 sps:$4 sm:$0xff]  }
 0x6de   : > { %v2306_v9 = vpop.xlane.xlu0 %2305 }
 0x6df   : > { %v2331_v16 = vsub.f32 %v7512_v50, %v2306_v9  ;;  %v6198_v9 = vld [vmem:[#allocation2 + $0x8] ss:$12 sps:$4 sm:$0xff]  }
 0x6e1   : > { %v2353_v18 = vmul.f32 1.442695, %v2331_v16  ;;  %v6199_v16 = vld [vmem:[#allocation2 + $0x80] ss:$12 sps:$4 sm:$0xff]  }
 0x6e2   : > { %v2302_v28 = vpop.xlane.xlu0 %2301 }
 0x6e3   : > { %6355 = vpow2.f32 %v2353_v18  ;;  %v2329_v29 = vsub.f32 %v7515_v51, %v2302_v28  ;;  %v6200_v18 = vld [vmem:[#allocation2 + $0x68] ss:$12 sps:$4 sm:$0xff]  }
 0x6e4   : > { %6357 = vpow2.f32 %v2351_v2  ;;  %v6201_v2 = vld [vmem:[#allocation2 + $0x50] ss:$12 sps:$4 sm:$0xff]  }
 0x6e5   : > { %v2349_v12 = vmul.f32 1.442695, %v2329_v29 }
 0x6e6   : > { %v2314_v57 = vpop.xlane.xlu0 %2313 }
 0x6e7   : > { %6359 = vpow2.f32 %v2349_v12  ;;  %v2335_v37 = vsub.f32 %v7518_v52, %v2314_v57 }
 0x6e8   : > { %6361 = vpow2.f32 %v2355_v33 }
 0x6e9   : > { %v2361_v48 = vmul.f32 1.442695, %v2335_v37 }
 0x6ea   : > { %v2310_v15 = vpop.xlane.xlu0 %2309 }
 0x6eb   : > { %6363 = vpow2.f32 %v2361_v48  ;;  %v2333_v40 = vsub.f32 %v7521_v38, %v2310_v15 }
 0x6ed   : > { %v2357_v19 = vmul.f32 1.442695, %v2333_v40 }
 0x6ee   : > { %v2322_v44 = vpop.xlane.xlu0 %2321 }
 0x6ef   : > { %6365 = vpow2.f32 %v2357_v19  ;;  %v2339_v45 = vsub.f32 %v7524_v11, %v2322_v44 }
 0x6f0   : > { %v7569_v3 = vpop.eup %6355  ;;  %6367 = vpow2.f32 %v2363_v17 }
 0x6f1   : > { %v2369_v50 = vmul.f32 1.442695, %v2339_v45  ;;  %2385 = vadd.xlane.f32.xlu0 %v7569_v3  ;;  %v7572_v53 = vpop.eup %6357 }
 0x6f2   : > { %v2318_v51 = vpop.xlane.xlu0 %2317  ;;  %v2324_v52 = vpop.xlane.xlu1 %2323 }
 0x6f3   : > { %6369 = vpow2.f32 %v2369_v50  ;;  %v2337_v58 = vsub.f32 %v7527_v54, %v2318_v51  ;;  %v2340_v38 = vsub.f32 %v7529_v55, %v2324_v52 }
 0x6f4   : > { %v7576_v4 = vpop.eup %6359  ;;  %6371 = vpow2.f32 %v2359_v42 }
 0x6f5   : > { %v2365_v30 = vmul.f32 1.442695, %v2337_v58  ;;  %2381 = vadd.xlane.f32.xlu0 %v7576_v4  ;;  %2383 = vadd.xlane.f32.xlu1 %v7572_v53  ;;  %v2371_v11 = vmul.f32 1.442695, %v2340_v38  ;;  %v7582_v24 = vpop.eup %6361 }
 0x6f6   : > { %v7580_v23 = vpop.permute.xlu0 %2845  ;;  %v2320_v59 = vpop.xlane.xlu1 %2319 }
 0x6f7   : > { %6373 = vpow2.f32 %v2365_v30  ;;  %v2338_v21 = vsub.f32 %v7533_v56, %v2320_v59  ;;  %5968 = vmatprep.subr.msk.bf16.mxu0 %vm1497_vm0, %v7580_v23  ;;  %v2893_v41 = vsel %vm1497_vm0, %v7580_v23, 0 }
 0x6f8   : > { %v7587_v54 = vpop.eup %6363  ;;  %6375 = vpow2.f32 %v2371_v11 }
 0x6f9   : > { %v2367_v55 = vmul.f32 1.442695, %v2338_v21  ;;  %2387 = vadd.xlane.f32.xlu0 %v7582_v24  ;;  %2393 = vadd.xlane.f32.xlu1 %v7587_v54 }
 0x6fa   : > { %v2842_v44 = vpop.permute.xlu0 %2841 }
 0x6fb   : > { %6377 = vpow2.f32 %v2367_v55 }
 0x6fc   : > { %v7591_v26 = vpop.eup %6365 }
 0x6fd   : > { %2389 = vadd.xlane.f32.xlu1 %v7591_v26  ;;  %v7594_v60 = vpop.eup %6367 }
 0x700   : > { %v7596_v20 = vpop.eup %6369 }
 0x701   : > { %2401 = vadd.xlane.f32.xlu0 %v7596_v20  ;;  %2395 = vadd.xlane.f32.xlu1 %v7594_v60  ;;  %v7600_v56 = vpop.eup %6371 }
 0x704   : > { %v7602_v36 = vpop.eup %6373 }
 0x705   : > { %2397 = vadd.xlane.f32.xlu0 %v7602_v36  ;;  %2391 = vadd.xlane.f32.xlu1 %v7600_v56  ;;  %v7606_v35 = vpop.eup %6375 }
 0x708   : > { %v7608_v34 = vpop.eup %6377 }
 0x709   : > { %2403 = vadd.xlane.f32.xlu0 %v7606_v35  ;;  %2399 = vadd.xlane.f32.xlu1 %v7608_v34 }
 0x71a   : > { %2831 = vrot.lane.b32.xlu1 %v6185_v49, %s6806_s12 }
 0x71e   : > { %2777 = vrot.lane.b32.xlu1 %v6186_v5, %s6806_s12 }
 0x71f   : > { %2833 = vrot.lane.b32.xlu0 %v6187_v39, %s6806_s12 }
 0x722   : > { %2781 = vrot.lane.b32.xlu1 %v6188_v0, %s6806_s12 }
 0x723   : > { %2775 = vrot.lane.b32.xlu0 %v6189_v46, %s6806_s12 }
 0x726   : > { %2785 = vrot.lane.b32.xlu1 %v6190_v47, %s6806_s12 }
 0x727   : > { %2779 = vrot.lane.b32.xlu0 %v6191_v13, %s6806_s12 }
 0x72a   : > { %2789 = vrot.lane.b32.xlu1 %v6192_v10, %s6806_s12 }
 0x72b   : > { %2783 = vrot.lane.b32.xlu0 %v6193_v61, %s6806_s12 }
 0x72e   : > { %3212 = vrot.lane.b32.xlu1 %v6194_v6, %s6806_s12 }
 0x72f   : > { %2787 = vrot.lane.b32.xlu0 %v6195_v63, %s6806_s12 }
 0x732   : > { %3204 = vrot.lane.b32.xlu1 %v6196_v7, %s6806_s12 }
 0x733   : > { %3214 = vrot.lane.b32.xlu0 %v6197_v8, %s6806_s12 }
 0x736   : > { %3200 = vrot.lane.b32.xlu1 %v6198_v9, %s6806_s12 }
 0x737   : > { %3210 = vrot.lane.b32.xlu0 %v6199_v16, %s6806_s12 }
 0x73b   : > { %3208 = vrot.lane.b32.xlu0 %v6200_v18, %s6806_s12 }
 0x73d   : > { %v2378_v27 = vpop.xlane.xlu1 %2377 }
 0x73f   : > { %3206 = vrot.lane.b32.xlu0 %v6201_v2, %s6806_s12 }
 0x741   : > { %v2374_v31 = vpop.xlane.xlu1 %2373 }
 0x745   : > { %v2380_v28 = vpop.xlane.xlu1 %2379 }
 0x746   : > { %6379 = vrcp.f32 %v2380_v28 }
 0x747   : > { %6381 = vrcp.f32 %v2374_v31 }
 0x748   : > { %6383 = vrcp.f32 %v2378_v27 }
 0x749   : > { %v2376_v29 = vpop.xlane.xlu1 %2375 }
 0x74a   : > { %6385 = vrcp.f32 %v2376_v29 }
 0x74d   : > { %v2836_v45 = vpop.permute.xlu1 %2835 }
 0x753   : > { %v6380_v12 = vpop.eup %6379 }
 0x754   : > { %v6382_v33 = vpop.eup %6381  ;;  %v2424_v48 = vmul.f32 %v6380_v12, %v7549_v14  ;;  %v2890_v14 = vsel %vm1497_vm0, %v7561_v1, 0 }
 0x755   : > { %v6384_v57 = vpop.eup %6383  ;;  %v2421_v22 = vmul.f32 %v6382_v33, %v7546_v25  ;;  %v2884_v25 = vsel %vm1497_vm0, %v7566_v43, 0 }
 0x756   : > { %v2423_v40 = vmul.f32 %v6384_v57, %v7543_v32  ;;  %v2887_v32 = vsel %vm1497_vm0, %v2842_v44, 0 }
 0x757   : > { %v6386_v37 = vpop.eup %6385 }
 0x758   : > { %v2422_v15 = vmul.f32 %v6386_v37, %v7552_v62  ;;  %v2438_v17 = vpack.c.bf16 %v2424_v48, %v2423_v40  ;;  %v2838_v62 = vpop.permute.xlu0 %2837 }
 0x75a   : > { %v2437_v19 = vpack.c.bf16 %v2422_v15, %v2421_v22 }
 0x75c   : > { %5696 = vmatprep.mubr.bf16.mxu0 %v2437_v19 }
 0x75d   : > { %5697 = vmatmul.mubr.bf16.vlgmr.msra.gmra.mxu0 %v2438_v17 }
 0x75e   : > { %5713 = vmatpush3.bf16.xpose.msra.mxu0 %v2893_v41 }
 0x75f   : > { %5969 = vmatprep.subr.msk.bf16.mxu0 %vm1497_vm0, %v7561_v1  ;;  %v2881_v1 = vsel %vm1497_vm0, %v2838_v62, 0 }
 0x766   : > { %5715 = vmatpush3.bf16.xpose.msra.mxu0 %v2890_v14 }
 0x767   : > { %5970 = vmatprep.subr.msk.bf16.mxu0 %vm1497_vm0, %v2842_v44 }
 0x76e   : > { %5717 = vmatpush3.bf16.xpose.msra.mxu0 %v2887_v32 }
 0x76f   : > { %5971 = vmatprep.subr.msk.bf16.mxu0 %vm1497_vm0, %v7566_v43  ;;  %v2878_v43 = vsel %vm1497_vm0, %v2836_v45, 0 }
 0x776   : > { %5719 = vmatpush3.bf16.xpose.msra.mxu0 %v2884_v25 }
 0x777   : > { %5972 = vmatprep.subr.msk.bf16.mxu0 %vm1497_vm0, %v2838_v62 }
 0x77a   : > { %v2386_v50 = vpop.xlane.xlu0 %2385 }
 0x77e   : > { %5721 = vmatpush3.bf16.xpose.msra.mxu0 %v2881_v1  ;;  %v2382_v42 = vpop.xlane.xlu0 %2381  ;;  %v2384_v51 = vpop.xlane.xlu1 %2383 }
 0x77f   : > { %6387 = vrcp.f32 %v2382_v42  ;;  %5973 = vmatprep.subr.msk.bf16.mxu0 %vm1497_vm0, %v2836_v45 }
 0x780   : > { %6389 = vrcp.f32 %v2384_v51 }
 0x781   : > { %6391 = vrcp.f32 %v2386_v50 }
 0x782   : > { %v2388_v52 = vpop.xlane.xlu0 %2387  ;;  %v2394_v58 = vpop.xlane.xlu1 %2393 }
 0x783   : > { %6393 = vrcp.f32 %v2388_v52 }
 0x786   : > { %5723 = vmatpush3.bf16.xpose.msra.mxu0 %v2878_v43  ;;  %v2390_v38 = vpop.xlane.xlu1 %2389 }
 0x78a   : > { %v2402_v30 = vpop.xlane.xlu0 %2401  ;;  %v2396_v11 = vpop.xlane.xlu1 %2395 }
 0x78b   : > { %6395 = vrcp.f32 %v2396_v11 }
 0x78c   : > { %v6388_v23 = vpop.eup %6387  ;;  %6397 = vrcp.f32 %v2390_v38 }
 0x78d   : > { %v6390_v59 = vpop.eup %6389  ;;  %v2425_v21 = vmul.f32 %v6388_v23, %v7576_v4  ;;  %6399 = vrcp.f32 %v2394_v58 }
 0x78e   : > { %v6392_v55 = vpop.eup %6391  ;;  %v2398_v49 = vpop.xlane.xlu0 %2397  ;;  %v2426_v39 = vmul.f32 %v6390_v59, %v7572_v53 }
 0x78f   : > { %v2392_v5 = vpop.xlane.xlu1 %2391  ;;  %v2427_v47 = vmul.f32 %v6392_v55, %v7569_v3 }
 0x790   : > { %v6394_v0 = vpop.eup %6393  ;;  %6401 = vrcp.f32 %v2392_v5  ;;  %v2439_v46 = vpack.c.bf16 %v2426_v39, %v2425_v21 }
 0x791   : > { %v2428_v13 = vmul.f32 %v6394_v0, %v7582_v24  ;;  %6403 = vrcp.f32 %v2398_v49 }
 0x792   : > { %5700 = vmatprep.mubr.bf16.mxu0 %v2439_v46  ;;  %v2404_v10 = vpop.xlane.xlu0 %2403 }
 0x793   : > { %v2400_v61 = vpop.xlane.xlu1 %2399  ;;  %v2440_v6 = vpack.c.bf16 %v2428_v13, %v2427_v47 }
 0x794   : > { %6405 = vrcp.f32 %v2400_v61 }
 0x795   : > { %6407 = vrcp.f32 %v2404_v10  ;;  %5701 = vmatmul.mubr.bf16.gmra.mxu0 %v2440_v6 }
 0x796   : > { %v2834_v4 = vpop.permute.xlu0 %2833  ;;  %6409 = vrcp.f32 %v2402_v30 }
 0x797   : > { %v2832_v63 = vpop.permute.xlu1 %2831  ;;  %5974 = vmatprep.subr.msk.bf16.mxu0 %vm1497_vm0, %v2834_v4  ;;  %v2875_v53 = vsel %vm1497_vm0, %v2834_v4, 0 }
 0x798   : > { %5725 = vmatpush3.bf16.xpose.msra.mxu0 %v2875_v53  ;;  %v6396_v3 = vpop.eup %6395  ;;  %v2872_v12 = vsel %vm1497_vm0, %v2832_v63, 0 }
 0x799   : > { %5975 = vmatprep.subr.msk.bf16.mxu0 %vm1497_vm0, %v2832_v63  ;;  %v6398_v8 = vpop.eup %6397  ;;  %v2432_v18 = vmul.f32 %v6396_v3, %v7594_v60 }
 0x79a   : > { %v2776_v24 = vpop.permute.xlu0 %2775  ;;  %v6400_v9 = vpop.eup %6399  ;;  %v2429_v31 = vmul.f32 %v6398_v8, %v7591_v26 }
 0x79b   : > { %v2778_v7 = vpop.permute.xlu1 %2777  ;;  %v2431_v33 = vmul.f32 %v6400_v9, %v7587_v54 }
 0x79d   : > { %v6402_v16 = vpop.eup %6401  ;;  %v2442_v48 = vpack.c.bf16 %v2432_v18, %v2431_v33 }
 0x79e   : > { %v2780_v27 = vpop.permute.xlu0 %2779  ;;  %v2430_v28 = vmul.f32 %v6402_v16, %v7600_v56  ;;  %v6404_v29 = vpop.eup %6403 }
 0x79f   : > { %v2782_v2 = vpop.permute.xlu1 %2781  ;;  %v2433_v60 = vmul.f32 %v6404_v29, %v7602_v36 }
 0x7a0   : > { %5727 = vmatpush3.bf16.xpose.msra.mxu0 %v2872_v12  ;;  %v2441_v57 = vpack.c.bf16 %v2430_v28, %v2429_v31  ;;  %v6204_v31 = vld [vmem:[#allocation2 + $0x64] ss:$12 sps:$4 sm:$0xff]  }
 0x7a1   : > { %v6406_v37 = vpop.eup %6405 }
 0x7a2   : > { %v6408_v22 = vpop.eup %6407  ;;  %5704 = vmatprep.mubr.bf16.mxu0 %v2441_v57  ;;  %v2784_v15 = vpop.permute.xlu0 %2783  ;;  %v2434_v19 = vmul.f32 %v6406_v37, %v7608_v34 }
 0x7a3   : > { %v2786_v40 = vpop.permute.xlu1 %2785  ;;  %5705 = vmatmul.mubr.bf16.gmra.mxu0 %v2442_v48  ;;  %v6410_v26 = vpop.eup %6409  ;;  %v2436_v17 = vmul.f32 %v6408_v22, %v7606_v35 }
 0x7a4   : > { %v2443_v56 = vpack.c.bf16 %v2434_v19, %v2433_v60  ;;  %v2435_v14 = vmul.f32 %v6410_v26, %v7596_v20  ;;  %v6205_v26 = vld [vmem:[#allocation2 + $0xac] ss:$12 sps:$4 sm:$0xff]  }
 0x7a6   : > { %5708 = vmatprep.mubr.bf16.mxu0 %v2443_v56  ;;  %v2788_v41 = vpop.permute.xlu0 %2787  ;;  %v2444_v44 = vpack.c.bf16 %v2436_v17, %v2435_v14  ;;  %v6206_v56 = vld [vmem:[#allocation2 + $0x7c] ss:$12 sps:$4 sm:$0xff]   ;;  %v6207_v17 = vld [vmem:[#allocation2 + $0x4c] ss:$12 sps:$4 sm:$0xff]  }
 0x7a7   : > { %v2790_v54 = vpop.permute.xlu1 %2789 }
 0x7aa   : > { %v3215_v32 = vpop.permute.xlu0 %3214 }
 0x7ab   : > { %5709 = vmatmul.mubr.bf16.gmra.mxu0 %v2444_v44  ;;  %5744 = vmatprep.subr.bf16.mxu1 %v3215_v32  ;;  %v3213_v25 = vpop.permute.xlu1 %3212 }
 0x7ac   : > { %5728 = vmatprep.mubr.msk.bf16.mxu0 %vm1497_vm0, %v2776_v24  ;;  %5745 = vmatpush3.bf16.msra.mxu1 %v3215_v32 }
 0x7ad   : > { %5746 = vmatprep.subr.bf16.mxu1 %v3213_v25 }
 0x7ae   : > { %v3211_v36 = vpop.permute.xlu0 %3210 }
 0x7af   : > { %v3205_v35 = vpop.permute.xlu1 %3204 }
 0x7b0   : > { %5747 = vmatpush3.bf16.msra.mxu1 %v3213_v25 }
 0x7b1   : > { %5748 = vmatprep.subr.bf16.mxu1 %v3211_v36 }
 0x7b2   : > { %v3209_v34 = vpop.permute.xlu0 %3208 }
 0x7b3   : > { %5729 = vmatmul.mubr.msk.bf16.vlgmr.msra.gmra.mxu0 %vm1497_vm0, %v2778_v7  ;;  %v3201_v14 = vpop.permute.xlu1 %3200 }
 0x7b4   : > { %5732 = vmatprep.mubr.msk.bf16.mxu0 %vm1497_vm0, %v2780_v27  ;;  %5749 = vmatpush3.bf16.msra.mxu1 %v3211_v36  ;;  %v6202_v27 = vld [vmem:[#allocation2 + $0x20] ss:$12 sps:$4 sm:$0xff]  }
 0x7b5   : > { %5750 = vmatprep.subr.bf16.mxu1 %v3209_v34 }
 0x7b6   : > { %v3207_v20 = vpop.permute.xlu0 %3206 }
 0x7b8   : > { %5751 = vmatpush3.bf16.msra.mxu1 %v3209_v34 }
 0x7b9   : > { %5752 = vmatprep.subr.bf16.mxu1 %v3207_v20 }
 0x7bb   : > { %5733 = vmatmul.mubr.msk.bf16.gmra.mxu0 %vm1497_vm0, %v2782_v2  ;;  %v6203_v2 = vld [vmem:[#allocation2 + $0x94] ss:$12 sps:$4 sm:$0xff]  }
 0x7bc   : > { %5736 = vmatprep.mubr.msk.bf16.mxu0 %vm1497_vm0, %v2784_v15  ;;  %5753 = vmatpush3.bf16.msra.mxu1 %v3207_v20 }
 0x7bd   : > { %5754 = vmatprep.subr.bf16.mxu1 %v3205_v35 }
 0x7c0   : > { %5755 = vmatpush3.bf16.msra.mxu1 %v3205_v35 }
 0x7c3   : > { %5737 = vmatmul.mubr.msk.bf16.gmra.mxu0 %vm1497_vm0, %v2786_v40 }
 0x7c4   : > { %5740 = vmatprep.mubr.msk.bf16.mxu0 %vm1497_vm0, %v2788_v41 }
 0x7cb   : > { %5741 = vmatmul.mubr.msk.bf16.gmra.mxu0 %vm1497_vm0, %v2790_v54 }
 0x81d   : > { %v7673_v62 = vpop.f32.mrf.mxu0 }
 0x81f   : > { %v7675_v45 = vpop.f32.mrf.mxu0 }
 0x821   : > { %v7677_v50 = vpop.f32.mrf.mxu0 }
 0x823   : > { %v7679_v1 = vpop.f32.mrf.mxu0 }
 0x855   : > { %v7681_v42 = vpop.f32.mrf.mxu0 }
 0x857   : > { %v7683_v51 = vpop.f32.mrf.mxu0 }
 0x859   : > { %v7685_v52 = vpop.f32.mrf.mxu0 }
 0x85b   : > { %v7687_v58 = vpop.f32.mrf.mxu0 }
 0x863   : > { %v7689_v43 = vpop.f32.mrf.mxu0 }
 0x865   : > { %v7691_v38 = vpop.f32.mrf.mxu0 }
 0x867   : > { %v7693_v30 = vpop.f32.mrf.mxu0 }
 0x869   : > { %v7695_v11 = vpop.f32.mrf.mxu0 }
 0x86b   : > { %v7697_v23 = vpop.f32.mrf.mxu0 }
 0x86d   : > { %v7699_v59 = vpop.f32.mrf.mxu0 }
 0x86f   : > { %v7701_v21 = vpop.f32.mrf.mxu0 }
 0x871   : > { %v7703_v55 = vpop.f32.mrf.mxu0 }
 0x873   : > { %v5730_v49 = vpop.f32.mrf.mxu0 }
 0x874   : > { %v7705_v5 = vmul.f32 0.17677669, %v5730_v49 }
 0x875   : > { %v2929_v39 = vpop.f32.mrf.mxu0 }
 0x876   : > { %3012 = vmax.xlane.f32.xlu0 %v7705_v5  ;;  %v7708_v46 = vmul.f32 0.17677669, %v2929_v39 }
 0x877   : > { %v5731_v0 = vpop.f32.mrf.mxu0 }
 0x878   : > { %v7713_v61 = vmul.f32 0.17677669, %v5731_v0 }
 0x879   : > { %v2932_v47 = vpop.f32.mrf.mxu0 }
 0x87a   : > { %v7710_v13 = vmul.f32 0.17677669, %v2932_v47  ;;  %3008 = vmax.xlane.f32.xlu0 %v7708_v46 }
 0x87b   : > { %v5734_v10 = vpop.f32.mrf.mxu0 }
 0x87c   : > { %3010 = vmax.xlane.f32.xlu1 %v7710_v13  ;;  %v7732_v28 = vmul.f32 0.17677669, %v5734_v10 }
 0x87d   : > { %v2945_v6 = vpop.f32.mrf.mxu0 }
 0x87e   : > { %3014 = vmax.xlane.f32.xlu0 %v7713_v61  ;;  %v7735_v29 = vmul.f32 0.17677669, %v2945_v6 }
 0x87f   : > { %v5735_v4 = vpop.f32.mrf.mxu0 }
 0x880   : > { %v7717_v63 = vmul.f32 0.17677669, %v5735_v4 }
 0x881   : > { %v2948_v53 = vpop.f32.mrf.mxu0 }
 0x882   : > { %3022 = vmax.xlane.f32.xlu1 %v7717_v63  ;;  %v7720_v24 = vmul.f32 0.17677669, %v2948_v53 }
 0x883   : > { %v5738_v3 = vpop.f32.mrf.mxu0 }
 0x884   : > { %v7738_v12 = vmul.f32 0.17677669, %v5738_v3 }
 0x885   : > { %v2961_v7 = vpop.f32.mrf.mxu0 }
 0x886   : > { %3018 = vmax.xlane.f32.xlu1 %v7720_v24  ;;  %v7741_v57 = vmul.f32 0.17677669, %v2961_v7 }
 0x887   : > { %v5739_v8 = vpop.f32.mrf.mxu0 }
 0x888   : > { %v7723_v9 = vmul.f32 0.17677669, %v5739_v8 }
 0x889   : > { %v2964_v16 = vpop.f32.mrf.mxu0 }
 0x88a   : > { %3030 = vmax.xlane.f32.xlu1 %v7723_v9  ;;  %v7726_v18 = vmul.f32 0.17677669, %v2964_v16 }
 0x88b   : > { %v5742_v33 = vpop.f32.mrf.mxu0 }
 0x88c   : > { %v7744_v48 = vmul.f32 0.17677669, %v5742_v33 }
 0x88d   : > { %v2977_v37 = vpop.f32.mrf.mxu0 }
 0x88e   : > { %3026 = vmax.xlane.f32.xlu1 %v7726_v18  ;;  %v7747_v15 = vmul.f32 0.17677669, %v2977_v37 }
 0x88f   : > { %v5743_v22 = vpop.f32.mrf.mxu0 }
 0x890   : > { %v7749_v40 = vmul.f32 0.17677669, %v5743_v22 }
 0x891   : > { %v2980_v60 = vpop.f32.mrf.mxu0 }
 0x892   : > { %v7753_v19 = vmul.f32 0.17677669, %v2980_v60 }
 0x894   : > { %3202 = vrot.lane.b32.xlu0 %v6202_v27, %s6806_s12 }
 0x89f   : > { %3558 = vrot.lane.b32.xlu1 %v6203_v2, %s6807_s13 }
 0x8a3   : > { %3554 = vrot.lane.b32.xlu1 %v6204_v31, %s6807_s13 }
 0x8b3   : > { %3020 = vmax.xlane.f32.xlu0 %v7732_v28 }
 0x8b7   : > { %3016 = vmax.xlane.f32.xlu0 %v7735_v29 }
 0x8bb   : > { %3028 = vmax.xlane.f32.xlu0 %v7738_v12 }
 0x8bf   : > { %3024 = vmax.xlane.f32.xlu0 %v7741_v57 }
 0x8c3   : > { %3036 = vmax.xlane.f32.xlu0 %v7744_v48 }
 0x8c7   : > { %3032 = vmax.xlane.f32.xlu0 %v7747_v15  ;;  %3038 = vmax.xlane.f32.xlu1 %v7749_v40 }
 0x8cb   : > { %3034 = vmax.xlane.f32.xlu1 %v7753_v19 }
 0x8dd   : > { %3560 = vrot.lane.b32.xlu0 %v6205_v26, %s6807_s13 }
 0x8e1   : > { %3556 = vrot.lane.b32.xlu0 %v6206_v56, %s6807_s13 }
 0x8e5   : > { %3552 = vrot.lane.b32.xlu0 %v6207_v17, %s6807_s13 }
 0x8ff   : > { %v3013_v41 = vpop.xlane.xlu0 %3012 }
 0x900   : > { %v3042_v54 = vsub.f32 %v7705_v5, %v3013_v41 }
 0x902   : > { %v3060_v44 = vmul.f32 1.442695, %v3042_v54 }
 0x903   : > { %v3009_v32 = vpop.xlane.xlu0 %3008 }
 0x904   : > { %6411 = vpow2.f32 %v3060_v44  ;;  %v3040_v25 = vsub.f32 %v7708_v46, %v3009_v32 }
 0x905   : > { %v3011_v36 = vpop.xlane.xlu1 %3010 }
 0x906   : > { %v3056_v34 = vmul.f32 1.442695, %v3040_v25  ;;  %v3041_v35 = vsub.f32 %v7710_v13, %v3011_v36 }
 0x907   : > { %v3015_v20 = vpop.xlane.xlu0 %3014 }
 0x908   : > { %6413 = vpow2.f32 %v3056_v34  ;;  %v3043_v49 = vsub.f32 %v7713_v61, %v3015_v20  ;;  %v3058_v47 = vmul.f32 1.442695, %v3041_v35  ;;  %v6208_v61 = vld [vmem:[#allocation2 + $0x34] ss:$12 sps:$4 sm:$0xff]  }
 0x90a   : > { %v3062_v39 = vmul.f32 1.442695, %v3043_v49 }
 0x90b   : > { %v3203_v0 = vpop.permute.xlu0 %3202  ;;  %v3023_v6 = vpop.xlane.xlu1 %3022 }
 0x90c   : > { %6415 = vpow2.f32 %v3062_v39  ;;  %5756 = vmatprep.subr.bf16.mxu1 %v3203_v0  ;;  %v3047_v27 = vsub.f32 %v7717_v63, %v3023_v6 }
 0x90d   : > { %5757 = vmatpush3.bf16.msra.mxu1 %v3203_v0  ;;  %6417 = vpow2.f32 %v3058_v47 }
 0x90e   : > { %5758 = vmatprep.subr.bf16.mxu1 %v3201_v14  ;;  %v3070_v60 = vmul.f32 1.442695, %v3047_v27  ;;  %v6209_v27 = vld [vmem:[#allocation2 + $0x4] ss:$12 sps:$4 sm:$0xff]  }
 0x90f   : > { %v3019_v4 = vpop.xlane.xlu1 %3018 }
 0x910   : > { %v3045_v3 = vsub.f32 %v7720_v24, %v3019_v4 }
 0x911   : > { %v7763_v5 = vpop.eup %6411  ;;  %5759 = vmatpush3.bf16.msra.mxu1 %v3201_v14 }
 0x912   : > { %3092 = vadd.xlane.f32.xlu1 %v7763_v5  ;;  %v3066_v2 = vmul.f32 1.442695, %v3045_v3 }
 0x913   : > { %v3031_v53 = vpop.xlane.xlu1 %3030 }
 0x915   : > { %v7766_v46 = vpop.eup %6413 }
 0x916   : > { %3088 = vadd.xlane.f32.xlu1 %v7766_v46 }
 0x917   : > { %v3027_v31 = vpop.xlane.xlu1 %3026 }
 0x919   : > { %v7769_v13 = vpop.eup %6415 }
 0x91a   : > { %3094 = vadd.xlane.f32.xlu1 %v7769_v13  ;;  %v7772_v10 = vpop.eup %6417 }
 0x91b   : > { %v7781_v24 = vpop.permute.xlu1 %3558 }
 0x91e   : > { %3090 = vadd.xlane.f32.xlu1 %v7772_v10 }
 0x91f   : > { %v7786_v44 = vpop.permute.xlu1 %3554 }
 0x92f   : > { %3550 = vrot.lane.b32.xlu1 %v6208_v61, %s6807_s13 }
 0x93c   : > { %v3021_v7 = vpop.xlane.xlu0 %3020 }
 0x93d   : > { %v3046_v8 = vsub.f32 %v7732_v28, %v3021_v7  ;;  %v3051_v28 = vsub.f32 %v7723_v9, %v3031_v53 }
 0x93f   : > { %v3068_v16 = vmul.f32 1.442695, %v3046_v8  ;;  %v3078_v14 = vmul.f32 1.442695, %v3051_v28  ;;  %v6219_v28 = vld [vmem:[#allocation2 + $0x90] ss:$12 sps:$4 sm:$0xff]  }
 0x940   : > { %v3017_v33 = vpop.xlane.xlu0 %3016 }
 0x941   : > { %6419 = vpow2.f32 %v3068_v16  ;;  %v3044_v37 = vsub.f32 %v7735_v29, %v3017_v33  ;;  %v3049_v29 = vsub.f32 %v7726_v18, %v3027_v31  ;;  %v6211_v31 = vld [vmem:[#allocation2 + $0x1c] ss:$12 sps:$4 sm:$0xff]  }
 0x942   : > { %6421 = vpow2.f32 %v3066_v2  ;;  %v6210_v2 = vld [vmem:[#allocation2 + $0x18] ss:$12 sps:$4 sm:$0xff]   ;;  %v6212_v33 = vld [vmem:[#allocation2 + $0x48] ss:$12 sps:$4 sm:$0xff]  }
 0x943   : > { %v3064_v22 = vmul.f32 1.442695, %v3044_v37  ;;  %v3074_v9 = vmul.f32 1.442695, %v3049_v29  ;;  %v6213_v37 = vld [vmem:[#allocation2] ss:$12 sps:$4 sm:$0xff]  }
 0x944   : > { %v3029_v26 = vpop.xlane.xlu0 %3028 }
 0x945   : > { %6423 = vpow2.f32 %v3064_v22  ;;  %v3050_v56 = vsub.f32 %v7738_v12, %v3029_v26  ;;  %v6214_v22 = vld [vmem:[#allocation2 + $0x78] ss:$12 sps:$4 sm:$0xff]   ;;  %v6216_v26 = vld [vmem:[#allocation2 + $0xa8] ss:$12 sps:$4 sm:$0xff]  }
 0x946   : > { %6425 = vpow2.f32 %v3070_v60  ;;  %v6215_v60 = vld [vmem:[#allocation2 + $0x30] ss:$12 sps:$4 sm:$0xff]  }
 0x947   : > { %v3076_v17 = vmul.f32 1.442695, %v3050_v56  ;;  %v6217_v56 = vld [vmem:[#allocation2 + $0x60] ss:$12 sps:$4 sm:$0xff]  }
 0x948   : > { %v3025_v63 = vpop.xlane.xlu0 %3024 }
 0x949   : > { %6427 = vpow2.f32 %v3076_v17  ;;  %v3048_v41 = vsub.f32 %v7741_v57, %v3025_v63  ;;  %v6218_v17 = vld [vmem:[#allocation2 + $0x98] ss:$12 sps:$4 sm:$0xff]   ;;  %v6220_v63 = vld [vmem:[#allocation2 + $0xb0] ss:$12 sps:$4 sm:$0xff]  }
 0x94b   : > { %v3072_v54 = vmul.f32 1.442695, %v3048_v41  ;;  %v6221_v41 = vld [vmem:[#allocation2 + $0x80] ss:$12 sps:$4 sm:$0xff]  }
 0x94c   : > { %v3037_v32 = vpop.xlane.xlu0 %3036 }
 0x94d   : > { %6429 = vpow2.f32 %v3072_v54  ;;  %v3054_v12 = vsub.f32 %v7744_v48, %v3037_v32 }
 0x94e   : > { %v7789_v25 = vpop.eup %6419  ;;  %6431 = vpow2.f32 %v3078_v14 }
 0x94f   : > { %v3084_v36 = vmul.f32 1.442695, %v3054_v12  ;;  %3100 = vadd.xlane.f32.xlu0 %v7789_v25  ;;  %v7792_v57 = vpop.eup %6421 }
 0x950   : > { %v3033_v34 = vpop.xlane.xlu0 %3032  ;;  %v3039_v20 = vpop.xlane.xlu1 %3038 }
 0x951   : > { %6433 = vpow2.f32 %v3084_v36  ;;  %v3052_v18 = vsub.f32 %v7747_v15, %v3033_v34  ;;  %v3055_v35 = vsub.f32 %v7749_v40, %v3039_v20 }
 0x952   : > { %v7796_v49 = vpop.eup %6423  ;;  %6435 = vpow2.f32 %v3074_v9 }
 0x953   : > { %v3080_v39 = vmul.f32 1.442695, %v3052_v18  ;;  %3096 = vadd.xlane.f32.xlu0 %v7796_v49  ;;  %3098 = vadd.xlane.f32.xlu1 %v7792_v57  ;;  %v3086_v48 = vmul.f32 1.442695, %v3055_v35  ;;  %v7802_v61 = vpop.eup %6425 }
 0x954   : > { %v7800_v0 = vpop.permute.xlu0 %3560  ;;  %v3035_v47 = vpop.xlane.xlu1 %3034 }
 0x955   : > { %6437 = vpow2.f32 %v3080_v39  ;;  %v3053_v6 = vsub.f32 %v7753_v19, %v3035_v47  ;;  %5976 = vmatprep.subr.msk.bf16.mxu1 %vm1497_vm0, %v7800_v0 }
 0x956   : > { %v7807_v15 = vpop.eup %6427  ;;  %6439 = vpow2.f32 %v3086_v48 }
 0x957   : > { %v3082_v40 = vmul.f32 1.442695, %v3053_v6  ;;  %3102 = vadd.xlane.f32.xlu0 %v7802_v61  ;;  %3108 = vadd.xlane.f32.xlu1 %v7807_v15  ;;  %v3608_v6 = vsel %vm1497_vm0, %v7800_v0, 0 }
 0x959   : > { %6441 = vpow2.f32 %v3082_v40  ;;  %v3557_v40 = vpop.permute.xlu0 %3556 }
 0x95a   : > { %v7811_v4 = vpop.eup %6429 }
 0x95b   : > { %3104 = vadd.xlane.f32.xlu1 %v7811_v4  ;;  %v7814_v53 = vpop.eup %6431 }
 0x95e   : > { %v7816_v3 = vpop.eup %6433 }
 0x95f   : > { %3116 = vadd.xlane.f32.xlu0 %v7816_v3  ;;  %3110 = vadd.xlane.f32.xlu1 %v7814_v53  ;;  %v7820_v19 = vpop.eup %6435 }
 0x962   : > { %v7822_v7 = vpop.eup %6437 }
 0x963   : > { %3112 = vadd.xlane.f32.xlu0 %v7822_v7  ;;  %3106 = vadd.xlane.f32.xlu1 %v7820_v19  ;;  %v7826_v8 = vpop.eup %6439 }
 0x966   : > { %v7828_v16 = vpop.eup %6441 }
 0x967   : > { %3118 = vadd.xlane.f32.xlu0 %v7826_v8  ;;  %3114 = vadd.xlane.f32.xlu1 %v7828_v16 }
 0x978   : > { %3546 = vrot.lane.b32.xlu1 %v6209_v27, %s6807_s13 }
 0x97c   : > { %3492 = vrot.lane.b32.xlu1 %v6210_v2, %s6807_s13 }
 0x97d   : > { %3548 = vrot.lane.b32.xlu0 %v6211_v31, %s6807_s13 }
 0x980   : > { %3496 = vrot.lane.b32.xlu1 %v6212_v33, %s6807_s13 }
 0x981   : > { %3490 = vrot.lane.b32.xlu0 %v6213_v37, %s6807_s13 }
 0x984   : > { %3500 = vrot.lane.b32.xlu1 %v6214_v22, %s6807_s13 }
 0x985   : > { %3494 = vrot.lane.b32.xlu0 %v6215_v60, %s6807_s13 }
 0x988   : > { %3504 = vrot.lane.b32.xlu1 %v6216_v26, %s6807_s13 }
 0x989   : > { %3498 = vrot.lane.b32.xlu0 %v6217_v56, %s6807_s13 }
 0x98c   : > { %3927 = vrot.lane.b32.xlu1 %v6218_v17, %s6807_s13 }
 0x98d   : > { %3502 = vrot.lane.b32.xlu0 %v6219_v28, %s6807_s13 }
 0x991   : > { %3929 = vrot.lane.b32.xlu0 %v6220_v63, %s6807_s13 }
 0x995   : > { %3925 = vrot.lane.b32.xlu0 %v6221_v41, %s6807_s13 }
 0x99b   : > { %v3093_v54 = vpop.xlane.xlu1 %3092 }
 0x99f   : > { %v3089_v14 = vpop.xlane.xlu1 %3088 }
 0x9a3   : > { %v3095_v29 = vpop.xlane.xlu1 %3094 }
 0x9a4   : > { %6443 = vrcp.f32 %v3095_v29 }
 0x9a5   : > { %6445 = vrcp.f32 %v3089_v14 }
 0x9a6   : > { %6447 = vrcp.f32 %v3093_v54 }
 0x9a7   : > { %v3091_v32 = vpop.xlane.xlu1 %3090 }
 0x9a8   : > { %6449 = vrcp.f32 %v3091_v32 }
 0x9ab   : > { %v3551_v0 = vpop.permute.xlu1 %3550 }
 0x9b1   : > { %v6444_v12 = vpop.eup %6443 }
 0x9b2   : > { %v6446_v36 = vpop.eup %6445  ;;  %v3139_v20 = vmul.f32 %v6444_v12, %v7769_v13  ;;  %v3605_v13 = vsel %vm1497_vm0, %v7781_v24, 0 }
 0x9b3   : > { %v6448_v9 = vpop.eup %6447  ;;  %v3136_v18 = vmul.f32 %v6446_v36, %v7766_v46  ;;  %v3599_v46 = vsel %vm1497_vm0, %v7786_v44, 0 }
 0x9b4   : > { %v3138_v39 = vmul.f32 %v6448_v9, %v7763_v5  ;;  %v3602_v5 = vsel %vm1497_vm0, %v3557_v40, 0 }
 0x9b5   : > { %v6450_v34 = vpop.eup %6449 }
 0x9b6   : > { %v3137_v35 = vmul.f32 %v6450_v34, %v7772_v10  ;;  %v3153_v47 = vpack.c.bf16 %v3139_v20, %v3138_v39  ;;  %v3553_v10 = vpop.permute.xlu0 %3552 }
 0x9b8   : > { %v3152_v48 = vpack.c.bf16 %v3137_v35, %v3136_v18 }
 0x9ba   : > { %5760 = vmatprep.mubr.bf16.mxu1 %v3152_v48 }
 0x9bb   : > { %5761 = vmatmul.mubr.bf16.vlgmr.msra.gmra.mxu1 %v3153_v47 }
 0x9bc   : > { %5777 = vmatpush3.bf16.xpose.msra.mxu1 %v3608_v6 }
 0x9bd   : > { %5977 = vmatprep.subr.msk.bf16.mxu1 %vm1497_vm0, %v7781_v24  ;;  %v3596_v24 = vsel %vm1497_vm0, %v3553_v10, 0 }
 0x9c4   : > { %5779 = vmatpush3.bf16.xpose.msra.mxu1 %v3605_v13 }
 0x9c5   : > { %5978 = vmatprep.subr.msk.bf16.mxu1 %vm1497_vm0, %v3557_v40 }
 0x9cc   : > { %5781 = vmatpush3.bf16.xpose.msra.mxu1 %v3602_v5 }
 0x9cd   : > { %5979 = vmatprep.subr.msk.bf16.mxu1 %vm1497_vm0, %v7786_v44  ;;  %v3593_v44 = vsel %vm1497_vm0, %v3551_v0, 0 }
 0x9d4   : > { %5783 = vmatpush3.bf16.xpose.msra.mxu1 %v3599_v46 }
 0x9d5   : > { %5980 = vmatprep.subr.msk.bf16.mxu1 %vm1497_vm0, %v3553_v10 }
 0x9d8   : > { %v3101_v27 = vpop.xlane.xlu0 %3100 }
 0x9dc   : > { %5785 = vmatpush3.bf16.xpose.msra.mxu1 %v3596_v24  ;;  %v3097_v2 = vpop.xlane.xlu0 %3096  ;;  %v3099_v31 = vpop.xlane.xlu1 %3098 }
 0x9dd   : > { %6451 = vrcp.f32 %v3097_v2  ;;  %5981 = vmatprep.subr.msk.bf16.mxu1 %vm1497_vm0, %v3551_v0 }
 0x9de   : > { %6453 = vrcp.f32 %v3099_v31 }
 0x9df   : > { %6455 = vrcp.f32 %v3101_v27 }
 0x9e0   : > { %v3103_v33 = vpop.xlane.xlu0 %3102  ;;  %v3109_v37 = vpop.xlane.xlu1 %3108 }
 0x9e1   : > { %6457 = vrcp.f32 %v3103_v33 }
 0x9e4   : > { %5787 = vmatpush3.bf16.xpose.msra.mxu1 %v3593_v44  ;;  %v3105_v22 = vpop.xlane.xlu1 %3104 }
 0x9e8   : > { %v3117_v60 = vpop.xlane.xlu0 %3116  ;;  %v3111_v26 = vpop.xlane.xlu1 %3110 }
 0x9e9   : > { %6459 = vrcp.f32 %v3111_v26 }
 0x9ea   : > { %v6452_v56 = vpop.eup %6451  ;;  %6461 = vrcp.f32 %v3105_v22 }
 0x9eb   : > { %v6454_v17 = vpop.eup %6453  ;;  %v3140_v28 = vmul.f32 %v6452_v56, %v7796_v49  ;;  %6463 = vrcp.f32 %v3109_v37 }
 0x9ec   : > { %v6456_v63 = vpop.eup %6455  ;;  %v3113_v41 = vpop.xlane.xlu0 %3112  ;;  %v3141_v14 = vmul.f32 %v6454_v17, %v7792_v57 }
 0x9ed   : > { %v3107_v54 = vpop.xlane.xlu1 %3106  ;;  %v3142_v12 = vmul.f32 %v6456_v63, %v7789_v25 }
 0x9ee   : > { %v6458_v29 = vpop.eup %6457  ;;  %6465 = vrcp.f32 %v3107_v54  ;;  %v3154_v32 = vpack.c.bf16 %v3141_v14, %v3140_v28 }
 0x9ef   : > { %v3143_v36 = vmul.f32 %v6458_v29, %v7802_v61  ;;  %6467 = vrcp.f32 %v3113_v41 }
 0x9f0   : > { %5764 = vmatprep.mubr.bf16.mxu1 %v3154_v32  ;;  %v3119_v9 = vpop.xlane.xlu0 %3118 }
 0x9f1   : > { %v3115_v34 = vpop.xlane.xlu1 %3114  ;;  %v3155_v20 = vpack.c.bf16 %v3143_v36, %v3142_v12 }
 0x9f2   : > { %6469 = vrcp.f32 %v3115_v34 }
 0x9f3   : > { %6471 = vrcp.f32 %v3119_v9  ;;  %5765 = vmatmul.mubr.bf16.gmra.mxu1 %v3155_v20 }
 0x9f4   : > { %v3549_v49 = vpop.permute.xlu0 %3548  ;;  %6473 = vrcp.f32 %v3117_v60 }
 0x9f5   : > { %v3547_v18 = vpop.permute.xlu1 %3546  ;;  %5982 = vmatprep.subr.msk.bf16.mxu1 %vm1497_vm0, %v3549_v49  ;;  %v3590_v57 = vsel %vm1497_vm0, %v3549_v49, 0 }
 0x9f6   : > { %5789 = vmatpush3.bf16.xpose.msra.mxu1 %v3590_v57  ;;  %v6460_v25 = vpop.eup %6459  ;;  %v3587_v0 = vsel %vm1497_vm0, %v3547_v18, 0 }
 0x9f7   : > { %5983 = vmatprep.subr.msk.bf16.mxu1 %vm1497_vm0, %v3547_v18  ;;  %v6462_v39 = vpop.eup %6461  ;;  %v3147_v6 = vmul.f32 %v6460_v25, %v7814_v53 }
 0x9f8   : > { %v3491_v61 = vpop.permute.xlu0 %3490  ;;  %v6464_v48 = vpop.eup %6463  ;;  %v3144_v5 = vmul.f32 %v6462_v39, %v7811_v4 }
 0x9f9   : > { %v3493_v35 = vpop.permute.xlu1 %3492  ;;  %v3146_v27 = vmul.f32 %v6464_v48, %v7807_v15 }
 0x9fb   : > { %v6466_v47 = vpop.eup %6465  ;;  %v3157_v31 = vpack.c.bf16 %v3147_v6, %v3146_v27 }
 0x9fc   : > { %v3495_v13 = vpop.permute.xlu0 %3494  ;;  %v3145_v46 = vmul.f32 %v6466_v47, %v7820_v19  ;;  %v6468_v10 = vpop.eup %6467 }
 0x9fd   : > { %v3497_v40 = vpop.permute.xlu1 %3496  ;;  %v3148_v53 = vmul.f32 %v6468_v10, %v7822_v7 }
 0x9fe   : > { %5791 = vmatpush3.bf16.xpose.msra.mxu1 %v3587_v0  ;;  %v3156_v24 = vpack.c.bf16 %v3145_v46, %v3144_v5 }
 0x9ff   : > { %v6470_v2 = vpop.eup %6469 }
 0xa00   : > { %v6472_v33 = vpop.eup %6471  ;;  %5768 = vmatprep.mubr.bf16.mxu1 %v3156_v24  ;;  %v3499_v37 = vpop.permute.xlu0 %3498  ;;  %v3149_v22 = vmul.f32 %v6470_v2, %v7828_v16 }
 0xa01   : > { %v3501_v44 = vpop.permute.xlu1 %3500  ;;  %5769 = vmatmul.mubr.bf16.gmra.mxu1 %v3157_v31  ;;  %v6474_v4 = vpop.eup %6473  ;;  %v3151_v60 = vmul.f32 %v6472_v33, %v7826_v8 }
 0xa02   : > { %v3158_v19 = vpack.c.bf16 %v3149_v22, %v3148_v53  ;;  %v3150_v56 = vmul.f32 %v6474_v4, %v7816_v3 }
 0xa04   : > { %5772 = vmatprep.mubr.bf16.mxu1 %v3158_v19  ;;  %v3503_v26 = vpop.permute.xlu0 %3502  ;;  %v3159_v17 = vpack.c.bf16 %v3151_v60, %v3150_v56 }
 0xa05   : > { %v3505_v15 = vpop.permute.xlu1 %3504 }
 0xa08   : > { %v3930_v28 = vpop.permute.xlu0 %3929 }
 0xa09   : > { %5773 = vmatmul.mubr.bf16.gmra.mxu1 %v3159_v17  ;;  %5808 = vmatprep.subr.bf16.mxu0 %v3930_v28  ;;  %v3928_v63 = vpop.permute.xlu1 %3927  ;;  %v6222_v17 = vld [vmem:[#allocation2 + $0x50] ss:$12 sps:$4 sm:$0xff]  }
 0xa0a   : > { %5792 = vmatprep.mubr.msk.bf16.mxu1 %vm1497_vm0, %v3491_v61  ;;  %5809 = vmatpush3.bf16.msra.mxu0 %v3930_v28  ;;  %v6223_v28 = vld [vmem:[#allocation2 + $0x68] ss:$12 sps:$4 sm:$0xff]  }
 0xa0b   : > { %5810 = vmatprep.subr.bf16.mxu0 %v3928_v63 }
 0xa0c   : > { %v3926_v7 = vpop.permute.xlu0 %3925 }
 0xa0e   : > { %5811 = vmatpush3.bf16.msra.mxu0 %v3928_v63 }
 0xa0f   : > { %5812 = vmatprep.subr.bf16.mxu0 %v3926_v7 }
 0xa11   : > { %5793 = vmatmul.mubr.msk.bf16.vlgmr.msra.gmra.mxu1 %vm1497_vm0, %v3493_v35 }
 0xa12   : > { %5796 = vmatprep.mubr.msk.bf16.mxu1 %vm1497_vm0, %v3495_v13  ;;  %5813 = vmatpush3.bf16.msra.mxu0 %v3926_v7 }
 0xa19   : > { %5797 = vmatmul.mubr.msk.bf16.gmra.mxu1 %vm1497_vm0, %v3497_v40 }
 0xa1a   : > { %5800 = vmatprep.mubr.msk.bf16.mxu1 %vm1497_vm0, %v3499_v37 }
 0xa21   : > { %5801 = vmatmul.mubr.msk.bf16.gmra.mxu1 %vm1497_vm0, %v3501_v44 }
 0xa22   : > { %5804 = vmatprep.mubr.msk.bf16.mxu1 %vm1497_vm0, %v3503_v26 }
 0xa29   : > { %5805 = vmatmul.mubr.msk.bf16.gmra.mxu1 %vm1497_vm0, %v3505_v15 }
 0xa7b   : > { %v7889_v3 = vpop.f32.mrf.mxu1 }
 0xa7d   : > { %v7891_v8 = vpop.f32.mrf.mxu1 }
 0xa7f   : > { %v7893_v16 = vpop.f32.mrf.mxu1 }
 0xa81   : > { %v7895_v41 = vpop.f32.mrf.mxu1 }
 0xab3   : > { %v7897_v54 = vpop.f32.mrf.mxu1 }
 0xab5   : > { %v7899_v14 = vpop.f32.mrf.mxu1 }
 0xab7   : > { %v7901_v29 = vpop.f32.mrf.mxu1 }
 0xab9   : > { %v7903_v32 = vpop.f32.mrf.mxu1 }
 0xac1   : > { %v7905_v12 = vpop.f32.mrf.mxu1 }
 0xac3   : > { %v7907_v36 = vpop.f32.mrf.mxu1 }
 0xac5   : > { %v7909_v9 = vpop.f32.mrf.mxu1 }
 0xac7   : > { %v7911_v34 = vpop.f32.mrf.mxu1 }
 0xac9   : > { %v7913_v20 = vpop.f32.mrf.mxu1 }
 0xacb   : > { %v7915_v49 = vpop.f32.mrf.mxu1 }
 0xacd   : > { %v7917_v18 = vpop.f32.mrf.mxu1 }
 0xace   : > { %8534 = vst [vmem:[#allocation21_spill] sm:$0xff] %v7917_v18 }
 0xacf   : > { %v7919_v57 = vpop.f32.mrf.mxu1 }
 0xad1   : > { %v5794_v25 = vpop.f32.mrf.mxu1 }
 0xad2   : > { %v3709_v61 = vmul.f32 0.17677669, %v5794_v25 }
 0xad3   : > { %v3644_v35 = vpop.f32.mrf.mxu1 }
 0xad4   : > { %3727 = vmax.xlane.f32.xlu0 %v3709_v61  ;;  %v3707_v48 = vmul.f32 0.17677669, %v3644_v35 }
 0xad5   : > { %v5795_v39 = vpop.f32.mrf.mxu1 }
 0xad6   : > { %v3710_v40 = vmul.f32 0.17677669, %v5795_v39  ;;  %v6224_v39 = vld [vmem:[#allocation2 + $0x38] ss:$12 sps:$4 sm:$0xff]  }
 0xad7   : > { %v3647_v47 = vpop.f32.mrf.mxu1 }
 0xad8   : > { %v3708_v6 = vmul.f32 0.17677669, %v3647_v47  ;;  %3723 = vmax.xlane.f32.xlu0 %v3707_v48 }
 0xad9   : > { %v5798_v13 = vpop.f32.mrf.mxu1 }
 0xada   : > { %3725 = vmax.xlane.f32.xlu1 %v3708_v6  ;;  %v3713_v10 = vmul.f32 0.17677669, %v5798_v13 }
 0xadb   : > { %v3660_v5 = vpop.f32.mrf.mxu1 }
 0xadc   : > { %3729 = vmax.xlane.f32.xlu0 %v3710_v40  ;;  %v3711_v2 = vmul.f32 0.17677669, %v3660_v5 }
 0xadd   : > { %v5799_v46 = vpop.f32.mrf.mxu1 }
 0xade   : > { %v7921_v0 = vmul.f32 0.17677669, %v5799_v46 }
 0xadf   : > { %v3663_v27 = vpop.f32.mrf.mxu1 }
 0xae0   : > { %3735 = vmax.xlane.f32.xlu0 %v3713_v10  ;;  %3737 = vmax.xlane.f32.xlu1 %v7921_v0  ;;  %v3712_v31 = vmul.f32 0.17677669, %v3663_v27 }
 0xae1   : > { %v5802_v24 = vpop.f32.mrf.mxu1 }
 0xae2   : > { %v7924_v44 = vmul.f32 0.17677669, %v5802_v24 }
 0xae3   : > { %v3676_v33 = vpop.f32.mrf.mxu1 }
 0xae4   : > { %3731 = vmax.xlane.f32.xlu0 %v3711_v2  ;;  %3733 = vmax.xlane.f32.xlu1 %v3712_v31  ;;  %v7930_v4 = vmul.f32 0.17677669, %v3676_v33 }
 0xae5   : > { %v5803_v37 = vpop.f32.mrf.mxu1 }
 0xae6   : > { %v7926_v53 = vmul.f32 0.17677669, %v5803_v37 }
 0xae7   : > { %v3679_v22 = vpop.f32.mrf.mxu1 }
 0xae8   : > { %3743 = vmax.xlane.f32.xlu0 %v7924_v44  ;;  %3745 = vmax.xlane.f32.xlu1 %v7926_v53  ;;  %v7932_v19 = vmul.f32 0.17677669, %v3679_v22 }
 0xae9   : > { %v5806_v60 = vpop.f32.mrf.mxu1 }
 0xaea   : > { %v7936_v26 = vmul.f32 0.17677669, %v5806_v60 }
 0xaeb   : > { %v3692_v15 = vpop.f32.mrf.mxu1 }
 0xaec   : > { %3739 = vmax.xlane.f32.xlu0 %v7930_v4  ;;  %3741 = vmax.xlane.f32.xlu1 %v7932_v19  ;;  %v7939_v56 = vmul.f32 0.17677669, %v3692_v15 }
 0xaed   : > { %v5807_v63 = vpop.f32.mrf.mxu1 }
 0xaee   : > { %v7944_v7 = vmul.f32 0.17677669, %v5807_v63 }
 0xaef   : > { %v3695_v25 = vpop.f32.mrf.mxu1 }
 0xaf0   : > { %3751 = vmax.xlane.f32.xlu0 %v7936_v26  ;;  %v7947_v35 = vmul.f32 0.17677669, %v3695_v25 }
 0xaf4   : > { %3747 = vmax.xlane.f32.xlu0 %v7939_v56 }
 0xafd   : > { %3921 = vrot.lane.b32.xlu1 %v6222_v17, %s6807_s13 }
 0xb0a   : > { %3923 = vrot.lane.b32.xlu0 %v6223_v28, %s6807_s13 }
 0xb21   : > { %3753 = vmax.xlane.f32.xlu1 %v7944_v7 }
 0xb25   : > { %3749 = vmax.xlane.f32.xlu1 %v7947_v35 }
 0xb36   : > { %3919 = vrot.lane.b32.xlu1 %v6224_v39, %s6807_s13 }
 0xb5d   : > { %v3728_v47 = vpop.xlane.xlu0 %3727 }
 0xb5e   : > { %v3757_v13 = vsub.f32 %v3709_v61, %v3728_v47 }
 0xb60   : > { %v3775_v5 = vmul.f32 1.442695, %v3757_v13 }
 0xb61   : > { %v3724_v46 = vpop.xlane.xlu0 %3723 }
 0xb62   : > { %6475 = vpow2.f32 %v3775_v5  ;;  %v3755_v27 = vsub.f32 %v3707_v48, %v3724_v46 }
 0xb63   : > { %v3726_v24 = vpop.xlane.xlu1 %3725 }
 0xb64   : > { %v3771_v33 = vmul.f32 1.442695, %v3755_v27  ;;  %v3756_v37 = vsub.f32 %v3708_v6, %v3726_v24 }
 0xb65   : > { %v3730_v22 = vpop.xlane.xlu0 %3729 }
 0xb66   : > { %6477 = vpow2.f32 %v3771_v33  ;;  %v3758_v60 = vsub.f32 %v3710_v40, %v3730_v22  ;;  %v3773_v17 = vmul.f32 1.442695, %v3756_v37 }
 0xb68   : > { %v3777_v15 = vmul.f32 1.442695, %v3758_v60 }
 0xb69   : > { %v3736_v28 = vpop.xlane.xlu0 %3735  ;;  %v3738_v63 = vpop.xlane.xlu1 %3737 }
 0xb6a   : > { %6479 = vpow2.f32 %v3777_v15  ;;  %v3761_v25 = vsub.f32 %v3713_v10, %v3736_v28  ;;  %v3762_v47 = vsub.f32 %v7921_v0, %v3738_v63 }
 0xb6b   : > { %6481 = vpow2.f32 %v3773_v17 }
 0xb6c   : > { %v3783_v18 = vmul.f32 1.442695, %v3761_v25  ;;  %v3785_v24 = vmul.f32 1.442695, %v3762_v47 }
 0xb6d   : > { %v3732_v39 = vpop.xlane.xlu0 %3731  ;;  %v3734_v61 = vpop.xlane.xlu1 %3733 }
 0xb6e   : > { %6483 = vpow2.f32 %v3783_v18  ;;  %v3759_v48 = vsub.f32 %v3711_v2, %v3732_v39  ;;  %v3760_v13 = vsub.f32 %v3712_v31, %v3734_v61 }
 0xb6f   : > { %v7952_v5 = vpop.eup %6475 }
 0xb70   : > { %v3779_v6 = vmul.f32 1.442695, %v3759_v48  ;;  %v3781_v46 = vmul.f32 1.442695, %v3760_v13  ;;  %3807 = vadd.xlane.f32.xlu1 %v7952_v5 }
 0xb71   : > { %v3744_v40 = vpop.xlane.xlu0 %3743  ;;  %v3746_v27 = vpop.xlane.xlu1 %3745 }
 0xb72   : > { %6485 = vpow2.f32 %v3779_v6  ;;  %v3765_v10 = vsub.f32 %v7924_v44, %v3744_v40  ;;  %v3766_v0 = vsub.f32 %v7926_v53, %v3746_v27 }
 0xb73   : > { %v7956_v33 = vpop.eup %6477  ;;  %6487 = vpow2.f32 %v3781_v46 }
 0xb74   : > { %3803 = vadd.xlane.f32.xlu1 %v7956_v33  ;;  %v3791_v18 = vmul.f32 1.442695, %v3765_v10  ;;  %6489 = vpow2.f32 %v3785_v24  ;;  %v3793_v44 = vmul.f32 1.442695, %v3766_v0  ;;  %v6226_v0 = vld [vmem:[#allocation2 + $0x20] ss:$12 sps:$4 sm:$0xff]  }
 0xb75   : > { %v3740_v2 = vpop.xlane.xlu0 %3739  ;;  %v3742_v37 = vpop.xlane.xlu1 %3741 }
 0xb76   : > { %v3763_v31 = vsub.f32 %v7930_v4, %v3740_v2  ;;  %6491 = vpow2.f32 %v3791_v18  ;;  %v3764_v15 = vsub.f32 %v7932_v19, %v3742_v37  ;;  %v6225_v18 = vld [vmem:[#allocation2 + $0x8] ss:$12 sps:$4 sm:$0xff]  }
 0xb77   : > { %v7961_v22 = vpop.eup %6479 }
 0xb78   : > { %v3787_v60 = vmul.f32 1.442695, %v3763_v31  ;;  %3809 = vadd.xlane.f32.xlu1 %v7961_v22  ;;  %v7965_v28 = vpop.eup %6481  ;;  %v3789_v4 = vmul.f32 1.442695, %v3764_v15 }
 0xb79   : > { %v3752_v17 = vpop.xlane.xlu0 %3751  ;;  %v3922_v6 = vpop.permute.xlu1 %3921 }
 0xb7a   : > { %6493 = vpow2.f32 %v3787_v60  ;;  %v3769_v53 = vsub.f32 %v7936_v26, %v3752_v17 }
 0xb7b   : > { %v7968_v63 = vpop.eup %6483  ;;  %6495 = vpow2.f32 %v3793_v44 }
 0xb7c   : > { %v3799_v25 = vmul.f32 1.442695, %v3769_v53  ;;  %3815 = vadd.xlane.f32.xlu0 %v7968_v63  ;;  %3805 = vadd.xlane.f32.xlu1 %v7965_v28 }
 0xb7d   : > { %v3748_v39 = vpop.xlane.xlu0 %3747 }
 0xb7e   : > { %6497 = vpow2.f32 %v3799_v25  ;;  %v3767_v61 = vsub.f32 %v7939_v56, %v3748_v39 }
 0xb7f   : > { %v7973_v19 = vpop.eup %6485  ;;  %6499 = vpow2.f32 %v3789_v4 }
 0xb80   : > { %v7975_v47 = vpop.eup %6487  ;;  %v3795_v48 = vmul.f32 1.442695, %v3767_v61  ;;  %3811 = vadd.xlane.f32.xlu0 %v7973_v19 }
 0xb81   : > { %3813 = vadd.xlane.f32.xlu1 %v7975_v47  ;;  %v3924_v26 = vpop.permute.xlu0 %3923  ;;  %v7979_v13 = vpop.eup %6489 }
 0xb82   : > { %6501 = vpow2.f32 %v3795_v48  ;;  %5814 = vmatprep.subr.bf16.mxu0 %v3924_v26 }
 0xb83   : > { %5815 = vmatpush3.bf16.msra.mxu0 %v3924_v26  ;;  %v7982_v56 = vpop.eup %6491 }
 0xb84   : > { %3817 = vadd.xlane.f32.xlu0 %v7979_v13  ;;  %5816 = vmatprep.subr.bf16.mxu0 %v3922_v6 }
 0xb87   : > { %v7984_v46 = vpop.eup %6493  ;;  %5817 = vmatpush3.bf16.msra.mxu0 %v3922_v6 }
 0xb88   : > { %3823 = vadd.xlane.f32.xlu0 %v7982_v56  ;;  %3819 = vadd.xlane.f32.xlu1 %v7984_v46  ;;  %v7988_v40 = vpop.eup %6495 }
 0xb8b   : > { %v7990_v27 = vpop.eup %6497 }
 0xb8c   : > { %3831 = vadd.xlane.f32.xlu1 %v7990_v27  ;;  %3825 = vadd.xlane.f32.xlu0 %v7988_v40  ;;  %v7994_v24 = vpop.eup %6499 }
 0xb8f   : > { %v7996_v10 = vpop.eup %6501 }
 0xb90   : > { %3827 = vadd.xlane.f32.xlu1 %v7996_v10  ;;  %3821 = vadd.xlane.f32.xlu0 %v7994_v24 }
 0xba1   : > { %3915 = vrot.lane.b32.xlu1 %v6225_v18, %s6807_s13 }
 0xba5   : > { %2624 = vrot.lane.b32.xlu1 %v7679_v1, %s6807_s13 }
 0xba6   : > { %3917 = vrot.lane.b32.xlu0 %v6226_v0, %s6807_s13 }
 0xba9   : > { %2626 = vrot.lane.b32.xlu1 %v7673_v62, %s6807_s13 }
 0xbaa   : > { %v3754_v2 = vpop.xlane.xlu1 %3753 }
 0xbab   : > { %v3770_v44 = vsub.f32 %v7944_v7, %v3754_v2 }
 0xbad   : > { %2628 = vrot.lane.b32.xlu1 %v7677_v50, %s6807_s13  ;;  %v3801_v62 = vmul.f32 1.442695, %v3770_v44 }
 0xbae   : > { %v3750_v31 = vpop.xlane.xlu1 %3749 }
 0xbaf   : > { %v3768_v37 = vsub.f32 %v7947_v35, %v3750_v31 }
 0xbb1   : > { %3339 = vrot.lane.b32.xlu1 %v7895_v41, %s6806_s12  ;;  %v3797_v15 = vmul.f32 1.442695, %v3768_v37 }
 0xbb2   : > { %v3920_v60 = vpop.permute.xlu1 %3919 }
 0xbb3   : > { %5818 = vmatprep.subr.bf16.mxu0 %v3920_v60  ;;  %6503 = vpow2.f32 %v3797_v15 }
 0xbb4   : > { %5819 = vmatpush3.bf16.msra.mxu0 %v3920_v60  ;;  %6505 = vpow2.f32 %v3801_v62 }
 0xbb5   : > { %3343 = vrot.lane.b32.xlu1 %v7893_v16, %s6806_s12 }
 0xbb9   : > { %2632 = vrot.lane.b32.xlu1 %v7687_v58, %s6807_s13 }
 0xbbd   : > { %2636 = vrot.lane.b32.xlu1 %v7685_v52, %s6807_s13 }
 0xbc0   : > { %v8020_v50 = vpop.eup %6503 }
 0xbc1   : > { %3347 = vrot.lane.b32.xlu1 %v7903_v32, %s6806_s12  ;;  %v8025_v1 = vpop.eup %6505 }
 0xbc5   : > { %3351 = vrot.lane.b32.xlu1 %v7901_v29, %s6806_s12  ;;  %3829 = vadd.xlane.f32.xlu0 %v8020_v50 }
 0xbc9   : > { %2640 = vrot.lane.b32.xlu1 %v7695_v11, %s6807_s13  ;;  %3833 = vadd.xlane.f32.xlu0 %v8025_v1 }
 0xbcd   : > { %2644 = vrot.lane.b32.xlu1 %v7693_v30, %s6807_s13 }
 0xbd1   : > { %3355 = vrot.lane.b32.xlu1 %v7911_v34, %s6806_s12 }
 0xbd5   : > { %3359 = vrot.lane.b32.xlu1 %v7909_v9, %s6806_s12 }
 0xbd9   : > { %2648 = vrot.lane.b32.xlu1 %v7703_v55, %s6807_s13 }
 0xbdd   : > { %2652 = vrot.lane.b32.xlu1 %v7701_v21, %s6807_s13 }
 0xbdf   : > { %2622 = vrot.lane.b32.xlu0 %v7675_v45, %s6807_s13 }
 0xbe1   : > { %3363 = vrot.lane.b32.xlu1 %v7919_v57, %s6806_s12 }
 0xbe3   : > { %3337 = vrot.lane.b32.xlu0 %v7891_v8, %s6806_s12 }
 0xbe7   : > { %3341 = vrot.lane.b32.xlu0 %v7889_v3, %s6806_s12 }
 0xbeb   : > { %2630 = vrot.lane.b32.xlu0 %v7683_v51, %s6807_s13 }
 0xbef   : > { %2634 = vrot.lane.b32.xlu0 %v7681_v42, %s6807_s13 }
 0xbf3   : > { %3345 = vrot.lane.b32.xlu0 %v7899_v14, %s6806_s12 }
 0xbf7   : > { %3349 = vrot.lane.b32.xlu0 %v7897_v54, %s6806_s12 }
 0xbf9   : > { %v3808_v45 = vpop.xlane.xlu1 %3807 }
 0xbfb   : > { %2638 = vrot.lane.b32.xlu0 %v7691_v38, %s6807_s13 }
 0xbfd   : > { %v3804_v52 = vpop.xlane.xlu1 %3803 }
 0xbfe   : > { %6507 = vrcp.f32 %v3804_v52 }
 0xbff   : > { %2642 = vrot.lane.b32.xlu0 %v7689_v43, %s6807_s13 }
 0xc01   : > { %v3810_v58 = vpop.xlane.xlu1 %3809 }
 0xc03   : > { %3353 = vrot.lane.b32.xlu0 %v7907_v36, %s6806_s12 }
 0xc05   : > { %v3816_v42 = vpop.xlane.xlu0 %3815  ;;  %v3806_v51 = vpop.xlane.xlu1 %3805 }
 0xc06   : > { %6509 = vrcp.f32 %v3806_v51 }
 0xc07   : > { %3357 = vrot.lane.b32.xlu0 %v7905_v12, %s6806_s12  ;;  %6511 = vrcp.f32 %v3810_v58 }
 0xc09   : > { %v3812_v30 = vpop.xlane.xlu0 %3811 }
 0xc0a   : > { %v3814_v38 = vpop.xlane.xlu1 %3813  ;;  %6513 = vrcp.f32 %v3812_v30 }
 0xc0b   : > { %2646 = vrot.lane.b32.xlu0 %v7699_v59, %s6807_s13  ;;  %6515 = vrcp.f32 %v3814_v38  ;;  %v6508_v55 = vpop.eup %6507 }
 0xc0c   : > { %6517 = vrcp.f32 %v3808_v45  ;;  %v3851_v59 = vmul.f32 %v6508_v55, %v7956_v33 }
 0xc0d   : > { %v3818_v11 = vpop.xlane.xlu0 %3817 }
 0xc0e   : > { %6519 = vrcp.f32 %v3818_v11 }
 0xc0f   : > { %2650 = vrot.lane.b32.xlu0 %v7697_v23, %s6807_s13  ;;  %6521 = vrcp.f32 %v3816_v42 }
 0xc11   : > { %v3824_v43 = vpop.xlane.xlu0 %3823  ;;  %v3820_v21 = vpop.xlane.xlu1 %3819 }
 0xc13   : > { %3361 = vrot.lane.b32.xlu0 %v7915_v49, %s6806_s12  ;;  %v6510_v3 = vpop.eup %6509 }
 0xc14   : > { %v3852_v41 = vmul.f32 %v6510_v3, %v7965_v28  ;;  %v6512_v29 = vpop.eup %6511 }
 0xc15   : > { %v3826_v8 = vpop.xlane.xlu0 %3825  ;;  %v8070_v16 = vpop.xlane.xlu1 %3831  ;;  %v3854_v49 = vmul.f32 %v6512_v29, %v7961_v22 }
 0xc16   : > { %v3867_v54 = vpack.c.bf16 %v3852_v41, %v3851_v59 }
 0xc17   : > { %v6514_v32 = vpop.eup %6513 }
 0xc18   : > { %5824 = vmatprep.mubr.bf16.mxu0 %v3867_v54  ;;  %v6516_v9 = vpop.eup %6515  ;;  %v3855_v7 = vmul.f32 %v6514_v32, %v7973_v19 }
 0xc19   : > { %v3822_v23 = vpop.xlane.xlu0 %3821  ;;  %v8074_v14 = vpop.xlane.xlu1 %3827  ;;  %v3856_v35 = vmul.f32 %v6516_v9, %v7975_v47 }
 0xc1a   : > { %6523 = vrcp.f32 %v3822_v23  ;;  %v6518_v34 = vpop.eup %6517 }
 0xc1b   : > { %6525 = vrcp.f32 %v3820_v21  ;;  %v3853_v33 = vmul.f32 %v6518_v34, %v7952_v5  ;;  %v6520_v28 = vpop.eup %6519  ;;  %v3869_v25 = vpack.c.bf16 %v3856_v35, %v3855_v7  ;;  %v6229_v7 = vld [vmem:[#allocation9 + $0x28] sm:$0xff]   ;;  %v6230_v35 = vld [vmem:[#allocation9 + $0x20] sm:$0xff]  }
 0xc1c   : > { %6527 = vrcp.f32 %v3826_v8  ;;  %v6522_v4 = vpop.eup %6521  ;;  %v3858_v61 = vmul.f32 %v6520_v28, %v7979_v13  ;;  %v6233_v28 = vld [vmem:[#allocation9 + $0x8] sm:$0xff]  }
 0xc1d   : > { %v3918_v12 = vpop.permute.xlu0 %3917  ;;  %v3916_v36 = vpop.permute.xlu1 %3915  ;;  %6529 = vrcp.f32 %v3824_v43  ;;  %v3868_v17 = vpack.c.bf16 %v3854_v49, %v3853_v33  ;;  %v3857_v5 = vmul.f32 %v6522_v4, %v7968_v63  ;;  %v6227_v49 = vld [vmem:[#allocation9 + $0x38] sm:$0xff]  }
 0xc1e   : > { %5820 = vmatprep.subr.bf16.mxu0 %v3918_v12  ;;  %6531 = vrcp.f32 %v8074_v14  ;;  %v6231_v33 = vld [vmem:[#allocation9 + $0x18] sm:$0xff]  }
 0xc1f   : > { %5821 = vmatpush3.bf16.msra.mxu0 %v3918_v12  ;;  %v3870_v26 = vpack.c.bf16 %v3858_v61, %v3857_v5 }
 0xc20   : > { %5822 = vmatprep.subr.bf16.mxu0 %v3916_v36 }
 0xc21   : > { %v2625_v57 = vpop.permute.xlu1 %2624 }
 0xc22   : > { %2672 = vst.msk [vmem:[#allocation3 + $0x8] sm:$0xff] %vm2670_vm1, %v2625_v57  ;;  %v6228_v57 = vld [vmem:[#allocation9 + $0x30] sm:$0xff]  }
 0xc23   : > { %5823 = vmatpush3.bf16.msra.mxu0 %v3916_v36 }
 0xc24   : > { %5840 = vmatprep.subr.bf16.mxu0 %v6227_v49 }
 0xc25   : > { %v2627_v53 = vpop.permute.xlu1 %2626 }
 0xc26   : > { %2673 = vst.msk [vmem:[#allocation3 + $0x10] sm:$0xff] %vm2670_vm1, %v2627_v53  ;;  %5825 = vmatmul.mubr.bf16.vlgmr.msra.gmra.mxu0 %v3868_v17  ;;  %v6232_v17 = vld [vmem:[#allocation9 + $0x10] sm:$0xff]  }
 0xc27   : > { %v6524_v22 = vpop.eup %6523  ;;  %5828 = vmatprep.mubr.bf16.mxu0 %v3869_v25  ;;  %5841 = vmatpush3.bf16.msra.mxu0 %v6227_v49  ;;  %v6234_v25 = vld [vmem:[#allocation9] sm:$0xff]  }
 0xc28   : > { %v6526_v39 = vpop.eup %6525  ;;  %v3860_v47 = vmul.f32 %v6524_v22, %v7994_v24  ;;  %5842 = vmatprep.subr.bf16.mxu0 %v6228_v57 }
 0xc29   : > { %v2629_v19 = vpop.permute.xlu1 %2628  ;;  %v3859_v48 = vmul.f32 %v6526_v39, %v7984_v46  ;;  %v6528_v6 = vpop.eup %6527 }
 0xc2a   : > { %2674 = vst.msk [vmem:[#allocation3 + $0x18] sm:$0xff] %vm2670_vm1, %v2629_v19  ;;  %v6530_v2 = vpop.eup %6529  ;;  %v3862_v13 = vmul.f32 %v6528_v6, %v7988_v40 }
 0xc2b   : > { %v3871_v0 = vpack.c.bf16 %v3860_v47, %v3859_v48  ;;  %v3861_v24 = vmul.f32 %v6530_v2, %v7982_v56  ;;  %v6532_v30 = vpop.eup %6531  ;;  %5843 = vmatpush3.bf16.msra.mxu0 %v6228_v57 }
 0xc2c   : > { %v3863_v21 = vmul.f32 %v6532_v30, %v7996_v10  ;;  %5844 = vmatprep.subr.bf16.mxu0 %v6229_v7 }
 0xc2d   : > { %v3340_v18 = vpop.permute.xlu1 %3339  ;;  %v3872_v63 = vpack.c.bf16 %v3862_v13, %v3861_v24 }
 0xc2e   : > { %3387 = vst.msk [vmem:[#allocation3 + $0x8] sm:$0xff] %vm3385_vm2, %v3340_v18  ;;  %5829 = vmatmul.mubr.bf16.gmra.mxu0 %v3870_v26 }
 0xc2f   : > { %5832 = vmatprep.mubr.bf16.mxu0 %v3871_v0  ;;  %5845 = vmatpush3.bf16.msra.mxu0 %v6229_v7  ;;  %v8535_v0 = vld [vmem:[#allocation21_spill] sm:$0xff] }
 0xc30   : > { %5846 = vmatprep.subr.bf16.mxu0 %v6230_v35 }
 0xc31   : > { %v3344_v31 = vpop.permute.xlu1 %3343 }
 0xc32   : > { %3389 = vst.msk [vmem:[#allocation3 + $0x18] sm:$0xff] %vm3385_vm2, %v3344_v31 }
 0xc33   : > { %5847 = vmatpush3.bf16.msra.mxu0 %v6230_v35 }
 0xc34   : > { %5848 = vmatprep.subr.bf16.mxu0 %v6231_v33 }
 0xc35   : > { %v2633_v37 = vpop.permute.xlu1 %2632 }
 0xc36   : > { %2676 = vst.msk [vmem:[#allocation3 + $0x28] sm:$0xff] %vm2670_vm1, %v2633_v37  ;;  %5833 = vmatmul.mubr.bf16.gmra.mxu0 %v3872_v63 }
 0xc37   : > { %5849 = vmatpush3.bf16.msra.mxu0 %v6231_v33  ;;  %v5292_v33 = vld [vmem:[%s8500_s6] ss:$0 sm:$0xff] }
 0xc38   : > { %5850 = vmatprep.subr.bf16.mxu0 %v6232_v17 }
 0xc39   : > { %v2637_v46 = vpop.permute.xlu1 %2636 }
 0xc3a   : > { %2678 = vst.msk [vmem:[#allocation3 + $0x38] sm:$0xff] %vm2670_vm1, %v2637_v46 }
 0xc3b   : > { %5851 = vmatpush3.bf16.msra.mxu0 %v6232_v17 }
 0xc3c   : > { %5852 = vmatprep.subr.bf16.mxu0 %v6233_v28 }
 0xc3d   : > { %v3348_v60 = vpop.permute.xlu1 %3347 }
 0xc3e   : > { %3391 = vst.msk [vmem:[#allocation3 + $0x28] sm:$0xff] %vm3385_vm2, %v3348_v60 }
 0xc3f   : > { %5853 = vmatpush3.bf16.msra.mxu0 %v6233_v28 }
 0xc40   : > { %5854 = vmatprep.subr.bf16.mxu0 %v6234_v25 }
 0xc41   : > { %v3352_v44 = vpop.permute.xlu1 %3351 }
 0xc42   : > { %3393 = vst.msk [vmem:[#allocation3 + $0x38] sm:$0xff] %vm3385_vm2, %v3352_v44 }
 0xc43   : > { %5855 = vmatpush3.bf16.msra.mxu0 %v6234_v25 }
 0xc45   : > { %v2641_v40 = vpop.permute.xlu1 %2640 }
 0xc46   : > { %2680 = vst.msk [vmem:[#allocation3 + $0x48] sm:$0xff] %vm2670_vm1, %v2641_v40 }
 0xc49   : > { %v2645_v15 = vpop.permute.xlu1 %2644 }
 0xc4a   : > { %2682 = vst.msk [vmem:[#allocation3 + $0x58] sm:$0xff] %vm2670_vm1, %v2645_v15 }
 0xc4d   : > { %v3356_v56 = vpop.permute.xlu1 %3355 }
 0xc4e   : > { %3395 = vst.msk [vmem:[#allocation3 + $0x48] sm:$0xff] %vm3385_vm2, %v3356_v56  ;;  %v3830_v62 = vpop.xlane.xlu0 %3829 }
 0xc4f   : > { %6533 = vrcp.f32 %v3830_v62 }
 0xc50   : > { %6535 = vrcp.f32 %v8070_v16 }
 0xc51   : > { %v3360_v45 = vpop.permute.xlu1 %3359 }
 0xc52   : > { %3397 = vst.msk [vmem:[#allocation3 + $0x58] sm:$0xff] %vm3385_vm2, %v3360_v45  ;;  %v3834_v52 = vpop.xlane.xlu0 %3833 }
 0xc53   : > { %6537 = vrcp.f32 %v3834_v52 }
 0xc55   : > { %v2649_v58 = vpop.permute.xlu1 %2648 }
 0xc56   : > { %2684 = vst.msk [vmem:[#allocation3 + $0x68] sm:$0xff] %vm2670_vm1, %v2649_v58  ;;  %v2623_v42 = vpop.permute.xlu0 %2622 }
 0xc57   : > { %2671 = vst.msk [vmem:[#allocation3] sm:$0xff] %vm2670_vm1, %v2623_v42 }
 0xc59   : > { %v2653_v51 = vpop.permute.xlu1 %2652 }
 0xc5a   : > { %2686 = vst.msk [vmem:[#allocation3 + $0x78] sm:$0xff] %vm2670_vm1, %v2653_v51  ;;  %v3338_v38 = vpop.permute.xlu0 %3337 }
 0xc5b   : > { %3386 = vst.msk [vmem:[#allocation3] sm:$0xff] %vm3385_vm2, %v3338_v38 }
 0xc5c   : > { %v6534_v11 = vpop.eup %6533 }
 0xc5d   : > { %v3364_v43 = vpop.permute.xlu1 %3363  ;;  %v3864_v55 = vmul.f32 %v6534_v11, %v8020_v50  ;;  %v6536_v3 = vpop.eup %6535 }
 0xc5e   : > { %3399 = vst.msk [vmem:[#allocation3 + $0x68] sm:$0xff] %vm3385_vm2, %v3364_v43  ;;  %v3342_v8 = vpop.permute.xlu0 %3341  ;;  %v3865_v41 = vmul.f32 %v6536_v3, %v7990_v27 }
 0xc5f   : > { %3388 = vst.msk [vmem:[#allocation3 + $0x10] sm:$0xff] %vm3385_vm2, %v3342_v8  ;;  %v3873_v16 = vpack.c.bf16 %v3864_v55, %v3863_v21 }
 0xc60   : > { %v6538_v59 = vpop.eup %6537 }
 0xc61   : > { %5836 = vmatprep.mubr.bf16.mxu0 %v3873_v16  ;;  %v3866_v54 = vmul.f32 %v6538_v59, %v8025_v1 }
 0xc62   : > { %v2631_v23 = vpop.permute.xlu0 %2630 }
 0xc63   : > { %2675 = vst.msk [vmem:[#allocation3 + $0x20] sm:$0xff] %vm2670_vm1, %v2631_v23  ;;  %v3874_v14 = vpack.c.bf16 %v3866_v54, %v3865_v41 }
 0xc65   : > { %5837 = vmatmul.mubr.bf16.gmra.mxu0 %v3874_v14 }
 0xc66   : > { %v2635_v10 = vpop.permute.xlu0 %2634 }
 0xc67   : > { %2677 = vst.msk [vmem:[#allocation3 + $0x30] sm:$0xff] %vm2670_vm1, %v2635_v10 }
 0xc6a   : > { %v3346_v50 = vpop.permute.xlu0 %3345 }
 0xc6b   : > { %3390 = vst.msk [vmem:[#allocation3 + $0x20] sm:$0xff] %vm3385_vm2, %v3346_v50 }
 0xc6e   : > { %v3350_v29 = vpop.permute.xlu0 %3349 }
 0xc6f   : > { %3392 = vst.msk [vmem:[#allocation3 + $0x30] sm:$0xff] %vm3385_vm2, %v3350_v29 }
 0xc72   : > { %v2639_v32 = vpop.permute.xlu0 %2638 }
 0xc73   : > { %2679 = vst.msk [vmem:[#allocation3 + $0x40] sm:$0xff] %vm2670_vm1, %v2639_v32 }
 0xc76   : > { %v2643_v27 = vpop.permute.xlu0 %2642 }
 0xc77   : > { %2681 = vst.msk [vmem:[#allocation3 + $0x50] sm:$0xff] %vm2670_vm1, %v2643_v27 }
 0xc7a   : > { %v3354_v1 = vpop.permute.xlu0 %3353 }
 0xc7b   : > { %3394 = vst.msk [vmem:[#allocation3 + $0x40] sm:$0xff] %vm3385_vm2, %v3354_v1 }
 0xc7e   : > { %v3358_v12 = vpop.permute.xlu0 %3357 }
 0xc7f   : > { %3396 = vst.msk [vmem:[#allocation3 + $0x50] sm:$0xff] %vm3385_vm2, %v3358_v12 }
 0xc82   : > { %v2647_v36 = vpop.permute.xlu0 %2646 }
 0xc83   : > { %2683 = vst.msk [vmem:[#allocation3 + $0x60] sm:$0xff] %vm2670_vm1, %v2647_v36 }
 0xc86   : > { %v2651_v9 = vpop.permute.xlu0 %2650 }
 0xc87   : > { %2685 = vst.msk [vmem:[#allocation3 + $0x70] sm:$0xff] %vm2670_vm1, %v2651_v9 }
 0xc8a   : > { %v3362_v34 = vpop.permute.xlu0 %3361 }
 0xc8b   : > { %3398 = vst.msk [vmem:[#allocation3 + $0x60] sm:$0xff] %vm3385_vm2, %v3362_v34 }
 0xce6   : > { %v5826_v53 = vpop.f32.mrf.mxu0 }
 0xce7   : > { %4056 = vrot.lane.b32.xlu0 %v5826_v53, %s6805_s17 }
 0xce8   : > { %v3973_v4 = vpop.f32.mrf.mxu0 }
 0xcea   : > { %v5827_v22 = vpop.f32.mrf.mxu0 }
 0xceb   : > { %4052 = vrot.lane.b32.xlu0 %v3973_v4, %s6805_s17  ;;  %4058 = vrot.lane.b32.xlu1 %v5827_v22, %s6805_s17 }
 0xcec   : > { %v3976_v39 = vpop.f32.mrf.mxu0 }
 0xcee   : > { %v5830_v61 = vpop.f32.mrf.mxu0 }
 0xcef   : > { %4054 = vrot.lane.b32.xlu1 %v3976_v39, %s6805_s17  ;;  %4064 = vrot.lane.b32.xlu0 %v5830_v61, %s6805_s17 }
 0xcf0   : > { %v3989_v19 = vpop.f32.mrf.mxu0 }
 0xcf2   : > { %v5831_v47 = vpop.f32.mrf.mxu0 }
 0xcf3   : > { %4060 = vrot.lane.b32.xlu0 %v3989_v19, %s6805_s17  ;;  %4066 = vrot.lane.b32.xlu1 %v5831_v47, %s6805_s17 }
 0xcf4   : > { %v3992_v5 = vpop.f32.mrf.mxu0 }
 0xcf6   : > { %v5834_v48 = vpop.f32.mrf.mxu0 }
 0xcf7   : > { %4062 = vrot.lane.b32.xlu1 %v3992_v5, %s6805_s17  ;;  %4072 = vrot.lane.b32.xlu0 %v5834_v48, %s6805_s17 }
 0xcf8   : > { %v4005_v26 = vpop.f32.mrf.mxu0 }
 0xcfa   : > { %v5835_v6 = vpop.f32.mrf.mxu0 }
 0xcfb   : > { %4068 = vrot.lane.b32.xlu0 %v4005_v26, %s6805_s17  ;;  %4074 = vrot.lane.b32.xlu1 %v5835_v6, %s6805_s17 }
 0xcfc   : > { %v4008_v18 = vpop.f32.mrf.mxu0 }
 0xcff   : > { %3365 = vrot.lane.b32.xlu0 %v7913_v20, %s6806_s12  ;;  %4070 = vrot.lane.b32.xlu1 %v4008_v18, %s6805_s17 }
 0xd03   : > { %3367 = vrot.lane.b32.xlu1 %v8535_v0, %s6806_s12  ;;  %s8392_s12 = scalar_lea.vmem [#allocation13], %s5100_s9  ;;  %s8538_s9 = sld [smem:[#allocation19_spill]] }
 0xd04   : > { %s4964_s15 = sshll.u32 %s8392_s12, 4  ;;  %s8443_s15 = int_to_ptr.vmem [resolvable:$true] %s4964_s15 }
 0xd05   : > { %s6703_s5 = scalar_lea.vmem %s8443_s15, 2048 }
 0xd06   : > { %p6704_p4 = scmp.ne.s32.totalorder %s8443_s15, %s6703_s5 }
 0xd08   : > { %p6705_p8 = pnand %p6704_p4, %p6992_p7 }
 0xd09   : > { %s5359_s13 = sshll.u32 %s8538_s9, 11 }
 0xd0a   : > { %s8441_s19 = scalar_lea.hbm %s8539_s24, %s5359_s13  ;;  %p6706_p9 = pneg %p6705_p8 }
 0xd25   : > { %v5838_v2 = vpop.f32.mrf.mxu0 }
 0xd27   : > { %v4021_v13 = vpop.f32.mrf.mxu0 }
 0xd28   : > { %4076 = vrot.lane.b32.xlu0 %v4021_v13, %s6805_s17 }
 0xd29   : > { %v5839_v31 = vpop.f32.mrf.mxu0 }
 0xd2b   : > { %v4024_v24 = vpop.f32.mrf.mxu0 }
 0xd2c   : > { %4080 = vrot.lane.b32.xlu0 %v5838_v2, %s6805_s17  ;;  %4078 = vrot.lane.b32.xlu1 %v4024_v24, %s6805_s17 }
 0xd30   : > { %4082 = vrot.lane.b32.xlu1 %v5839_v31, %s6805_s17  ;;  %s8537_s17 = sld [smem:[#allocation26_spill]] }
 0xd59   : > { %v4057_v63 = vpop.permute.xlu0 %4056 }
 0xd5a   : > { %4103 = vst.msk [vmem:[#allocation3 + $0x10] sm:$0xff] %vm4100_vm3, %v4057_v63 }
 0xd5d   : > { %v4053_v20 = vpop.permute.xlu0 %4052  ;;  %v4059_v37 = vpop.permute.xlu1 %4058 }
 0xd5e   : > { %4101 = vst.msk [vmem:[#allocation3] sm:$0xff] %vm4100_vm3, %v4053_v20  ;;  %4104 = vst.msk [vmem:[#allocation3 + $0x18] sm:$0xff] %vm4100_vm3, %v4059_v37 }
 0xd61   : > { %v4065_v46 = vpop.permute.xlu0 %4064  ;;  %v4055_v60 = vpop.permute.xlu1 %4054  ;;  %v4119_v42 = vld [vmem:[#allocation3 + $0x10] sm:$0xff] }
 0xd62   : > { %4107 = vst.msk [vmem:[#allocation3 + $0x30] sm:$0xff] %vm4100_vm3, %v4065_v46  ;;  %4102 = vst.msk [vmem:[#allocation3 + $0x8] sm:$0xff] %vm4100_vm3, %v4055_v60 }
 0xd65   : > { %v4061_v44 = vpop.permute.xlu0 %4060  ;;  %v4067_v40 = vpop.permute.xlu1 %4066  ;;  %v4120_v15 = vld [vmem:[#allocation3 + $0x18] sm:$0xff]  ;;  %v4117_v45 = vld [vmem:[#allocation3] sm:$0xff] }
 0xd66   : > { %4105 = vst.msk [vmem:[#allocation3 + $0x20] sm:$0xff] %vm4100_vm3, %v4061_v44  ;;  %4108 = vst.msk [vmem:[#allocation3 + $0x38] sm:$0xff] %vm4100_vm3, %v4067_v40  ;;  %v4134_v51 = vpack.c.bf16 %v4120_v15, %v4119_v42 }
 0xd69   : > { %v4073_v56 = vpop.permute.xlu0 %4072  ;;  %v4063_v62 = vpop.permute.xlu1 %4062  ;;  %v4118_v52 = vld [vmem:[#allocation3 + $0x8] sm:$0xff]  ;;  %v4123_v16 = vld [vmem:[#allocation3 + $0x30] sm:$0xff] }
 0xd6a   : > { %4111 = vst.msk [vmem:[#allocation3 + $0x50] sm:$0xff] %vm4100_vm3, %v4073_v56  ;;  %4106 = vst.msk [vmem:[#allocation3 + $0x28] sm:$0xff] %vm4100_vm3, %v4063_v62  ;;  %v4133_v58 = vpack.c.bf16 %v4118_v52, %v4117_v45 }
 0xd6c   : > { %5856 = vmatprep.mubr.bf16.mxu0 %v4133_v58 }
 0xd6d   : > { %v4069_v30 = vpop.permute.xlu0 %4068  ;;  %5857 = vmatmul.mubr.bf16.vlgmr.msra.gmra.mxu0 %v4134_v51  ;;  %v4075_v38 = vpop.permute.xlu1 %4074  ;;  %v4124_v11 = vld [vmem:[#allocation3 + $0x38] sm:$0xff]  ;;  %v4121_v55 = vld [vmem:[#allocation3 + $0x20] sm:$0xff] }
 0xd6e   : > { %4109 = vst.msk [vmem:[#allocation3 + $0x40] sm:$0xff] %vm4100_vm3, %v4069_v30  ;;  %4112 = vst.msk [vmem:[#allocation3 + $0x58] sm:$0xff] %vm4100_vm3, %v4075_v38  ;;  %v4136_v59 = vpack.c.bf16 %v4124_v11, %v4123_v16 }
 0xd71   : > { %v3366_v43 = vpop.permute.xlu0 %3365  ;;  %v4071_v21 = vpop.permute.xlu1 %4070  ;;  %v4122_v3 = vld [vmem:[#allocation3 + $0x28] sm:$0xff]  ;;  %v4127_v50 = vld [vmem:[#allocation3 + $0x50] sm:$0xff] }
 0xd72   : > { %3400 = vst.msk [vmem:[#allocation3 + $0x70] sm:$0xff] %vm3385_vm2, %v3366_v43  ;;  %v4135_v8 = vpack.c.bf16 %v4122_v3, %v4121_v55 }
 0xd73   : > { %4110 = vst.msk [vmem:[#allocation3 + $0x48] sm:$0xff] %vm4100_vm3, %v4071_v21 }
 0xd74   : > { %5860 = vmatprep.mubr.bf16.mxu0 %v4135_v8 }
 0xd75   : > { %5861 = vmatmul.mubr.bf16.gmra.mxu0 %v4136_v59  ;;  %v3368_v41 = vpop.permute.xlu1 %3367  ;;  %v4128_v54 = vld [vmem:[#allocation3 + $0x58] sm:$0xff]  ;;  %v4125_v23 = vld [vmem:[#allocation3 + $0x40] sm:$0xff] }
 0xd76   : > { %3401 = vst.msk [vmem:[#allocation3 + $0x78] sm:$0xff] %vm3385_vm2, %v3368_v41  ;;  %v4138_v29 = vpack.c.bf16 %v4128_v54, %v4127_v50 }
 0xd7a   : > { %v4126_v14 = vld [vmem:[#allocation3 + $0x48] sm:$0xff] }
 0xd7b   : > { %v4137_v10 = vpack.c.bf16 %v4126_v14, %v4125_v23 }
 0xd7d   : > { %5864 = vmatprep.mubr.bf16.mxu0 %v4137_v10 }
 0xd7e   : > { %5865 = vmatmul.mubr.bf16.gmra.mxu0 %v4138_v29 }
 0xd9a   : > { %v4077_v32 = vpop.permute.xlu0 %4076 }
 0xd9b   : > { %4113 = vst.msk [vmem:[#allocation3 + $0x60] sm:$0xff] %vm4100_vm3, %v4077_v32 }
 0xd9e   : > { %v4081_v27 = vpop.permute.xlu0 %4080  ;;  %v4079_v1 = vpop.permute.xlu1 %4078 }
 0xd9f   : > { %4115 = vst.msk [vmem:[#allocation3 + $0x70] sm:$0xff] %vm4100_vm3, %v4081_v27  ;;  %4114 = vst.msk [vmem:[#allocation3 + $0x68] sm:$0xff] %vm4100_vm3, %v4079_v1 }
 0xda2   : > { %v4083_v12 = vpop.permute.xlu1 %4082  ;;  %v4129_v36 = vld [vmem:[#allocation3 + $0x60] sm:$0xff] }
 0xda3   : > { %4116 = vst.msk [vmem:[#allocation3 + $0x78] sm:$0xff] %vm4100_vm3, %v4083_v12 }
 0xda6   : > { %v4130_v9 = vld [vmem:[#allocation3 + $0x68] sm:$0xff]  ;;  %v4131_v49 = vld [vmem:[#allocation3 + $0x70] sm:$0xff] }
 0xda7   : > { %v4139_v34 = vpack.c.bf16 %v4130_v9, %v4129_v36 }
 0xda9   : > { %5868 = vmatprep.mubr.bf16.mxu0 %v4139_v34 }
 0xdaa   : > { %v4132_v57 = vld [vmem:[#allocation3 + $0x78] sm:$0xff] }
 0xdab   : > { %v4140_v7 = vpack.c.bf16 %v4132_v57, %v4131_v49 }
 0xdad   : > { %5869 = vmatmul.mubr.bf16.gmra.mxu0 %v4140_v7 }
 0xe2d   : > { %v5858_v35 = vpop.f32.mrf.mxu0 }
 0xe2e   : > { %v4255_v25 = vadd.f32 %v5858_v35, %v5292_v33 }
 0xe2f   : > { %v4246_v17 = vpop.f32.mrf.mxu0 }
 0xe30   : > { %v4247_v28 = vadd.f32 %v5292_v33, %v4246_v17  ;;  %v8166_v19 = vadd.f32 4.0, %v4255_v25 }
 0xe31   : > { %v5859_v53 = vpop.f32.mrf.mxu0 }
 0xe32   : > { %v8163_v4 = vadd.f32 4.0, %v4247_v28  ;;  %v4258_v47 = vadd.f32 %v5859_v53, %v5292_v33 }
 0xe33   : > { %v4249_v22 = vpop.f32.mrf.mxu0 }
 0xe34   : > { %v4250_v39 = vadd.f32 %v5292_v33, %v4249_v22  ;;  %4327 = vadd.xlane.f32.xlu0 %v8163_v4  ;;  %v8172_v6 = vadd.f32 4.0, %v4258_v47 }
 0xe35   : > { %v5862_v61 = vpop.f32.mrf.mxu0 }
 0xe36   : > { %v8168_v5 = vadd.f32 4.0, %v4250_v39  ;;  %v4271_v31 = vadd.f32 %v5862_v61, %v5292_v33 }
 0xe37   : > { %v4262_v48 = vpop.f32.mrf.mxu0 }
 0xe38   : > { %4329 = vadd.xlane.f32.xlu1 %v8168_v5  ;;  %4331 = vadd.xlane.f32.xlu0 %v8166_v19  ;;  %v4263_v18 = vadd.f32 %v5292_v33, %v4262_v48  ;;  %v8181_v60 = vadd.f32 4.0, %v4271_v31 }
 0xe39   : > { %v5863_v26 = vpop.f32.mrf.mxu0 }
 0xe3a   : > { %v8175_v24 = vadd.f32 4.0, %v4263_v18  ;;  %v4274_v63 = vadd.f32 %v5863_v26, %v5292_v33 }
 0xe3b   : > { %v4265_v0 = vpop.f32.mrf.mxu0 }
 0xe3c   : > { %v4266_v2 = vadd.f32 %v5292_v33, %v4265_v0  ;;  %4333 = vadd.xlane.f32.xlu0 %v8172_v6  ;;  %v8183_v44 = vadd.f32 4.0, %v4274_v63 }
 0xe3e   : > { %v5866_v13 = vpop.f32.mrf.mxu0  ;;  %v8177_v20 = vadd.f32 4.0, %v4266_v2 }
 0xe3f   : > { %v4287_v62 = vadd.f32 %v5866_v13, %v5292_v33 }
 0xe40   : > { %v4278_v37 = vpop.f32.mrf.mxu0  ;;  %4337 = vadd.xlane.f32.xlu1 %v8177_v20  ;;  %4335 = vadd.xlane.f32.xlu0 %v8175_v24 }
 0xe41   : > { %v4279_v40 = vadd.f32 %v5292_v33, %v4278_v37  ;;  %v8193_v42 = vadd.f32 4.0, %v4287_v62 }
 0xe42   : > { %v5867_v46 = vpop.f32.mrf.mxu0 }
 0xe43   : > { %v8187_v45 = vadd.f32 4.0, %v4279_v40  ;;  %v4290_v52 = vadd.f32 %v5867_v46, %v5292_v33 }
 0xe44   : > { %v4281_v15 = vpop.f32.mrf.mxu0  ;;  %4341 = vadd.xlane.f32.xlu1 %v8183_v44  ;;  %4339 = vadd.xlane.f32.xlu0 %v8181_v60 }
 0xe45   : > { %v4282_v56 = vadd.f32 %v5292_v33, %v4281_v15  ;;  %v8195_v51 = vadd.f32 4.0, %v4290_v52  ;;  %v6235_v15 = vld [vmem:[#allocation10 + $0x38] sm:$0xff]  }
 0xe46   : > { %5872 = vmatprep.subr.bf16.mxu1 %v6235_v15 }
 0xe47   : > { %v8189_v58 = vadd.f32 4.0, %v4282_v56  ;;  %5873 = vmatpush3.bf16.msra.mxu1 %v6235_v15  ;;  %v8307_v15 = vld [vmem:[#allocation12 + $0x18] sm:$0xff]  }
 0xe48   : > { %4343 = vadd.xlane.f32.xlu0 %v8187_v45 }
 0xe49   : > { %4345 = vadd.xlane.f32.xlu1 %v8189_v58 }
 0xe4c   : > { %4347 = vadd.xlane.f32.xlu0 %v8193_v42 }
 0xe4d   : > { %4349 = vadd.xlane.f32.xlu1 %v8195_v51 }
 0xe6d   : > { %v5870_v30 = vpop.f32.mrf.mxu0 }
 0xe6e   : > { %v4303_v21 = vadd.f32 %v5870_v30, %v5292_v33 }
 0xe6f   : > { %v4294_v38 = vpop.f32.mrf.mxu0 }
 0xe70   : > { %v4295_v11 = vadd.f32 %v5292_v33, %v4294_v38  ;;  %v8202_v16 = vadd.f32 4.0, %v4303_v21 }
 0xe71   : > { %v5871_v43 = vpop.f32.mrf.mxu0 }
 0xe72   : > { %v8199_v55 = vadd.f32 4.0, %v4295_v11  ;;  %v4306_v59 = vadd.f32 %v5871_v43, %v5292_v33 }
 0xe73   : > { %v4297_v3 = vpop.f32.mrf.mxu0 }
 0xe74   : > { %v4298_v8 = vadd.f32 %v5292_v33, %v4297_v3  ;;  %4351 = vadd.xlane.f32.xlu0 %v8199_v55  ;;  %v8208_v54 = vadd.f32 4.0, %v4306_v59 }
 0xe76   : > { %v8204_v41 = vadd.f32 4.0, %v4298_v8 }
 0xe78   : > { %4353 = vadd.xlane.f32.xlu1 %v8204_v41  ;;  %4355 = vadd.xlane.f32.xlu0 %v8202_v16 }
 0xe7c   : > { %4357 = vadd.xlane.f32.xlu1 %v8208_v54 }
 0xebd   : > { %v4328_v23 = vpop.xlane.xlu0 %4327 }
 0xebe   : > { %v4360_v14 = vmul.f32 0.0078125, %v4328_v23 }
 0xec0   : > { %v8212_v10 = vsub.f32 %v8163_v4, %v4360_v14  ;;  %v6236_v14 = vld [vmem:[#allocation10 + $0x30] sm:$0xff]  }
 0xec1   : > { %v4332_v50 = vpop.xlane.xlu0 %4331  ;;  %v4330_v29 = vpop.xlane.xlu1 %4329  ;;  %5874 = vmatprep.subr.bf16.mxu1 %v6236_v14 }
 0xec2   : > { %v4362_v32 = vmul.f32 0.0078125, %v4332_v50  ;;  %v4361_v27 = vmul.f32 0.0078125, %v4330_v29  ;;  %v4392_v1 = vmul.f32 %v8212_v10, %v8212_v10  ;;  %5875 = vmatpush3.bf16.msra.mxu1 %v6236_v14  ;;  %v6237_v50 = vld [vmem:[#allocation10 + $0x28] sm:$0xff]   ;;  %v6238_v29 = vld [vmem:[#allocation10 + $0x20] sm:$0xff]  }
 0xec3   : > { %5876 = vmatprep.subr.bf16.mxu1 %v6237_v50 }
 0xec4   : > { %v8217_v12 = vsub.f32 %v8166_v19, %v4362_v32  ;;  %v8220_v36 = vsub.f32 %v8168_v5, %v4361_v27  ;;  %4408 = vadd.xlane.f32.xlu0 %v4392_v1  ;;  %v6239_v32 = vld [vmem:[#allocation10 + $0x18] sm:$0xff]   ;;  %v6240_v27 = vld [vmem:[#allocation10 + $0x10] sm:$0xff]   ;;  %v6241_v1 = vld [vmem:[#allocation10 + $0x8] sm:$0xff]  }
 0xec5   : > { %v4334_v9 = vpop.xlane.xlu0 %4333 }
 0xec6   : > { %v4363_v34 = vmul.f32 0.0078125, %v4334_v9  ;;  %v4394_v49 = vmul.f32 %v8217_v12, %v8217_v12  ;;  %v4393_v57 = vmul.f32 %v8220_v36, %v8220_v36  ;;  %5877 = vmatpush3.bf16.msra.mxu1 %v6237_v50  ;;  %v6242_v9 = vld [vmem:[#allocation10] sm:$0xff]  }
 0xec7   : > { %5878 = vmatprep.subr.bf16.mxu1 %v6238_v29 }
 0xec8   : > { %v8227_v7 = vsub.f32 %v8172_v6, %v4363_v34  ;;  %4412 = vadd.xlane.f32.xlu0 %v4394_v49  ;;  %4410 = vadd.xlane.f32.xlu1 %v4393_v57 }
 0xec9   : > { %v4336_v35 = vpop.xlane.xlu0 %4335  ;;  %v4338_v33 = vpop.xlane.xlu1 %4337 }
 0xeca   : > { %v4364_v17 = vmul.f32 0.0078125, %v4336_v35  ;;  %v4365_v28 = vmul.f32 0.0078125, %v4338_v33  ;;  %v4395_v53 = vmul.f32 %v8227_v7, %v8227_v7  ;;  %5879 = vmatpush3.bf16.msra.mxu1 %v6238_v29 }
 0xecb   : > { %5880 = vmatprep.subr.bf16.mxu1 %v6239_v32 }
 0xecc   : > { %v8232_v25 = vsub.f32 %v8175_v24, %v4364_v17  ;;  %v8235_v22 = vsub.f32 %v8177_v20, %v4365_v28  ;;  %4414 = vadd.xlane.f32.xlu1 %v4395_v53 }
 0xecd   : > { %v4340_v39 = vpop.xlane.xlu0 %4339  ;;  %v4342_v61 = vpop.xlane.xlu1 %4341 }
 0xece   : > { %v4366_v47 = vmul.f32 0.0078125, %v4340_v39  ;;  %v4367_v48 = vmul.f32 0.0078125, %v4342_v61  ;;  %v4396_v26 = vmul.f32 %v8232_v25, %v8232_v25  ;;  %v4397_v18 = vmul.f32 %v8235_v22, %v8235_v22  ;;  %5881 = vmatpush3.bf16.msra.mxu1 %v6239_v32 }
 0xecf   : > { %5882 = vmatprep.subr.bf16.mxu1 %v6240_v27 }
 0xed0   : > { %v8242_v0 = vsub.f32 %v8181_v60, %v4366_v47  ;;  %v8245_v2 = vsub.f32 %v8183_v44, %v4367_v48  ;;  %4416 = vadd.xlane.f32.xlu0 %v4396_v26  ;;  %4418 = vadd.xlane.f32.xlu1 %v4397_v18 }
 0xed1   : > { %v4344_v13 = vpop.xlane.xlu0 %4343 }
 0xed2   : > { %v4346_v31 = vpop.xlane.xlu1 %4345  ;;  %v4368_v63 = vmul.f32 0.0078125, %v4344_v13  ;;  %v4398_v46 = vmul.f32 %v8242_v0, %v8242_v0  ;;  %v4399_v40 = vmul.f32 %v8245_v2, %v8245_v2  ;;  %5883 = vmatpush3.bf16.msra.mxu1 %v6240_v27 }
 0xed3   : > { %v4369_v37 = vmul.f32 0.0078125, %v4346_v31  ;;  %5884 = vmatprep.subr.bf16.mxu1 %v6241_v1 }
 0xed4   : > { %v8252_v56 = vsub.f32 %v8187_v45, %v4368_v63  ;;  %4420 = vadd.xlane.f32.xlu0 %v4398_v46  ;;  %4422 = vadd.xlane.f32.xlu1 %v4399_v40  ;;  %v8291_v63 = vld [vmem:[#allocation12 + $0x38] sm:$0xff]   ;;  %v8299_v46 = vld [vmem:[#allocation12 + $0x28] sm:$0xff]   ;;  %v8303_v40 = vld [vmem:[#allocation12 + $0x20] sm:$0xff]  }
 0xed5   : > { %v8255_v62 = vsub.f32 %v8189_v58, %v4369_v37  ;;  %v4348_v52 = vpop.xlane.xlu0 %4347  ;;  %v8293_v37 = vld [vmem:[#allocation12 + $0x30] sm:$0xff]   ;;  %5904 = vmatprep.subr.bf16.mxu0 %v8291_v63 }
 0xed6   : > { %v4350_v30 = vpop.xlane.xlu1 %4349  ;;  %v4370_v38 = vmul.f32 0.0078125, %v4348_v52  ;;  %v4400_v43 = vmul.f32 %v8252_v56, %v8252_v56  ;;  %5885 = vmatpush3.bf16.msra.mxu1 %v6241_v1  ;;  %5905 = vmatpush3.bf16.msra.mxu0 %v8291_v63 }
 0xed7   : > { %v4371_v11 = vmul.f32 0.0078125, %v4350_v30  ;;  %v4401_v21 = vmul.f32 %v8255_v62, %v8255_v62  ;;  %5886 = vmatprep.subr.bf16.mxu1 %v6242_v9  ;;  %5906 = vmatprep.subr.bf16.mxu0 %v8293_v37 }
 0xed8   : > { %v8262_v3 = vsub.f32 %v8193_v42, %v4370_v38  ;;  %4424 = vadd.xlane.f32.xlu0 %v4400_v43 }
 0xed9   : > { %v8265_v8 = vsub.f32 %v8195_v51, %v4371_v11  ;;  %4426 = vadd.xlane.f32.xlu1 %v4401_v21 }
 0xeda   : > { %v4402_v59 = vmul.f32 %v8262_v3, %v8262_v3  ;;  %5887 = vmatpush3.bf16.msra.mxu1 %v6242_v9  ;;  %5907 = vmatpush3.bf16.msra.mxu0 %v8293_v37 }
 0xedb   : > { %v4403_v23 = vmul.f32 %v8265_v8, %v8265_v8  ;;  %5936 = vmatprep.subr.bf16.mxu1 %v8291_v63  ;;  %5908 = vmatprep.subr.bf16.mxu0 %v8299_v46 }
 0xedc   : > { %4428 = vadd.xlane.f32.xlu0 %v4402_v59 }
 0xedd   : > { %4430 = vadd.xlane.f32.xlu1 %v4403_v23 }
 0xede   : > { %5909 = vmatpush3.bf16.msra.mxu0 %v8299_v46 }
 0xedf   : > { %5910 = vmatprep.subr.bf16.mxu0 %v8303_v40 }
 0xee2   : > { %5911 = vmatpush3.bf16.msra.mxu0 %v8303_v40 }
 0xee3   : > { %5912 = vmatprep.subr.bf16.mxu0 %v8307_v15 }
 0xee6   : > { %5913 = vmatpush3.bf16.msra.mxu0 %v8307_v15 }
 0xefd   : > { %v4352_v34 = vpop.xlane.xlu0 %4351 }
 0xefe   : > { %v4372_v49 = vmul.f32 0.0078125, %v4352_v34 }
 0xf00   : > { %v8272_v57 = vsub.f32 %v8199_v55, %v4372_v49 }
 0xf01   : > { %v4356_v35 = vpop.xlane.xlu0 %4355  ;;  %v4354_v33 = vpop.xlane.xlu1 %4353 }
 0xf02   : > { %v4374_v17 = vmul.f32 0.0078125, %v4356_v35  ;;  %v4373_v28 = vmul.f32 0.0078125, %v4354_v33  ;;  %v4404_v53 = vmul.f32 %v8272_v57, %v8272_v57 }
 0xf04   : > { %v8277_v39 = vsub.f32 %v8202_v16, %v4374_v17  ;;  %v8280_v61 = vsub.f32 %v8204_v41, %v4373_v28  ;;  %4432 = vadd.xlane.f32.xlu0 %v4404_v53 }
 0xf05   : > { %v4358_v47 = vpop.xlane.xlu1 %4357 }
 0xf06   : > { %v4375_v48 = vmul.f32 0.0078125, %v4358_v47  ;;  %v4406_v26 = vmul.f32 %v8277_v39, %v8277_v39  ;;  %v4405_v18 = vmul.f32 %v8280_v61, %v8280_v61 }
 0xf08   : > { %v8287_v13 = vsub.f32 %v8208_v54, %v4375_v48  ;;  %4436 = vadd.xlane.f32.xlu0 %v4406_v26  ;;  %4434 = vadd.xlane.f32.xlu1 %v4405_v18 }
 0xf0a   : > { %v4407_v31 = vmul.f32 %v8287_v13, %v8287_v13 }
 0xf0c   : > { %4438 = vadd.xlane.f32.xlu1 %v4407_v31 }
 0xf4d   : > { %v4409_v52 = vpop.xlane.xlu0 %4408 }
 0xf4e   : > { %v4440_v30 = vmul.f32 0.0078125, %v4409_v52 }
 0xf50   : > { %v4456_v38 = vadd.f32 1e-05, %v4440_v30 }
 0xf51   : > { %v4413_v11 = vpop.xlane.xlu0 %4412  ;;  %v4411_v43 = vpop.xlane.xlu1 %4410 }
 0xf52   : > { %6539 = vrsqrt.f32 %v4456_v38  ;;  %v4442_v21 = vmul.f32 0.0078125, %v4413_v11  ;;  %v4441_v59 = vmul.f32 0.0078125, %v4411_v43  ;;  %v8316_v11 = vld [vmem:[%s8501_s7] ss:$0 sm:$0xff] }
 0xf54   : > { %v4458_v23 = vadd.f32 1e-05, %v4442_v21  ;;  %v4457_v14 = vadd.f32 1e-05, %v4441_v59 }
 0xf55   : > { %v4415_v50 = vpop.xlane.xlu1 %4414 }
 0xf56   : > { %6541 = vrsqrt.f32 %v4458_v23  ;;  %v4443_v29 = vmul.f32 0.0078125, %v4415_v50 }
 0xf57   : > { %6543 = vrsqrt.f32 %v4457_v14 }
 0xf58   : > { %v4459_v32 = vadd.f32 1e-05, %v4443_v29 }
 0xf59   : > { %v4417_v27 = vpop.xlane.xlu0 %4416  ;;  %v4419_v1 = vpop.xlane.xlu1 %4418 }
 0xf5a   : > { %6545 = vrsqrt.f32 %v4459_v32  ;;  %v4444_v9 = vmul.f32 0.0078125, %v4417_v27  ;;  %v4445_v34 = vmul.f32 0.0078125, %v4419_v1 }
 0xf5c   : > { %v4460_v49 = vadd.f32 1e-05, %v4444_v9  ;;  %v4461_v35 = vadd.f32 1e-05, %v4445_v34  ;;  %v8324_v9 = vld [vmem:[%s8502_s8] ss:$0 sm:$0xff] }
 0xf5d   : > { %v4421_v33 = vpop.xlane.xlu0 %4420  ;;  %v4423_v17 = vpop.xlane.xlu1 %4422 }
 0xf5e   : > { %6547 = vrsqrt.f32 %v4460_v49  ;;  %v4446_v28 = vmul.f32 0.0078125, %v4421_v33  ;;  %v4447_v53 = vmul.f32 0.0078125, %v4423_v17 }
 0xf5f   : > { %v6540_v47 = vpop.eup %6539  ;;  %6549 = vrsqrt.f32 %v4461_v35 }
 0xf60   : > { %v4462_v48 = vadd.f32 1e-05, %v4446_v28  ;;  %v4463_v26 = vadd.f32 1e-05, %v4447_v53  ;;  %v4488_v52 = vmul.f32 %v6540_v47, %v8212_v10 }
 0xf61   : > { %v4425_v18 = vpop.xlane.xlu0 %4424 }
 0xf62   : > { %v4427_v31 = vpop.xlane.xlu1 %4426  ;;  %6551 = vrsqrt.f32 %v4462_v48  ;;  %v4448_v30 = vmul.f32 0.0078125, %v4425_v18  ;;  %v4510_v10 = vmul.f32 %v8316_v11, %v4488_v52 }
 0xf63   : > { %v4449_v38 = vmul.f32 0.0078125, %v4427_v31  ;;  %v6542_v43 = vpop.eup %6541  ;;  %6553 = vrsqrt.f32 %v4463_v26 }
 0xf64   : > { %v6544_v21 = vpop.eup %6543  ;;  %v4490_v59 = vmul.f32 %v6542_v43, %v8217_v12  ;;  %v4464_v23 = vadd.f32 1e-05, %v4448_v30  ;;  %v4532_v17 = vadd.f32 %v8324_v9, %v4510_v10 }
 0xf65   : > { %v4465_v14 = vadd.f32 1e-05, %v4449_v38  ;;  %v4429_v50 = vpop.xlane.xlu0 %4428  ;;  %v4489_v32 = vmul.f32 %v6544_v21, %v8220_v36 }
 0xf66   : > { %v4431_v29 = vpop.xlane.xlu1 %4430  ;;  %6555 = vrsqrt.f32 %v4464_v23  ;;  %v4450_v27 = vmul.f32 0.0078125, %v4429_v50  ;;  %v4512_v36 = vmul.f32 %v8316_v11, %v4490_v59 }
 0xf67   : > { %v4451_v1 = vmul.f32 0.0078125, %v4431_v29  ;;  %v6546_v34 = vpop.eup %6545  ;;  %6557 = vrsqrt.f32 %v4465_v14  ;;  %v4511_v12 = vmul.f32 %v8316_v11, %v4489_v32 }
 0xf68   : > { %v4491_v49 = vmul.f32 %v6546_v34, %v8227_v7  ;;  %v4466_v35 = vadd.f32 1e-05, %v4450_v27  ;;  %v4534_v18 = vadd.f32 %v8324_v9, %v4512_v36 }
 0xf69   : > { %v4467_v33 = vadd.f32 1e-05, %v4451_v1  ;;  %v4533_v28 = vadd.f32 %v8324_v9, %v4511_v12 }
 0xf6a   : > { %6559 = vrsqrt.f32 %v4466_v35  ;;  %v4513_v53 = vmul.f32 %v8316_v11, %v4491_v49 }
 0xf6b   : > { %v6548_v47 = vpop.eup %6547  ;;  %6561 = vrsqrt.f32 %v4467_v33  ;;  %v4548_v48 = vpack.c.bf16 %v4533_v28, %v4532_v17 }
 0xf6c   : > { %v6550_v26 = vpop.eup %6549  ;;  %v4535_v31 = vadd.f32 %v8324_v9, %v4513_v53  ;;  %v4492_v7 = vmul.f32 %v6548_v47, %v8232_v25 }
 0xf6d   : > { %5888 = vmatprep.mubr.bf16.mxu1 %v4548_v48  ;;  %v4493_v52 = vmul.f32 %v6550_v26, %v8235_v22 }
 0xf6e   : > { %v4549_v30 = vpack.c.bf16 %v4535_v31, %v4534_v18  ;;  %v4514_v38 = vmul.f32 %v8316_v11, %v4492_v7 }
 0xf6f   : > { %v6552_v43 = vpop.eup %6551  ;;  %v4515_v21 = vmul.f32 %v8316_v11, %v4493_v52 }
 0xf70   : > { %v6554_v59 = vpop.eup %6553  ;;  %5889 = vmatmul.mubr.bf16.vlgmr.msra.gmra.mxu1 %v4549_v30  ;;  %v4536_v23 = vadd.f32 %v8324_v9, %v4514_v38  ;;  %v4494_v14 = vmul.f32 %v6552_v43, %v8242_v0 }
 0xf71   : > { %v4537_v50 = vadd.f32 %v8324_v9, %v4515_v21  ;;  %v4495_v29 = vmul.f32 %v6554_v59, %v8245_v2  ;;  %5944 = vmatpush3.bf16.msra.mxu1 %v8291_v63 }
 0xf72   : > { %v4516_v25 = vmul.f32 %v8316_v11, %v4494_v14  ;;  %5937 = vmatprep.subr.bf16.mxu1 %v8293_v37 }
 0xf73   : > { %v6556_v22 = vpop.eup %6555  ;;  %v4550_v32 = vpack.c.bf16 %v4537_v50, %v4536_v23  ;;  %v4517_v10 = vmul.f32 %v8316_v11, %v4495_v29 }
 0xf74   : > { %v6558_v27 = vpop.eup %6557  ;;  %v4538_v1 = vadd.f32 %v8324_v9, %v4516_v25  ;;  %v4496_v34 = vmul.f32 %v6556_v22, %v8252_v56 }
 0xf75   : > { %5892 = vmatprep.mubr.bf16.mxu1 %v4550_v32  ;;  %v4539_v0 = vadd.f32 %v8324_v9, %v4517_v10  ;;  %v4497_v2 = vmul.f32 %v6558_v27, %v8255_v62  ;;  %5945 = vmatpush3.bf16.msra.mxu1 %v8293_v37 }
 0xf76   : > { %v4518_v63 = vmul.f32 %v8316_v11, %v4496_v34  ;;  %5938 = vmatprep.subr.bf16.mxu1 %v8299_v46 }
 0xf77   : > { %v6560_v12 = vpop.eup %6559  ;;  %v4551_v49 = vpack.c.bf16 %v4539_v0, %v4538_v1  ;;  %v4519_v35 = vmul.f32 %v8316_v11, %v4497_v2 }
 0xf78   : > { %v6562_v33 = vpop.eup %6561  ;;  %v4540_v36 = vadd.f32 %v8324_v9, %v4518_v63  ;;  %v4498_v56 = vmul.f32 %v6560_v12, %v8262_v3  ;;  %v6248_v63 = vld [vmem:[#allocation12 + $0x10] sm:$0xff]   ;;  %v6250_v12 = vld [vmem:[#allocation12] sm:$0xff]  }
 0xf79   : > { %5893 = vmatmul.mubr.bf16.gmra.mxu1 %v4551_v49  ;;  %v4541_v17 = vadd.f32 %v8324_v9, %v4519_v35  ;;  %v4499_v62 = vmul.f32 %v6562_v33, %v8265_v8  ;;  %5914 = vmatprep.subr.bf16.mxu0 %v6248_v63  ;;  %v5303_v49 = vld [vmem:[%s8536_s18] ss:$0 sm:$0xff]  ;;  %s6707_s18 = sshll.u32 %s6808_s16, 4  ;;  %s6708_s18 = int_to_ptr.vmem [resolvable:$false] %s6707_s18 }
 0xf7a   : > { %v4520_v37 = vmul.f32 %v8316_v11, %v4498_v56  ;;  %5946 = vmatpush3.bf16.msra.mxu1 %v8299_v46  ;;  %5915 = vmatpush3.bf16.msra.mxu0 %v6248_v63  ;;  %s6709_s20 = scalar_lea.vmem %s6708_s18, 4096  ;;  %p6710_p11 = scmp.lt.s32.totalorder %s8443_s15, %s6708_s18 }
 0xf7b   : > { %v4552_v28 = vpack.c.bf16 %v4541_v17, %v4540_v36  ;;  %v4521_v53 = vmul.f32 %v8316_v11, %v4499_v62  ;;  %5939 = vmatprep.subr.bf16.mxu1 %v8303_v40  ;;  %p6711_p2 = scmp.lt.s32.totalorder %s6709_s20, %s6703_s5 }
 0xf7c   : > { %v4542_v47 = vadd.f32 %v8324_v9, %v4520_v37 }
 0xf7d   : > { %5896 = vmatprep.mubr.bf16.mxu1 %v4552_v28  ;;  %v4543_v48 = vadd.f32 %v8324_v9, %v4521_v53  ;;  %p6712_p1 = por %p6711_p2, %p6710_p11 }
 0xf7e   : > { %5947 = vmatpush3.bf16.msra.mxu1 %v8303_v40 }
 0xf7f   : > { %v4553_v3 = vpack.c.bf16 %v4543_v48, %v4542_v47  ;;  %5940 = vmatprep.subr.bf16.mxu1 %v8307_v15  ;;  %p6713_p13 = pnand %p6712_p1, %p6706_p9 }
 0xf81   : > { %5897 = vmatmul.mubr.bf16.gmra.mxu1 %v4553_v3 }
 0xf82   : > { %5948 = vmatpush3.bf16.msra.mxu1 %v8307_v15 }
 0xf83   : > { %5941 = vmatprep.subr.bf16.mxu1 %v6248_v63 }
 0xf86   : > { %5949 = vmatpush3.bf16.msra.mxu1 %v6248_v63 }
 0xf8d   : > { %v4433_v8 = vpop.xlane.xlu0 %4432 }
 0xf8e   : > { %v4452_v46 = vmul.f32 0.0078125, %v4433_v8 }
 0xf90   : > { %v4468_v26 = vadd.f32 1e-05, %v4452_v46 }
 0xf91   : > { %v4437_v18 = vpop.xlane.xlu0 %4436  ;;  %v4435_v31 = vpop.xlane.xlu1 %4434 }
 0xf92   : > { %6563 = vrsqrt.f32 %v4468_v26  ;;  %v4454_v7 = vmul.f32 0.0078125, %v4437_v18  ;;  %v4453_v52 = vmul.f32 0.0078125, %v4435_v31 }
 0xf94   : > { %v4470_v30 = vadd.f32 1e-05, %v4454_v7  ;;  %v4469_v38 = vadd.f32 1e-05, %v4453_v52 }
 0xf95   : > { %v4439_v43 = vpop.xlane.xlu1 %4438 }
 0xf96   : > { %6565 = vrsqrt.f32 %v4470_v30  ;;  %v4455_v21 = vmul.f32 0.0078125, %v4439_v43 }
 0xf97   : > { %6567 = vrsqrt.f32 %v4469_v38 }
 0xf98   : > { %v4471_v40 = vadd.f32 1e-05, %v4455_v21 }
 0xf9a   : > { %6569 = vrsqrt.f32 %v4471_v40 }
 0xf9f   : > { %v6564_v59 = vpop.eup %6563 }
 0xfa0   : > { %v4500_v23 = vmul.f32 %v6564_v59, %v8272_v57 }
 0xfa2   : > { %v4522_v25 = vmul.f32 %v8316_v11, %v4500_v23 }
 0xfa3   : > { %v6566_v15 = vpop.eup %6565 }
 0xfa4   : > { %v6568_v14 = vpop.eup %6567  ;;  %v4502_v50 = vmul.f32 %v6566_v15, %v8277_v39  ;;  %v4544_v1 = vadd.f32 %v8324_v9, %v4522_v25 }
 0xfa5   : > { %v4501_v29 = vmul.f32 %v6568_v14, %v8280_v61 }
 0xfa6   : > { %v4524_v27 = vmul.f32 %v8316_v11, %v4502_v50 }
 0xfa7   : > { %v6570_v22 = vpop.eup %6569  ;;  %v4523_v32 = vmul.f32 %v8316_v11, %v4501_v29 }
 0xfa8   : > { %v4503_v10 = vmul.f32 %v6570_v22, %v8287_v13  ;;  %v4546_v39 = vadd.f32 %v8324_v9, %v4524_v27  ;;  %v6249_v13 = vld [vmem:[#allocation12 + $0x8] sm:$0xff]  }
 0xfa9   : > { %v4545_v34 = vadd.f32 %v8324_v9, %v4523_v32  ;;  %5916 = vmatprep.subr.bf16.mxu0 %v6249_v13  ;;  %5942 = vmatprep.subr.bf16.mxu1 %v6249_v13 }
 0xfaa   : > { %v4525_v57 = vmul.f32 %v8316_v11, %v4503_v10  ;;  %5917 = vmatpush3.bf16.msra.mxu0 %v6249_v13  ;;  %5950 = vmatpush3.bf16.msra.mxu1 %v6249_v13 }
 0xfab   : > { %v4554_v0 = vpack.c.bf16 %v4545_v34, %v4544_v1  ;;  %5918 = vmatprep.subr.bf16.mxu0 %v6250_v12  ;;  %5943 = vmatprep.subr.bf16.mxu1 %v6250_v12 }
 0xfac   : > { %v4547_v61 = vadd.f32 %v8324_v9, %v4525_v57 }
 0xfad   : > { %5900 = vmatprep.mubr.bf16.mxu1 %v4554_v0 }
 0xfae   : > { %v4555_v2 = vpack.c.bf16 %v4547_v61, %v4546_v39  ;;  %5919 = vmatpush3.bf16.msra.mxu0 %v6250_v12  ;;  %5951 = vmatpush3.bf16.msra.mxu1 %v6250_v12 }
 0xfb0   : > { %5901 = vmatmul.mubr.bf16.gmra.mxu1 %v4555_v2 }
0x1030   : > { %v5890_v11 = vpop.f32.mrf.mxu1 }
0x1031   : > { %v4670_v56 = vadd.f32 %v5890_v11, %v5303_v49 }
0x1032   : > { %v4661_v9 = vpop.f32.mrf.mxu1 }
0x1033   : > { %v4662_v33 = vadd.f32 %v5303_v49, %v4661_v9  ;;  %v4726_v48 = vmax.f32 %v4670_v56, 0.0 }
0x1034   : > { %v5891_v35 = vpop.f32.mrf.mxu1 }
0x1035   : > { %v4673_v36 = vadd.f32 %v5891_v35, %v5303_v49  ;;  %v4724_v28 = vmax.f32 %v4662_v33, 0.0 }
0x1036   : > { %v4664_v17 = vpop.f32.mrf.mxu1 }
0x1037   : > { %v4665_v62 = vadd.f32 %v5303_v49, %v4664_v17  ;;  %v4727_v37 = vmax.f32 %v4673_v36, 0.0 }
0x1039   : > { %v4725_v53 = vmax.f32 %v4665_v62, 0.0  ;;  %v5894_v47 = vpop.f32.mrf.mxu1  ;;  %v4741_v46 = vpack.c.bf16 %v4727_v37, %v4726_v48 }
0x103a   : > { %v4686_v7 = vadd.f32 %v5894_v47, %v5303_v49 }
0x103b   : > { %v4740_v3 = vpack.c.bf16 %v4725_v53, %v4724_v28  ;;  %v4677_v8 = vpop.f32.mrf.mxu1  ;;  %v8385_v28 = vld [vmem:[%s8537_s17] ss:$0 sm:$0xff] }
0x103c   : > { %v4678_v18 = vadd.f32 %v5303_v49, %v4677_v8  ;;  %v4730_v59 = vmax.f32 %v4686_v7, 0.0 }
0x103d   : > { %v5895_v26 = vpop.f32.mrf.mxu1  ;;  %5920 = vmatprep.mubr.bf16.mxu0 %v4740_v3 }
0x103e   : > { %v4689_v31 = vadd.f32 %v5895_v26, %v5303_v49  ;;  %5921 = vmatmul.mubr.bf16.vlgmr.msra.gmra.mxu0 %v4741_v46  ;;  %v4728_v21 = vmax.f32 %v4678_v18, 0.0 }
0x103f   : > { %v4680_v52 = vpop.f32.mrf.mxu1 }
0x1040   : > { %v4681_v30 = vadd.f32 %v5303_v49, %v4680_v52  ;;  %v4731_v38 = vmax.f32 %v4689_v31, 0.0 }
0x1041   : > { %v5898_v43 = vpop.f32.mrf.mxu1 }
0x1042   : > { %v4729_v40 = vmax.f32 %v4681_v30, 0.0  ;;  %v4743_v14 = vpack.c.bf16 %v4731_v38, %v4730_v59  ;;  %v4702_v22 = vadd.f32 %v5898_v43, %v5303_v49 }
0x1043   : > { %v4693_v23 = vpop.f32.mrf.mxu1 }
0x1044   : > { %v4742_v15 = vpack.c.bf16 %v4729_v40, %v4728_v21  ;;  %v4694_v29 = vadd.f32 %v5303_v49, %v4693_v23  ;;  %v4734_v57 = vmax.f32 %v4702_v22, 0.0 }
0x1045   : > { %v5899_v50 = vpop.f32.mrf.mxu1 }
0x1046   : > { %v4705_v25 = vadd.f32 %v5899_v50, %v5303_v49  ;;  %5924 = vmatprep.mubr.bf16.mxu0 %v4742_v15  ;;  %v4732_v1 = vmax.f32 %v4694_v29, 0.0 }
0x1047   : > { %v4696_v32 = vpop.f32.mrf.mxu1  ;;  %5925 = vmatmul.mubr.bf16.gmra.mxu0 %v4743_v14 }
0x1048   : > { %v4697_v10 = vadd.f32 %v5303_v49, %v4696_v32  ;;  %v4735_v27 = vmax.f32 %v4705_v25, 0.0 }
0x104a   : > { %v4733_v34 = vmax.f32 %v4697_v10, 0.0  ;;  %v4745_v39 = vpack.c.bf16 %v4735_v27, %v4734_v57 }
0x104c   : > { %v4744_v0 = vpack.c.bf16 %v4733_v34, %v4732_v1 }
0x104e   : > { %5928 = vmatprep.mubr.bf16.mxu1 %v4744_v0 }
0x104f   : > { %5929 = vmatmul.mubr.bf16.vlgmr.msra.gmra.mxu1 %v4745_v39 }
0x1070   : > { %v5902_v61 = vpop.f32.mrf.mxu1 }
0x1071   : > { %v4718_v11 = vadd.f32 %v5902_v61, %v5303_v49 }
0x1072   : > { %v4709_v2 = vpop.f32.mrf.mxu1 }
0x1073   : > { %v4710_v13 = vadd.f32 %v5303_v49, %v4709_v2  ;;  %v4738_v17 = vmax.f32 %v4718_v11, 0.0 }
0x1074   : > { %v5903_v63 = vpop.f32.mrf.mxu1 }
0x1075   : > { %v4721_v12 = vadd.f32 %v5903_v63, %v5303_v49  ;;  %v4736_v36 = vmax.f32 %v4710_v13, 0.0 }
0x1076   : > { %v4712_v9 = vpop.f32.mrf.mxu1 }
0x1077   : > { %v4713_v35 = vadd.f32 %v5303_v49, %v4712_v9  ;;  %v4739_v33 = vmax.f32 %v4721_v12, 0.0 }
0x1079   : > { %v4737_v56 = vmax.f32 %v4713_v35, 0.0  ;;  %v4747_v37 = vpack.c.bf16 %v4739_v33, %v4738_v17 }
0x107b   : > { %v4746_v62 = vpack.c.bf16 %v4737_v56, %v4736_v36 }
0x107d   : > { %5932 = vmatprep.mubr.bf16.mxu1 %v4746_v62 }
0x107e   : > { %5933 = vmatmul.mubr.bf16.gmra.mxu1 %v4747_v37 }
0x10fe   : > { %v5922_v53 = vpop.f32.mrf.mxu0 }
0x10ff   : > { %v4862_v47 = vadd.f32 %v5922_v53, %v8385_v28 }
0x1100   : > { %v4853_v48 = vpop.f32.mrf.mxu0 }
0x1101   : > { %v4918_v49 = vadd.f32 %v4862_v47, %v8166_v19  ;;  %v4854_v3 = vadd.f32 %v8385_v28, %v4853_v48 }
0x1102   : > { %v5923_v8 = vpop.f32.mrf.mxu0 }
0x1103   : > { %4934 = vst [vmem:[%s8392_s12 + $0x10] sm:$0xff] %v4918_v49  ;;  %v4916_v46 = vadd.f32 %v4854_v3, %v8163_v4  ;;  %v4865_v26 = vadd.f32 %v5923_v8, %v8385_v28 }
0x1104   : > { %v4856_v18 = vpop.f32.mrf.mxu0 }
0x1105   : > { %4932 = vst [vmem:[%s8392_s12] sm:$0xff] %v4916_v46  ;;  %v4919_v19 = vadd.f32 %v4865_v26, %v8172_v6  ;;  %v4857_v31 = vadd.f32 %v8385_v28, %v4856_v18 }
0x1107   : > { %4935 = vst [vmem:[%s8392_s12 + $0x18] sm:$0xff] %v4919_v19  ;;  %v4917_v7 = vadd.f32 %v4857_v31, %v8168_v5  ;;  %v5926_v52 = vpop.f32.mrf.mxu0 }
0x1108   : > { %v4878_v30 = vadd.f32 %v5926_v52, %v8385_v28 }
0x1109   : > { %4933 = vst [vmem:[%s8392_s12 + $0x8] sm:$0xff] %v4917_v7  ;;  %v4869_v38 = vpop.f32.mrf.mxu0 }
0x110a   : > { %v4922_v4 = vadd.f32 %v4878_v30, %v8181_v60  ;;  %v4870_v43 = vadd.f32 %v8385_v28, %v4869_v38 }
0x110b   : > { %v5927_v21 = vpop.f32.mrf.mxu0 }
0x110c   : > { %4938 = vst [vmem:[%s8392_s12 + $0x30] sm:$0xff] %v4922_v4  ;;  %v4920_v6 = vadd.f32 %v4870_v43, %v8175_v24  ;;  %v4881_v40 = vadd.f32 %v5927_v21, %v8385_v28 }
0x110d   : > { %v4872_v59 = vpop.f32.mrf.mxu0 }
0x110e   : > { %4936 = vst [vmem:[%s8392_s12 + $0x20] sm:$0xff] %v4920_v6  ;;  %v4923_v5 = vadd.f32 %v4881_v40, %v8183_v44  ;;  %v4873_v23 = vadd.f32 %v8385_v28, %v4872_v59 }
0x110f   : > { %v5930_v15 = vpop.f32.mrf.mxu1 }
0x1110   : > { %4939 = vst [vmem:[%s8392_s12 + $0x38] sm:$0xff] %v4923_v5  ;;  %v4921_v60 = vadd.f32 %v4873_v23, %v8177_v20  ;;  %v4894_v14 = vadd.f32 %v5930_v15, %v8385_v28 }
0x1111   : > { %v4885_v50 = vpop.f32.mrf.mxu1 }
0x1112   : > { %4937 = vst [vmem:[%s8392_s12 + $0x28] sm:$0xff] %v4921_v60  ;;  %v4926_v24 = vadd.f32 %v4894_v14, %v8193_v42  ;;  %v4886_v29 = vadd.f32 %v8385_v28, %v4885_v50 }
0x1113   : > { %v5931_v25 = vpop.f32.mrf.mxu1 }
0x1114   : > { %4942 = vst [vmem:[%s8392_s12 + $0x50] sm:$0xff] %v4926_v24  ;;  %v4924_v44 = vadd.f32 %v4886_v29, %v8187_v45  ;;  %v4897_v22 = vadd.f32 %v5931_v25, %v8385_v28 }
0x1115   : > { %v4888_v32 = vpop.f32.mrf.mxu1 }
0x1116   : > { %4940 = vst [vmem:[%s8392_s12 + $0x40] sm:$0xff] %v4924_v44  ;;  %v4927_v20 = vadd.f32 %v4897_v22, %v8195_v51  ;;  %v4889_v10 = vadd.f32 %v8385_v28, %v4888_v32 }
0x1118   : > { %4943 = vst [vmem:[%s8392_s12 + $0x58] sm:$0xff] %v4927_v20  ;;  %v4925_v42 = vadd.f32 %v4889_v10, %v8189_v58 }
0x111a   : > { %4941 = vst [vmem:[%s8392_s12 + $0x48] sm:$0xff] %v4925_v42 }
0x113e   : > { %v5934_v27 = vpop.f32.mrf.mxu1 }
0x113f   : > { %v4910_v1 = vadd.f32 %v5934_v27, %v8385_v28 }
0x1140   : > { %v4901_v45 = vpop.f32.mrf.mxu1 }
0x1141   : > { %v4930_v34 = vadd.f32 %v4910_v1, %v8202_v16  ;;  %v4902_v57 = vadd.f32 %v8385_v28, %v4901_v45 }
0x1142   : > { %v5935_v0 = vpop.f32.mrf.mxu1 }
0x1143   : > { %4946 = vst [vmem:[%s8392_s12 + $0x70] sm:$0xff] %v4930_v34  ;;  %v4928_v51 = vadd.f32 %v4902_v57, %v8199_v55  ;;  %v4913_v39 = vadd.f32 %v5935_v0, %v8385_v28 }
0x1144   : > { %v4904_v58 = vpop.f32.mrf.mxu1 }
0x1145   : > { %4944 = vst [vmem:[%s8392_s12 + $0x60] sm:$0xff] %v4928_v51  ;;  %v4931_v61 = vadd.f32 %v4913_v39, %v8208_v54  ;;  %v4905_v2 = vadd.f32 %v8385_v28, %v4904_v58 }
0x1147   : > { %4947 = vst [vmem:[%s8392_s12 + $0x78] sm:$0xff] %v4931_v61  ;;  %v4929_v55 = vadd.f32 %v4905_v2, %v8204_v41 }
0x1149   : > { %4945 = vst [vmem:[%s8392_s12 + $0x68] sm:$0xff] %v4929_v55 }
0x114a   : > { %6716 = shalt.err (!%p6713_p13)
}
0x114b   : > { %s6717_s25 = scalar_lea.hbm %s8441_s19, 2048  ;;  %s6721_s9 = scalar_lea.hbm %s8539_s24, 4096 }
0x114c   : > { %p6718_p10 = scmp.ne.s32.totalorder %s8441_s19, %s6717_s25  ;;  %p6722_p6 = scmp.lt.s32.totalorder %s8441_s19, %s8539_s24 }
0x114d   : > { %p6723_p3 = scmp.lt.s32.totalorder %s6721_s9, %s6717_s25 }
0x114e   : > { %p6719_p12 = pnand %p6718_p10, %p6992_p7 }
0x114f   : > { %p6724_p5 = por %p6723_p3, %p6722_p6 }
0x1150   : > { %p6720_p0 = pneg %p6719_p12 }
0x1152   : > { %p6725_p4 = pnand %p6724_p5, %p6720_p0 }
0x1154   : > { %6728 = shalt.err (!%p6725_p4)
}
0x1155   : > { %s6809_s21 = smov 128   ;;  %s6810_s5 = smov 8  }
0x1156   : > { %6002 = dma.vmem_to_hbm [thread:$0]  (%p6992_p7), %s8443_s15, 2048, %s8441_s19, %s4949_s3, %s6809_s21, %s6809_s21, %s6810_s5  }
0x1157 PF: > { %s8540_s16 = sld [smem:[#allocation18_spill]]  ;;  %p8543_p9 = scmp.ge.s32.totalorder %s6791_s30, 2 }
0x1158   : > { %s8541_s18 = sld [smem:[#allocation20_spill]] }
0x115d   : > { %s4979_s20 = sand.u32 1, %s8540_s16  }
0x115e   : > { %p8542_p8 = scmp.ne.s32.totalorder %s8541_s18, 0  ;;  %s4980_s25 = scalar_lea.sflag [#allocation6], %s4979_s20 }
0x1160   : > { %p6022_p11 = pnand %p8543_p9, %p8542_p8 }
0x1162   : > { %p6023_p2 = pneg %p6022_p11 }
0x1164   : > { %6766 = dma.done.wait (%p6023_p2), %s4980_s25, 2048  }
0x1165   : > { %6768 = vsyncadd (%p6023_p2), %s4980_s25, 4294965248  ;;  %s31_s30 = sadd.s32 1, %s6791_s30   ;;  %s8544_s23 = smov %s8551_s28 }
0x1166   : > { %p28_p1 = scmp.ge.s32.totalorder %s31_s30, 4   ;;  %s8545_s25 = smov %s6775_s26 }
0x1167   : > { %s8546_s26 = smov %s6779_s27  ;;  %s8547_s27 = smov %s7001_s14 }
0x1168   : > { %s8548_s28 = smov %s6787_s29  ;;  %s8549_s29 = smov %s8544_s23 }
0x1169   :  { %30 = sbr.rel (!%p28_p1) target bundleno = 15 (0xf), region = 138 }
0x116e   :  { %4985 = vsyncpa [#allocation5], 1 }
0x116f   :  { %4987 = vsyncpa [#allocation5 + $0x1], 1 }
0x1170   :  { %4988 = vsyncpa [#allocation8], 1 }
0x1171   :  { %4989 = vsyncpa [#allocation11], 1 }
0x1172   :  { %4990 = vsyncpa [#allocation6], 1 }
0x1173   :  { %4992 = vsyncpa [#allocation6 + $0x1], 1 }

// kernel: tpu_custom_call.1
= control target key start
LH: loop header
LB: loop body
LE: loop exit
PB: predicated region body
PF: predicated region fallthrough
CT: control target
= control target key end

     0   :  { %s8494_s0 = inlined_call_operand.hbm [shape: f32[2,128,128], index: 0, kind: input, shape index: {}]   ;;  %s8495_s1 = inlined_call_operand.vmem [shape: f32[1,128], index: 1, kind: input, shape index: {}]   ;;  %s8496_s2 = inlined_call_operand.vmem [shape: f32[1,128], index: 2, kind: input, shape index: {}]   ;;  %s8497_s3 = inlined_call_operand.hbm [shape: bf16[128,384], index: 3, kind: input, shape index: {}]   ;;  %s8498_s4 = inlined_call_operand.vmem [shape: f32[1,384], index: 4, kind: input, shape index: {}]   ;;  %s8499_s5 = inlined_call_operand.hbm [shape: bf16[128,128], index: 5, kind: input, shape index: {}]   ;;  %s8500_s6 = inlined_call_operand.vmem [shape: f32[1,128], index: 6, kind: input, shape index: {}]   ;;  %s8501_s7 = inlined_call_operand.vmem [shape: f32[1,128], index: 7, kind: input, shape index: {}]   ;;  %s8502_s8 = inlined_call_operand.vmem [shape: f32[1,128], index: 8, kind: input, shape index: {}]   ;;  %s8503_s9 = inlined_call_operand.hbm [shape: bf16[128,128], index: 9, kind: input, shape index: {}]   ;;  %s8504_s10 = inlined_call_operand.vmem [shape: f32[1,128], index: 10, kind: input, shape index: {}]   ;;  %s8505_s11 = inlined_call_operand.hbm [shape: bf16[128,128], index: 11, kind: input, shape index: {}]   ;;  %s8506_s12 = inlined_call_operand.vmem [shape: f32[1,128], index: 12, kind: input, shape index: {}]   ;;  %s8507_s13 = inlined_call_operand.hbm [shape: f32[2,128,128], index: 13, kind: output, shape index: {}]  }
   0x1   :  { %8513 = sst [smem:[#allocation22_spill]] %s8497_s3 }
   0x2   :  { %8514 = sst [smem:[#allocation23_spill]] %s8499_s5 }
   0x3   :  { %8515 = sst [smem:[#allocation24_spill]] %s8503_s9 }
   0x4   :  { %8516 = sst [smem:[#allocation25_spill]] %s8504_s10 }
   0x5   :  { %8517 = sst [smem:[#allocation26_spill]] %s8506_s12 }
   0x6   :  { %8518 = sst [smem:[#allocation27_spill]] %s8507_s13 }
   0x7   :  { %18 = vsyncpa [#allocation5], 0 }
   0x8   :  { %20 = vsyncpa [#allocation5 + $0x1], 0 }
   0x9   :  { %21 = vsyncpa [#allocation8], 0 }
   0xa   :  { %22 = vsyncpa [#allocation11], 0 }
   0xb   :  { %23 = vsyncpa [#allocation6], 0 }
   0xc   :  { %25 = vsyncpa [#allocation6 + $0x1], 0  ;;  %s6881_s25 = smov 0   ;;  %s6883_s26 = smov 0  }
   0xd   :  { %s6885_s27 = smov 0   ;;  %s6887_s28 = smov 0  }
   0xe   :  { %s6889_s29 = smov 0   ;;  %s6891_s30 = smov 0  }
   0xf LB: > { %8519 = sst [smem:[#allocation18_spill]] %s6771_s25  ;;  %s5088_s14 = sadd.s32 4294967295, %s6791_s30   ;;  %s6791_s30 = sphi %s6891_s30, %s31_s30   ;;  %s6787_s29 = sphi %s6889_s29, %s8549_s29   ;;  %s6783_s28 = sphi %s6887_s28, %s8548_s28   ;;  %s6779_s27 = sphi %s6885_s27, %s8547_s27   ;;  %s6775_s26 = sphi %s6883_s26, %s8546_s26   ;;  %s6771_s25 = sphi %s6881_s25, %s8545_s25  }
  0x10   : > { %8520 = sst [smem:[#allocation19_spill]] %s6783_s28  ;;  %s5089_s15 = sadd.s32 4294967294, %s6791_s30  }
  0x11   : > { %p63_p0 = scmp.ne.s32.totalorder %s6775_s26, %s6771_s25  ;;  %p6915_p1 = scmp.eq.s32.totalorder %s5088_s14, 0 }
  0x12   : > { %p6919_p2 = scmp.eq.s32.totalorder %s5088_s14, 1  ;;  %p347_p3 = scmp.eq.s32.totalorder %s5089_s15, 1 }
  0x13   : > { %s8521_s16 = scalar_select %p6915_p1, 1, 0 }
  0x14   : > { %p6925_p4 = por %p6915_p1, %p63_p0  ;;  %p5090_p5 = scmp.ge.s32.totalorder %s6791_s30, 1 }
  0x15   : > { %p6930_p6 = por %p347_p3, %p63_p0  ;;  %p354_p7 = scmp.lt.s32.totalorder %s6791_s30, 3 }
  0x16   : > { %s6793_s21 = smov [#allocation7]   ;;  %s6794_s24 = smov [#allocation10]  }
  0x17   : > { %s8524_s19 = scalar_select %p6930_p6, 1, 0 }
  0x18   : > { %p6935_p8 = pnand %p5090_p5, %p354_p7  ;;  %s372_s22 = sshll.u32 %s6793_s21, 4  ;;  %s373_s22 = int_to_ptr.vmem [resolvable:$true] %s372_s22 }
  0x19   : > { %8525 = sst [smem:[#allocation20_spill]] %s8524_s19  ;;  %s410_s14 = sshll.u32 %s6794_s24, 4  ;;  %s411_s14 = int_to_ptr.vmem [resolvable:$true] %s410_s14 }
  0x1a   : > { %p6004_p9 = pneg %p6935_p8  ;;  %s6582_s15 = scalar_lea.vmem %s373_s22, 3072 }
  0x1b   : > { %p6583_p13 = scmp.ne.s32.totalorder %s373_s22, %s6582_s15  ;;  %p6590_p5 = scmp.lt.s32.totalorder %s373_s22, %s373_s22 }
  0x1c   : > { %p6944_p11 = pnand %p6004_p9, %p6915_p1  ;;  %p6591_p7 = scmp.lt.s32.totalorder %s6582_s15, %s6582_s15 }
  0x1e   : > { %p6573_p12 = pneg %p6944_p11  ;;  %p6592_p10 = por %p6591_p7, %p6590_p5 }
  0x20   : > { %p6585_p0 = pnand %p6583_p13, %p6573_p12 }
  0x22   : > { %p6586_p3 = pneg %p6585_p0 }
  0x24   : > { %p6593_p6 = pnand %p6592_p10, %p6586_p3 }
  0x26   : > { %6596 = shalt.err (!%p6593_p6)
}
  0x27   : > { %s6795_s21 = smov 192   ;;  %s6796_s19 = smov 12  }
  0x28   : > { %s8528_s3 = sld [smem:[#allocation22_spill]]  ;;  %s6797_s13 = smov [#allocation9]  }
  0x29   : > { %s388_s28 = sshll.u32 %s6797_s13, 4  ;;  %s6608_s12 = scalar_lea.vmem %s411_s14, 1024  ;;  %s389_s28 = int_to_ptr.vmem [resolvable:$true] %s388_s28 }
  0x2a   : > { %p6609_p9 = scmp.ne.s32.totalorder %s411_s14, %s6608_s12  ;;  %p6616_p10 = scmp.lt.s32.totalorder %s411_s14, %s411_s14 }
  0x2b   : > { %p6617_p6 = scmp.lt.s32.totalorder %s6608_s12, %s6608_s12 }
  0x2c   : > { %p6611_p13 = pnand %p6609_p9, %p6573_p12 }
  0x2d   : > { %p6618_p3 = por %p6617_p6, %p6616_p10 }
  0x2e   : > { %6007 = dma.hbm_to_vmem [thread:$0]  (!%p6944_p11), %s8528_s3, 3072, %s373_s22, [#allocation8], %s6795_s21, %s6795_s21, %s6796_s19  }
  0x2f   : > { %p6612_p0 = pneg %p6611_p13 }
  0x31   : > { %p6619_p5 = pnand %p6618_p3, %p6612_p0 }
  0x33   : > { %6622 = shalt.err (!%p6619_p5)
}
  0x34   : > { %s6798_s15 = smov 64   ;;  %s6799_s10 = smov 4  }
  0x35   : > { %s8529_s9 = sld [smem:[#allocation24_spill]]  ;;  %s6634_s13 = scalar_lea.vmem %s389_s28, 1024 }
  0x36   : > { %p6635_p7 = scmp.ne.s32.totalorder %s389_s28, %s6634_s13  ;;  %p6642_p1 = scmp.lt.s32.totalorder %s389_s28, %s389_s28 }
  0x37   : > { %p6643_p10 = scmp.lt.s32.totalorder %s6634_s13, %s6634_s13 }
  0x38   : > { %p6637_p9 = pnand %p6635_p7, %p6573_p12 }
  0x39   : > { %p6644_p0 = por %p6643_p10, %p6642_p1 }
  0x3a   : > { %p6638_p13 = pneg %p6637_p9 }
  0x3b   : > { %6013 = dma.hbm_to_vmem [thread:$0]  (!%p6944_p11), %s8529_s9, 1024, %s411_s14, [#allocation11], %s6798_s15, %s6798_s15, %s6799_s10  }
  0x3c   : > { %p6645_p6 = pnand %p6644_p0, %p6638_p13 }
  0x3e   : > { %6648 = shalt.err (!%p6645_p6)
}
  0x3f   : > { %s8530_s5 = sld [smem:[#allocation23_spill]]  ;;  %s6800_s14 = smov [#allocation12]  }
  0x40   : > { %s426_s21 = sshll.u32 %s6800_s14, 4  ;;  %s427_s21 = int_to_ptr.vmem [resolvable:$true] %s426_s21 }
  0x41   : > { %s6660_s24 = scalar_lea.vmem %s427_s21, 1024  ;;  %p6668_p9 = scmp.lt.s32.totalorder %s427_s21, %s427_s21 }
  0x42   : > { %p6661_p3 = scmp.ne.s32.totalorder %s427_s21, %s6660_s24  ;;  %p6669_p1 = scmp.lt.s32.totalorder %s6660_s24, %s6660_s24 }
  0x44   : > { %p6663_p5 = pnand %p6661_p3, %p6573_p12  ;;  %p6670_p13 = por %p6669_p1, %p6668_p9 }
  0x45   : > { %6010 = dma.hbm_to_vmem [thread:$0]  (!%p6944_p11), %s8530_s5, 1024, %s389_s28, [#allocation8], %s6798_s15, %s6798_s15, %s6799_s10  }
  0x46   : > { %p6664_p7 = pneg %p6663_p5 }
  0x48   : > { %p6671_p10 = pnand %p6670_p13, %p6664_p7 }
  0x4a   : > { %6674 = shalt.err (!%p6671_p10)
}
  0x4b   : > { %6016 = dma.hbm_to_vmem [thread:$0]  (!%p6944_p11), %s8505_s11, 1024, %s427_s21, [#allocation11], %s6798_s15, %s6798_s15, %s6799_s10  }
  0x4c   : > { %s43_s28 = sadd.s32 1, %s6787_s29  ;;  %s50_s13 = sadd.s32 1, %s6779_s27 }
  0x4d   : > { %p45_p12 = scmp.ge.s32.totalorder %s43_s28, 2  ;;  %p57_p0 = scmp.ne.s32.totalorder %s6779_s27, %s6775_s26 }
  0x4e   : > { %p58_p6 = scmp.eq.s32.totalorder %s6791_s30, 0  ;;  %p6029_p3 = scmp.lt.s32.totalorder %s6791_s30, 2 }
  0x4f   : > { %s8551_s28 = smov (%p45_p12, %s43_s28), 0  ;;  %p6992_p7 = por %p6919_p2, %p57_p0 }
  0x50   : > { %p59_p5 = por %p58_p6, %p57_p0  ;;  %s47_s12 = ssub.s32 %s6787_s29, %s8551_s28 }
  0x51   : > { %s443_s22 = sand.u32 1, %s6779_s27   ;;  %p48_p9 = scmp.eq.s32.totalorder %s47_s12, 0 }
  0x52   : > { %s5096_s10 = sshll.u32 %s443_s22, 7  ;;  %s5326_s15 = sshll.u32 %s6787_s29, 11 }
  0x53   : > { %s7001_s14 = scalar_select %p48_p9, %s6779_s27, %s50_s13  }
  0x54   : > { %s453_s25 = scalar_lea.hbm %s8494_s0, %s5326_s15  ;;  %s447_s19 = scalar_lea.vmem [#allocation4], %s5096_s10 }
  0x55   : > { %s454_s3 = sshll.u32 %s447_s19, 4  ;;  %p7008_p11 = pnand %p6029_p3, %p59_p5  ;;  %s455_s3 = int_to_ptr.vmem [resolvable:$true] %s454_s3 }
  0x56   : > { %s444_s5 = scalar_lea.sflag [#allocation5], %s443_s22  ;;  %s6688_s12 = scalar_lea.vmem %s455_s3, 2048 }
  0x57   : > { %p6677_p2 = pneg %p7008_p11  ;;  %p6689_p1 = scmp.ne.s32.totalorder %s455_s3, %s6688_s12 }
  0x58   : > { %s6801_s13 = smov [#allocation4]  }
  0x59   : > { %p6691_p13 = pnand %p6689_p1, %p6677_p2  ;;  %s6693_s9 = sshll.u32 %s6801_s13, 4  ;;  %s6694_s9 = int_to_ptr.vmem [resolvable:$false] %s6693_s9 }
  0x5a   : > { %s6695_s15 = scalar_lea.vmem %s6694_s9, 4096  ;;  %p6696_p12 = scmp.lt.s32.totalorder %s455_s3, %s6694_s9 }
  0x5b   : > { %p6692_p10 = pneg %p6691_p13  ;;  %p6697_p0 = scmp.lt.s32.totalorder %s6695_s15, %s6688_s12 }
  0x5d   : > { %p6698_p6 = por %p6697_p0, %p6696_p12 }
  0x5f   : > { %p6699_p3 = pnand %p6698_p6, %p6692_p10 }
  0x61   : > { %6702 = shalt.err (!%p6699_p3)
}
  0x62   : > { %s6802_s10 = smov 128   ;;  %s6803_s21 = smov 8  }
  0x63   : > { %6020 = dma.hbm_to_vmem [thread:$0]  (!%p7008_p11), %s453_s25, 2048, %s455_s3, %s444_s5, %s6802_s10, %s6802_s10, %s6803_s21  }
  0x64   : > { %466 = sbr.rel (%p6935_p8) target bundleno = 4439 (0x1157), region = 72 }
  0x69   : > { %s7019_s22 = sand.u32 1, %s6775_s26  }
  0x6a   : > { %s5100_s9 = sshll.u32 %s7019_s22, 7  ;;  %s469_s24 = scalar_lea.sflag [#allocation5], %s7019_s22 }
  0x6b   : > { %s7025_s19 = scalar_lea.vmem [#allocation4], %s5100_s9 }
  0x6c   : > { %6754 = dma.done.wait (%p6925_p4), %s469_s24, 2048  }
  0x6d   : > { %6756 = vsyncadd (%p6925_p4), %s469_s24, 4294965248  ;;  %p8533_p5 = scmp.ne.s32.totalorder %s8521_s16, 0 }
  0x6f   : > { %6758 = dma.done.wait (%p8533_p5), [#allocation8], 4096  }
  0x70   : > { %6760 = vsyncadd (%p8533_p5), [#allocation8], 4294963200 }
  0x71   : > { %6762 = dma.done.wait (%p8533_p5), [#allocation11], 2048  }
  0x72   : > { %6764 = vsyncadd (%p8533_p5), [#allocation11], 4294965248  ;;  %v537_v0 = vld [vmem:[%s7025_s19] sm:$0xff]  ;;  %v539_v1 = vld [vmem:[%s7025_s19 + $0x10] sm:$0xff]  ;;  %vm1497_vm0 = vcmask 261120   ;;  %s6805_s17 = smov 96  }
  0x73   : > { %555 = vadd.xlane.f32.xlu0 %v537_v0  ;;  %559 = vadd.xlane.f32.xlu1 %v539_v1  ;;  %v538_v2 = vld [vmem:[%s7025_s19 + $0x8] sm:$0xff]  ;;  %v540_v3 = vld [vmem:[%s7025_s19 + $0x18] sm:$0xff]  ;;  %v541_v4 = vld [vmem:[%s7025_s19 + $0x20] sm:$0xff]  ;;  %s6806_s12 = smov 64   ;;  %s6807_s13 = smov 32   ;;  %vm2670_vm1 = vcmask 523520  }
  0x74   : > { %v542_v5 = vld [vmem:[%s7025_s19 + $0x28] sm:$0xff]  ;;  %v543_v6 = vld [vmem:[%s7025_s19 + $0x30] sm:$0xff]  ;;  %v544_v7 = vld [vmem:[%s7025_s19 + $0x38] sm:$0xff]  ;;  %vm3385_vm2 = vcmask 785920   ;;  %vm4100_vm3 = vcmask 1048320   ;;  %s8536_s18 = sld [smem:[#allocation25_spill]] }
  0x75   : > { %v7048_v8 = vld [vmem:[%s7025_s19 + $0x40] sm:$0xff]  ;;  %v7051_v9 = vld [vmem:[%s7025_s19 + $0x48] sm:$0xff]  ;;  %v7054_v10 = vld [vmem:[%s7025_s19 + $0x50] sm:$0xff]  ;;  %s8539_s24 = sld [smem:[#allocation27_spill]]  ;;  %s4949_s3 = scalar_lea.sflag [#allocation6], %s7019_s22 }
  0x76   : > { %v7057_v11 = vld [vmem:[%s7025_s19 + $0x58] sm:$0xff]  ;;  %v7062_v12 = vld [vmem:[%s7025_s19 + $0x60] sm:$0xff]  ;;  %v7065_v13 = vld [vmem:[%s7025_s19 + $0x68] sm:$0xff]  ;;  %s6808_s16 = smov [#allocation13]  }
  0x77   : > { %557 = vadd.xlane.f32.xlu0 %v538_v2  ;;  %561 = vadd.xlane.f32.xlu1 %v540_v3  ;;  %v7070_v14 = vld [vmem:[%s7025_s19 + $0x70] sm:$0xff]  ;;  %v7073_v15 = vld [vmem:[%s7025_s19 + $0x78] sm:$0xff] }
  0x78   : > { %v6099_v16 = vld [vmem:[#allocation7 + $0xac] ss:$12 sps:$4 sm:$0xff]   ;;  %v6101_v17 = vld [vmem:[#allocation7 + $0xa8] ss:$12 sps:$4 sm:$0xff]   ;;  %v6104_v54 = vld [vmem:[#allocation7 + $0xb0] ss:$12 sps:$4 sm:$0xff]  }
  0x79   : > { %961 = vmatprep.subr.bf16.mxu0 %v6099_v16  ;;  %v6102_v53 = vld [vmem:[#allocation7 + $0x94] ss:$12 sps:$4 sm:$0xff]   ;;  %v6105_v55 = vld [vmem:[#allocation7 + $0x90] ss:$12 sps:$4 sm:$0xff]   ;;  %5552 = vmatprep.subr.bf16.mxu1 %v6104_v54 }
  0x7a   : > { %962 = vmatpush1.bf16.msra.mxu0 %v6101_v17  ;;  %5553 = vmatpush3.bf16.msra.mxu1 %v6104_v54  ;;  %v6110_v17 = vld [vmem:[#allocation7 + $0x64] ss:$12 sps:$4 sm:$0xff]  }
  0x7b   : > { %563 = vadd.xlane.f32.xlu0 %v541_v4  ;;  %565 = vadd.xlane.f32.xlu1 %v542_v5 }
  0x7c   : > { %963 = vmatprep.subr.bf16.mxu0 %v6102_v53 }
  0x7e   : > { %964 = vmatpush1.bf16.msra.mxu0 %v6105_v55 }
  0x7f   : > { %567 = vadd.xlane.f32.xlu0 %v543_v6  ;;  %569 = vadd.xlane.f32.xlu1 %v544_v7 }
  0x83   : > { %571 = vadd.xlane.f32.xlu0 %v7048_v8  ;;  %573 = vadd.xlane.f32.xlu1 %v7051_v9 }
  0x87   : > { %575 = vadd.xlane.f32.xlu0 %v7054_v10  ;;  %577 = vadd.xlane.f32.xlu1 %v7057_v11 }
  0x8b   : > { %579 = vadd.xlane.f32.xlu0 %v7062_v12  ;;  %581 = vadd.xlane.f32.xlu1 %v7065_v13 }
  0x8f   : > { %583 = vadd.xlane.f32.xlu0 %v7070_v14  ;;  %585 = vadd.xlane.f32.xlu1 %v7073_v15 }
  0xfc   : > { %v556_v18 = vpop.xlane.xlu0 %555  ;;  %v560_v19 = vpop.xlane.xlu1 %559 }
  0xfd   : > { %v588_v20 = vmul.f32 0.0078125, %v556_v18  ;;  %v590_v21 = vmul.f32 0.0078125, %v560_v19  ;;  %v6112_v18 = vld [vmem:[#allocation7 + $0x80] ss:$12 sps:$4 sm:$0xff]  }
  0xff   : > { %v7079_v22 = vsub.f32 %v537_v0, %v588_v20  ;;  %v7081_v23 = vsub.f32 %v539_v1, %v590_v21  ;;  %v6106_v0 = vld [vmem:[#allocation7 + $0x7c] ss:$12 sps:$4 sm:$0xff]   ;;  %v6108_v1 = vld [vmem:[#allocation7 + $0x98] ss:$12 sps:$4 sm:$0xff]   ;;  %v6113_v20 = vld [vmem:[#allocation7 + $0x60] ss:$12 sps:$4 sm:$0xff]  }
 0x100   : > { %v558_v24 = vpop.xlane.xlu0 %557  ;;  %v562_v25 = vpop.xlane.xlu1 %561  ;;  %965 = vmatprep.subr.bf16.mxu0 %v6106_v0  ;;  %5554 = vmatprep.subr.bf16.mxu1 %v6108_v1 }
 0x101   : > { %v589_v26 = vmul.f32 0.0078125, %v558_v24  ;;  %v620_v27 = vmul.f32 %v7079_v22, %v7079_v22  ;;  %v591_v28 = vmul.f32 0.0078125, %v562_v25  ;;  %v622_v29 = vmul.f32 %v7081_v23, %v7081_v23  ;;  %5555 = vmatpush3.bf16.msra.mxu1 %v6108_v1 }
 0x102   : > { %5556 = vmatprep.subr.bf16.mxu1 %v6112_v18 }
 0x103   : > { %636 = vadd.xlane.f32.xlu0 %v620_v27  ;;  %v7087_v30 = vsub.f32 %v538_v2, %v589_v26  ;;  %v7089_v31 = vsub.f32 %v540_v3, %v591_v28  ;;  %v6114_v28 = vld [vmem:[#allocation7 + $0x4c] ss:$12 sps:$4 sm:$0xff]  }
 0x104   : > { %v564_v32 = vpop.xlane.xlu0 %563  ;;  %v566_v33 = vpop.xlane.xlu1 %565 }
 0x105   : > { %v592_v34 = vmul.f32 0.0078125, %v564_v32  ;;  %v621_v35 = vmul.f32 %v7087_v30, %v7087_v30  ;;  %v593_v36 = vmul.f32 0.0078125, %v566_v33  ;;  %v623_v37 = vmul.f32 %v7089_v31, %v7089_v31  ;;  %5557 = vmatpush3.bf16.msra.mxu1 %v6112_v18  ;;  %v6117_v33 = vld [vmem:[#allocation7 + $0x48] ss:$12 sps:$4 sm:$0xff]  }
 0x107   : > { %640 = vadd.xlane.f32.xlu0 %v622_v29  ;;  %638 = vadd.xlane.f32.xlu1 %v621_v35  ;;  %v7095_v38 = vsub.f32 %v541_v4, %v592_v34  ;;  %v7097_v39 = vsub.f32 %v542_v5, %v593_v36  ;;  %v6109_v5 = vld [vmem:[#allocation7 + $0x78] ss:$12 sps:$4 sm:$0xff]   ;;  %v6116_v29 = vld [vmem:[#allocation7 + $0x68] ss:$12 sps:$4 sm:$0xff]   ;;  %v6120_v36 = vld [vmem:[#allocation7 + $0x50] ss:$12 sps:$4 sm:$0xff]  }
 0x108   : > { %v568_v40 = vpop.xlane.xlu0 %567  ;;  %v570_v41 = vpop.xlane.xlu1 %569  ;;  %966 = vmatpush1.bf16.msra.mxu0 %v6109_v5  ;;  %5558 = vmatprep.subr.bf16.mxu1 %v6116_v29  ;;  %v6118_v35 = vld [vmem:[#allocation7 + $0x34] ss:$12 sps:$4 sm:$0xff]  }
 0x109   : > { %v594_v42 = vmul.f32 0.0078125, %v568_v40  ;;  %v624_v43 = vmul.f32 %v7095_v38, %v7095_v38  ;;  %v595_v44 = vmul.f32 0.0078125, %v570_v41  ;;  %v625_v45 = vmul.f32 %v7097_v39, %v7097_v39  ;;  %967 = vmatprep.subr.bf16.mxu0 %v6110_v17  ;;  %5559 = vmatpush3.bf16.msra.mxu1 %v6116_v29  ;;  %v6124_v40 = vld [vmem:[#allocation7 + $0x38] ss:$12 sps:$4 sm:$0xff]  }
 0x10a   : > { %5560 = vmatprep.subr.bf16.mxu1 %v6120_v36  ;;  %v6125_v41 = vld [vmem:[#allocation7 + $0x18] ss:$12 sps:$4 sm:$0xff]  }
 0x10b   : > { %642 = vadd.xlane.f32.xlu1 %v623_v37  ;;  %644 = vadd.xlane.f32.xlu0 %v624_v43  ;;  %v7103_v46 = vsub.f32 %v543_v6, %v594_v42  ;;  %v7105_v47 = vsub.f32 %v544_v7, %v595_v44  ;;  %v6126_v42 = vld [vmem:[#allocation7 + $0x4] ss:$12 sps:$4 sm:$0xff]   ;;  %v6128_v43 = vld [vmem:[#allocation7 + $0x20] ss:$12 sps:$4 sm:$0xff]  }
 0x10c   : > { %v572_v48 = vpop.xlane.xlu0 %571  ;;  %v574_v49 = vpop.xlane.xlu1 %573  ;;  %968 = vmatpush1.bf16.msra.mxu0 %v6113_v20  ;;  %v6129_v44 = vld [vmem:[#allocation7] ss:$12 sps:$4 sm:$0xff]  }
 0x10d   : > { %v596_v50 = vmul.f32 0.0078125, %v572_v48  ;;  %v626_v51 = vmul.f32 %v7103_v46, %v7103_v46  ;;  %v597_v52 = vmul.f32 0.0078125, %v574_v49  ;;  %v627_v56 = vmul.f32 %v7105_v47, %v7105_v47  ;;  %969 = vmatprep.subr.bf16.mxu0 %v6114_v28  ;;  %5561 = vmatpush3.bf16.msra.mxu1 %v6120_v36 }
 0x10e   : > { %5562 = vmatprep.subr.bf16.mxu1 %v6124_v40  ;;  %v6804_v48 = vmov 0  }
 0x10f   : > { %646 = vadd.xlane.f32.xlu1 %v625_v45  ;;  %648 = vadd.xlane.f32.xlu0 %v626_v51  ;;  %v7112_v57 = vsub.f32 %v7048_v8, %v596_v50  ;;  %v7115_v58 = vsub.f32 %v7051_v9, %v597_v52  ;;  %v6130_v45 = vld [vmem:[#allocation7 + $0x8] ss:$12 sps:$4 sm:$0xff]  }
 0x110   : > { %v576_v59 = vpop.xlane.xlu0 %575  ;;  %v578_v60 = vpop.xlane.xlu1 %577  ;;  %970 = vmatpush1.bf16.msra.mxu0 %v6117_v33  ;;  %993 = vmatprep.mubr.bf16.mxu0 %v6804_v48 }
 0x111   : > { %v598_v61 = vmul.f32 0.0078125, %v576_v59  ;;  %v628_v62 = vmul.f32 %v7112_v57, %v7112_v57  ;;  %v599_v63 = vmul.f32 0.0078125, %v578_v60  ;;  %v629_v2 = vmul.f32 %v7115_v58, %v7115_v58  ;;  %971 = vmatprep.subr.bf16.mxu0 %v6118_v35  ;;  %5563 = vmatpush3.bf16.msra.mxu1 %v6124_v40 }
 0x112   : > { %5564 = vmatprep.subr.bf16.mxu1 %v6128_v43 }
 0x113   : > { %650 = vadd.xlane.f32.xlu1 %v627_v56  ;;  %652 = vadd.xlane.f32.xlu0 %v628_v62  ;;  %v7122_v3 = vsub.f32 %v7054_v10, %v598_v61  ;;  %v7125_v4 = vsub.f32 %v7057_v11, %v599_v63 }
 0x114   : > { %v580_v6 = vpop.xlane.xlu0 %579  ;;  %v582_v7 = vpop.xlane.xlu1 %581 }
 0x115   : > { %v600_v8 = vmul.f32 0.0078125, %v580_v6  ;;  %v630_v9 = vmul.f32 %v7122_v3, %v7122_v3  ;;  %v601_v16 = vmul.f32 0.0078125, %v582_v7  ;;  %v631_v10 = vmul.f32 %v7125_v4, %v7125_v4  ;;  %5565 = vmatpush3.bf16.msra.mxu1 %v6128_v43 }
 0x116   : > { %5566 = vmatprep.subr.bf16.mxu1 %v6130_v45 }
 0x117   : > { %654 = vadd.xlane.f32.xlu1 %v629_v2  ;;  %656 = vadd.xlane.f32.xlu0 %v630_v9  ;;  %v7132_v11 = vsub.f32 %v7062_v12, %v600_v8  ;;  %v7135_v19 = vsub.f32 %v7065_v13, %v601_v16 }
 0x118   : > { %v584_v21 = vpop.xlane.xlu0 %583  ;;  %v586_v24 = vpop.xlane.xlu1 %585 }
 0x119   : > { %v602_v25 = vmul.f32 0.0078125, %v584_v21  ;;  %v632_v26 = vmul.f32 %v7132_v11, %v7132_v11  ;;  %v603_v27 = vmul.f32 0.0078125, %v586_v24  ;;  %v633_v12 = vmul.f32 %v7135_v19, %v7135_v19  ;;  %5567 = vmatpush3.bf16.msra.mxu1 %v6130_v45 }
 0x11b   : > { %658 = vadd.xlane.f32.xlu1 %v631_v10  ;;  %660 = vadd.xlane.f32.xlu0 %v632_v26  ;;  %v7142_v13 = vsub.f32 %v7070_v14, %v602_v25  ;;  %v7145_v32 = vsub.f32 %v7073_v15, %v603_v27  ;;  %v6121_v14 = vld [vmem:[#allocation7 + $0x30] ss:$12 sps:$4 sm:$0xff]   ;;  %v7155_v25 = vld [vmem:[%s8495_s1] ss:$0 sm:$0xff] }
 0x11c   : > { %972 = vmatpush1.bf16.msra.mxu0 %v6121_v14  ;;  %v6122_v15 = vld [vmem:[#allocation7 + $0x1c] ss:$12 sps:$4 sm:$0xff]   ;;  %v7162_v14 = vld [vmem:[%s8496_s2] ss:$0 sm:$0xff] }
 0x11d   : > { %v634_v34 = vmul.f32 %v7142_v13, %v7142_v13  ;;  %v635_v37 = vmul.f32 %v7145_v32, %v7145_v32  ;;  %973 = vmatprep.subr.bf16.mxu0 %v6122_v15 }
 0x11f   : > { %662 = vadd.xlane.f32.xlu1 %v633_v12  ;;  %664 = vadd.xlane.f32.xlu0 %v634_v34 }
 0x120   : > { %974 = vmatpush1.bf16.msra.mxu0 %v6125_v41 }
 0x121   : > { %975 = vmatprep.subr.bf16.mxu0 %v6126_v42 }
 0x123   : > { %666 = vadd.xlane.f32.xlu1 %v635_v37 }
 0x124   : > { %976 = vmatpush1.bf16.msra.mxu0 %v6129_v44 }
 0x18c   : > { %v637_v49 = vpop.xlane.xlu0 %636 }
 0x18d   : > { %v668_v50 = vmul.f32 0.0078125, %v637_v49 }
 0x18f   : > { %v684_v51 = vadd.f32 1e-05, %v668_v50 }
 0x190   : > { %v639_v52 = vpop.xlane.xlu1 %638  ;;  %v641_v53 = vpop.xlane.xlu0 %640 }
 0x191   : > { %6251 = vrsqrt.f32 %v684_v51  ;;  %v669_v54 = vmul.f32 0.0078125, %v639_v52  ;;  %v670_v55 = vmul.f32 0.0078125, %v641_v53 }
 0x193   : > { %v685_v56 = vadd.f32 1e-05, %v669_v54  ;;  %v686_v59 = vadd.f32 1e-05, %v670_v55 }
 0x194   : > { %v643_v60 = vpop.xlane.xlu1 %642  ;;  %v645_v61 = vpop.xlane.xlu0 %644 }
 0x195   : > { %6253 = vrsqrt.f32 %v685_v56  ;;  %v671_v62 = vmul.f32 0.0078125, %v643_v60  ;;  %v672_v63 = vmul.f32 0.0078125, %v645_v61 }
 0x196   : > { %6255 = vrsqrt.f32 %v686_v59 }
 0x197   : > { %v687_v0 = vadd.f32 1e-05, %v671_v62  ;;  %v688_v1 = vadd.f32 1e-05, %v672_v63 }
 0x198   : > { %v647_v2 = vpop.xlane.xlu1 %646  ;;  %v649_v5 = vpop.xlane.xlu0 %648 }
 0x199   : > { %6257 = vrsqrt.f32 %v687_v0  ;;  %v673_v6 = vmul.f32 0.0078125, %v647_v2  ;;  %v674_v7 = vmul.f32 0.0078125, %v649_v5 }
 0x19a   : > { %6259 = vrsqrt.f32 %v688_v1 }
 0x19b   : > { %v689_v8 = vadd.f32 1e-05, %v673_v6  ;;  %v690_v9 = vadd.f32 1e-05, %v674_v7 }
 0x19c   : > { %v651_v16 = vpop.xlane.xlu1 %650  ;;  %v653_v17 = vpop.xlane.xlu0 %652 }
 0x19d   : > { %6261 = vrsqrt.f32 %v689_v8  ;;  %v675_v18 = vmul.f32 0.0078125, %v651_v16  ;;  %v676_v10 = vmul.f32 0.0078125, %v653_v17 }
 0x19e   : > { %v6252_v20 = vpop.eup %6251  ;;  %6263 = vrsqrt.f32 %v690_v9 }
 0x19f   : > { %v691_v21 = vadd.f32 1e-05, %v675_v18  ;;  %v692_v24 = vadd.f32 1e-05, %v676_v10  ;;  %v716_v26 = vmul.f32 %v6252_v20, %v7079_v22 }
 0x1a0   : > { %v655_v27 = vpop.xlane.xlu1 %654  ;;  %v657_v28 = vpop.xlane.xlu0 %656 }
 0x1a1   : > { %6265 = vrsqrt.f32 %v691_v21  ;;  %v677_v29 = vmul.f32 0.0078125, %v655_v27  ;;  %v678_v12 = vmul.f32 0.0078125, %v657_v28  ;;  %v738_v34 = vmul.f32 %v7155_v25, %v716_v26 }
 0x1a2   : > { %v6254_v33 = vpop.eup %6253  ;;  %6267 = vrsqrt.f32 %v692_v24 }
 0x1a3   : > { %v6256_v35 = vpop.eup %6255  ;;  %v693_v36 = vadd.f32 1e-05, %v677_v29  ;;  %v694_v37 = vadd.f32 1e-05, %v678_v12  ;;  %v717_v15 = vmul.f32 %v6254_v33, %v7087_v30  ;;  %v760_v49 = vadd.f32 %v7162_v14, %v738_v34 }
 0x1a4   : > { %v659_v22 = vpop.xlane.xlu1 %658  ;;  %v661_v40 = vpop.xlane.xlu0 %660  ;;  %v718_v41 = vmul.f32 %v6256_v35, %v7081_v23 }
 0x1a5   : > { %6269 = vrsqrt.f32 %v693_v36  ;;  %v679_v42 = vmul.f32 0.0078125, %v659_v22  ;;  %v680_v43 = vmul.f32 0.0078125, %v661_v40  ;;  %v739_v44 = vmul.f32 %v7155_v25, %v717_v15 }
 0x1a6   : > { %v6258_v45 = vpop.eup %6257  ;;  %6271 = vrsqrt.f32 %v694_v37  ;;  %v740_v23 = vmul.f32 %v7155_v25, %v718_v41 }
 0x1a7   : > { %v6260_v50 = vpop.eup %6259  ;;  %v695_v51 = vadd.f32 1e-05, %v679_v42  ;;  %v696_v52 = vadd.f32 1e-05, %v680_v43  ;;  %v761_v53 = vadd.f32 %v7162_v14, %v739_v44  ;;  %v719_v30 = vmul.f32 %v6258_v45, %v7089_v31 }
 0x1a8   : > { %v663_v54 = vpop.xlane.xlu1 %662  ;;  %v665_v55 = vpop.xlane.xlu0 %664  ;;  %v720_v56 = vmul.f32 %v6260_v50, %v7095_v38  ;;  %v762_v38 = vadd.f32 %v7162_v14, %v740_v23 }
 0x1a9   : > { %6273 = vrsqrt.f32 %v695_v51  ;;  %v681_v59 = vmul.f32 0.0078125, %v663_v54  ;;  %v682_v60 = vmul.f32 0.0078125, %v665_v55  ;;  %v776_v61 = vpack.c.bf16 %v761_v53, %v760_v49 }
 0x1aa   : > { %v6262_v62 = vpop.eup %6261  ;;  %6275 = vrsqrt.f32 %v696_v52  ;;  %v741_v63 = vmul.f32 %v7155_v25, %v719_v30  ;;  %v742_v5 = vmul.f32 %v7155_v25, %v720_v56 }
 0x1ab   : > { %v6264_v0 = vpop.eup %6263  ;;  %v697_v1 = vadd.f32 1e-05, %v681_v59  ;;  %v698_v2 = vadd.f32 1e-05, %v682_v60  ;;  %994 = vmatmul.mubr.bf16.vlgmr.msra.gmra.mxu0 %v776_v61  ;;  %5568 = vmatprep.mubr.bf16.mxu1 %v776_v61  ;;  %v721_v31 = vmul.f32 %v6262_v62, %v7097_v39 }
 0x1ac   : > { %v667_v6 = vpop.xlane.xlu1 %666  ;;  %v763_v7 = vadd.f32 %v7162_v14, %v741_v63  ;;  %1003 = vmatprep.mubr.bf16.mxu0 %v6804_v48  ;;  %v722_v8 = vmul.f32 %v6264_v0, %v7103_v46  ;;  %v764_v21 = vadd.f32 %v7162_v14, %v742_v5 }
 0x1ad   : > { %6277 = vrsqrt.f32 %v697_v1  ;;  %v683_v9 = vmul.f32 0.0078125, %v667_v6  ;;  %v743_v16 = vmul.f32 %v7155_v25, %v721_v31 }
 0x1ae   : > { %v6266_v17 = vpop.eup %6265  ;;  %6279 = vrsqrt.f32 %v698_v2  ;;  %v777_v18 = vpack.c.bf16 %v763_v7, %v762_v38  ;;  %v744_v39 = vmul.f32 %v7155_v25, %v722_v8 }
 0x1af   : > { %v6268_v10 = vpop.eup %6267  ;;  %v699_v20 = vadd.f32 1e-05, %v683_v9  ;;  %v765_v24 = vadd.f32 %v7162_v14, %v743_v16  ;;  %v723_v26 = vmul.f32 %v6266_v17, %v7105_v47 }
 0x1b0   : > { %5569 = vmatmul.mubr.bf16.vlgmr.msra.gmra.mxu1 %v777_v18  ;;  %v724_v46 = vmul.f32 %v6268_v10, %v7112_v57  ;;  %v766_v12 = vadd.f32 %v7162_v14, %v744_v39 }
 0x1b1   : > { %6281 = vrsqrt.f32 %v699_v20  ;;  %v778_v27 = vpack.c.bf16 %v765_v24, %v764_v21  ;;  %v745_v28 = vmul.f32 %v7155_v25, %v723_v26 }
 0x1b2   : > { %v6270_v29 = vpop.eup %6269  ;;  %v746_v36 = vmul.f32 %v7155_v25, %v724_v46 }
 0x1b3   : > { %v6272_v33 = vpop.eup %6271  ;;  %1004 = vmatmul.mubr.bf16.gmra.mxu0 %v777_v18  ;;  %5572 = vmatprep.mubr.bf16.mxu1 %v778_v27  ;;  %v767_v34 = vadd.f32 %v7162_v14, %v745_v28  ;;  %v725_v35 = vmul.f32 %v6270_v29, %v7115_v58 }
 0x1b4   : > { %1013 = vmatprep.mubr.bf16.mxu0 %v6804_v48  ;;  %v726_v47 = vmul.f32 %v6272_v33, %v7122_v3  ;;  %v768_v41 = vadd.f32 %v7162_v14, %v746_v36 }
 0x1b5   : > { %v779_v57 = vpack.c.bf16 %v767_v34, %v766_v12  ;;  %v747_v37 = vmul.f32 %v7155_v25, %v725_v35 }
 0x1b6   : > { %v6274_v15 = vpop.eup %6273  ;;  %v748_v22 = vmul.f32 %v7155_v25, %v726_v47 }
 0x1b7   : > { %v6276_v40 = vpop.eup %6275  ;;  %v769_v42 = vadd.f32 %v7162_v14, %v747_v37  ;;  %v727_v43 = vmul.f32 %v6274_v15, %v7125_v4 }
 0x1b8   : > { %5573 = vmatmul.mubr.bf16.gmra.mxu1 %v779_v57  ;;  %v728_v58 = vmul.f32 %v6276_v40, %v7132_v11  ;;  %v770_v49 = vadd.f32 %v7162_v14, %v748_v22 }
 0x1b9   : > { %v780_v44 = vpack.c.bf16 %v769_v42, %v768_v41  ;;  %v749_v45 = vmul.f32 %v7155_v25, %v727_v43 }
 0x1ba   : > { %v6278_v3 = vpop.eup %6277  ;;  %v750_v53 = vmul.f32 %v7155_v25, %v728_v58 }
 0x1bb   : > { %v6280_v50 = vpop.eup %6279  ;;  %1014 = vmatmul.mubr.bf16.gmra.mxu0 %v778_v27  ;;  %5576 = vmatprep.mubr.bf16.mxu1 %v780_v44  ;;  %v771_v51 = vadd.f32 %v7162_v14, %v749_v45  ;;  %v729_v52 = vmul.f32 %v6278_v3, %v7135_v19 }
 0x1bc   : > { %1023 = vmatprep.mubr.bf16.mxu0 %v6804_v48  ;;  %v730_v4 = vmul.f32 %v6280_v50, %v7142_v13  ;;  %v772_v55 = vadd.f32 %v7162_v14, %v750_v53 }
 0x1bd   : > { %v781_v11 = vpack.c.bf16 %v771_v51, %v770_v49  ;;  %v751_v30 = vmul.f32 %v7155_v25, %v729_v52 }
 0x1be   : > { %v6282_v54 = vpop.eup %6281  ;;  %v752_v59 = vmul.f32 %v7155_v25, %v730_v4 }
 0x1bf   : > { %v773_v23 = vadd.f32 %v7162_v14, %v751_v30  ;;  %v731_v56 = vmul.f32 %v6282_v54, %v7145_v32  ;;  %v818_v32 = vlaneseq }
 0x1c0   : > { %5577 = vmatmul.mubr.bf16.gmra.mxu1 %v781_v11  ;;  %v774_v13 = vadd.f32 %v7162_v14, %v752_v59 }
 0x1c1   : > { %v782_v19 = vpack.c.bf16 %v773_v23, %v772_v55  ;;  %v753_v60 = vmul.f32 %v7155_v25, %v731_v56  ;;  %v819_v25 = vshrl.u32 %v818_v32, 7 }
 0x1c3   : > { %1024 = vmatmul.mubr.bf16.gmra.mxu0 %v779_v57  ;;  %5580 = vmatprep.mubr.bf16.mxu1 %v782_v19  ;;  %v775_v61 = vadd.f32 %v7162_v14, %v753_v60  ;;  %v820_v63 = vsub.s32 0, %v819_v25  ;;  %v824_v0 = vsub.s32 1, %v819_v25  ;;  %v816_v14 = vld [vmem:[%s8498_s4] sm:$0x7]  ;;  %v828_v1 = vsub.s32 2, %v819_v25 }
 0x1c4   : > { %1033 = vmatprep.mubr.bf16.mxu0 %v6804_v48 }
 0x1c5   : > { %v783_v62 = vpack.c.bf16 %v775_v61, %v774_v13  ;;  %v7220_v2 = vrot.slane %v816_v14, %v820_v63  ;;  %v7222_v31 = vrot.slane %v816_v14, %v824_v0  ;;  %v7224_v38 = vrot.slane %v816_v14, %v828_v1 }
 0x1c8   : > { %5581 = vmatmul.mubr.bf16.gmra.mxu1 %v783_v62 }
 0x1cb   : > { %1034 = vmatmul.mubr.bf16.gmra.mxu0 %v780_v44 }
 0x1cc   : > { %1043 = vmatprep.mubr.bf16.mxu0 %v6804_v48 }
 0x1d3   : > { %1044 = vmatmul.mubr.bf16.gmra.mxu0 %v781_v11 }
 0x1d4   : > { %1053 = vmatprep.mubr.bf16.mxu0 %v6804_v48 }
 0x1db   : > { %1054 = vmatmul.mubr.bf16.gmra.mxu0 %v782_v19 }
 0x1dc   : > { %1063 = vmatprep.mubr.bf16.mxu0 %v6804_v48 }
 0x1e3   : > { %1064 = vmatmul.mubr.bf16.gmra.mxu0 %v783_v62 }
 0x26b   : > { %v995_v5 = vpop.f32.mrf.mxu0 }
 0x26c   : > { %v996_v48 = vadd.f32 %v995_v5, %v7220_v2 }
 0x26d   : > { %v997_v6 = vpop.f32.mrf.mxu0 }
 0x26e   : > { %v998_v7 = vadd.f32 %v997_v6, %v7222_v31 }
 0x26f   : > { %v999_v8 = vpop.f32.mrf.mxu0 }
 0x270   : > { %v5327_v9 = vpack.c.bf16 %v998_v7, %v996_v48  ;;  %v5570_v16 = vpop.f32.mrf.mxu1  ;;  %v1000_v39 = vadd.f32 %v999_v8, %v7220_v2 }
 0x271   : > { %v1117_v17 = vadd.f32 %v5570_v16, %v7224_v38  ;;  %v1001_v18 = vpop.f32.mrf.mxu0 }
 0x272   : > { %1331 = vst [vmem:[#allocation2] sm:$0xff] %v5327_v9  ;;  %v1002_v10 = vadd.f32 %v1001_v18, %v7222_v31  ;;  %v1108_v20 = vpop.f32.mrf.mxu1 }
 0x273   : > { %v5332_v21 = vpack.c.bf16 %v1117_v17, %v1117_v17  ;;  %v1109_v24 = vadd.f32 %v1108_v20, %v7224_v38  ;;  %v1005_v26 = vpop.f32.mrf.mxu0 }
 0x274   : > { %v5329_v46 = vpack.c.bf16 %v1002_v10, %v1000_v39  ;;  %v5571_v27 = vpop.f32.mrf.mxu1  ;;  %v1006_v33 = vadd.f32 %v1005_v26, %v7220_v2 }
 0x275   : > { %1336 = vst [vmem:[#allocation2 + $0x20] sm:$0xf] %v5332_v21  ;;  %v5328_v28 = vpack.c.bf16 %v1109_v24, %v1109_v24  ;;  %v1120_v29 = vadd.f32 %v5571_v27, %v7224_v38  ;;  %v1007_v12 = vpop.f32.mrf.mxu0 }
 0x276   : > { %1333 = vst [vmem:[#allocation2 + $0xc] sm:$0xff] %v5329_v46  ;;  %v1008_v34 = vadd.f32 %v1007_v12, %v7222_v31  ;;  %v1111_v35 = vpop.f32.mrf.mxu1 }
 0x277   : > { %1332 = vst [vmem:[#allocation2 + $0x8] sm:$0xf] %v5328_v28  ;;  %v5334_v36 = vpack.c.bf16 %v1120_v29, %v1120_v29  ;;  %v1112_v47 = vadd.f32 %v1111_v35, %v7224_v38  ;;  %v1009_v57 = vpop.f32.mrf.mxu0 }
 0x278   : > { %v5331_v37 = vpack.c.bf16 %v1008_v34, %v1006_v33  ;;  %v5574_v15 = vpop.f32.mrf.mxu1  ;;  %v1010_v42 = vadd.f32 %v1009_v57, %v7220_v2 }
 0x279   : > { %1338 = vst [vmem:[#allocation2 + $0x2c] sm:$0xf] %v5334_v36  ;;  %v5330_v22 = vpack.c.bf16 %v1112_v47, %v1112_v47  ;;  %v1133_v40 = vadd.f32 %v5574_v15, %v7224_v38  ;;  %v1011_v41 = vpop.f32.mrf.mxu0 }
 0x27a   : > { %1335 = vst [vmem:[#allocation2 + $0x18] sm:$0xff] %v5331_v37  ;;  %v1012_v43 = vadd.f32 %v1011_v41, %v7222_v31  ;;  %v1124_v58 = vpop.f32.mrf.mxu1 }
 0x27b   : > { %1334 = vst [vmem:[#allocation2 + $0x14] sm:$0xf] %v5330_v22  ;;  %v5340_v44 = vpack.c.bf16 %v1133_v40, %v1133_v40  ;;  %v1125_v45 = vadd.f32 %v1124_v58, %v7224_v38  ;;  %v1015_v3 = vpop.f32.mrf.mxu0 }
 0x27c   : > { %v5333_v49 = vpack.c.bf16 %v1012_v43, %v1010_v42  ;;  %v5575_v50 = vpop.f32.mrf.mxu1  ;;  %v1016_v11 = vadd.f32 %v1015_v3, %v7220_v2 }
 0x27d   : > { %1344 = vst [vmem:[#allocation2 + $0x50] sm:$0xf] %v5340_v44  ;;  %v5336_v51 = vpack.c.bf16 %v1125_v45, %v1125_v45  ;;  %v1136_v52 = vadd.f32 %v5575_v50, %v7224_v38  ;;  %v1017_v53 = vpop.f32.mrf.mxu0  ;;  %v6131_v4 = vld [vmem:[#allocation2] ss:$12 sps:$4 sm:$0xff]  }
 0x27e   : > { %1337 = vst [vmem:[#allocation2 + $0x24] sm:$0xff] %v5333_v49  ;;  %v1018_v30 = vadd.f32 %v1017_v53, %v7222_v31  ;;  %v1127_v54 = vpop.f32.mrf.mxu1  ;;  %5600 = vmatprep.mubr.msk.bf16.mxu0 %vm1497_vm0, %v6131_v4 }
 0x27f   : > { %1340 = vst [vmem:[#allocation2 + $0x38] sm:$0xf] %v5336_v51  ;;  %v5342_v55 = vpack.c.bf16 %v1136_v52, %v1136_v52  ;;  %v1128_v23 = vadd.f32 %v1127_v54, %v7224_v38  ;;  %v1019_v56 = vpop.f32.mrf.mxu0 }
 0x280   : > { %v5335_v59 = vpack.c.bf16 %v1018_v30, %v1016_v11  ;;  %v5578_v19 = vpop.f32.mrf.mxu1  ;;  %v1020_v62 = vadd.f32 %v1019_v56, %v7220_v2 }
 0x281   : > { %1346 = vst [vmem:[#allocation2 + $0x5c] sm:$0xf] %v5342_v55  ;;  %v5338_v60 = vpack.c.bf16 %v1128_v23, %v1128_v23  ;;  %v1149_v13 = vadd.f32 %v5578_v19, %v7224_v38  ;;  %v1021_v61 = vpop.f32.mrf.mxu0 }
 0x282   : > { %1339 = vst [vmem:[#allocation2 + $0x30] sm:$0xff] %v5335_v59  ;;  %v1022_v32 = vadd.f32 %v1021_v61, %v7222_v31  ;;  %v1140_v25 = vpop.f32.mrf.mxu1 }
 0x283   : > { %1342 = vst [vmem:[#allocation2 + $0x44] sm:$0xf] %v5338_v60  ;;  %v5348_v63 = vpack.c.bf16 %v1149_v13, %v1149_v13  ;;  %v1141_v0 = vadd.f32 %v1140_v25, %v7224_v38  ;;  %v1025_v14 = vpop.f32.mrf.mxu0 }
 0x284   : > { %v5337_v1 = vpack.c.bf16 %v1022_v32, %v1020_v62  ;;  %v5579_v5 = vpop.f32.mrf.mxu1  ;;  %v1026_v8 = vadd.f32 %v1025_v14, %v7220_v2 }
 0x285   : > { %1352 = vst [vmem:[#allocation2 + $0x80] sm:$0xf] %v5348_v63  ;;  %v5344_v6 = vpack.c.bf16 %v1141_v0, %v1141_v0  ;;  %v1152_v48 = vadd.f32 %v5579_v5, %v7224_v38  ;;  %v1027_v7 = vpop.f32.mrf.mxu0 }
 0x286   : > { %1341 = vst [vmem:[#allocation2 + $0x3c] sm:$0xff] %v5337_v1  ;;  %v1028_v9 = vadd.f32 %v1027_v7, %v7222_v31  ;;  %v1143_v16 = vpop.f32.mrf.mxu1 }
 0x287   : > { %1348 = vst [vmem:[#allocation2 + $0x68] sm:$0xf] %v5344_v6  ;;  %v5350_v17 = vpack.c.bf16 %v1152_v48, %v1152_v48  ;;  %v1144_v18 = vadd.f32 %v1143_v16, %v7224_v38  ;;  %v1029_v39 = vpop.f32.mrf.mxu0 }
 0x288   : > { %v5339_v10 = vpack.c.bf16 %v1028_v9, %v1026_v8  ;;  %v5582_v20 = vpop.f32.mrf.mxu1  ;;  %v1030_v46 = vadd.f32 %v1029_v39, %v7220_v2  ;;  %v6136_v8 = vld [vmem:[#allocation2 + $0x50] ss:$12 sps:$4 sm:$0xff]  }
 0x289   : > { %1354 = vst [vmem:[#allocation2 + $0x8c] sm:$0xf] %v5350_v17  ;;  %v5346_v21 = vpack.c.bf16 %v1144_v18, %v1144_v18  ;;  %v1165_v24 = vadd.f32 %v5582_v20, %v7224_v38  ;;  %v1031_v26 = vpop.f32.mrf.mxu0 }
 0x28a   : > { %1343 = vst [vmem:[#allocation2 + $0x48] sm:$0xff] %v5339_v10  ;;  %v1032_v27 = vadd.f32 %v1031_v26, %v7222_v31  ;;  %v1156_v28 = vpop.f32.mrf.mxu1  ;;  %v6137_v17 = vld [vmem:[#allocation2 + $0x38] ss:$12 sps:$4 sm:$0xff]   ;;  %v6140_v26 = vld [vmem:[#allocation2 + $0x8] ss:$12 sps:$4 sm:$0xff]  }
 0x28b   : > { %1350 = vst [vmem:[#allocation2 + $0x74] sm:$0xf] %v5346_v21  ;;  %v5356_v29 = vpack.c.bf16 %v1165_v24, %v1165_v24  ;;  %v1157_v12 = vadd.f32 %v1156_v28, %v7224_v38  ;;  %v1035_v33 = vpop.f32.mrf.mxu0  ;;  %v6139_v24 = vld [vmem:[#allocation2 + $0x20] ss:$12 sps:$4 sm:$0xff]  }
 0x28c   : > { %v5341_v34 = vpack.c.bf16 %v1032_v27, %v1030_v46  ;;  %v5583_v35 = vpop.f32.mrf.mxu1  ;;  %v1036_v37 = vadd.f32 %v1035_v33, %v7220_v2 }
 0x28d   : > { %1360 = vst [vmem:[#allocation2 + $0xb0] sm:$0xf] %v5356_v29  ;;  %v5352_v36 = vpack.c.bf16 %v1157_v12, %v1157_v12  ;;  %v1168_v47 = vadd.f32 %v5583_v35, %v7224_v38  ;;  %v1037_v57 = vpop.f32.mrf.mxu0 }
 0x28e   : > { %1345 = vst [vmem:[#allocation2 + $0x54] sm:$0xff] %v5341_v34  ;;  %v1038_v15 = vadd.f32 %v1037_v57, %v7222_v31  ;;  %v1159_v22 = vpop.f32.mrf.mxu1 }
 0x28f   : > { %1356 = vst [vmem:[#allocation2 + $0x98] sm:$0xf] %v5352_v36  ;;  %v5358_v40 = vpack.c.bf16 %v1168_v47, %v1168_v47  ;;  %v1160_v41 = vadd.f32 %v1159_v22, %v7224_v38  ;;  %v1039_v42 = vpop.f32.mrf.mxu0  ;;  %v6147_v36 = vld [vmem:[#allocation2 + $0x34] ss:$12 sps:$4 sm:$0xff]   ;;  %v6149_v22 = vld [vmem:[#allocation2 + $0x4] ss:$12 sps:$4 sm:$0xff]  }
 0x290   : > { %v5343_v43 = vpack.c.bf16 %v1038_v15, %v1036_v37  ;;  %v1040_v45 = vadd.f32 %v1039_v42, %v7220_v2  ;;  %v6134_v61 = vld [vmem:[#allocation2 + $0x80] ss:$12 sps:$4 sm:$0xff]   ;;  %v1529_v57 = vsel %vm1497_vm0, %v6147_v36, 0  ;;  %v6148_v37 = vld [vmem:[#allocation2 + $0x1c] ss:$12 sps:$4 sm:$0xff]  }
 0x291   : > { %1362 = vst [vmem:[#allocation2 + $0xbc] sm:$0xf] %v5358_v40  ;;  %v5354_v58 = vpack.c.bf16 %v1160_v41, %v1160_v41  ;;  %v1041_v44 = vpop.f32.mrf.mxu0  ;;  %v1526_v15 = vsel %vm1497_vm0, %v6148_v37, 0  ;;  %v1523_v40 = vsel %vm1497_vm0, %v6149_v22, 0  ;;  %v6150_v41 = vld [vmem:[#allocation2 + $0x18] ss:$12 sps:$4 sm:$0xff]  }
 0x292   : > { %1347 = vst [vmem:[#allocation2 + $0x60] sm:$0xff] %v5343_v43  ;;  %v1042_v3 = vadd.f32 %v1041_v44, %v7222_v31  ;;  %v6135_v14 = vld [vmem:[#allocation2 + $0x68] ss:$12 sps:$4 sm:$0xff]   ;;  %v6151_v42 = vld [vmem:[#allocation2 + $0x30] ss:$12 sps:$4 sm:$0xff]  }
 0x293   : > { %1358 = vst [vmem:[#allocation2 + $0xa4] sm:$0xf] %v5354_v58  ;;  %v1045_v49 = vpop.f32.mrf.mxu0 }
 0x294   : > { %v5345_v50 = vpack.c.bf16 %v1042_v3, %v1040_v45  ;;  %v1046_v52 = vadd.f32 %v1045_v49, %v7220_v2 }
 0x295   : > { %v1047_v51 = vpop.f32.mrf.mxu0  ;;  %v6146_v34 = vld [vmem:[#allocation2 + $0x4c] ss:$12 sps:$4 sm:$0xff]   ;;  %v6152_v43 = vld [vmem:[#allocation2 + $0x48] ss:$12 sps:$4 sm:$0xff]  }
 0x296   : > { %1349 = vst [vmem:[#allocation2 + $0x6c] sm:$0xff] %v5345_v50  ;;  %v1048_v53 = vadd.f32 %v1047_v51, %v7222_v31  ;;  %v1532_v47 = vsel %vm1497_vm0, %v6146_v34, 0 }
 0x297   : > { %v1049_v38 = vpop.f32.mrf.mxu0 }
 0x298   : > { %v5347_v4 = vpack.c.bf16 %v1048_v53, %v1046_v52  ;;  %v6132_v11 = vld [vmem:[#allocation2 + $0xb0] ss:$12 sps:$4 sm:$0xff]   ;;  %v1050_v54 = vadd.f32 %v1049_v38, %v7220_v2 }
 0x299   : > { %v1051_v30 = vpop.f32.mrf.mxu0  ;;  %5616 = vmatprep.subr.bf16.mxu1 %v6132_v11 }
 0x29a   : > { %1351 = vst [vmem:[#allocation2 + $0x78] sm:$0xff] %v5347_v4  ;;  %v1052_v55 = vadd.f32 %v1051_v30, %v7222_v31  ;;  %v6133_v23 = vld [vmem:[#allocation2 + $0x98] ss:$12 sps:$4 sm:$0xff]   ;;  %5617 = vmatpush3.bf16.msra.mxu1 %v6132_v11 }
 0x29b   : > { %v1055_v56 = vpop.f32.mrf.mxu0  ;;  %5618 = vmatprep.subr.bf16.mxu1 %v6133_v23 }
 0x29c   : > { %v5349_v59 = vpack.c.bf16 %v1052_v55, %v1050_v54  ;;  %v1056_v60 = vadd.f32 %v1055_v56, %v7220_v2 }
 0x29d   : > { %v1057_v19 = vpop.f32.mrf.mxu0  ;;  %v6145_v12 = vld [vmem:[#allocation2 + $0x64] ss:$12 sps:$4 sm:$0xff]   ;;  %v6153_v58 = vld [vmem:[#allocation2 + $0x60] ss:$12 sps:$4 sm:$0xff]  }
 0x29e   : > { %1353 = vst [vmem:[#allocation2 + $0x84] sm:$0xff] %v5349_v59  ;;  %v1058_v13 = vadd.f32 %v1057_v19, %v7222_v31  ;;  %5619 = vmatpush3.bf16.msra.mxu1 %v6133_v23  ;;  %v1535_v35 = vsel %vm1497_vm0, %v6145_v12, 0 }
 0x29f   : > { %v1059_v62 = vpop.f32.mrf.mxu0  ;;  %5620 = vmatprep.subr.bf16.mxu1 %v6134_v61 }
 0x2a0   : > { %v5351_v32 = vpack.c.bf16 %v1058_v13, %v1056_v60  ;;  %v1060_v63 = vadd.f32 %v1059_v62, %v7220_v2 }
 0x2a1   : > { %v1061_v25 = vpop.f32.mrf.mxu0 }
 0x2a2   : > { %1355 = vst [vmem:[#allocation2 + $0x90] sm:$0xff] %v5351_v32  ;;  %v1062_v0 = vadd.f32 %v1061_v25, %v7222_v31  ;;  %5621 = vmatpush3.bf16.msra.mxu1 %v6134_v61 }
 0x2a3   : > { %v1065_v1 = vpop.f32.mrf.mxu0  ;;  %5622 = vmatprep.subr.bf16.mxu1 %v6135_v14 }
 0x2a4   : > { %v5353_v5 = vpack.c.bf16 %v1062_v0, %v1060_v63  ;;  %v1066_v48 = vadd.f32 %v1065_v1, %v7220_v2 }
 0x2a5   : > { %v1067_v6 = vpop.f32.mrf.mxu0  ;;  %v6144_v28 = vld [vmem:[#allocation2 + $0x7c] ss:$12 sps:$4 sm:$0xff]   ;;  %v6154_v44 = vld [vmem:[#allocation2 + $0x78] ss:$12 sps:$4 sm:$0xff]  }
 0x2a6   : > { %1357 = vst [vmem:[#allocation2 + $0x9c] sm:$0xff] %v5353_v5  ;;  %v1068_v7 = vadd.f32 %v1067_v6, %v7222_v31  ;;  %5623 = vmatpush3.bf16.msra.mxu1 %v6135_v14  ;;  %v1538_v33 = vsel %vm1497_vm0, %v6144_v28, 0 }
 0x2a7   : > { %v1069_v9 = vpop.f32.mrf.mxu0  ;;  %5624 = vmatprep.subr.bf16.mxu1 %v6136_v8 }
 0x2a8   : > { %v5355_v16 = vpack.c.bf16 %v1068_v7, %v1066_v48  ;;  %v1070_v39 = vadd.f32 %v1069_v9, %v7220_v2  ;;  %v6158_v9 = vld [vmem:[#allocation2 + $0x7c] ss:$12 sps:$4 sm:$0xff]  }
 0x2a9   : > { %v1071_v18 = vpop.f32.mrf.mxu0 }
 0x2aa   : > { %1359 = vst [vmem:[#allocation2 + $0xa8] sm:$0xff] %v5355_v16  ;;  %v1072_v10 = vadd.f32 %v1071_v18, %v7222_v31  ;;  %5625 = vmatpush3.bf16.msra.mxu1 %v6136_v8  ;;  %v6157_v8 = vld [vmem:[#allocation2 + $0x64] ss:$12 sps:$4 sm:$0xff]  }
 0x2ab   : > { %5626 = vmatprep.subr.bf16.mxu1 %v6137_v17 }
 0x2ac   : > { %v5357_v20 = vpack.c.bf16 %v1072_v10, %v1070_v39 }
 0x2ad   : > { %v6138_v21 = vld [vmem:[#allocation2 + $0x94] ss:$12 sps:$4 sm:$0xff]   ;;  %v6155_v45 = vld [vmem:[#allocation2 + $0x90] ss:$12 sps:$4 sm:$0xff]  }
 0x2ae   : > { %1361 = vst [vmem:[#allocation2 + $0xb4] sm:$0xff] %v5357_v20  ;;  %5627 = vmatpush3.bf16.msra.mxu1 %v6137_v17  ;;  %2128 = vrot.lane.b32.xlu1 %v6138_v21, %s6805_s17  ;;  %v6143_v31 = vld [vmem:[#allocation2 + $0x94] ss:$12 sps:$4 sm:$0xff]  }
 0x2af   : > { %5628 = vmatprep.subr.bf16.mxu1 %v6139_v24  ;;  %v1541_v29 = vsel %vm1497_vm0, %v6143_v31, 0 }
 0x2b2   : > { %5629 = vmatpush3.bf16.msra.mxu1 %v6139_v24 }
 0x2b3   : > { %5630 = vmatprep.subr.bf16.mxu1 %v6140_v26 }
 0x2b5   : > { %v6141_v46 = vld [vmem:[#allocation2 + $0xac] ss:$12 sps:$4 sm:$0xff]   ;;  %v6156_v3 = vld [vmem:[#allocation2 + $0xa8] ss:$12 sps:$4 sm:$0xff]  }
 0x2b6   : > { %v6142_v27 = vld [vmem:[#allocation2 + $0xac] ss:$12 sps:$4 sm:$0xff]   ;;  %5631 = vmatpush3.bf16.msra.mxu1 %v6140_v26  ;;  %2130 = vrot.lane.b32.xlu0 %v6141_v46, %s6805_s17 }
 0x2b7   : > { %5952 = vmatprep.subr.msk.bf16.mxu0 %vm1497_vm0, %v6142_v27  ;;  %v1544_v2 = vsel %vm1497_vm0, %v6142_v27, 0 }
 0x2b8   : > { %5585 = vmatpush3.bf16.xpose.msra.mxu0 %v1544_v2 }
 0x2b9   : > { %5953 = vmatprep.subr.msk.bf16.mxu0 %vm1497_vm0, %v6143_v31 }
 0x2c0   : > { %5587 = vmatpush3.bf16.xpose.msra.mxu0 %v1541_v29 }
 0x2c1   : > { %5954 = vmatprep.subr.msk.bf16.mxu0 %vm1497_vm0, %v6144_v28 }
 0x2c8   : > { %5589 = vmatpush3.bf16.xpose.msra.mxu0 %v1538_v33 }
 0x2c9   : > { %5955 = vmatprep.subr.msk.bf16.mxu0 %vm1497_vm0, %v6145_v12 }
 0x2d0   : > { %5591 = vmatpush3.bf16.xpose.msra.mxu0 %v1535_v35 }
 0x2d1   : > { %5956 = vmatprep.subr.msk.bf16.mxu0 %vm1497_vm0, %v6146_v34 }
 0x2d8   : > { %5593 = vmatpush3.bf16.xpose.msra.mxu0 %v1532_v47 }
 0x2d9   : > { %5957 = vmatprep.subr.msk.bf16.mxu0 %vm1497_vm0, %v6147_v36 }
 0x2e0   : > { %5595 = vmatpush3.bf16.xpose.msra.mxu0 %v1529_v57 }
 0x2e1   : > { %5958 = vmatprep.subr.msk.bf16.mxu0 %vm1497_vm0, %v6148_v37 }
 0x2e8   : > { %5597 = vmatpush3.bf16.xpose.msra.mxu0 %v1526_v15  ;;  %v6159_v15 = vld [vmem:[#allocation2 + $0x34] ss:$12 sps:$4 sm:$0xff]  }
 0x2e9   : > { %5959 = vmatprep.subr.msk.bf16.mxu0 %vm1497_vm0, %v6149_v22  ;;  %v6160_v22 = vld [vmem:[#allocation2 + $0x4c] ss:$12 sps:$4 sm:$0xff]  }
 0x2f0   : > { %5599 = vmatpush3.bf16.xpose.msra.mxu0 %v1523_v40 }
 0x2f7   : > { %5601 = vmatmul.mubr.msk.bf16.vlgmr.msra.gmra.mxu0 %vm1497_vm0, %v6150_v41 }
 0x2f8   : > { %5604 = vmatprep.mubr.msk.bf16.mxu0 %vm1497_vm0, %v6151_v42 }
 0x2ff   : > { %5605 = vmatmul.mubr.msk.bf16.gmra.mxu0 %vm1497_vm0, %v6152_v43 }
 0x300   : > { %5608 = vmatprep.mubr.msk.bf16.mxu0 %vm1497_vm0, %v6153_v58 }
 0x307   : > { %5609 = vmatmul.mubr.msk.bf16.gmra.mxu0 %vm1497_vm0, %v6154_v44 }
 0x308   : > { %5612 = vmatprep.mubr.msk.bf16.mxu0 %vm1497_vm0, %v6155_v45 }
 0x30f   : > { %5613 = vmatmul.mubr.msk.bf16.gmra.mxu0 %vm1497_vm0, %v6156_v3 }
 0x320   : > { %v7342_v10 = vpop.permute.xlu1 %2128 }
 0x328   : > { %v7300_v49 = vpop.permute.xlu0 %2130 }
 0x329   : > { %5960 = vmatprep.subr.msk.bf16.mxu1 %vm1497_vm0, %v7300_v49 }
 0x3b7   : > { %v5602_v50 = vpop.f32.mrf.mxu0 }
 0x3b8   : > { %v1645_v51 = vmul.f32 0.17677669, %v5602_v50 }
 0x3b9   : > { %v1580_v52 = vpop.f32.mrf.mxu0 }
 0x3ba   : > { %1663 = vmax.xlane.f32.xlu0 %v1645_v51  ;;  %v1643_v38 = vmul.f32 0.17677669, %v1580_v52 }
 0x3bb   : > { %v5603_v53 = vpop.f32.mrf.mxu0 }
 0x3bc   : > { %v1646_v4 = vmul.f32 0.17677669, %v5603_v53 }
 0x3bd   : > { %v1583_v11 = vpop.f32.mrf.mxu0 }
 0x3be   : > { %1659 = vmax.xlane.f32.xlu0 %v1643_v38  ;;  %1665 = vmax.xlane.f32.xlu1 %v1646_v4  ;;  %v1644_v54 = vmul.f32 0.17677669, %v1583_v11 }
 0x3bf   : > { %v5606_v30 = vpop.f32.mrf.mxu0 }
 0x3c0   : > { %v7304_v55 = vmul.f32 0.17677669, %v5606_v30 }
 0x3c1   : > { %v1596_v23 = vpop.f32.mrf.mxu0 }
 0x3c2   : > { %1661 = vmax.xlane.f32.xlu1 %v1644_v54  ;;  %1671 = vmax.xlane.f32.xlu0 %v7304_v55  ;;  %v7307_v59 = vmul.f32 0.17677669, %v1596_v23 }
 0x3c3   : > { %v5607_v56 = vpop.f32.mrf.mxu0 }
 0x3c4   : > { %v7309_v19 = vmul.f32 0.17677669, %v5607_v56 }
 0x3c5   : > { %v1599_v60 = vpop.f32.mrf.mxu0 }
 0x3c6   : > { %1667 = vmax.xlane.f32.xlu0 %v7307_v59  ;;  %1673 = vmax.xlane.f32.xlu1 %v7309_v19  ;;  %v7313_v61 = vmul.f32 0.17677669, %v1599_v60 }
 0x3c7   : > { %v5610_v13 = vpop.f32.mrf.mxu0 }
 0x3c8   : > { %v7315_v62 = vmul.f32 0.17677669, %v5610_v13 }
 0x3c9   : > { %v1612_v32 = vpop.f32.mrf.mxu0 }
 0x3ca   : > { %1669 = vmax.xlane.f32.xlu1 %v7313_v61  ;;  %1679 = vmax.xlane.f32.xlu0 %v7315_v62  ;;  %v7319_v63 = vmul.f32 0.17677669, %v1612_v32 }
 0x3cb   : > { %v5611_v25 = vpop.f32.mrf.mxu0 }
 0x3cc   : > { %v7321_v0 = vmul.f32 0.17677669, %v5611_v25 }
 0x3cd   : > { %v1615_v14 = vpop.f32.mrf.mxu0 }
 0x3ce   : > { %1675 = vmax.xlane.f32.xlu0 %v7319_v63  ;;  %1681 = vmax.xlane.f32.xlu1 %v7321_v0  ;;  %v7325_v5 = vmul.f32 0.17677669, %v1615_v14 }
 0x3cf   : > { %v5614_v1 = vpop.f32.mrf.mxu0 }
 0x3d0   : > { %v7327_v6 = vmul.f32 0.17677669, %v5614_v1 }
 0x3d1   : > { %v1628_v48 = vpop.f32.mrf.mxu0 }
 0x3d2   : > { %1677 = vmax.xlane.f32.xlu1 %v7325_v5  ;;  %1687 = vmax.xlane.f32.xlu0 %v7327_v6  ;;  %v7331_v7 = vmul.f32 0.17677669, %v1628_v48 }
 0x3d3   : > { %v5615_v16 = vpop.f32.mrf.mxu0 }
 0x3d4   : > { %v7336_v17 = vmul.f32 0.17677669, %v5615_v16 }
 0x3d5   : > { %v1631_v18 = vpop.f32.mrf.mxu0 }
 0x3d6   : > { %1683 = vmax.xlane.f32.xlu0 %v7331_v7  ;;  %v7339_v39 = vmul.f32 0.17677669, %v1631_v18 }
 0x3e3   : > { %2124 = vrot.lane.b32.xlu1 %v6157_v8, %s6805_s17 }
 0x3ec   : > { %2126 = vrot.lane.b32.xlu0 %v6158_v9, %s6805_s17 }
 0x407   : > { %1689 = vmax.xlane.f32.xlu1 %v7336_v17 }
 0x40b   : > { %1685 = vmax.xlane.f32.xlu1 %v7339_v39 }
 0x443   : > { %v1664_v20 = vpop.xlane.xlu0 %1663 }
 0x444   : > { %v1693_v21 = vsub.f32 %v1645_v51, %v1664_v20 }
 0x446   : > { %v1711_v24 = vmul.f32 1.442695, %v1693_v21 }
 0x447   : > { %v1660_v26 = vpop.xlane.xlu0 %1659  ;;  %v1666_v46 = vpop.xlane.xlu1 %1665 }
 0x448   : > { %6283 = vpow2.f32 %v1711_v24  ;;  %v1691_v27 = vsub.f32 %v1643_v38, %v1660_v26  ;;  %v1694_v2 = vsub.f32 %v1646_v4, %v1666_v46 }
 0x44a   : > { %v1707_v31 = vmul.f32 1.442695, %v1691_v27  ;;  %v1713_v28 = vmul.f32 1.442695, %v1694_v2  ;;  %v6161_v27 = vld [vmem:[#allocation2 + $0x1c] ss:$12 sps:$4 sm:$0xff]  }
 0x44b   : > { %v1662_v29 = vpop.xlane.xlu1 %1661  ;;  %v1672_v57 = vpop.xlane.xlu0 %1671  ;;  %v6162_v2 = vld [vmem:[#allocation2 + $0x4] ss:$12 sps:$4 sm:$0xff]  }
 0x44c   : > { %6285 = vpow2.f32 %v1707_v31  ;;  %v1692_v12 = vsub.f32 %v1644_v54, %v1662_v29  ;;  %v1697_v43 = vsub.f32 %v7304_v55, %v1672_v57  ;;  %v6163_v31 = vld [vmem:[#allocation2] ss:$12 sps:$4 sm:$0xff]   ;;  %v6165_v29 = vld [vmem:[#allocation2 + $0x30] ss:$12 sps:$4 sm:$0xff]   ;;  %v6168_v57 = vld [vmem:[#allocation2 + $0x78] ss:$12 sps:$4 sm:$0xff]  }
 0x44d   : > { %6287 = vpow2.f32 %v1713_v28  ;;  %v6164_v28 = vld [vmem:[#allocation2 + $0x18] ss:$12 sps:$4 sm:$0xff]  }
 0x44e   : > { %v1709_v33 = vmul.f32 1.442695, %v1692_v12  ;;  %v1719_v45 = vmul.f32 1.442695, %v1697_v43  ;;  %v6166_v12 = vld [vmem:[#allocation2 + $0x48] ss:$12 sps:$4 sm:$0xff]  }
 0x44f   : > { %v1668_v37 = vpop.xlane.xlu0 %1667  ;;  %v1674_v41 = vpop.xlane.xlu1 %1673  ;;  %v6175_v43 = vld [vmem:[#allocation2 + $0x68] ss:$12 sps:$4 sm:$0xff]  }
 0x450   : > { %6289 = vpow2.f32 %v1709_v33  ;;  %v1695_v50 = vsub.f32 %v7307_v59, %v1668_v37  ;;  %v1698_v4 = vsub.f32 %v7309_v19, %v1674_v41  ;;  %v6167_v33 = vld [vmem:[#allocation2 + $0x60] ss:$12 sps:$4 sm:$0xff]   ;;  %v6169_v37 = vld [vmem:[#allocation2 + $0x90] ss:$12 sps:$4 sm:$0xff]  }
 0x451   : > { %6291 = vpow2.f32 %v1719_v45  ;;  %v6173_v41 = vld [vmem:[#allocation2 + $0x80] ss:$12 sps:$4 sm:$0xff]  }
 0x452   : > { %v1715_v38 = vmul.f32 1.442695, %v1695_v50  ;;  %v1721_v55 = vmul.f32 1.442695, %v1698_v4 }
 0x453   : > { %v1680_v40 = vpop.xlane.xlu0 %1679  ;;  %v1670_v58 = vpop.xlane.xlu1 %1669 }
 0x454   : > { %v1696_v3 = vsub.f32 %v7313_v61, %v1670_v58  ;;  %v1701_v23 = vsub.f32 %v7315_v62, %v1680_v40  ;;  %v6172_v40 = vld [vmem:[#allocation2 + $0x98] ss:$12 sps:$4 sm:$0xff]   ;;  %v6176_v58 = vld [vmem:[#allocation2 + $0x8] ss:$12 sps:$4 sm:$0xff]  }
 0x455   : > { %v7344_v34 = vpop.eup %6283 }
 0x456   : > { %1743 = vadd.xlane.f32.xlu0 %v7344_v34  ;;  %v1717_v52 = vmul.f32 1.442695, %v1696_v3  ;;  %v1727_v60 = vmul.f32 1.442695, %v1701_v23 }
 0x457   : > { %v1676_v42 = vpop.xlane.xlu0 %1675  ;;  %v1682_v51 = vpop.xlane.xlu1 %1681 }
 0x458   : > { %6293 = vpow2.f32 %v1717_v52  ;;  %v1699_v13 = vsub.f32 %v7319_v63, %v1676_v42  ;;  %v1702_v25 = vsub.f32 %v7321_v0, %v1682_v51  ;;  %v6174_v42 = vld [vmem:[#allocation2 + $0x38] ss:$12 sps:$4 sm:$0xff]  }
 0x459   : > { %v7347_v35 = vpop.eup %6285  ;;  %6295 = vpow2.f32 %v1715_v38 }
 0x45a   : > { %v7349_v36 = vpop.eup %6287  ;;  %1739 = vadd.xlane.f32.xlu0 %v7347_v35  ;;  %v1723_v32 = vmul.f32 1.442695, %v1699_v13 }
 0x45b   : > { %1745 = vadd.xlane.f32.xlu1 %v7349_v36  ;;  %v1688_v44 = vpop.xlane.xlu0 %1687  ;;  %v1678_v56 = vpop.xlane.xlu1 %1677 }
 0x45c   : > { %v1705_v53 = vsub.f32 %v7327_v6, %v1688_v44  ;;  %v1729_v6 = vmul.f32 1.442695, %v1702_v25  ;;  %v1700_v63 = vsub.f32 %v7325_v5, %v1678_v56  ;;  %v6177_v44 = vld [vmem:[#allocation2 + $0x50] ss:$12 sps:$4 sm:$0xff]  }
 0x45d   : > { %v7353_v47 = vpop.eup %6289 }
 0x45e   : > { %v1735_v30 = vmul.f32 1.442695, %v1705_v53  ;;  %v7368_v19 = vpop.eup %6291  ;;  %v1725_v9 = vmul.f32 1.442695, %v1700_v63 }
 0x45f   : > { %1741 = vadd.xlane.f32.xlu1 %v7353_v47  ;;  %v1684_v11 = vpop.xlane.xlu0 %1683  ;;  %v7366_v61 = vpop.permute.xlu1 %2124 }
 0x460   : > { %v1703_v54 = vsub.f32 %v7331_v7, %v1684_v11  ;;  %6297 = vpow2.f32 %v1735_v30 }
 0x461   : > { %6299 = vpow2.f32 %v1721_v55 }
 0x462   : > { %v1731_v59 = vmul.f32 1.442695, %v1703_v54 }
 0x463   : > { %v2127_v45 = vpop.permute.xlu0 %2126 }
 0x464   : > { %6301 = vpow2.f32 %v1731_v59 }
 0x465   : > { %6303 = vpow2.f32 %v1727_v60  ;;  %v7373_v1 = vpop.eup %6293  ;;  %v2178_v60 = vsel %vm1497_vm0, %v7300_v49, 0  ;;  %v2169_v49 = vsel %vm1497_vm0, %v7366_v61, 0 }
 0x466   : > { %6305 = vpow2.f32 %v1723_v32  ;;  %v7376_v48 = vpop.eup %6295 }
 0x46d   : > { %v7380_v0 = vpop.eup %6297 }
 0x470   : > { %2120 = vrot.lane.b32.xlu1 %v6159_v15, %s6805_s17  ;;  %2122 = vrot.lane.b32.xlu0 %v6160_v22, %s6805_s17  ;;  %v6170_v15 = vld [vmem:[#allocation2 + $0xa8] ss:$12 sps:$4 sm:$0xff]   ;;  %v6171_v22 = vld [vmem:[#allocation2 + $0xb0] ss:$12 sps:$4 sm:$0xff]  }
 0x48f   : > { %1751 = vadd.xlane.f32.xlu0 %v7368_v19 }
 0x490   : > { %v1690_v14 = vpop.xlane.xlu1 %1689 }
 0x491   : > { %v1706_v62 = vsub.f32 %v7336_v17, %v1690_v14  ;;  %v7383_v17 = vpop.eup %6299 }
 0x492   : > { %v7387_v5 = vpop.eup %6301 }
 0x493   : > { %v1737_v7 = vmul.f32 1.442695, %v1706_v62  ;;  %1749 = vadd.xlane.f32.xlu0 %v7373_v1  ;;  %v7389_v20 = vpop.eup %6303 }
 0x494   : > { %1747 = vadd.xlane.f32.xlu1 %v7376_v48  ;;  %v1686_v8 = vpop.xlane.xlu1 %1685  ;;  %v7393_v21 = vpop.eup %6305 }
 0x495   : > { %6307 = vpow2.f32 %v1737_v7  ;;  %v1704_v16 = vsub.f32 %v7339_v39, %v1686_v8 }
 0x496   : > { %6309 = vpow2.f32 %v1729_v6 }
 0x497   : > { %1767 = vadd.xlane.f32.xlu0 %v7380_v0  ;;  %6311 = vpow2.f32 %v1725_v9  ;;  %v1733_v18 = vmul.f32 1.442695, %v1704_v16 }
 0x498   : > { %1753 = vadd.xlane.f32.xlu1 %v7383_v17 }
 0x499   : > { %6313 = vpow2.f32 %v1733_v18 }
 0x49b   : > { %1763 = vadd.xlane.f32.xlu0 %v7387_v5 }
 0x49c   : > { %1759 = vadd.xlane.f32.xlu1 %v7389_v20 }
 0x4a0   : > { %1755 = vadd.xlane.f32.xlu1 %v7393_v21 }
 0x4a2   : > { %v7396_v39 = vpop.eup %6307 }
 0x4a3   : > { %v7398_v24 = vpop.eup %6309  ;;  %1769 = vadd.xlane.f32.xlu0 %v7396_v39 }
 0x4a4   : > { %1761 = vadd.xlane.f32.xlu1 %v7398_v24  ;;  %v7402_v26 = vpop.eup %6311 }
 0x4a6   : > { %v7405_v46 = vpop.eup %6313 }
 0x4a8   : > { %1757 = vadd.xlane.f32.xlu1 %v7402_v26 }
 0x4ac   : > { %1765 = vadd.xlane.f32.xlu1 %v7405_v46 }
 0x4b9   : > { %2118 = vrot.lane.b32.xlu0 %v6161_v27, %s6805_s17 }
 0x4bd   : > { %2116 = vrot.lane.b32.xlu1 %v6162_v2, %s6805_s17  ;;  %2060 = vrot.lane.b32.xlu0 %v6163_v31, %s6805_s17 }
 0x4c1   : > { %2062 = vrot.lane.b32.xlu1 %v6164_v28, %s6805_s17  ;;  %2064 = vrot.lane.b32.xlu0 %v6165_v29, %s6805_s17 }
 0x4c5   : > { %2066 = vrot.lane.b32.xlu1 %v6166_v12, %s6805_s17  ;;  %2068 = vrot.lane.b32.xlu0 %v6167_v33, %s6805_s17 }
 0x4c9   : > { %2070 = vrot.lane.b32.xlu1 %v6168_v57, %s6805_s17  ;;  %2072 = vrot.lane.b32.xlu0 %v6169_v37, %s6805_s17 }
 0x4cd   : > { %2074 = vrot.lane.b32.xlu1 %v6170_v15, %s6805_s17  ;;  %2499 = vrot.lane.b32.xlu0 %v6171_v22, %s6805_s17 }
 0x4d1   : > { %2497 = vrot.lane.b32.xlu1 %v6172_v40, %s6805_s17  ;;  %2495 = vrot.lane.b32.xlu0 %v6173_v41, %s6805_s17 }
 0x4d5   : > { %2489 = vrot.lane.b32.xlu1 %v6174_v42, %s6805_s17  ;;  %2493 = vrot.lane.b32.xlu0 %v6175_v43, %s6805_s17 }
 0x4d9   : > { %2485 = vrot.lane.b32.xlu1 %v6176_v58, %s6805_s17  ;;  %2491 = vrot.lane.b32.xlu0 %v6177_v44, %s6805_s17 }
 0x4df   : > { %v1744_v3 = vpop.xlane.xlu0 %1743 }
 0x4e3   : > { %v1740_v50 = vpop.xlane.xlu0 %1739 }
 0x4e4   : > { %v1746_v51 = vpop.xlane.xlu1 %1745 }
 0x4e5   : > { %6315 = vrcp.f32 %v1746_v51 }
 0x4e6   : > { %6317 = vrcp.f32 %v1740_v50 }
 0x4e7   : > { %6319 = vrcp.f32 %v1744_v3 }
 0x4e8   : > { %v1742_v52 = vpop.xlane.xlu1 %1741 }
 0x4e9   : > { %6321 = vrcp.f32 %v1742_v52 }
 0x4ec   : > { %v2121_v13 = vpop.permute.xlu1 %2120 }
 0x4f2   : > { %v6316_v53 = vpop.eup %6315 }
 0x4f3   : > { %v6318_v38 = vpop.eup %6317  ;;  %v1790_v30 = vmul.f32 %v6316_v53, %v7349_v36  ;;  %v2175_v36 = vsel %vm1497_vm0, %v7342_v10, 0 }
 0x4f4   : > { %v6320_v4 = vpop.eup %6319  ;;  %v1787_v54 = vmul.f32 %v6318_v38, %v7347_v35  ;;  %v2172_v35 = vsel %vm1497_vm0, %v2127_v45, 0 }
 0x4f5   : > { %v1789_v23 = vmul.f32 %v6320_v4, %v7344_v34  ;;  %v2123_v34 = vpop.permute.xlu0 %2122 }
 0x4f6   : > { %v6322_v11 = vpop.eup %6321 }
 0x4f7   : > { %v1788_v55 = vmul.f32 %v6322_v11, %v7353_v47  ;;  %v1804_v59 = vpack.c.bf16 %v1790_v30, %v1789_v23 }
 0x4f9   : > { %v1803_v56 = vpack.c.bf16 %v1788_v55, %v1787_v54 }
 0x4fb   : > { %5632 = vmatprep.mubr.bf16.mxu1 %v1803_v56 }
 0x4fc   : > { %5633 = vmatmul.mubr.bf16.vlgmr.msra.gmra.mxu1 %v1804_v59 }
 0x4fd   : > { %5649 = vmatpush3.bf16.xpose.msra.mxu1 %v2178_v60 }
 0x4fe   : > { %5961 = vmatprep.subr.msk.bf16.mxu1 %vm1497_vm0, %v7342_v10  ;;  %v2166_v10 = vsel %vm1497_vm0, %v2123_v34, 0 }
 0x505   : > { %5651 = vmatpush3.bf16.xpose.msra.mxu1 %v2175_v36 }
 0x506   : > { %5962 = vmatprep.subr.msk.bf16.mxu1 %vm1497_vm0, %v2127_v45 }
 0x50d   : > { %5653 = vmatpush3.bf16.xpose.msra.mxu1 %v2172_v35 }
 0x50e   : > { %5963 = vmatprep.subr.msk.bf16.mxu1 %vm1497_vm0, %v7366_v61  ;;  %v2163_v61 = vsel %vm1497_vm0, %v2121_v13, 0 }
 0x515   : > { %5655 = vmatpush3.bf16.xpose.msra.mxu1 %v2169_v49 }
 0x516   : > { %5964 = vmatprep.subr.msk.bf16.mxu1 %vm1497_vm0, %v2123_v34 }
 0x518   : > { %v1752_v47 = vpop.xlane.xlu0 %1751 }
 0x51c   : > { %v1750_v32 = vpop.xlane.xlu0 %1749 }
 0x51d   : > { %5657 = vmatpush3.bf16.xpose.msra.mxu1 %v2166_v10  ;;  %6323 = vrcp.f32 %v1750_v32  ;;  %v1748_v25 = vpop.xlane.xlu1 %1747 }
 0x51e   : > { %5965 = vmatprep.subr.msk.bf16.mxu1 %vm1497_vm0, %v2121_v13  ;;  %6325 = vrcp.f32 %v1748_v25 }
 0x51f   : > { %6327 = vrcp.f32 %v1752_v47 }
 0x520   : > { %v1768_v62 = vpop.xlane.xlu0 %1767 }
 0x521   : > { %v1754_v14 = vpop.xlane.xlu1 %1753 }
 0x522   : > { %6329 = vrcp.f32 %v1754_v14 }
 0x524   : > { %v1764_v63 = vpop.xlane.xlu0 %1763 }
 0x525   : > { %5659 = vmatpush3.bf16.xpose.msra.mxu1 %v2163_v61  ;;  %v1760_v6 = vpop.xlane.xlu1 %1759 }
 0x529   : > { %v1756_v7 = vpop.xlane.xlu1 %1755 }
 0x52a   : > { %v6324_v8 = vpop.eup %6323 }
 0x52b   : > { %v6326_v9 = vpop.eup %6325  ;;  %v1792_v16 = vmul.f32 %v6324_v8, %v7373_v1 }
 0x52c   : > { %v1770_v18 = vpop.xlane.xlu0 %1769  ;;  %v1791_v27 = vmul.f32 %v6326_v9, %v7376_v48  ;;  %v6328_v2 = vpop.eup %6327 }
 0x52d   : > { %v1762_v31 = vpop.xlane.xlu1 %1761  ;;  %v1793_v33 = vmul.f32 %v6328_v2, %v7368_v19 }
 0x52e   : > { %v1805_v28 = vpack.c.bf16 %v1792_v16, %v1791_v27  ;;  %6331 = vrcp.f32 %v1762_v31 }
 0x52f   : > { %v6330_v29 = vpop.eup %6329  ;;  %6333 = vrcp.f32 %v1756_v7 }
 0x530   : > { %5636 = vmatprep.mubr.bf16.mxu1 %v1805_v28  ;;  %v2119_v12 = vpop.permute.xlu0 %2118  ;;  %v1794_v57 = vmul.f32 %v6330_v29, %v7383_v17  ;;  %6335 = vrcp.f32 %v1760_v6 }
 0x531   : > { %v1758_v37 = vpop.xlane.xlu1 %1757  ;;  %5966 = vmatprep.subr.msk.bf16.mxu1 %vm1497_vm0, %v2119_v12  ;;  %v2160_v1 = vsel %vm1497_vm0, %v2119_v12, 0 }
 0x532   : > { %6337 = vrcp.f32 %v1758_v37  ;;  %5661 = vmatpush3.bf16.xpose.msra.mxu1 %v2160_v1  ;;  %v1806_v48 = vpack.c.bf16 %v1794_v57, %v1793_v33 }
 0x533   : > { %6339 = vrcp.f32 %v1764_v63 }
 0x534   : > { %5637 = vmatmul.mubr.bf16.gmra.mxu1 %v1806_v48  ;;  %v2061_v15 = vpop.permute.xlu0 %2060 }
 0x535   : > { %v1766_v22 = vpop.xlane.xlu1 %1765 }
 0x536   : > { %6341 = vrcp.f32 %v1766_v22 }
 0x537   : > { %6343 = vrcp.f32 %v1770_v18 }
 0x538   : > { %v2065_v40 = vpop.permute.xlu0 %2064  ;;  %6345 = vrcp.f32 %v1768_v62 }
 0x539   : > { %v2117_v19 = vpop.permute.xlu1 %2116 }
 0x53a   : > { %5967 = vmatprep.subr.msk.bf16.mxu1 %vm1497_vm0, %v2117_v19  ;;  %v2157_v17 = vsel %vm1497_vm0, %v2117_v19, 0 }
 0x53b   : > { %5663 = vmatpush3.bf16.xpose.msra.mxu1 %v2157_v17  ;;  %v6332_v41 = vpop.eup %6331 }
 0x53c   : > { %v2069_v42 = vpop.permute.xlu0 %2068  ;;  %v6334_v43 = vpop.eup %6333  ;;  %v1798_v3 = vmul.f32 %v6332_v41, %v7398_v24 }
 0x53d   : > { %v2063_v58 = vpop.permute.xlu1 %2062  ;;  %v6336_v44 = vpop.eup %6335  ;;  %v1795_v51 = vmul.f32 %v6334_v43, %v7393_v21 }
 0x53e   : > { %v1797_v4 = vmul.f32 %v6336_v44, %v7389_v20  ;;  %v6178_v44 = vld [vmem:[#allocation2 + $0x20] ss:$12 sps:$4 sm:$0xff]  }
 0x53f   : > { %v6338_v45 = vpop.eup %6337 }
 0x540   : > { %v2073_v50 = vpop.permute.xlu0 %2072  ;;  %v1796_v52 = vmul.f32 %v6338_v45, %v7402_v26  ;;  %v6340_v53 = vpop.eup %6339  ;;  %v1808_v54 = vpack.c.bf16 %v1798_v3, %v1797_v4  ;;  %v6179_v45 = vld [vmem:[#allocation2 + $0x94] ss:$12 sps:$4 sm:$0xff]   ;;  %v6180_v3 = vld [vmem:[#allocation2 + $0x64] ss:$12 sps:$4 sm:$0xff]  }
 0x541   : > { %v2067_v38 = vpop.permute.xlu1 %2066  ;;  %v1799_v56 = vmul.f32 %v6340_v53, %v7387_v5 }
 0x542   : > { %v1807_v11 = vpack.c.bf16 %v1796_v52, %v1795_v51 }
 0x543   : > { %v6342_v30 = vpop.eup %6341 }
 0x544   : > { %v6344_v55 = vpop.eup %6343  ;;  %5640 = vmatprep.mubr.bf16.mxu1 %v1807_v11  ;;  %v2500_v23 = vpop.permute.xlu0 %2499  ;;  %v1800_v59 = vmul.f32 %v6342_v30, %v7405_v46 }
 0x545   : > { %5641 = vmatmul.mubr.bf16.gmra.mxu1 %v1808_v54  ;;  %v2071_v24 = vpop.permute.xlu1 %2070  ;;  %5680 = vmatprep.subr.bf16.mxu0 %v2500_v23  ;;  %v6346_v21 = vpop.eup %6345  ;;  %v1802_v60 = vmul.f32 %v6344_v55, %v7396_v39 }
 0x546   : > { %5681 = vmatpush3.bf16.msra.mxu0 %v2500_v23  ;;  %v1809_v26 = vpack.c.bf16 %v1800_v59, %v1799_v56  ;;  %v1801_v36 = vmul.f32 %v6346_v21, %v7380_v0  ;;  %v6181_v59 = vld [vmem:[#allocation2 + $0xac] ss:$12 sps:$4 sm:$0xff]  }
 0x547   : > { %v6183_v21 = vld [vmem:[#allocation2 + $0x4c] ss:$12 sps:$4 sm:$0xff]  }
 0x548   : > { %5644 = vmatprep.mubr.bf16.mxu1 %v1809_v26  ;;  %v2496_v35 = vpop.permute.xlu0 %2495  ;;  %v1810_v34 = vpack.c.bf16 %v1802_v60, %v1801_v36 }
 0x549   : > { %v2075_v20 = vpop.permute.xlu1 %2074 }
 0x54c   : > { %v2494_v5 = vpop.permute.xlu0 %2493 }
 0x54d   : > { %5645 = vmatmul.mubr.bf16.gmra.mxu1 %v1810_v34  ;;  %v2498_v49 = vpop.permute.xlu1 %2497 }
 0x54e   : > { %5664 = vmatprep.mubr.msk.bf16.mxu1 %vm1497_vm0, %v2061_v15  ;;  %5682 = vmatprep.subr.bf16.mxu0 %v2498_v49 }
 0x54f   : > { %5683 = vmatpush3.bf16.msra.mxu0 %v2498_v49 }
 0x550   : > { %5684 = vmatprep.subr.bf16.mxu0 %v2496_v35  ;;  %v2492_v39 = vpop.permute.xlu0 %2491 }
 0x551   : > { %v2490_v0 = vpop.permute.xlu1 %2489 }
 0x553   : > { %5685 = vmatpush3.bf16.msra.mxu0 %v2496_v35 }
 0x554   : > { %5686 = vmatprep.subr.bf16.mxu0 %v2494_v5 }
 0x555   : > { %5665 = vmatmul.mubr.msk.bf16.vlgmr.msra.gmra.mxu1 %vm1497_vm0, %v2063_v58 }
 0x556   : > { %5668 = vmatprep.mubr.msk.bf16.mxu1 %vm1497_vm0, %v2065_v40 }
 0x557   : > { %5687 = vmatpush3.bf16.msra.mxu0 %v2494_v5 }
 0x558   : > { %5688 = vmatprep.subr.bf16.mxu0 %v2492_v39 }
 0x55b   : > { %5689 = vmatpush3.bf16.msra.mxu0 %v2492_v39 }
 0x55c   : > { %5690 = vmatprep.subr.bf16.mxu0 %v2490_v0 }
 0x55d   : > { %5669 = vmatmul.mubr.msk.bf16.gmra.mxu1 %vm1497_vm0, %v2067_v38 }
 0x55e   : > { %5672 = vmatprep.mubr.msk.bf16.mxu1 %vm1497_vm0, %v2069_v42 }
 0x55f   : > { %5691 = vmatpush3.bf16.msra.mxu0 %v2490_v0 }
 0x565   : > { %5673 = vmatmul.mubr.msk.bf16.gmra.mxu1 %vm1497_vm0, %v2071_v24  ;;  %v6182_v24 = vld [vmem:[#allocation2 + $0x7c] ss:$12 sps:$4 sm:$0xff]  }
 0x566   : > { %5676 = vmatprep.mubr.msk.bf16.mxu1 %vm1497_vm0, %v2073_v50 }
 0x56d   : > { %5677 = vmatmul.mubr.msk.bf16.gmra.mxu1 %vm1497_vm0, %v2075_v20  ;;  %v2486_v20 = vpop.permute.xlu1 %2485 }
 0x5bc   : > { %v5634_v46 = vpop.f32.mrf.mxu1 }
 0x5bd   : > { %1958 = vst.msk [vmem:[#allocation3 + $0x10] sm:$0xff] %vm1497_vm0, %v5634_v46 }
 0x5be   : > { %v1893_v47 = vpop.f32.mrf.mxu1 }
 0x5bf   : > { %1956 = vst.msk [vmem:[#allocation3] sm:$0xff] %vm1497_vm0, %v1893_v47 }
 0x5c0   : > { %v5635_v13 = vpop.f32.mrf.mxu1 }
 0x5c1   : > { %1959 = vst.msk [vmem:[#allocation3 + $0x18] sm:$0xff] %vm1497_vm0, %v5635_v13 }
 0x5c2   : > { %v1896_v10 = vpop.f32.mrf.mxu1 }
 0x5c3   : > { %1957 = vst.msk [vmem:[#allocation3 + $0x8] sm:$0xff] %vm1497_vm0, %v1896_v10 }
 0x5f4   : > { %v5638_v32 = vpop.f32.mrf.mxu1 }
 0x5f5   : > { %1962 = vst.msk [vmem:[#allocation3 + $0x30] sm:$0xff] %vm1497_vm0, %v5638_v32 }
 0x5f6   : > { %v1909_v25 = vpop.f32.mrf.mxu1 }
 0x5f7   : > { %1960 = vst.msk [vmem:[#allocation3 + $0x20] sm:$0xff] %vm1497_vm0, %v1909_v25 }
 0x5f8   : > { %v5639_v14 = vpop.f32.mrf.mxu1 }
 0x5f9   : > { %1963 = vst.msk [vmem:[#allocation3 + $0x38] sm:$0xff] %vm1497_vm0, %v5639_v14 }
 0x5fa   : > { %v1912_v62 = vpop.f32.mrf.mxu1 }
 0x5fb   : > { %1961 = vst.msk [vmem:[#allocation3 + $0x28] sm:$0xff] %vm1497_vm0, %v1912_v62 }
 0x605   : > { %v5642_v61 = vpop.f32.mrf.mxu1 }
 0x606   : > { %1966 = vst.msk [vmem:[#allocation3 + $0x50] sm:$0xff] %vm1497_vm0, %v5642_v61  ;;  %v6184_v61 = vld [vmem:[#allocation2 + $0x34] ss:$12 sps:$4 sm:$0xff]  }
 0x607   : > { %v1925_v6 = vpop.f32.mrf.mxu1 }
 0x608   : > { %1964 = vst.msk [vmem:[#allocation3 + $0x40] sm:$0xff] %vm1497_vm0, %v1925_v6 }
 0x609   : > { %v5643_v63 = vpop.f32.mrf.mxu1 }
 0x60a   : > { %1967 = vst.msk [vmem:[#allocation3 + $0x58] sm:$0xff] %vm1497_vm0, %v5643_v63 }
 0x60b   : > { %v1928_v7 = vpop.f32.mrf.mxu1 }
 0x60c   : > { %1965 = vst.msk [vmem:[#allocation3 + $0x48] sm:$0xff] %vm1497_vm0, %v1928_v7 }
 0x60d   : > { %v5646_v8 = vpop.f32.mrf.mxu1 }
 0x60e   : > { %1970 = vst.msk [vmem:[#allocation3 + $0x70] sm:$0xff] %vm1497_vm0, %v5646_v8 }
 0x60f   : > { %v1941_v9 = vpop.f32.mrf.mxu1 }
 0x610   : > { %1968 = vst.msk [vmem:[#allocation3 + $0x60] sm:$0xff] %vm1497_vm0, %v1941_v9 }
 0x611   : > { %v5647_v16 = vpop.f32.mrf.mxu1 }
 0x612   : > { %1971 = vst.msk [vmem:[#allocation3 + $0x78] sm:$0xff] %vm1497_vm0, %v5647_v16 }
 0x613   : > { %v1944_v18 = vpop.f32.mrf.mxu1 }
 0x614   : > { %1969 = vst.msk [vmem:[#allocation3 + $0x68] sm:$0xff] %vm1497_vm0, %v1944_v18 }
 0x615   : > { %v5666_v27 = vpop.f32.mrf.mxu1 }
 0x616   : > { %v7485_v2 = vmul.f32 0.17677669, %v5666_v27 }
 0x617   : > { %v2214_v31 = vpop.f32.mrf.mxu1 }
 0x618   : > { %2297 = vmax.xlane.f32.xlu0 %v7485_v2  ;;  %v7488_v29 = vmul.f32 0.17677669, %v2214_v31 }
 0x619   : > { %v5667_v28 = vpop.f32.mrf.mxu1 }
 0x61a   : > { %v7493_v37 = vmul.f32 0.17677669, %v5667_v28 }
 0x61b   : > { %v2217_v12 = vpop.f32.mrf.mxu1 }
 0x61c   : > { %v7490_v33 = vmul.f32 0.17677669, %v2217_v12  ;;  %2293 = vmax.xlane.f32.xlu0 %v7488_v29 }
 0x61d   : > { %v5670_v57 = vpop.f32.mrf.mxu1 }
 0x61e   : > { %2295 = vmax.xlane.f32.xlu1 %v7490_v33  ;;  %v7512_v50 = vmul.f32 0.17677669, %v5670_v57 }
 0x61f   : > { %v2230_v1 = vpop.f32.mrf.mxu1 }
 0x620   : > { %2299 = vmax.xlane.f32.xlu0 %v7493_v37  ;;  %v7515_v51 = vmul.f32 0.17677669, %v2230_v1 }
 0x621   : > { %v5671_v48 = vpop.f32.mrf.mxu1 }
 0x622   : > { %v7497_v15 = vmul.f32 0.17677669, %v5671_v48 }
 0x623   : > { %v2233_v22 = vpop.f32.mrf.mxu1 }
 0x624   : > { %2307 = vmax.xlane.f32.xlu1 %v7497_v15  ;;  %v7500_v19 = vmul.f32 0.17677669, %v2233_v22 }
 0x625   : > { %v5674_v40 = vpop.f32.mrf.mxu1 }
 0x626   : > { %v7518_v52 = vmul.f32 0.17677669, %v5674_v40 }
 0x627   : > { %v2246_v17 = vpop.f32.mrf.mxu1 }
 0x628   : > { %2303 = vmax.xlane.f32.xlu1 %v7500_v19  ;;  %v7521_v38 = vmul.f32 0.17677669, %v2246_v17 }
 0x629   : > { %v5675_v41 = vpop.f32.mrf.mxu1 }
 0x62a   : > { %v7503_v42 = vmul.f32 0.17677669, %v5675_v41 }
 0x62b   : > { %v2249_v43 = vpop.f32.mrf.mxu1 }
 0x62c   : > { %2315 = vmax.xlane.f32.xlu1 %v7503_v42  ;;  %v7506_v58 = vmul.f32 0.17677669, %v2249_v43 }
 0x62d   : > { %v5678_v53 = vpop.f32.mrf.mxu1 }
 0x62e   : > { %v7524_v11 = vmul.f32 0.17677669, %v5678_v53 }
 0x62f   : > { %v2262_v4 = vpop.f32.mrf.mxu1 }
 0x630   : > { %2311 = vmax.xlane.f32.xlu1 %v7506_v58  ;;  %v7527_v54 = vmul.f32 0.17677669, %v2262_v4 }
 0x631   : > { %v5679_v30 = vpop.f32.mrf.mxu1 }
 0x632   : > { %v7529_v55 = vmul.f32 0.17677669, %v5679_v30 }
 0x633   : > { %v2265_v23 = vpop.f32.mrf.mxu1 }
 0x634   : > { %v7533_v56 = vmul.f32 0.17677669, %v2265_v23 }
 0x636   : > { %2487 = vrot.lane.b32.xlu0 %v6178_v44, %s6805_s17 }
 0x641   : > { %2843 = vrot.lane.b32.xlu1 %v6179_v45, %s6806_s12 }
 0x645   : > { %2839 = vrot.lane.b32.xlu1 %v6180_v3, %s6806_s12 }
 0x655   : > { %2305 = vmax.xlane.f32.xlu0 %v7512_v50 }
 0x659   : > { %2301 = vmax.xlane.f32.xlu0 %v7515_v51 }
 0x65d   : > { %2313 = vmax.xlane.f32.xlu0 %v7518_v52 }
 0x661   : > { %2309 = vmax.xlane.f32.xlu0 %v7521_v38 }
 0x665   : > { %2321 = vmax.xlane.f32.xlu0 %v7524_v11 }
 0x669   : > { %2317 = vmax.xlane.f32.xlu0 %v7527_v54  ;;  %2323 = vmax.xlane.f32.xlu1 %v7529_v55 }
 0x66d   : > { %2319 = vmax.xlane.f32.xlu1 %v7533_v56 }
 0x67f   : > { %2845 = vrot.lane.b32.xlu0 %v6181_v59, %s6806_s12 }
 0x683   : > { %2841 = vrot.lane.b32.xlu0 %v6182_v24, %s6806_s12 }
 0x687   : > { %2837 = vrot.lane.b32.xlu0 %v6183_v21, %s6806_s12 }
 0x6a1   : > { %v2298_v26 = vpop.xlane.xlu0 %2297 }
 0x6a2   : > { %v2327_v60 = vsub.f32 %v7485_v2, %v2298_v26 }
 0x6a4   : > { %v2345_v36 = vmul.f32 1.442695, %v2327_v60 }
 0x6a5   : > { %v2294_v35 = vpop.xlane.xlu0 %2293 }
 0x6a6   : > { %6347 = vpow2.f32 %v2345_v36  ;;  %v2325_v34 = vsub.f32 %v7488_v29, %v2294_v35 }
 0x6a7   : > { %v2296_v49 = vpop.xlane.xlu1 %2295 }
 0x6a8   : > { %v2341_v5 = vmul.f32 1.442695, %v2325_v34  ;;  %v2326_v0 = vsub.f32 %v7490_v33, %v2296_v49  ;;  %v6185_v49 = vld [vmem:[#allocation2 + $0x4] ss:$12 sps:$4 sm:$0xff]  }
 0x6a9   : > { %v2300_v39 = vpop.xlane.xlu0 %2299 }
 0x6aa   : > { %6349 = vpow2.f32 %v2341_v5  ;;  %v2328_v46 = vsub.f32 %v7493_v37, %v2300_v39  ;;  %v2343_v10 = vmul.f32 1.442695, %v2326_v0  ;;  %v6186_v5 = vld [vmem:[#allocation2 + $0x18] ss:$12 sps:$4 sm:$0xff]   ;;  %v6187_v39 = vld [vmem:[#allocation2 + $0x1c] ss:$12 sps:$4 sm:$0xff]  }
 0x6ab   : > { %v6188_v0 = vld [vmem:[#allocation2 + $0x48] ss:$12 sps:$4 sm:$0xff]  }
 0x6ac   : > { %v2347_v47 = vmul.f32 1.442695, %v2328_v46  ;;  %v6189_v46 = vld [vmem:[#allocation2] ss:$12 sps:$4 sm:$0xff]  }
 0x6ad   : > { %v2488_v13 = vpop.permute.xlu0 %2487  ;;  %v2308_v6 = vpop.xlane.xlu1 %2307 }
 0x6ae   : > { %6351 = vpow2.f32 %v2347_v47  ;;  %5692 = vmatprep.subr.bf16.mxu0 %v2488_v13  ;;  %v2332_v27 = vsub.f32 %v7497_v15, %v2308_v6  ;;  %v6190_v47 = vld [vmem:[#allocation2 + $0x78] ss:$12 sps:$4 sm:$0xff]  }
 0x6af   : > { %5693 = vmatpush3.bf16.msra.mxu0 %v2488_v13  ;;  %6353 = vpow2.f32 %v2343_v10  ;;  %v6191_v13 = vld [vmem:[#allocation2 + $0x30] ss:$12 sps:$4 sm:$0xff]   ;;  %v6192_v10 = vld [vmem:[#allocation2 + $0xa8] ss:$12 sps:$4 sm:$0xff]   ;;  %v6194_v6 = vld [vmem:[#allocation2 + $0x98] ss:$12 sps:$4 sm:$0xff]  }
 0x6b0   : > { %5694 = vmatprep.subr.bf16.mxu0 %v2486_v20  ;;  %v2355_v33 = vmul.f32 1.442695, %v2332_v27 }
 0x6b1   : > { %v2304_v63 = vpop.xlane.xlu1 %2303 }
 0x6b2   : > { %v2330_v8 = vsub.f32 %v7500_v19, %v2304_v63  ;;  %v6195_v63 = vld [vmem:[#allocation2 + $0x90] ss:$12 sps:$4 sm:$0xff]  }
 0x6b3   : > { %v7543_v32 = vpop.eup %6347  ;;  %5695 = vmatpush3.bf16.msra.mxu0 %v2486_v20 }
 0x6b4   : > { %2377 = vadd.xlane.f32.xlu1 %v7543_v32  ;;  %v2351_v2 = vmul.f32 1.442695, %v2330_v8  ;;  %v6197_v8 = vld [vmem:[#allocation2 + $0xb0] ss:$12 sps:$4 sm:$0xff]  }
 0x6b5   : > { %v2316_v7 = vpop.xlane.xlu1 %2315 }
 0x6b6   : > { %v2336_v22 = vsub.f32 %v7503_v42, %v2316_v7  ;;  %v6196_v7 = vld [vmem:[#allocation2 + $0x38] ss:$12 sps:$4 sm:$0xff]  }
 0x6b7   : > { %v7546_v25 = vpop.eup %6349 }
 0x6b8   : > { %2373 = vadd.xlane.f32.xlu1 %v7546_v25  ;;  %v2363_v17 = vmul.f32 1.442695, %v2336_v22 }
 0x6b9   : > { %v2312_v31 = vpop.xlane.xlu1 %2311 }
 0x6ba   : > { %v2334_v41 = vsub.f32 %v7506_v58, %v2312_v31 }
 0x6bb   : > { %v7549_v14 = vpop.eup %6351 }
 0x6bc   : > { %2379 = vadd.xlane.f32.xlu1 %v7549_v14  ;;  %v7552_v62 = vpop.eup %6353  ;;  %v2359_v42 = vmul.f32 1.442695, %v2334_v41 }
 0x6bd   : > { %v7561_v1 = vpop.permute.xlu1 %2843 }
 0x6c0   : > { %2375 = vadd.xlane.f32.xlu1 %v7552_v62 }
 0x6c1   : > { %v7566_v43 = vpop.permute.xlu1 %2839 }
 0x6d1   : > { %2835 = vrot.lane.b32.xlu1 %v6184_v61, %s6806_s12  ;;  %v6193_v61 = vld [vmem:[#allocation2 + $0x60] ss:$12 sps:$4 sm:$0xff]  }
 0x6de   : > { %v2306_v9 = vpop.xlane.xlu0 %2305 }
 0x6df   : > { %v2331_v16 = vsub.f32 %v7512_v50, %v2306_v9  ;;  %v6198_v9 = vld [vmem:[#allocation2 + $0x8] ss:$12 sps:$4 sm:$0xff]  }
 0x6e1   : > { %v2353_v18 = vmul.f32 1.442695, %v2331_v16  ;;  %v6199_v16 = vld [vmem:[#allocation2 + $0x80] ss:$12 sps:$4 sm:$0xff]  }
 0x6e2   : > { %v2302_v28 = vpop.xlane.xlu0 %2301 }
 0x6e3   : > { %6355 = vpow2.f32 %v2353_v18  ;;  %v2329_v29 = vsub.f32 %v7515_v51, %v2302_v28  ;;  %v6200_v18 = vld [vmem:[#allocation2 + $0x68] ss:$12 sps:$4 sm:$0xff]  }
 0x6e4   : > { %6357 = vpow2.f32 %v2351_v2  ;;  %v6201_v2 = vld [vmem:[#allocation2 + $0x50] ss:$12 sps:$4 sm:$0xff]  }
 0x6e5   : > { %v2349_v12 = vmul.f32 1.442695, %v2329_v29 }
 0x6e6   : > { %v2314_v57 = vpop.xlane.xlu0 %2313 }
 0x6e7   : > { %6359 = vpow2.f32 %v2349_v12  ;;  %v2335_v37 = vsub.f32 %v7518_v52, %v2314_v57 }
 0x6e8   : > { %6361 = vpow2.f32 %v2355_v33 }
 0x6e9   : > { %v2361_v48 = vmul.f32 1.442695, %v2335_v37 }
 0x6ea   : > { %v2310_v15 = vpop.xlane.xlu0 %2309 }
 0x6eb   : > { %6363 = vpow2.f32 %v2361_v48  ;;  %v2333_v40 = vsub.f32 %v7521_v38, %v2310_v15 }
 0x6ed   : > { %v2357_v19 = vmul.f32 1.442695, %v2333_v40 }
 0x6ee   : > { %v2322_v44 = vpop.xlane.xlu0 %2321 }
 0x6ef   : > { %6365 = vpow2.f32 %v2357_v19  ;;  %v2339_v45 = vsub.f32 %v7524_v11, %v2322_v44 }
 0x6f0   : > { %v7569_v3 = vpop.eup %6355  ;;  %6367 = vpow2.f32 %v2363_v17 }
 0x6f1   : > { %v2369_v50 = vmul.f32 1.442695, %v2339_v45  ;;  %2385 = vadd.xlane.f32.xlu0 %v7569_v3  ;;  %v7572_v53 = vpop.eup %6357 }
 0x6f2   : > { %v2318_v51 = vpop.xlane.xlu0 %2317  ;;  %v2324_v52 = vpop.xlane.xlu1 %2323 }
 0x6f3   : > { %6369 = vpow2.f32 %v2369_v50  ;;  %v2337_v58 = vsub.f32 %v7527_v54, %v2318_v51  ;;  %v2340_v38 = vsub.f32 %v7529_v55, %v2324_v52 }
 0x6f4   : > { %v7576_v4 = vpop.eup %6359  ;;  %6371 = vpow2.f32 %v2359_v42 }
 0x6f5   : > { %v2365_v30 = vmul.f32 1.442695, %v2337_v58  ;;  %2381 = vadd.xlane.f32.xlu0 %v7576_v4  ;;  %2383 = vadd.xlane.f32.xlu1 %v7572_v53  ;;  %v2371_v11 = vmul.f32 1.442695, %v2340_v38  ;;  %v7582_v24 = vpop.eup %6361 }
 0x6f6   : > { %v7580_v23 = vpop.permute.xlu0 %2845  ;;  %v2320_v59 = vpop.xlane.xlu1 %2319 }
 0x6f7   : > { %6373 = vpow2.f32 %v2365_v30  ;;  %v2338_v21 = vsub.f32 %v7533_v56, %v2320_v59  ;;  %5968 = vmatprep.subr.msk.bf16.mxu0 %vm1497_vm0, %v7580_v23  ;;  %v2893_v41 = vsel %vm1497_vm0, %v7580_v23, 0 }
 0x6f8   : > { %v7587_v54 = vpop.eup %6363  ;;  %6375 = vpow2.f32 %v2371_v11 }
 0x6f9   : > { %v2367_v55 = vmul.f32 1.442695, %v2338_v21  ;;  %2387 = vadd.xlane.f32.xlu0 %v7582_v24  ;;  %2393 = vadd.xlane.f32.xlu1 %v7587_v54 }
 0x6fa   : > { %v2842_v44 = vpop.permute.xlu0 %2841 }
 0x6fb   : > { %6377 = vpow2.f32 %v2367_v55 }
 0x6fc   : > { %v7591_v26 = vpop.eup %6365 }
 0x6fd   : > { %2389 = vadd.xlane.f32.xlu1 %v7591_v26  ;;  %v7594_v60 = vpop.eup %6367 }
 0x700   : > { %v7596_v20 = vpop.eup %6369 }
 0x701   : > { %2401 = vadd.xlane.f32.xlu0 %v7596_v20  ;;  %2395 = vadd.xlane.f32.xlu1 %v7594_v60  ;;  %v7600_v56 = vpop.eup %6371 }
 0x704   : > { %v7602_v36 = vpop.eup %6373 }
 0x705   : > { %2397 = vadd.xlane.f32.xlu0 %v7602_v36  ;;  %2391 = vadd.xlane.f32.xlu1 %v7600_v56  ;;  %v7606_v35 = vpop.eup %6375 }
 0x708   : > { %v7608_v34 = vpop.eup %6377 }
 0x709   : > { %2403 = vadd.xlane.f32.xlu0 %v7606_v35  ;;  %2399 = vadd.xlane.f32.xlu1 %v7608_v34 }
 0x71a   : > { %2831 = vrot.lane.b32.xlu1 %v6185_v49, %s6806_s12 }
 0x71e   : > { %2777 = vrot.lane.b32.xlu1 %v6186_v5, %s6806_s12 }
 0x71f   : > { %2833 = vrot.lane.b32.xlu0 %v6187_v39, %s6806_s12 }
 0x722   : > { %2781 = vrot.lane.b32.xlu1 %v6188_v0, %s6806_s12 }
 0x723   : > { %2775 = vrot.lane.b32.xlu0 %v6189_v46, %s6806_s12 }
 0x726   : > { %2785 = vrot.lane.b32.xlu1 %v6190_v47, %s6806_s12 }
 0x727   : > { %2779 = vrot.lane.b32.xlu0 %v6191_v13, %s6806_s12 }
 0x72a   : > { %2789 = vrot.lane.b32.xlu1 %v6192_v10, %s6806_s12 }
 0x72b   : > { %2783 = vrot.lane.b32.xlu0 %v6193_v61, %s6806_s12 }
 0x72e   : > { %3212 = vrot.lane.b32.xlu1 %v6194_v6, %s6806_s12 }
 0x72f   : > { %2787 = vrot.lane.b32.xlu0 %v6195_v63, %s6806_s12 }
 0x732   : > { %3204 = vrot.lane.b32.xlu1 %v6196_v7, %s6806_s12 }
 0x733   : > { %3214 = vrot.lane.b32.xlu0 %v6197_v8, %s6806_s12 }
 0x736   : > { %3200 = vrot.lane.b32.xlu1 %v6198_v9, %s6806_s12 }
 0x737   : > { %3210 = vrot.lane.b32.xlu0 %v6199_v16, %s6806_s12 }
 0x73b   : > { %3208 = vrot.lane.b32.xlu0 %v6200_v18, %s6806_s12 }
 0x73d   : > { %v2378_v27 = vpop.xlane.xlu1 %2377 }
 0x73f   : > { %3206 = vrot.lane.b32.xlu0 %v6201_v2, %s6806_s12 }
 0x741   : > { %v2374_v31 = vpop.xlane.xlu1 %2373 }
 0x745   : > { %v2380_v28 = vpop.xlane.xlu1 %2379 }
 0x746   : > { %6379 = vrcp.f32 %v2380_v28 }
 0x747   : > { %6381 = vrcp.f32 %v2374_v31 }
 0x748   : > { %6383 = vrcp.f32 %v2378_v27 }
 0x749   : > { %v2376_v29 = vpop.xlane.xlu1 %2375 }
 0x74a   : > { %6385 = vrcp.f32 %v2376_v29 }
 0x74d   : > { %v2836_v45 = vpop.permute.xlu1 %2835 }
 0x753   : > { %v6380_v12 = vpop.eup %6379 }
 0x754   : > { %v6382_v33 = vpop.eup %6381  ;;  %v2424_v48 = vmul.f32 %v6380_v12, %v7549_v14  ;;  %v2890_v14 = vsel %vm1497_vm0, %v7561_v1, 0 }
 0x755   : > { %v6384_v57 = vpop.eup %6383  ;;  %v2421_v22 = vmul.f32 %v6382_v33, %v7546_v25  ;;  %v2884_v25 = vsel %vm1497_vm0, %v7566_v43, 0 }
 0x756   : > { %v2423_v40 = vmul.f32 %v6384_v57, %v7543_v32  ;;  %v2887_v32 = vsel %vm1497_vm0, %v2842_v44, 0 }
 0x757   : > { %v6386_v37 = vpop.eup %6385 }
 0x758   : > { %v2422_v15 = vmul.f32 %v6386_v37, %v7552_v62  ;;  %v2438_v17 = vpack.c.bf16 %v2424_v48, %v2423_v40  ;;  %v2838_v62 = vpop.permute.xlu0 %2837 }
 0x75a   : > { %v2437_v19 = vpack.c.bf16 %v2422_v15, %v2421_v22 }
 0x75c   : > { %5696 = vmatprep.mubr.bf16.mxu0 %v2437_v19 }
 0x75d   : > { %5697 = vmatmul.mubr.bf16.vlgmr.msra.gmra.mxu0 %v2438_v17 }
 0x75e   : > { %5713 = vmatpush3.bf16.xpose.msra.mxu0 %v2893_v41 }
 0x75f   : > { %5969 = vmatprep.subr.msk.bf16.mxu0 %vm1497_vm0, %v7561_v1  ;;  %v2881_v1 = vsel %vm1497_vm0, %v2838_v62, 0 }
 0x766   : > { %5715 = vmatpush3.bf16.xpose.msra.mxu0 %v2890_v14 }
 0x767   : > { %5970 = vmatprep.subr.msk.bf16.mxu0 %vm1497_vm0, %v2842_v44 }
 0x76e   : > { %5717 = vmatpush3.bf16.xpose.msra.mxu0 %v2887_v32 }
 0x76f   : > { %5971 = vmatprep.subr.msk.bf16.mxu0 %vm1497_vm0, %v7566_v43  ;;  %v2878_v43 = vsel %vm1497_vm0, %v2836_v45, 0 }
 0x776   : > { %5719 = vmatpush3.bf16.xpose.msra.mxu0 %v2884_v25 }
 0x777   : > { %5972 = vmatprep.subr.msk.bf16.mxu0 %vm1497_vm0, %v2838_v62 }
 0x77a   : > { %v2386_v50 = vpop.xlane.xlu0 %2385 }
 0x77e   : > { %5721 = vmatpush3.bf16.xpose.msra.mxu0 %v2881_v1  ;;  %v2382_v42 = vpop.xlane.xlu0 %2381  ;;  %v2384_v51 = vpop.xlane.xlu1 %2383 }
 0x77f   : > { %6387 = vrcp.f32 %v2382_v42  ;;  %5973 = vmatprep.subr.msk.bf16.mxu0 %vm1497_vm0, %v2836_v45 }
 0x780   : > { %6389 = vrcp.f32 %v2384_v51 }
 0x781   : > { %6391 = vrcp.f32 %v2386_v50 }
 0x782   : > { %v2388_v52 = vpop.xlane.xlu0 %2387  ;;  %v2394_v58 = vpop.xlane.xlu1 %2393 }
 0x783   : > { %6393 = vrcp.f32 %v2388_v52 }
 0x786   : > { %5723 = vmatpush3.bf16.xpose.msra.mxu0 %v2878_v43  ;;  %v2390_v38 = vpop.xlane.xlu1 %2389 }
 0x78a   : > { %v2402_v30 = vpop.xlane.xlu0 %2401  ;;  %v2396_v11 = vpop.xlane.xlu1 %2395 }
 0x78b   : > { %6395 = vrcp.f32 %v2396_v11 }
 0x78c   : > { %v6388_v23 = vpop.eup %6387  ;;  %6397 = vrcp.f32 %v2390_v38 }
 0x78d   : > { %v6390_v59 = vpop.eup %6389  ;;  %v2425_v21 = vmul.f32 %v6388_v23, %v7576_v4  ;;  %6399 = vrcp.f32 %v2394_v58 }
 0x78e   : > { %v6392_v55 = vpop.eup %6391  ;;  %v2398_v49 = vpop.xlane.xlu0 %2397  ;;  %v2426_v39 = vmul.f32 %v6390_v59, %v7572_v53 }
 0x78f   : > { %v2392_v5 = vpop.xlane.xlu1 %2391  ;;  %v2427_v47 = vmul.f32 %v6392_v55, %v7569_v3 }
 0x790   : > { %v6394_v0 = vpop.eup %6393  ;;  %6401 = vrcp.f32 %v2392_v5  ;;  %v2439_v46 = vpack.c.bf16 %v2426_v39, %v2425_v21 }
 0x791   : > { %v2428_v13 = vmul.f32 %v6394_v0, %v7582_v24  ;;  %6403 = vrcp.f32 %v2398_v49 }
 0x792   : > { %5700 = vmatprep.mubr.bf16.mxu0 %v2439_v46  ;;  %v2404_v10 = vpop.xlane.xlu0 %2403 }
 0x793   : > { %v2400_v61 = vpop.xlane.xlu1 %2399  ;;  %v2440_v6 = vpack.c.bf16 %v2428_v13, %v2427_v47 }
 0x794   : > { %6405 = vrcp.f32 %v2400_v61 }
 0x795   : > { %6407 = vrcp.f32 %v2404_v10  ;;  %5701 = vmatmul.mubr.bf16.gmra.mxu0 %v2440_v6 }
 0x796   : > { %v2834_v4 = vpop.permute.xlu0 %2833  ;;  %6409 = vrcp.f32 %v2402_v30 }
 0x797   : > { %v2832_v63 = vpop.permute.xlu1 %2831  ;;  %5974 = vmatprep.subr.msk.bf16.mxu0 %vm1497_vm0, %v2834_v4  ;;  %v2875_v53 = vsel %vm1497_vm0, %v2834_v4, 0 }
 0x798   : > { %5725 = vmatpush3.bf16.xpose.msra.mxu0 %v2875_v53  ;;  %v6396_v3 = vpop.eup %6395  ;;  %v2872_v12 = vsel %vm1497_vm0, %v2832_v63, 0 }
 0x799   : > { %5975 = vmatprep.subr.msk.bf16.mxu0 %vm1497_vm0, %v2832_v63  ;;  %v6398_v8 = vpop.eup %6397  ;;  %v2432_v18 = vmul.f32 %v6396_v3, %v7594_v60 }
 0x79a   : > { %v2776_v24 = vpop.permute.xlu0 %2775  ;;  %v6400_v9 = vpop.eup %6399  ;;  %v2429_v31 = vmul.f32 %v6398_v8, %v7591_v26 }
 0x79b   : > { %v2778_v7 = vpop.permute.xlu1 %2777  ;;  %v2431_v33 = vmul.f32 %v6400_v9, %v7587_v54 }
 0x79d   : > { %v6402_v16 = vpop.eup %6401  ;;  %v2442_v48 = vpack.c.bf16 %v2432_v18, %v2431_v33 }
 0x79e   : > { %v2780_v27 = vpop.permute.xlu0 %2779  ;;  %v2430_v28 = vmul.f32 %v6402_v16, %v7600_v56  ;;  %v6404_v29 = vpop.eup %6403 }
 0x79f   : > { %v2782_v2 = vpop.permute.xlu1 %2781  ;;  %v2433_v60 = vmul.f32 %v6404_v29, %v7602_v36 }
 0x7a0   : > { %5727 = vmatpush3.bf16.xpose.msra.mxu0 %v2872_v12  ;;  %v2441_v57 = vpack.c.bf16 %v2430_v28, %v2429_v31  ;;  %v6204_v31 = vld [vmem:[#allocation2 + $0x64] ss:$12 sps:$4 sm:$0xff]  }
 0x7a1   : > { %v6406_v37 = vpop.eup %6405 }
 0x7a2   : > { %v6408_v22 = vpop.eup %6407  ;;  %5704 = vmatprep.mubr.bf16.mxu0 %v2441_v57  ;;  %v2784_v15 = vpop.permute.xlu0 %2783  ;;  %v2434_v19 = vmul.f32 %v6406_v37, %v7608_v34 }
 0x7a3   : > { %v2786_v40 = vpop.permute.xlu1 %2785  ;;  %5705 = vmatmul.mubr.bf16.gmra.mxu0 %v2442_v48  ;;  %v6410_v26 = vpop.eup %6409  ;;  %v2436_v17 = vmul.f32 %v6408_v22, %v7606_v35 }
 0x7a4   : > { %v2443_v56 = vpack.c.bf16 %v2434_v19, %v2433_v60  ;;  %v2435_v14 = vmul.f32 %v6410_v26, %v7596_v20  ;;  %v6205_v26 = vld [vmem:[#allocation2 + $0xac] ss:$12 sps:$4 sm:$0xff]  }
 0x7a6   : > { %5708 = vmatprep.mubr.bf16.mxu0 %v2443_v56  ;;  %v2788_v41 = vpop.permute.xlu0 %2787  ;;  %v2444_v44 = vpack.c.bf16 %v2436_v17, %v2435_v14  ;;  %v6206_v56 = vld [vmem:[#allocation2 + $0x7c] ss:$12 sps:$4 sm:$0xff]   ;;  %v6207_v17 = vld [vmem:[#allocation2 + $0x4c] ss:$12 sps:$4 sm:$0xff]  }
 0x7a7   : > { %v2790_v54 = vpop.permute.xlu1 %2789 }
 0x7aa   : > { %v3215_v32 = vpop.permute.xlu0 %3214 }
 0x7ab   : > { %5709 = vmatmul.mubr.bf16.gmra.mxu0 %v2444_v44  ;;  %5744 = vmatprep.subr.bf16.mxu1 %v3215_v32  ;;  %v3213_v25 = vpop.permute.xlu1 %3212 }
 0x7ac   : > { %5728 = vmatprep.mubr.msk.bf16.mxu0 %vm1497_vm0, %v2776_v24  ;;  %5745 = vmatpush3.bf16.msra.mxu1 %v3215_v32 }
 0x7ad   : > { %5746 = vmatprep.subr.bf16.mxu1 %v3213_v25 }
 0x7ae   : > { %v3211_v36 = vpop.permute.xlu0 %3210 }
 0x7af   : > { %v3205_v35 = vpop.permute.xlu1 %3204 }
 0x7b0   : > { %5747 = vmatpush3.bf16.msra.mxu1 %v3213_v25 }
 0x7b1   : > { %5748 = vmatprep.subr.bf16.mxu1 %v3211_v36 }
 0x7b2   : > { %v3209_v34 = vpop.permute.xlu0 %3208 }
 0x7b3   : > { %5729 = vmatmul.mubr.msk.bf16.vlgmr.msra.gmra.mxu0 %vm1497_vm0, %v2778_v7  ;;  %v3201_v14 = vpop.permute.xlu1 %3200 }
 0x7b4   : > { %5732 = vmatprep.mubr.msk.bf16.mxu0 %vm1497_vm0, %v2780_v27  ;;  %5749 = vmatpush3.bf16.msra.mxu1 %v3211_v36  ;;  %v6202_v27 = vld [vmem:[#allocation2 + $0x20] ss:$12 sps:$4 sm:$0xff]  }
 0x7b5   : > { %5750 = vmatprep.subr.bf16.mxu1 %v3209_v34 }
 0x7b6   : > { %v3207_v20 = vpop.permute.xlu0 %3206 }
 0x7b8   : > { %5751 = vmatpush3.bf16.msra.mxu1 %v3209_v34 }
 0x7b9   : > { %5752 = vmatprep.subr.bf16.mxu1 %v3207_v20 }
 0x7bb   : > { %5733 = vmatmul.mubr.msk.bf16.gmra.mxu0 %vm1497_vm0, %v2782_v2  ;;  %v6203_v2 = vld [vmem:[#allocation2 + $0x94] ss:$12 sps:$4 sm:$0xff]  }
 0x7bc   : > { %5736 = vmatprep.mubr.msk.bf16.mxu0 %vm1497_vm0, %v2784_v15  ;;  %5753 = vmatpush3.bf16.msra.mxu1 %v3207_v20 }
 0x7bd   : > { %5754 = vmatprep.subr.bf16.mxu1 %v3205_v35 }
 0x7c0   : > { %5755 = vmatpush3.bf16.msra.mxu1 %v3205_v35 }
 0x7c3   : > { %5737 = vmatmul.mubr.msk.bf16.gmra.mxu0 %vm1497_vm0, %v2786_v40 }
 0x7c4   : > { %5740 = vmatprep.mubr.msk.bf16.mxu0 %vm1497_vm0, %v2788_v41 }
 0x7cb   : > { %5741 = vmatmul.mubr.msk.bf16.gmra.mxu0 %vm1497_vm0, %v2790_v54 }
 0x81d   : > { %v7673_v62 = vpop.f32.mrf.mxu0 }
 0x81f   : > { %v7675_v45 = vpop.f32.mrf.mxu0 }
 0x821   : > { %v7677_v50 = vpop.f32.mrf.mxu0 }
 0x823   : > { %v7679_v1 = vpop.f32.mrf.mxu0 }
 0x855   : > { %v7681_v42 = vpop.f32.mrf.mxu0 }
 0x857   : > { %v7683_v51 = vpop.f32.mrf.mxu0 }
 0x859   : > { %v7685_v52 = vpop.f32.mrf.mxu0 }
 0x85b   : > { %v7687_v58 = vpop.f32.mrf.mxu0 }
 0x863   : > { %v7689_v43 = vpop.f32.mrf.mxu0 }
 0x865   : > { %v7691_v38 = vpop.f32.mrf.mxu0 }
 0x867   : > { %v7693_v30 = vpop.f32.mrf.mxu0 }
 0x869   : > { %v7695_v11 = vpop.f32.mrf.mxu0 }
 0x86b   : > { %v7697_v23 = vpop.f32.mrf.mxu0 }
 0x86d   : > { %v7699_v59 = vpop.f32.mrf.mxu0 }
 0x86f   : > { %v7701_v21 = vpop.f32.mrf.mxu0 }
 0x871   : > { %v7703_v55 = vpop.f32.mrf.mxu0 }
 0x873   : > { %v5730_v49 = vpop.f32.mrf.mxu0 }
 0x874   : > { %v7705_v5 = vmul.f32 0.17677669, %v5730_v49 }
 0x875   : > { %v2929_v39 = vpop.f32.mrf.mxu0 }
 0x876   : > { %3012 = vmax.xlane.f32.xlu0 %v7705_v5  ;;  %v7708_v46 = vmul.f32 0.17677669, %v2929_v39 }
 0x877   : > { %v5731_v0 = vpop.f32.mrf.mxu0 }
 0x878   : > { %v7713_v61 = vmul.f32 0.17677669, %v5731_v0 }
 0x879   : > { %v2932_v47 = vpop.f32.mrf.mxu0 }
 0x87a   : > { %v7710_v13 = vmul.f32 0.17677669, %v2932_v47  ;;  %3008 = vmax.xlane.f32.xlu0 %v7708_v46 }
 0x87b   : > { %v5734_v10 = vpop.f32.mrf.mxu0 }
 0x87c   : > { %3010 = vmax.xlane.f32.xlu1 %v7710_v13  ;;  %v7732_v28 = vmul.f32 0.17677669, %v5734_v10 }
 0x87d   : > { %v2945_v6 = vpop.f32.mrf.mxu0 }
 0x87e   : > { %3014 = vmax.xlane.f32.xlu0 %v7713_v61  ;;  %v7735_v29 = vmul.f32 0.17677669, %v2945_v6 }
 0x87f   : > { %v5735_v4 = vpop.f32.mrf.mxu0 }
 0x880   : > { %v7717_v63 = vmul.f32 0.17677669, %v5735_v4 }
 0x881   : > { %v2948_v53 = vpop.f32.mrf.mxu0 }
 0x882   : > { %3022 = vmax.xlane.f32.xlu1 %v7717_v63  ;;  %v7720_v24 = vmul.f32 0.17677669, %v2948_v53 }
 0x883   : > { %v5738_v3 = vpop.f32.mrf.mxu0 }
 0x884   : > { %v7738_v12 = vmul.f32 0.17677669, %v5738_v3 }
 0x885   : > { %v2961_v7 = vpop.f32.mrf.mxu0 }
 0x886   : > { %3018 = vmax.xlane.f32.xlu1 %v7720_v24  ;;  %v7741_v57 = vmul.f32 0.17677669, %v2961_v7 }
 0x887   : > { %v5739_v8 = vpop.f32.mrf.mxu0 }
 0x888   : > { %v7723_v9 = vmul.f32 0.17677669, %v5739_v8 }
 0x889   : > { %v2964_v16 = vpop.f32.mrf.mxu0 }
 0x88a   : > { %3030 = vmax.xlane.f32.xlu1 %v7723_v9  ;;  %v7726_v18 = vmul.f32 0.17677669, %v2964_v16 }
 0x88b   : > { %v5742_v33 = vpop.f32.mrf.mxu0 }
 0x88c   : > { %v7744_v48 = vmul.f32 0.17677669, %v5742_v33 }
 0x88d   : > { %v2977_v37 = vpop.f32.mrf.mxu0 }
 0x88e   : > { %3026 = vmax.xlane.f32.xlu1 %v7726_v18  ;;  %v7747_v15 = vmul.f32 0.17677669, %v2977_v37 }
 0x88f   : > { %v5743_v22 = vpop.f32.mrf.mxu0 }
 0x890   : > { %v7749_v40 = vmul.f32 0.17677669, %v5743_v22 }
 0x891   : > { %v2980_v60 = vpop.f32.mrf.mxu0 }
 0x892   : > { %v7753_v19 = vmul.f32 0.17677669, %v2980_v60 }
 0x894   : > { %3202 = vrot.lane.b32.xlu0 %v6202_v27, %s6806_s12 }
 0x89f   : > { %3558 = vrot.lane.b32.xlu1 %v6203_v2, %s6807_s13 }
 0x8a3   : > { %3554 = vrot.lane.b32.xlu1 %v6204_v31, %s6807_s13 }
 0x8b3   : > { %3020 = vmax.xlane.f32.xlu0 %v7732_v28 }
 0x8b7   : > { %3016 = vmax.xlane.f32.xlu0 %v7735_v29 }
 0x8bb   : > { %3028 = vmax.xlane.f32.xlu0 %v7738_v12 }
 0x8bf   : > { %3024 = vmax.xlane.f32.xlu0 %v7741_v57 }
 0x8c3   : > { %3036 = vmax.xlane.f32.xlu0 %v7744_v48 }
 0x8c7   : > { %3032 = vmax.xlane.f32.xlu0 %v7747_v15  ;;  %3038 = vmax.xlane.f32.xlu1 %v7749_v40 }
 0x8cb   : > { %3034 = vmax.xlane.f32.xlu1 %v7753_v19 }
 0x8dd   : > { %3560 = vrot.lane.b32.xlu0 %v6205_v26, %s6807_s13 }
 0x8e1   : > { %3556 = vrot.lane.b32.xlu0 %v6206_v56, %s6807_s13 }
 0x8e5   : > { %3552 = vrot.lane.b32.xlu0 %v6207_v17, %s6807_s13 }
 0x8ff   : > { %v3013_v41 = vpop.xlane.xlu0 %3012 }
 0x900   : > { %v3042_v54 = vsub.f32 %v7705_v5, %v3013_v41 }
 0x902   : > { %v3060_v44 = vmul.f32 1.442695, %v3042_v54 }
 0x903   : > { %v3009_v32 = vpop.xlane.xlu0 %3008 }
 0x904   : > { %6411 = vpow2.f32 %v3060_v44  ;;  %v3040_v25 = vsub.f32 %v7708_v46, %v3009_v32 }
 0x905   : > { %v3011_v36 = vpop.xlane.xlu1 %3010 }
 0x906   : > { %v3056_v34 = vmul.f32 1.442695, %v3040_v25  ;;  %v3041_v35 = vsub.f32 %v7710_v13, %v3011_v36 }
 0x907   : > { %v3015_v20 = vpop.xlane.xlu0 %3014 }
 0x908   : > { %6413 = vpow2.f32 %v3056_v34  ;;  %v3043_v49 = vsub.f32 %v7713_v61, %v3015_v20  ;;  %v3058_v47 = vmul.f32 1.442695, %v3041_v35  ;;  %v6208_v61 = vld [vmem:[#allocation2 + $0x34] ss:$12 sps:$4 sm:$0xff]  }
 0x90a   : > { %v3062_v39 = vmul.f32 1.442695, %v3043_v49 }
 0x90b   : > { %v3203_v0 = vpop.permute.xlu0 %3202  ;;  %v3023_v6 = vpop.xlane.xlu1 %3022 }
 0x90c   : > { %6415 = vpow2.f32 %v3062_v39  ;;  %5756 = vmatprep.subr.bf16.mxu1 %v3203_v0  ;;  %v3047_v27 = vsub.f32 %v7717_v63, %v3023_v6 }
 0x90d   : > { %5757 = vmatpush3.bf16.msra.mxu1 %v3203_v0  ;;  %6417 = vpow2.f32 %v3058_v47 }
 0x90e   : > { %5758 = vmatprep.subr.bf16.mxu1 %v3201_v14  ;;  %v3070_v60 = vmul.f32 1.442695, %v3047_v27  ;;  %v6209_v27 = vld [vmem:[#allocation2 + $0x4] ss:$12 sps:$4 sm:$0xff]  }
 0x90f   : > { %v3019_v4 = vpop.xlane.xlu1 %3018 }
 0x910   : > { %v3045_v3 = vsub.f32 %v7720_v24, %v3019_v4 }
 0x911   : > { %v7763_v5 = vpop.eup %6411  ;;  %5759 = vmatpush3.bf16.msra.mxu1 %v3201_v14 }
 0x912   : > { %3092 = vadd.xlane.f32.xlu1 %v7763_v5  ;;  %v3066_v2 = vmul.f32 1.442695, %v3045_v3 }
 0x913   : > { %v3031_v53 = vpop.xlane.xlu1 %3030 }
 0x915   : > { %v7766_v46 = vpop.eup %6413 }
 0x916   : > { %3088 = vadd.xlane.f32.xlu1 %v7766_v46 }
 0x917   : > { %v3027_v31 = vpop.xlane.xlu1 %3026 }
 0x919   : > { %v7769_v13 = vpop.eup %6415 }
 0x91a   : > { %3094 = vadd.xlane.f32.xlu1 %v7769_v13  ;;  %v7772_v10 = vpop.eup %6417 }
 0x91b   : > { %v7781_v24 = vpop.permute.xlu1 %3558 }
 0x91e   : > { %3090 = vadd.xlane.f32.xlu1 %v7772_v10 }
 0x91f   : > { %v7786_v44 = vpop.permute.xlu1 %3554 }
 0x92f   : > { %3550 = vrot.lane.b32.xlu1 %v6208_v61, %s6807_s13 }
 0x93c   : > { %v3021_v7 = vpop.xlane.xlu0 %3020 }
 0x93d   : > { %v3046_v8 = vsub.f32 %v7732_v28, %v3021_v7  ;;  %v3051_v28 = vsub.f32 %v7723_v9, %v3031_v53 }
 0x93f   : > { %v3068_v16 = vmul.f32 1.442695, %v3046_v8  ;;  %v3078_v14 = vmul.f32 1.442695, %v3051_v28  ;;  %v6219_v28 = vld [vmem:[#allocation2 + $0x90] ss:$12 sps:$4 sm:$0xff]  }
 0x940   : > { %v3017_v33 = vpop.xlane.xlu0 %3016 }
 0x941   : > { %6419 = vpow2.f32 %v3068_v16  ;;  %v3044_v37 = vsub.f32 %v7735_v29, %v3017_v33  ;;  %v3049_v29 = vsub.f32 %v7726_v18, %v3027_v31  ;;  %v6211_v31 = vld [vmem:[#allocation2 + $0x1c] ss:$12 sps:$4 sm:$0xff]  }
 0x942   : > { %6421 = vpow2.f32 %v3066_v2  ;;  %v6210_v2 = vld [vmem:[#allocation2 + $0x18] ss:$12 sps:$4 sm:$0xff]   ;;  %v6212_v33 = vld [vmem:[#allocation2 + $0x48] ss:$12 sps:$4 sm:$0xff]  }
 0x943   : > { %v3064_v22 = vmul.f32 1.442695, %v3044_v37  ;;  %v3074_v9 = vmul.f32 1.442695, %v3049_v29  ;;  %v6213_v37 = vld [vmem:[#allocation2] ss:$12 sps:$4 sm:$0xff]  }
 0x944   : > { %v3029_v26 = vpop.xlane.xlu0 %3028 }
 0x945   : > { %6423 = vpow2.f32 %v3064_v22  ;;  %v3050_v56 = vsub.f32 %v7738_v12, %v3029_v26  ;;  %v6214_v22 = vld [vmem:[#allocation2 + $0x78] ss:$12 sps:$4 sm:$0xff]   ;;  %v6216_v26 = vld [vmem:[#allocation2 + $0xa8] ss:$12 sps:$4 sm:$0xff]  }
 0x946   : > { %6425 = vpow2.f32 %v3070_v60  ;;  %v6215_v60 = vld [vmem:[#allocation2 + $0x30] ss:$12 sps:$4 sm:$0xff]  }
 0x947   : > { %v3076_v17 = vmul.f32 1.442695, %v3050_v56  ;;  %v6217_v56 = vld [vmem:[#allocation2 + $0x60] ss:$12 sps:$4 sm:$0xff]  }
 0x948   : > { %v3025_v63 = vpop.xlane.xlu0 %3024 }
 0x949   : > { %6427 = vpow2.f32 %v3076_v17  ;;  %v3048_v41 = vsub.f32 %v7741_v57, %v3025_v63  ;;  %v6218_v17 = vld [vmem:[#allocation2 + $0x98] ss:$12 sps:$4 sm:$0xff]   ;;  %v6220_v63 = vld [vmem:[#allocation2 + $0xb0] ss:$12 sps:$4 sm:$0xff]  }
 0x94b   : > { %v3072_v54 = vmul.f32 1.442695, %v3048_v41  ;;  %v6221_v41 = vld [vmem:[#allocation2 + $0x80] ss:$12 sps:$4 sm:$0xff]  }
 0x94c   : > { %v3037_v32 = vpop.xlane.xlu0 %3036 }
 0x94d   : > { %6429 = vpow2.f32 %v3072_v54  ;;  %v3054_v12 = vsub.f32 %v7744_v48, %v3037_v32 }
 0x94e   : > { %v7789_v25 = vpop.eup %6419  ;;  %6431 = vpow2.f32 %v3078_v14 }
 0x94f   : > { %v3084_v36 = vmul.f32 1.442695, %v3054_v12  ;;  %3100 = vadd.xlane.f32.xlu0 %v7789_v25  ;;  %v7792_v57 = vpop.eup %6421 }
 0x950   : > { %v3033_v34 = vpop.xlane.xlu0 %3032  ;;  %v3039_v20 = vpop.xlane.xlu1 %3038 }
 0x951   : > { %6433 = vpow2.f32 %v3084_v36  ;;  %v3052_v18 = vsub.f32 %v7747_v15, %v3033_v34  ;;  %v3055_v35 = vsub.f32 %v7749_v40, %v3039_v20 }
 0x952   : > { %v7796_v49 = vpop.eup %6423  ;;  %6435 = vpow2.f32 %v3074_v9 }
 0x953   : > { %v3080_v39 = vmul.f32 1.442695, %v3052_v18  ;;  %3096 = vadd.xlane.f32.xlu0 %v7796_v49  ;;  %3098 = vadd.xlane.f32.xlu1 %v7792_v57  ;;  %v3086_v48 = vmul.f32 1.442695, %v3055_v35  ;;  %v7802_v61 = vpop.eup %6425 }
 0x954   : > { %v7800_v0 = vpop.permute.xlu0 %3560  ;;  %v3035_v47 = vpop.xlane.xlu1 %3034 }
 0x955   : > { %6437 = vpow2.f32 %v3080_v39  ;;  %v3053_v6 = vsub.f32 %v7753_v19, %v3035_v47  ;;  %5976 = vmatprep.subr.msk.bf16.mxu1 %vm1497_vm0, %v7800_v0 }
 0x956   : > { %v7807_v15 = vpop.eup %6427  ;;  %6439 = vpow2.f32 %v3086_v48 }
 0x957   : > { %v3082_v40 = vmul.f32 1.442695, %v3053_v6  ;;  %3102 = vadd.xlane.f32.xlu0 %v7802_v61  ;;  %3108 = vadd.xlane.f32.xlu1 %v7807_v15  ;;  %v3608_v6 = vsel %vm1497_vm0, %v7800_v0, 0 }
 0x959   : > { %6441 = vpow2.f32 %v3082_v40  ;;  %v3557_v40 = vpop.permute.xlu0 %3556 }
 0x95a   : > { %v7811_v4 = vpop.eup %6429 }
 0x95b   : > { %3104 = vadd.xlane.f32.xlu1 %v7811_v4  ;;  %v7814_v53 = vpop.eup %6431 }
 0x95e   : > { %v7816_v3 = vpop.eup %6433 }
 0x95f   : > { %3116 = vadd.xlane.f32.xlu0 %v7816_v3  ;;  %3110 = vadd.xlane.f32.xlu1 %v7814_v53  ;;  %v7820_v19 = vpop.eup %6435 }
 0x962   : > { %v7822_v7 = vpop.eup %6437 }
 0x963   : > { %3112 = vadd.xlane.f32.xlu0 %v7822_v7  ;;  %3106 = vadd.xlane.f32.xlu1 %v7820_v19  ;;  %v7826_v8 = vpop.eup %6439 }
 0x966   : > { %v7828_v16 = vpop.eup %6441 }
 0x967   : > { %3118 = vadd.xlane.f32.xlu0 %v7826_v8  ;;  %3114 = vadd.xlane.f32.xlu1 %v7828_v16 }
 0x978   : > { %3546 = vrot.lane.b32.xlu1 %v6209_v27, %s6807_s13 }
 0x97c   : > { %3492 = vrot.lane.b32.xlu1 %v6210_v2, %s6807_s13 }
 0x97d   : > { %3548 = vrot.lane.b32.xlu0 %v6211_v31, %s6807_s13 }
 0x980   : > { %3496 = vrot.lane.b32.xlu1 %v6212_v33, %s6807_s13 }
 0x981   : > { %3490 = vrot.lane.b32.xlu0 %v6213_v37, %s6807_s13 }
 0x984   : > { %3500 = vrot.lane.b32.xlu1 %v6214_v22, %s6807_s13 }
 0x985   : > { %3494 = vrot.lane.b32.xlu0 %v6215_v60, %s6807_s13 }
 0x988   : > { %3504 = vrot.lane.b32.xlu1 %v6216_v26, %s6807_s13 }
 0x989   : > { %3498 = vrot.lane.b32.xlu0 %v6217_v56, %s6807_s13 }
 0x98c   : > { %3927 = vrot.lane.b32.xlu1 %v6218_v17, %s6807_s13 }
 0x98d   : > { %3502 = vrot.lane.b32.xlu0 %v6219_v28, %s6807_s13 }
 0x991   : > { %3929 = vrot.lane.b32.xlu0 %v6220_v63, %s6807_s13 }
 0x995   : > { %3925 = vrot.lane.b32.xlu0 %v6221_v41, %s6807_s13 }
 0x99b   : > { %v3093_v54 = vpop.xlane.xlu1 %3092 }
 0x99f   : > { %v3089_v14 = vpop.xlane.xlu1 %3088 }
 0x9a3   : > { %v3095_v29 = vpop.xlane.xlu1 %3094 }
 0x9a4   : > { %6443 = vrcp.f32 %v3095_v29 }
 0x9a5   : > { %6445 = vrcp.f32 %v3089_v14 }
 0x9a6   : > { %6447 = vrcp.f32 %v3093_v54 }
 0x9a7   : > { %v3091_v32 = vpop.xlane.xlu1 %3090 }
 0x9a8   : > { %6449 = vrcp.f32 %v3091_v32 }
 0x9ab   : > { %v3551_v0 = vpop.permute.xlu1 %3550 }
 0x9b1   : > { %v6444_v12 = vpop.eup %6443 }
 0x9b2   : > { %v6446_v36 = vpop.eup %6445  ;;  %v3139_v20 = vmul.f32 %v6444_v12, %v7769_v13  ;;  %v3605_v13 = vsel %vm1497_vm0, %v7781_v24, 0 }
 0x9b3   : > { %v6448_v9 = vpop.eup %6447  ;;  %v3136_v18 = vmul.f32 %v6446_v36, %v7766_v46  ;;  %v3599_v46 = vsel %vm1497_vm0, %v7786_v44, 0 }
 0x9b4   : > { %v3138_v39 = vmul.f32 %v6448_v9, %v7763_v5  ;;  %v3602_v5 = vsel %vm1497_vm0, %v3557_v40, 0 }
 0x9b5   : > { %v6450_v34 = vpop.eup %6449 }
 0x9b6   : > { %v3137_v35 = vmul.f32 %v6450_v34, %v7772_v10  ;;  %v3153_v47 = vpack.c.bf16 %v3139_v20, %v3138_v39  ;;  %v3553_v10 = vpop.permute.xlu0 %3552 }
 0x9b8   : > { %v3152_v48 = vpack.c.bf16 %v3137_v35, %v3136_v18 }
 0x9ba   : > { %5760 = vmatprep.mubr.bf16.mxu1 %v3152_v48 }
 0x9bb   : > { %5761 = vmatmul.mubr.bf16.vlgmr.msra.gmra.mxu1 %v3153_v47 }
 0x9bc   : > { %5777 = vmatpush3.bf16.xpose.msra.mxu1 %v3608_v6 }
 0x9bd   : > { %5977 = vmatprep.subr.msk.bf16.mxu1 %vm1497_vm0, %v7781_v24  ;;  %v3596_v24 = vsel %vm1497_vm0, %v3553_v10, 0 }
 0x9c4   : > { %5779 = vmatpush3.bf16.xpose.msra.mxu1 %v3605_v13 }
 0x9c5   : > { %5978 = vmatprep.subr.msk.bf16.mxu1 %vm1497_vm0, %v3557_v40 }
 0x9cc   : > { %5781 = vmatpush3.bf16.xpose.msra.mxu1 %v3602_v5 }
 0x9cd   : > { %5979 = vmatprep.subr.msk.bf16.mxu1 %vm1497_vm0, %v7786_v44  ;;  %v3593_v44 = vsel %vm1497_vm0, %v3551_v0, 0 }
 0x9d4   : > { %5783 = vmatpush3.bf16.xpose.msra.mxu1 %v3599_v46 }
 0x9d5   : > { %5980 = vmatprep.subr.msk.bf16.mxu1 %vm1497_vm0, %v3553_v10 }
 0x9d8   : > { %v3101_v27 = vpop.xlane.xlu0 %3100 }
 0x9dc   : > { %5785 = vmatpush3.bf16.xpose.msra.mxu1 %v3596_v24  ;;  %v3097_v2 = vpop.xlane.xlu0 %3096  ;;  %v3099_v31 = vpop.xlane.xlu1 %3098 }
 0x9dd   : > { %6451 = vrcp.f32 %v3097_v2  ;;  %5981 = vmatprep.subr.msk.bf16.mxu1 %vm1497_vm0, %v3551_v0 }
 0x9de   : > { %6453 = vrcp.f32 %v3099_v31 }
 0x9df   : > { %6455 = vrcp.f32 %v3101_v27 }
 0x9e0   : > { %v3103_v33 = vpop.xlane.xlu0 %3102  ;;  %v3109_v37 = vpop.xlane.xlu1 %3108 }
 0x9e1   : > { %6457 = vrcp.f32 %v3103_v33 }
 0x9e4   : > { %5787 = vmatpush3.bf16.xpose.msra.mxu1 %v3593_v44  ;;  %v3105_v22 = vpop.xlane.xlu1 %3104 }
 0x9e8   : > { %v3117_v60 = vpop.xlane.xlu0 %3116  ;;  %v3111_v26 = vpop.xlane.xlu1 %3110 }
 0x9e9   : > { %6459 = vrcp.f32 %v3111_v26 }
 0x9ea   : > { %v6452_v56 = vpop.eup %6451  ;;  %6461 = vrcp.f32 %v3105_v22 }
 0x9eb   : > { %v6454_v17 = vpop.eup %6453  ;;  %v3140_v28 = vmul.f32 %v6452_v56, %v7796_v49  ;;  %6463 = vrcp.f32 %v3109_v37 }
 0x9ec   : > { %v6456_v63 = vpop.eup %6455  ;;  %v3113_v41 = vpop.xlane.xlu0 %3112  ;;  %v3141_v14 = vmul.f32 %v6454_v17, %v7792_v57 }
 0x9ed   : > { %v3107_v54 = vpop.xlane.xlu1 %3106  ;;  %v3142_v12 = vmul.f32 %v6456_v63, %v7789_v25 }
 0x9ee   : > { %v6458_v29 = vpop.eup %6457  ;;  %6465 = vrcp.f32 %v3107_v54  ;;  %v3154_v32 = vpack.c.bf16 %v3141_v14, %v3140_v28 }
 0x9ef   : > { %v3143_v36 = vmul.f32 %v6458_v29, %v7802_v61  ;;  %6467 = vrcp.f32 %v3113_v41 }
 0x9f0   : > { %5764 = vmatprep.mubr.bf16.mxu1 %v3154_v32  ;;  %v3119_v9 = vpop.xlane.xlu0 %3118 }
 0x9f1   : > { %v3115_v34 = vpop.xlane.xlu1 %3114  ;;  %v3155_v20 = vpack.c.bf16 %v3143_v36, %v3142_v12 }
 0x9f2   : > { %6469 = vrcp.f32 %v3115_v34 }
 0x9f3   : > { %6471 = vrcp.f32 %v3119_v9  ;;  %5765 = vmatmul.mubr.bf16.gmra.mxu1 %v3155_v20 }
 0x9f4   : > { %v3549_v49 = vpop.permute.xlu0 %3548  ;;  %6473 = vrcp.f32 %v3117_v60 }
 0x9f5   : > { %v3547_v18 = vpop.permute.xlu1 %3546  ;;  %5982 = vmatprep.subr.msk.bf16.mxu1 %vm1497_vm0, %v3549_v49  ;;  %v3590_v57 = vsel %vm1497_vm0, %v3549_v49, 0 }
 0x9f6   : > { %5789 = vmatpush3.bf16.xpose.msra.mxu1 %v3590_v57  ;;  %v6460_v25 = vpop.eup %6459  ;;  %v3587_v0 = vsel %vm1497_vm0, %v3547_v18, 0 }
 0x9f7   : > { %5983 = vmatprep.subr.msk.bf16.mxu1 %vm1497_vm0, %v3547_v18  ;;  %v6462_v39 = vpop.eup %6461  ;;  %v3147_v6 = vmul.f32 %v6460_v25, %v7814_v53 }
 0x9f8   : > { %v3491_v61 = vpop.permute.xlu0 %3490  ;;  %v6464_v48 = vpop.eup %6463  ;;  %v3144_v5 = vmul.f32 %v6462_v39, %v7811_v4 }
 0x9f9   : > { %v3493_v35 = vpop.permute.xlu1 %3492  ;;  %v3146_v27 = vmul.f32 %v6464_v48, %v7807_v15 }
 0x9fb   : > { %v6466_v47 = vpop.eup %6465  ;;  %v3157_v31 = vpack.c.bf16 %v3147_v6, %v3146_v27 }
 0x9fc   : > { %v3495_v13 = vpop.permute.xlu0 %3494  ;;  %v3145_v46 = vmul.f32 %v6466_v47, %v7820_v19  ;;  %v6468_v10 = vpop.eup %6467 }
 0x9fd   : > { %v3497_v40 = vpop.permute.xlu1 %3496  ;;  %v3148_v53 = vmul.f32 %v6468_v10, %v7822_v7 }
 0x9fe   : > { %5791 = vmatpush3.bf16.xpose.msra.mxu1 %v3587_v0  ;;  %v3156_v24 = vpack.c.bf16 %v3145_v46, %v3144_v5 }
 0x9ff   : > { %v6470_v2 = vpop.eup %6469 }
 0xa00   : > { %v6472_v33 = vpop.eup %6471  ;;  %5768 = vmatprep.mubr.bf16.mxu1 %v3156_v24  ;;  %v3499_v37 = vpop.permute.xlu0 %3498  ;;  %v3149_v22 = vmul.f32 %v6470_v2, %v7828_v16 }
 0xa01   : > { %v3501_v44 = vpop.permute.xlu1 %3500  ;;  %5769 = vmatmul.mubr.bf16.gmra.mxu1 %v3157_v31  ;;  %v6474_v4 = vpop.eup %6473  ;;  %v3151_v60 = vmul.f32 %v6472_v33, %v7826_v8 }
 0xa02   : > { %v3158_v19 = vpack.c.bf16 %v3149_v22, %v3148_v53  ;;  %v3150_v56 = vmul.f32 %v6474_v4, %v7816_v3 }
 0xa04   : > { %5772 = vmatprep.mubr.bf16.mxu1 %v3158_v19  ;;  %v3503_v26 = vpop.permute.xlu0 %3502  ;;  %v3159_v17 = vpack.c.bf16 %v3151_v60, %v3150_v56 }
 0xa05   : > { %v3505_v15 = vpop.permute.xlu1 %3504 }
 0xa08   : > { %v3930_v28 = vpop.permute.xlu0 %3929 }
 0xa09   : > { %5773 = vmatmul.mubr.bf16.gmra.mxu1 %v3159_v17  ;;  %5808 = vmatprep.subr.bf16.mxu0 %v3930_v28  ;;  %v3928_v63 = vpop.permute.xlu1 %3927  ;;  %v6222_v17 = vld [vmem:[#allocation2 + $0x50] ss:$12 sps:$4 sm:$0xff]  }
 0xa0a   : > { %5792 = vmatprep.mubr.msk.bf16.mxu1 %vm1497_vm0, %v3491_v61  ;;  %5809 = vmatpush3.bf16.msra.mxu0 %v3930_v28  ;;  %v6223_v28 = vld [vmem:[#allocation2 + $0x68] ss:$12 sps:$4 sm:$0xff]  }
 0xa0b   : > { %5810 = vmatprep.subr.bf16.mxu0 %v3928_v63 }
 0xa0c   : > { %v3926_v7 = vpop.permute.xlu0 %3925 }
 0xa0e   : > { %5811 = vmatpush3.bf16.msra.mxu0 %v3928_v63 }
 0xa0f   : > { %5812 = vmatprep.subr.bf16.mxu0 %v3926_v7 }
 0xa11   : > { %5793 = vmatmul.mubr.msk.bf16.vlgmr.msra.gmra.mxu1 %vm1497_vm0, %v3493_v35 }
 0xa12   : > { %5796 = vmatprep.mubr.msk.bf16.mxu1 %vm1497_vm0, %v3495_v13  ;;  %5813 = vmatpush3.bf16.msra.mxu0 %v3926_v7 }
 0xa19   : > { %5797 = vmatmul.mubr.msk.bf16.gmra.mxu1 %vm1497_vm0, %v3497_v40 }
 0xa1a   : > { %5800 = vmatprep.mubr.msk.bf16.mxu1 %vm1497_vm0, %v3499_v37 }
 0xa21   : > { %5801 = vmatmul.mubr.msk.bf16.gmra.mxu1 %vm1497_vm0, %v3501_v44 }
 0xa22   : > { %5804 = vmatprep.mubr.msk.bf16.mxu1 %vm1497_vm0, %v3503_v26 }
 0xa29   : > { %5805 = vmatmul.mubr.msk.bf16.gmra.mxu1 %vm1497_vm0, %v3505_v15 }
 0xa7b   : > { %v7889_v3 = vpop.f32.mrf.mxu1 }
 0xa7d   : > { %v7891_v8 = vpop.f32.mrf.mxu1 }
 0xa7f   : > { %v7893_v16 = vpop.f32.mrf.mxu1 }
 0xa81   : > { %v7895_v41 = vpop.f32.mrf.mxu1 }
 0xab3   : > { %v7897_v54 = vpop.f32.mrf.mxu1 }
 0xab5   : > { %v7899_v14 = vpop.f32.mrf.mxu1 }
 0xab7   : > { %v7901_v29 = vpop.f32.mrf.mxu1 }
 0xab9   : > { %v7903_v32 = vpop.f32.mrf.mxu1 }
 0xac1   : > { %v7905_v12 = vpop.f32.mrf.mxu1 }
 0xac3   : > { %v7907_v36 = vpop.f32.mrf.mxu1 }
 0xac5   : > { %v7909_v9 = vpop.f32.mrf.mxu1 }
 0xac7   : > { %v7911_v34 = vpop.f32.mrf.mxu1 }
 0xac9   : > { %v7913_v20 = vpop.f32.mrf.mxu1 }
 0xacb   : > { %v7915_v49 = vpop.f32.mrf.mxu1 }
 0xacd   : > { %v7917_v18 = vpop.f32.mrf.mxu1 }
 0xace   : > { %8534 = vst [vmem:[#allocation21_spill] sm:$0xff] %v7917_v18 }
 0xacf   : > { %v7919_v57 = vpop.f32.mrf.mxu1 }
 0xad1   : > { %v5794_v25 = vpop.f32.mrf.mxu1 }
 0xad2   : > { %v3709_v61 = vmul.f32 0.17677669, %v5794_v25 }
 0xad3   : > { %v3644_v35 = vpop.f32.mrf.mxu1 }
 0xad4   : > { %3727 = vmax.xlane.f32.xlu0 %v3709_v61  ;;  %v3707_v48 = vmul.f32 0.17677669, %v3644_v35 }
 0xad5   : > { %v5795_v39 = vpop.f32.mrf.mxu1 }
 0xad6   : > { %v3710_v40 = vmul.f32 0.17677669, %v5795_v39  ;;  %v6224_v39 = vld [vmem:[#allocation2 + $0x38] ss:$12 sps:$4 sm:$0xff]  }
 0xad7   : > { %v3647_v47 = vpop.f32.mrf.mxu1 }
 0xad8   : > { %v3708_v6 = vmul.f32 0.17677669, %v3647_v47  ;;  %3723 = vmax.xlane.f32.xlu0 %v3707_v48 }
 0xad9   : > { %v5798_v13 = vpop.f32.mrf.mxu1 }
 0xada   : > { %3725 = vmax.xlane.f32.xlu1 %v3708_v6  ;;  %v3713_v10 = vmul.f32 0.17677669, %v5798_v13 }
 0xadb   : > { %v3660_v5 = vpop.f32.mrf.mxu1 }
 0xadc   : > { %3729 = vmax.xlane.f32.xlu0 %v3710_v40  ;;  %v3711_v2 = vmul.f32 0.17677669, %v3660_v5 }
 0xadd   : > { %v5799_v46 = vpop.f32.mrf.mxu1 }
 0xade   : > { %v7921_v0 = vmul.f32 0.17677669, %v5799_v46 }
 0xadf   : > { %v3663_v27 = vpop.f32.mrf.mxu1 }
 0xae0   : > { %3735 = vmax.xlane.f32.xlu0 %v3713_v10  ;;  %3737 = vmax.xlane.f32.xlu1 %v7921_v0  ;;  %v3712_v31 = vmul.f32 0.17677669, %v3663_v27 }
 0xae1   : > { %v5802_v24 = vpop.f32.mrf.mxu1 }
 0xae2   : > { %v7924_v44 = vmul.f32 0.17677669, %v5802_v24 }
 0xae3   : > { %v3676_v33 = vpop.f32.mrf.mxu1 }
 0xae4   : > { %3731 = vmax.xlane.f32.xlu0 %v3711_v2  ;;  %3733 = vmax.xlane.f32.xlu1 %v3712_v31  ;;  %v7930_v4 = vmul.f32 0.17677669, %v3676_v33 }
 0xae5   : > { %v5803_v37 = vpop.f32.mrf.mxu1 }
 0xae6   : > { %v7926_v53 = vmul.f32 0.17677669, %v5803_v37 }
 0xae7   : > { %v3679_v22 = vpop.f32.mrf.mxu1 }
 0xae8   : > { %3743 = vmax.xlane.f32.xlu0 %v7924_v44  ;;  %3745 = vmax.xlane.f32.xlu1 %v7926_v53  ;;  %v7932_v19 = vmul.f32 0.17677669, %v3679_v22 }
 0xae9   : > { %v5806_v60 = vpop.f32.mrf.mxu1 }
 0xaea   : > { %v7936_v26 = vmul.f32 0.17677669, %v5806_v60 }
 0xaeb   : > { %v3692_v15 = vpop.f32.mrf.mxu1 }
 0xaec   : > { %3739 = vmax.xlane.f32.xlu0 %v7930_v4  ;;  %3741 = vmax.xlane.f32.xlu1 %v7932_v19  ;;  %v7939_v56 = vmul.f32 0.17677669, %v3692_v15 }
 0xaed   : > { %v5807_v63 = vpop.f32.mrf.mxu1 }
 0xaee   : > { %v7944_v7 = vmul.f32 0.17677669, %v5807_v63 }
 0xaef   : > { %v3695_v25 = vpop.f32.mrf.mxu1 }
 0xaf0   : > { %3751 = vmax.xlane.f32.xlu0 %v7936_v26  ;;  %v7947_v35 = vmul.f32 0.17677669, %v3695_v25 }
 0xaf4   : > { %3747 = vmax.xlane.f32.xlu0 %v7939_v56 }
 0xafd   : > { %3921 = vrot.lane.b32.xlu1 %v6222_v17, %s6807_s13 }
 0xb0a   : > { %3923 = vrot.lane.b32.xlu0 %v6223_v28, %s6807_s13 }
 0xb21   : > { %3753 = vmax.xlane.f32.xlu1 %v7944_v7 }
 0xb25   : > { %3749 = vmax.xlane.f32.xlu1 %v7947_v35 }
 0xb36   : > { %3919 = vrot.lane.b32.xlu1 %v6224_v39, %s6807_s13 }
 0xb5d   : > { %v3728_v47 = vpop.xlane.xlu0 %3727 }
 0xb5e   : > { %v3757_v13 = vsub.f32 %v3709_v61, %v3728_v47 }
 0xb60   : > { %v3775_v5 = vmul.f32 1.442695, %v3757_v13 }
 0xb61   : > { %v3724_v46 = vpop.xlane.xlu0 %3723 }
 0xb62   : > { %6475 = vpow2.f32 %v3775_v5  ;;  %v3755_v27 = vsub.f32 %v3707_v48, %v3724_v46 }
 0xb63   : > { %v3726_v24 = vpop.xlane.xlu1 %3725 }
 0xb64   : > { %v3771_v33 = vmul.f32 1.442695, %v3755_v27  ;;  %v3756_v37 = vsub.f32 %v3708_v6, %v3726_v24 }
 0xb65   : > { %v3730_v22 = vpop.xlane.xlu0 %3729 }
 0xb66   : > { %6477 = vpow2.f32 %v3771_v33  ;;  %v3758_v60 = vsub.f32 %v3710_v40, %v3730_v22  ;;  %v3773_v17 = vmul.f32 1.442695, %v3756_v37 }
 0xb68   : > { %v3777_v15 = vmul.f32 1.442695, %v3758_v60 }
 0xb69   : > { %v3736_v28 = vpop.xlane.xlu0 %3735  ;;  %v3738_v63 = vpop.xlane.xlu1 %3737 }
 0xb6a   : > { %6479 = vpow2.f32 %v3777_v15  ;;  %v3761_v25 = vsub.f32 %v3713_v10, %v3736_v28  ;;  %v3762_v47 = vsub.f32 %v7921_v0, %v3738_v63 }
 0xb6b   : > { %6481 = vpow2.f32 %v3773_v17 }
 0xb6c   : > { %v3783_v18 = vmul.f32 1.442695, %v3761_v25  ;;  %v3785_v24 = vmul.f32 1.442695, %v3762_v47 }
 0xb6d   : > { %v3732_v39 = vpop.xlane.xlu0 %3731  ;;  %v3734_v61 = vpop.xlane.xlu1 %3733 }
 0xb6e   : > { %6483 = vpow2.f32 %v3783_v18  ;;  %v3759_v48 = vsub.f32 %v3711_v2, %v3732_v39  ;;  %v3760_v13 = vsub.f32 %v3712_v31, %v3734_v61 }
 0xb6f   : > { %v7952_v5 = vpop.eup %6475 }
 0xb70   : > { %v3779_v6 = vmul.f32 1.442695, %v3759_v48  ;;  %v3781_v46 = vmul.f32 1.442695, %v3760_v13  ;;  %3807 = vadd.xlane.f32.xlu1 %v7952_v5 }
 0xb71   : > { %v3744_v40 = vpop.xlane.xlu0 %3743  ;;  %v3746_v27 = vpop.xlane.xlu1 %3745 }
 0xb72   : > { %6485 = vpow2.f32 %v3779_v6  ;;  %v3765_v10 = vsub.f32 %v7924_v44, %v3744_v40  ;;  %v3766_v0 = vsub.f32 %v7926_v53, %v3746_v27 }
 0xb73   : > { %v7956_v33 = vpop.eup %6477  ;;  %6487 = vpow2.f32 %v3781_v46 }
 0xb74   : > { %3803 = vadd.xlane.f32.xlu1 %v7956_v33  ;;  %v3791_v18 = vmul.f32 1.442695, %v3765_v10  ;;  %6489 = vpow2.f32 %v3785_v24  ;;  %v3793_v44 = vmul.f32 1.442695, %v3766_v0  ;;  %v6226_v0 = vld [vmem:[#allocation2 + $0x20] ss:$12 sps:$4 sm:$0xff]  }
 0xb75   : > { %v3740_v2 = vpop.xlane.xlu0 %3739  ;;  %v3742_v37 = vpop.xlane.xlu1 %3741 }
 0xb76   : > { %v3763_v31 = vsub.f32 %v7930_v4, %v3740_v2  ;;  %6491 = vpow2.f32 %v3791_v18  ;;  %v3764_v15 = vsub.f32 %v7932_v19, %v3742_v37  ;;  %v6225_v18 = vld [vmem:[#allocation2 + $0x8] ss:$12 sps:$4 sm:$0xff]  }
 0xb77   : > { %v7961_v22 = vpop.eup %6479 }
 0xb78   : > { %v3787_v60 = vmul.f32 1.442695, %v3763_v31  ;;  %3809 = vadd.xlane.f32.xlu1 %v7961_v22  ;;  %v7965_v28 = vpop.eup %6481  ;;  %v3789_v4 = vmul.f32 1.442695, %v3764_v15 }
 0xb79   : > { %v3752_v17 = vpop.xlane.xlu0 %3751  ;;  %v3922_v6 = vpop.permute.xlu1 %3921 }
 0xb7a   : > { %6493 = vpow2.f32 %v3787_v60  ;;  %v3769_v53 = vsub.f32 %v7936_v26, %v3752_v17 }
 0xb7b   : > { %v7968_v63 = vpop.eup %6483  ;;  %6495 = vpow2.f32 %v3793_v44 }
 0xb7c   : > { %v3799_v25 = vmul.f32 1.442695, %v3769_v53  ;;  %3815 = vadd.xlane.f32.xlu0 %v7968_v63  ;;  %3805 = vadd.xlane.f32.xlu1 %v7965_v28 }
 0xb7d   : > { %v3748_v39 = vpop.xlane.xlu0 %3747 }
 0xb7e   : > { %6497 = vpow2.f32 %v3799_v25  ;;  %v3767_v61 = vsub.f32 %v7939_v56, %v3748_v39 }
 0xb7f   : > { %v7973_v19 = vpop.eup %6485  ;;  %6499 = vpow2.f32 %v3789_v4 }
 0xb80   : > { %v7975_v47 = vpop.eup %6487  ;;  %v3795_v48 = vmul.f32 1.442695, %v3767_v61  ;;  %3811 = vadd.xlane.f32.xlu0 %v7973_v19 }
 0xb81   : > { %3813 = vadd.xlane.f32.xlu1 %v7975_v47  ;;  %v3924_v26 = vpop.permute.xlu0 %3923  ;;  %v7979_v13 = vpop.eup %6489 }
 0xb82   : > { %6501 = vpow2.f32 %v3795_v48  ;;  %5814 = vmatprep.subr.bf16.mxu0 %v3924_v26 }
 0xb83   : > { %5815 = vmatpush3.bf16.msra.mxu0 %v3924_v26  ;;  %v7982_v56 = vpop.eup %6491 }
 0xb84   : > { %3817 = vadd.xlane.f32.xlu0 %v7979_v13  ;;  %5816 = vmatprep.subr.bf16.mxu0 %v3922_v6 }
 0xb87   : > { %v7984_v46 = vpop.eup %6493  ;;  %5817 = vmatpush3.bf16.msra.mxu0 %v3922_v6 }
 0xb88   : > { %3823 = vadd.xlane.f32.xlu0 %v7982_v56  ;;  %3819 = vadd.xlane.f32.xlu1 %v7984_v46  ;;  %v7988_v40 = vpop.eup %6495 }
 0xb8b   : > { %v7990_v27 = vpop.eup %6497 }
 0xb8c   : > { %3831 = vadd.xlane.f32.xlu1 %v7990_v27  ;;  %3825 = vadd.xlane.f32.xlu0 %v7988_v40  ;;  %v7994_v24 = vpop.eup %6499 }
 0xb8f   : > { %v7996_v10 = vpop.eup %6501 }
 0xb90   : > { %3827 = vadd.xlane.f32.xlu1 %v7996_v10  ;;  %3821 = vadd.xlane.f32.xlu0 %v7994_v24 }
 0xba1   : > { %3915 = vrot.lane.b32.xlu1 %v6225_v18, %s6807_s13 }
 0xba5   : > { %2624 = vrot.lane.b32.xlu1 %v7679_v1, %s6807_s13 }
 0xba6   : > { %3917 = vrot.lane.b32.xlu0 %v6226_v0, %s6807_s13 }
 0xba9   : > { %2626 = vrot.lane.b32.xlu1 %v7673_v62, %s6807_s13 }
 0xbaa   : > { %v3754_v2 = vpop.xlane.xlu1 %3753 }
 0xbab   : > { %v3770_v44 = vsub.f32 %v7944_v7, %v3754_v2 }
 0xbad   : > { %2628 = vrot.lane.b32.xlu1 %v7677_v50, %s6807_s13  ;;  %v3801_v62 = vmul.f32 1.442695, %v3770_v44 }
 0xbae   : > { %v3750_v31 = vpop.xlane.xlu1 %3749 }
 0xbaf   : > { %v3768_v37 = vsub.f32 %v7947_v35, %v3750_v31 }
 0xbb1   : > { %3339 = vrot.lane.b32.xlu1 %v7895_v41, %s6806_s12  ;;  %v3797_v15 = vmul.f32 1.442695, %v3768_v37 }
 0xbb2   : > { %v3920_v60 = vpop.permute.xlu1 %3919 }
 0xbb3   : > { %5818 = vmatprep.subr.bf16.mxu0 %v3920_v60  ;;  %6503 = vpow2.f32 %v3797_v15 }
 0xbb4   : > { %5819 = vmatpush3.bf16.msra.mxu0 %v3920_v60  ;;  %6505 = vpow2.f32 %v3801_v62 }
 0xbb5   : > { %3343 = vrot.lane.b32.xlu1 %v7893_v16, %s6806_s12 }
 0xbb9   : > { %2632 = vrot.lane.b32.xlu1 %v7687_v58, %s6807_s13 }
 0xbbd   : > { %2636 = vrot.lane.b32.xlu1 %v7685_v52, %s6807_s13 }
 0xbc0   : > { %v8020_v50 = vpop.eup %6503 }
 0xbc1   : > { %3347 = vrot.lane.b32.xlu1 %v7903_v32, %s6806_s12  ;;  %v8025_v1 = vpop.eup %6505 }
 0xbc5   : > { %3351 = vrot.lane.b32.xlu1 %v7901_v29, %s6806_s12  ;;  %3829 = vadd.xlane.f32.xlu0 %v8020_v50 }
 0xbc9   : > { %2640 = vrot.lane.b32.xlu1 %v7695_v11, %s6807_s13  ;;  %3833 = vadd.xlane.f32.xlu0 %v8025_v1 }
 0xbcd   : > { %2644 = vrot.lane.b32.xlu1 %v7693_v30, %s6807_s13 }
 0xbd1   : > { %3355 = vrot.lane.b32.xlu1 %v7911_v34, %s6806_s12 }
 0xbd5   : > { %3359 = vrot.lane.b32.xlu1 %v7909_v9, %s6806_s12 }
 0xbd9   : > { %2648 = vrot.lane.b32.xlu1 %v7703_v55, %s6807_s13 }
 0xbdd   : > { %2652 = vrot.lane.b32.xlu1 %v7701_v21, %s6807_s13 }
 0xbdf   : > { %2622 = vrot.lane.b32.xlu0 %v7675_v45, %s6807_s13 }
 0xbe1   : > { %3363 = vrot.lane.b32.xlu1 %v7919_v57, %s6806_s12 }
 0xbe3   : > { %3337 = vrot.lane.b32.xlu0 %v7891_v8, %s6806_s12 }
 0xbe7   : > { %3341 = vrot.lane.b32.xlu0 %v7889_v3, %s6806_s12 }
 0xbeb   : > { %2630 = vrot.lane.b32.xlu0 %v7683_v51, %s6807_s13 }
 0xbef   : > { %2634 = vrot.lane.b32.xlu0 %v7681_v42, %s6807_s13 }
 0xbf3   : > { %3345 = vrot.lane.b32.xlu0 %v7899_v14, %s6806_s12 }
 0xbf7   : > { %3349 = vrot.lane.b32.xlu0 %v7897_v54, %s6806_s12 }
 0xbf9   : > { %v3808_v45 = vpop.xlane.xlu1 %3807 }
 0xbfb   : > { %2638 = vrot.lane.b32.xlu0 %v7691_v38, %s6807_s13 }
 0xbfd   : > { %v3804_v52 = vpop.xlane.xlu1 %3803 }
 0xbfe   : > { %6507 = vrcp.f32 %v3804_v52 }
 0xbff   : > { %2642 = vrot.lane.b32.xlu0 %v7689_v43, %s6807_s13 }
 0xc01   : > { %v3810_v58 = vpop.xlane.xlu1 %3809 }
 0xc03   : > { %3353 = vrot.lane.b32.xlu0 %v7907_v36, %s6806_s12 }
 0xc05   : > { %v3816_v42 = vpop.xlane.xlu0 %3815  ;;  %v3806_v51 = vpop.xlane.xlu1 %3805 }
 0xc06   : > { %6509 = vrcp.f32 %v3806_v51 }
 0xc07   : > { %3357 = vrot.lane.b32.xlu0 %v7905_v12, %s6806_s12  ;;  %6511 = vrcp.f32 %v3810_v58 }
 0xc09   : > { %v3812_v30 = vpop.xlane.xlu0 %3811 }
 0xc0a   : > { %v3814_v38 = vpop.xlane.xlu1 %3813  ;;  %6513 = vrcp.f32 %v3812_v30 }
 0xc0b   : > { %2646 = vrot.lane.b32.xlu0 %v7699_v59, %s6807_s13  ;;  %6515 = vrcp.f32 %v3814_v38  ;;  %v6508_v55 = vpop.eup %6507 }
 0xc0c   : > { %6517 = vrcp.f32 %v3808_v45  ;;  %v3851_v59 = vmul.f32 %v6508_v55, %v7956_v33 }
 0xc0d   : > { %v3818_v11 = vpop.xlane.xlu0 %3817 }
 0xc0e   : > { %6519 = vrcp.f32 %v3818_v11 }
 0xc0f   : > { %2650 = vrot.lane.b32.xlu0 %v7697_v23, %s6807_s13  ;;  %6521 = vrcp.f32 %v3816_v42 }
 0xc11   : > { %v3824_v43 = vpop.xlane.xlu0 %3823  ;;  %v3820_v21 = vpop.xlane.xlu1 %3819 }
 0xc13   : > { %3361 = vrot.lane.b32.xlu0 %v7915_v49, %s6806_s12  ;;  %v6510_v3 = vpop.eup %6509 }
 0xc14   : > { %v3852_v41 = vmul.f32 %v6510_v3, %v7965_v28  ;;  %v6512_v29 = vpop.eup %6511 }
 0xc15   : > { %v3826_v8 = vpop.xlane.xlu0 %3825  ;;  %v8070_v16 = vpop.xlane.xlu1 %3831  ;;  %v3854_v49 = vmul.f32 %v6512_v29, %v7961_v22 }
 0xc16   : > { %v3867_v54 = vpack.c.bf16 %v3852_v41, %v3851_v59 }
 0xc17   : > { %v6514_v32 = vpop.eup %6513 }
 0xc18   : > { %5824 = vmatprep.mubr.bf16.mxu0 %v3867_v54  ;;  %v6516_v9 = vpop.eup %6515  ;;  %v3855_v7 = vmul.f32 %v6514_v32, %v7973_v19 }
 0xc19   : > { %v3822_v23 = vpop.xlane.xlu0 %3821  ;;  %v8074_v14 = vpop.xlane.xlu1 %3827  ;;  %v3856_v35 = vmul.f32 %v6516_v9, %v7975_v47 }
 0xc1a   : > { %6523 = vrcp.f32 %v3822_v23  ;;  %v6518_v34 = vpop.eup %6517 }
 0xc1b   : > { %6525 = vrcp.f32 %v3820_v21  ;;  %v3853_v33 = vmul.f32 %v6518_v34, %v7952_v5  ;;  %v6520_v28 = vpop.eup %6519  ;;  %v3869_v25 = vpack.c.bf16 %v3856_v35, %v3855_v7  ;;  %v6229_v7 = vld [vmem:[#allocation9 + $0x28] sm:$0xff]   ;;  %v6230_v35 = vld [vmem:[#allocation9 + $0x20] sm:$0xff]  }
 0xc1c   : > { %6527 = vrcp.f32 %v3826_v8  ;;  %v6522_v4 = vpop.eup %6521  ;;  %v3858_v61 = vmul.f32 %v6520_v28, %v7979_v13  ;;  %v6233_v28 = vld [vmem:[#allocation9 + $0x8] sm:$0xff]  }
 0xc1d   : > { %v3918_v12 = vpop.permute.xlu0 %3917  ;;  %v3916_v36 = vpop.permute.xlu1 %3915  ;;  %6529 = vrcp.f32 %v3824_v43  ;;  %v3868_v17 = vpack.c.bf16 %v3854_v49, %v3853_v33  ;;  %v3857_v5 = vmul.f32 %v6522_v4, %v7968_v63  ;;  %v6227_v49 = vld [vmem:[#allocation9 + $0x38] sm:$0xff]  }
 0xc1e   : > { %5820 = vmatprep.subr.bf16.mxu0 %v3918_v12  ;;  %6531 = vrcp.f32 %v8074_v14  ;;  %v6231_v33 = vld [vmem:[#allocation9 + $0x18] sm:$0xff]  }
 0xc1f   : > { %5821 = vmatpush3.bf16.msra.mxu0 %v3918_v12  ;;  %v3870_v26 = vpack.c.bf16 %v3858_v61, %v3857_v5 }
 0xc20   : > { %5822 = vmatprep.subr.bf16.mxu0 %v3916_v36 }
 0xc21   : > { %v2625_v57 = vpop.permute.xlu1 %2624 }
 0xc22   : > { %2672 = vst.msk [vmem:[#allocation3 + $0x8] sm:$0xff] %vm2670_vm1, %v2625_v57  ;;  %v6228_v57 = vld [vmem:[#allocation9 + $0x30] sm:$0xff]  }
 0xc23   : > { %5823 = vmatpush3.bf16.msra.mxu0 %v3916_v36 }
 0xc24   : > { %5840 = vmatprep.subr.bf16.mxu0 %v6227_v49 }
 0xc25   : > { %v2627_v53 = vpop.permute.xlu1 %2626 }
 0xc26   : > { %2673 = vst.msk [vmem:[#allocation3 + $0x10] sm:$0xff] %vm2670_vm1, %v2627_v53  ;;  %5825 = vmatmul.mubr.bf16.vlgmr.msra.gmra.mxu0 %v3868_v17  ;;  %v6232_v17 = vld [vmem:[#allocation9 + $0x10] sm:$0xff]  }
 0xc27   : > { %v6524_v22 = vpop.eup %6523  ;;  %5828 = vmatprep.mubr.bf16.mxu0 %v3869_v25  ;;  %5841 = vmatpush3.bf16.msra.mxu0 %v6227_v49  ;;  %v6234_v25 = vld [vmem:[#allocation9] sm:$0xff]  }
 0xc28   : > { %v6526_v39 = vpop.eup %6525  ;;  %v3860_v47 = vmul.f32 %v6524_v22, %v7994_v24  ;;  %5842 = vmatprep.subr.bf16.mxu0 %v6228_v57 }
 0xc29   : > { %v2629_v19 = vpop.permute.xlu1 %2628  ;;  %v3859_v48 = vmul.f32 %v6526_v39, %v7984_v46  ;;  %v6528_v6 = vpop.eup %6527 }
 0xc2a   : > { %2674 = vst.msk [vmem:[#allocation3 + $0x18] sm:$0xff] %vm2670_vm1, %v2629_v19  ;;  %v6530_v2 = vpop.eup %6529  ;;  %v3862_v13 = vmul.f32 %v6528_v6, %v7988_v40 }
 0xc2b   : > { %v3871_v0 = vpack.c.bf16 %v3860_v47, %v3859_v48  ;;  %v3861_v24 = vmul.f32 %v6530_v2, %v7982_v56  ;;  %v6532_v30 = vpop.eup %6531  ;;  %5843 = vmatpush3.bf16.msra.mxu0 %v6228_v57 }
 0xc2c   : > { %v3863_v21 = vmul.f32 %v6532_v30, %v7996_v10  ;;  %5844 = vmatprep.subr.bf16.mxu0 %v6229_v7 }
 0xc2d   : > { %v3340_v18 = vpop.permute.xlu1 %3339  ;;  %v3872_v63 = vpack.c.bf16 %v3862_v13, %v3861_v24 }
 0xc2e   : > { %3387 = vst.msk [vmem:[#allocation3 + $0x8] sm:$0xff] %vm3385_vm2, %v3340_v18  ;;  %5829 = vmatmul.mubr.bf16.gmra.mxu0 %v3870_v26 }
 0xc2f   : > { %5832 = vmatprep.mubr.bf16.mxu0 %v3871_v0  ;;  %5845 = vmatpush3.bf16.msra.mxu0 %v6229_v7  ;;  %v8535_v0 = vld [vmem:[#allocation21_spill] sm:$0xff] }
 0xc30   : > { %5846 = vmatprep.subr.bf16.mxu0 %v6230_v35 }
 0xc31   : > { %v3344_v31 = vpop.permute.xlu1 %3343 }
 0xc32   : > { %3389 = vst.msk [vmem:[#allocation3 + $0x18] sm:$0xff] %vm3385_vm2, %v3344_v31 }
 0xc33   : > { %5847 = vmatpush3.bf16.msra.mxu0 %v6230_v35 }
 0xc34   : > { %5848 = vmatprep.subr.bf16.mxu0 %v6231_v33 }
 0xc35   : > { %v2633_v37 = vpop.permute.xlu1 %2632 }
 0xc36   : > { %2676 = vst.msk [vmem:[#allocation3 + $0x28] sm:$0xff] %vm2670_vm1, %v2633_v37  ;;  %5833 = vmatmul.mubr.bf16.gmra.mxu0 %v3872_v63 }
 0xc37   : > { %5849 = vmatpush3.bf16.msra.mxu0 %v6231_v33  ;;  %v5292_v33 = vld [vmem:[%s8500_s6] ss:$0 sm:$0xff] }
 0xc38   : > { %5850 = vmatprep.subr.bf16.mxu0 %v6232_v17 }
 0xc39   : > { %v2637_v46 = vpop.permute.xlu1 %2636 }
 0xc3a   : > { %2678 = vst.msk [vmem:[#allocation3 + $0x38] sm:$0xff] %vm2670_vm1, %v2637_v46 }
 0xc3b   : > { %5851 = vmatpush3.bf16.msra.mxu0 %v6232_v17 }
 0xc3c   : > { %5852 = vmatprep.subr.bf16.mxu0 %v6233_v28 }
 0xc3d   : > { %v3348_v60 = vpop.permute.xlu1 %3347 }
 0xc3e   : > { %3391 = vst.msk [vmem:[#allocation3 + $0x28] sm:$0xff] %vm3385_vm2, %v3348_v60 }
 0xc3f   : > { %5853 = vmatpush3.bf16.msra.mxu0 %v6233_v28 }
 0xc40   : > { %5854 = vmatprep.subr.bf16.mxu0 %v6234_v25 }
 0xc41   : > { %v3352_v44 = vpop.permute.xlu1 %3351 }
 0xc42   : > { %3393 = vst.msk [vmem:[#allocation3 + $0x38] sm:$0xff] %vm3385_vm2, %v3352_v44 }
 0xc43   : > { %5855 = vmatpush3.bf16.msra.mxu0 %v6234_v25 }
 0xc45   : > { %v2641_v40 = vpop.permute.xlu1 %2640 }
 0xc46   : > { %2680 = vst.msk [vmem:[#allocation3 + $0x48] sm:$0xff] %vm2670_vm1, %v2641_v40 }
 0xc49   : > { %v2645_v15 = vpop.permute.xlu1 %2644 }
 0xc4a   : > { %2682 = vst.msk [vmem:[#allocation3 + $0x58] sm:$0xff] %vm2670_vm1, %v2645_v15 }
 0xc4d   : > { %v3356_v56 = vpop.permute.xlu1 %3355 }
 0xc4e   : > { %3395 = vst.msk [vmem:[#allocation3 + $0x48] sm:$0xff] %vm3385_vm2, %v3356_v56  ;;  %v3830_v62 = vpop.xlane.xlu0 %3829 }
 0xc4f   : > { %6533 = vrcp.f32 %v3830_v62 }
 0xc50   : > { %6535 = vrcp.f32 %v8070_v16 }
 0xc51   : > { %v3360_v45 = vpop.permute.xlu1 %3359 }
 0xc52   : > { %3397 = vst.msk [vmem:[#allocation3 + $0x58] sm:$0xff] %vm3385_vm2, %v3360_v45  ;;  %v3834_v52 = vpop.xlane.xlu0 %3833 }
 0xc53   : > { %6537 = vrcp.f32 %v3834_v52 }
 0xc55   : > { %v2649_v58 = vpop.permute.xlu1 %2648 }
 0xc56   : > { %2684 = vst.msk [vmem:[#allocation3 + $0x68] sm:$0xff] %vm2670_vm1, %v2649_v58  ;;  %v2623_v42 = vpop.permute.xlu0 %2622 }
 0xc57   : > { %2671 = vst.msk [vmem:[#allocation3] sm:$0xff] %vm2670_vm1, %v2623_v42 }
 0xc59   : > { %v2653_v51 = vpop.permute.xlu1 %2652 }
 0xc5a   : > { %2686 = vst.msk [vmem:[#allocation3 + $0x78] sm:$0xff] %vm2670_vm1, %v2653_v51  ;;  %v3338_v38 = vpop.permute.xlu0 %3337 }
 0xc5b   : > { %3386 = vst.msk [vmem:[#allocation3] sm:$0xff] %vm3385_vm2, %v3338_v38 }
 0xc5c   : > { %v6534_v11 = vpop.eup %6533 }
 0xc5d   : > { %v3364_v43 = vpop.permute.xlu1 %3363  ;;  %v3864_v55 = vmul.f32 %v6534_v11, %v8020_v50  ;;  %v6536_v3 = vpop.eup %6535 }
 0xc5e   : > { %3399 = vst.msk [vmem:[#allocation3 + $0x68] sm:$0xff] %vm3385_vm2, %v3364_v43  ;;  %v3342_v8 = vpop.permute.xlu0 %3341  ;;  %v3865_v41 = vmul.f32 %v6536_v3, %v7990_v27 }
 0xc5f   : > { %3388 = vst.msk [vmem:[#allocation3 + $0x10] sm:$0xff] %vm3385_vm2, %v3342_v8  ;;  %v3873_v16 = vpack.c.bf16 %v3864_v55, %v3863_v21 }
 0xc60   : > { %v6538_v59 = vpop.eup %6537 }
 0xc61   : > { %5836 = vmatprep.mubr.bf16.mxu0 %v3873_v16  ;;  %v3866_v54 = vmul.f32 %v6538_v59, %v8025_v1 }
 0xc62   : > { %v2631_v23 = vpop.permute.xlu0 %2630 }
 0xc63   : > { %2675 = vst.msk [vmem:[#allocation3 + $0x20] sm:$0xff] %vm2670_vm1, %v2631_v23  ;;  %v3874_v14 = vpack.c.bf16 %v3866_v54, %v3865_v41 }
 0xc65   : > { %5837 = vmatmul.mubr.bf16.gmra.mxu0 %v3874_v14 }
 0xc66   : > { %v2635_v10 = vpop.permute.xlu0 %2634 }
 0xc67   : > { %2677 = vst.msk [vmem:[#allocation3 + $0x30] sm:$0xff] %vm2670_vm1, %v2635_v10 }
 0xc6a   : > { %v3346_v50 = vpop.permute.xlu0 %3345 }
 0xc6b   : > { %3390 = vst.msk [vmem:[#allocation3 + $0x20] sm:$0xff] %vm3385_vm2, %v3346_v50 }
 0xc6e   : > { %v3350_v29 = vpop.permute.xlu0 %3349 }
 0xc6f   : > { %3392 = vst.msk [vmem:[#allocation3 + $0x30] sm:$0xff] %vm3385_vm2, %v3350_v29 }
 0xc72   : > { %v2639_v32 = vpop.permute.xlu0 %2638 }
 0xc73   : > { %2679 = vst.msk [vmem:[#allocation3 + $0x40] sm:$0xff] %vm2670_vm1, %v2639_v32 }
 0xc76   : > { %v2643_v27 = vpop.permute.xlu0 %2642 }
 0xc77   : > { %2681 = vst.msk [vmem:[#allocation3 + $0x50] sm:$0xff] %vm2670_vm1, %v2643_v27 }
 0xc7a   : > { %v3354_v1 = vpop.permute.xlu0 %3353 }
 0xc7b   : > { %3394 = vst.msk [vmem:[#allocation3 + $0x40] sm:$0xff] %vm3385_vm2, %v3354_v1 }
 0xc7e   : > { %v3358_v12 = vpop.permute.xlu0 %3357 }
 0xc7f   : > { %3396 = vst.msk [vmem:[#allocation3 + $0x50] sm:$0xff] %vm3385_vm2, %v3358_v12 }
 0xc82   : > { %v2647_v36 = vpop.permute.xlu0 %2646 }
 0xc83   : > { %2683 = vst.msk [vmem:[#allocation3 + $0x60] sm:$0xff] %vm2670_vm1, %v2647_v36 }
 0xc86   : > { %v2651_v9 = vpop.permute.xlu0 %2650 }
 0xc87   : > { %2685 = vst.msk [vmem:[#allocation3 + $0x70] sm:$0xff] %vm2670_vm1, %v2651_v9 }
 0xc8a   : > { %v3362_v34 = vpop.permute.xlu0 %3361 }
 0xc8b   : > { %3398 = vst.msk [vmem:[#allocation3 + $0x60] sm:$0xff] %vm3385_vm2, %v3362_v34 }
 0xce6   : > { %v5826_v53 = vpop.f32.mrf.mxu0 }
 0xce7   : > { %4056 = vrot.lane.b32.xlu0 %v5826_v53, %s6805_s17 }
 0xce8   : > { %v3973_v4 = vpop.f32.mrf.mxu0 }
 0xcea   : > { %v5827_v22 = vpop.f32.mrf.mxu0 }
 0xceb   : > { %4052 = vrot.lane.b32.xlu0 %v3973_v4, %s6805_s17  ;;  %4058 = vrot.lane.b32.xlu1 %v5827_v22, %s6805_s17 }
 0xcec   : > { %v3976_v39 = vpop.f32.mrf.mxu0 }
 0xcee   : > { %v5830_v61 = vpop.f32.mrf.mxu0 }
 0xcef   : > { %4054 = vrot.lane.b32.xlu1 %v3976_v39, %s6805_s17  ;;  %4064 = vrot.lane.b32.xlu0 %v5830_v61, %s6805_s17 }
 0xcf0   : > { %v3989_v19 = vpop.f32.mrf.mxu0 }
 0xcf2   : > { %v5831_v47 = vpop.f32.mrf.mxu0 }
 0xcf3   : > { %4060 = vrot.lane.b32.xlu0 %v3989_v19, %s6805_s17  ;;  %4066 = vrot.lane.b32.xlu1 %v5831_v47, %s6805_s17 }
 0xcf4   : > { %v3992_v5 = vpop.f32.mrf.mxu0 }
 0xcf6   : > { %v5834_v48 = vpop.f32.mrf.mxu0 }
 0xcf7   : > { %4062 = vrot.lane.b32.xlu1 %v3992_v5, %s6805_s17  ;;  %4072 = vrot.lane.b32.xlu0 %v5834_v48, %s6805_s17 }
 0xcf8   : > { %v4005_v26 = vpop.f32.mrf.mxu0 }
 0xcfa   : > { %v5835_v6 = vpop.f32.mrf.mxu0 }
 0xcfb   : > { %4068 = vrot.lane.b32.xlu0 %v4005_v26, %s6805_s17  ;;  %4074 = vrot.lane.b32.xlu1 %v5835_v6, %s6805_s17 }
 0xcfc   : > { %v4008_v18 = vpop.f32.mrf.mxu0 }
 0xcff   : > { %3365 = vrot.lane.b32.xlu0 %v7913_v20, %s6806_s12  ;;  %4070 = vrot.lane.b32.xlu1 %v4008_v18, %s6805_s17 }
 0xd03   : > { %3367 = vrot.lane.b32.xlu1 %v8535_v0, %s6806_s12  ;;  %s8392_s12 = scalar_lea.vmem [#allocation13], %s5100_s9  ;;  %s8538_s9 = sld [smem:[#allocation19_spill]] }
 0xd04   : > { %s4964_s15 = sshll.u32 %s8392_s12, 4  ;;  %s8443_s15 = int_to_ptr.vmem [resolvable:$true] %s4964_s15 }
 0xd05   : > { %s6703_s5 = scalar_lea.vmem %s8443_s15, 2048 }
 0xd06   : > { %p6704_p4 = scmp.ne.s32.totalorder %s8443_s15, %s6703_s5 }
 0xd08   : > { %p6705_p8 = pnand %p6704_p4, %p6992_p7 }
 0xd09   : > { %s5359_s13 = sshll.u32 %s8538_s9, 11 }
 0xd0a   : > { %s8441_s19 = scalar_lea.hbm %s8539_s24, %s5359_s13  ;;  %p6706_p9 = pneg %p6705_p8 }
 0xd25   : > { %v5838_v2 = vpop.f32.mrf.mxu0 }
 0xd27   : > { %v4021_v13 = vpop.f32.mrf.mxu0 }
 0xd28   : > { %4076 = vrot.lane.b32.xlu0 %v4021_v13, %s6805_s17 }
 0xd29   : > { %v5839_v31 = vpop.f32.mrf.mxu0 }
 0xd2b   : > { %v4024_v24 = vpop.f32.mrf.mxu0 }
 0xd2c   : > { %4080 = vrot.lane.b32.xlu0 %v5838_v2, %s6805_s17  ;;  %4078 = vrot.lane.b32.xlu1 %v4024_v24, %s6805_s17 }
 0xd30   : > { %4082 = vrot.lane.b32.xlu1 %v5839_v31, %s6805_s17  ;;  %s8537_s17 = sld [smem:[#allocation26_spill]] }
 0xd59   : > { %v4057_v63 = vpop.permute.xlu0 %4056 }
 0xd5a   : > { %4103 = vst.msk [vmem:[#allocation3 + $0x10] sm:$0xff] %vm4100_vm3, %v4057_v63 }
 0xd5d   : > { %v4053_v20 = vpop.permute.xlu0 %4052  ;;  %v4059_v37 = vpop.permute.xlu1 %4058 }
 0xd5e   : > { %4101 = vst.msk [vmem:[#allocation3] sm:$0xff] %vm4100_vm3, %v4053_v20  ;;  %4104 = vst.msk [vmem:[#allocation3 + $0x18] sm:$0xff] %vm4100_vm3, %v4059_v37 }
 0xd61   : > { %v4065_v46 = vpop.permute.xlu0 %4064  ;;  %v4055_v60 = vpop.permute.xlu1 %4054  ;;  %v4119_v42 = vld [vmem:[#allocation3 + $0x10] sm:$0xff] }
 0xd62   : > { %4107 = vst.msk [vmem:[#allocation3 + $0x30] sm:$0xff] %vm4100_vm3, %v4065_v46  ;;  %4102 = vst.msk [vmem:[#allocation3 + $0x8] sm:$0xff] %vm4100_vm3, %v4055_v60 }
 0xd65   : > { %v4061_v44 = vpop.permute.xlu0 %4060  ;;  %v4067_v40 = vpop.permute.xlu1 %4066  ;;  %v4120_v15 = vld [vmem:[#allocation3 + $0x18] sm:$0xff]  ;;  %v4117_v45 = vld [vmem:[#allocation3] sm:$0xff] }
 0xd66   : > { %4105 = vst.msk [vmem:[#allocation3 + $0x20] sm:$0xff] %vm4100_vm3, %v4061_v44  ;;  %4108 = vst.msk [vmem:[#allocation3 + $0x38] sm:$0xff] %vm4100_vm3, %v4067_v40  ;;  %v4134_v51 = vpack.c.bf16 %v4120_v15, %v4119_v42 }
 0xd69   : > { %v4073_v56 = vpop.permute.xlu0 %4072  ;;  %v4063_v62 = vpop.permute.xlu1 %4062  ;;  %v4118_v52 = vld [vmem:[#allocation3 + $0x8] sm:$0xff]  ;;  %v4123_v16 = vld [vmem:[#allocation3 + $0x30] sm:$0xff] }
 0xd6a   : > { %4111 = vst.msk [vmem:[#allocation3 + $0x50] sm:$0xff] %vm4100_vm3, %v4073_v56  ;;  %4106 = vst.msk [vmem:[#allocation3 + $0x28] sm:$0xff] %vm4100_vm3, %v4063_v62  ;;  %v4133_v58 = vpack.c.bf16 %v4118_v52, %v4117_v45 }
 0xd6c   : > { %5856 = vmatprep.mubr.bf16.mxu0 %v4133_v58 }
 0xd6d   : > { %v4069_v30 = vpop.permute.xlu0 %4068  ;;  %5857 = vmatmul.mubr.bf16.vlgmr.msra.gmra.mxu0 %v4134_v51  ;;  %v4075_v38 = vpop.permute.xlu1 %4074  ;;  %v4124_v11 = vld [vmem:[#allocation3 + $0x38] sm:$0xff]  ;;  %v4121_v55 = vld [vmem:[#allocation3 + $0x20] sm:$0xff] }
 0xd6e   : > { %4109 = vst.msk [vmem:[#allocation3 + $0x40] sm:$0xff] %vm4100_vm3, %v4069_v30  ;;  %4112 = vst.msk [vmem:[#allocation3 + $0x58] sm:$0xff] %vm4100_vm3, %v4075_v38  ;;  %v4136_v59 = vpack.c.bf16 %v4124_v11, %v4123_v16 }
 0xd71   : > { %v3366_v43 = vpop.permute.xlu0 %3365  ;;  %v4071_v21 = vpop.permute.xlu1 %4070  ;;  %v4122_v3 = vld [vmem:[#allocation3 + $0x28] sm:$0xff]  ;;  %v4127_v50 = vld [vmem:[#allocation3 + $0x50] sm:$0xff] }
 0xd72   : > { %3400 = vst.msk [vmem:[#allocation3 + $0x70] sm:$0xff] %vm3385_vm2, %v3366_v43  ;;  %v4135_v8 = vpack.c.bf16 %v4122_v3, %v4121_v55 }
 0xd73   : > { %4110 = vst.msk [vmem:[#allocation3 + $0x48] sm:$0xff] %vm4100_vm3, %v4071_v21 }
 0xd74   : > { %5860 = vmatprep.mubr.bf16.mxu0 %v4135_v8 }
 0xd75   : > { %5861 = vmatmul.mubr.bf16.gmra.mxu0 %v4136_v59  ;;  %v3368_v41 = vpop.permute.xlu1 %3367  ;;  %v4128_v54 = vld [vmem:[#allocation3 + $0x58] sm:$0xff]  ;;  %v4125_v23 = vld [vmem:[#allocation3 + $0x40] sm:$0xff] }
 0xd76   : > { %3401 = vst.msk [vmem:[#allocation3 + $0x78] sm:$0xff] %vm3385_vm2, %v3368_v41  ;;  %v4138_v29 = vpack.c.bf16 %v4128_v54, %v4127_v50 }
 0xd7a   : > { %v4126_v14 = vld [vmem:[#allocation3 + $0x48] sm:$0xff] }
 0xd7b   : > { %v4137_v10 = vpack.c.bf16 %v4126_v14, %v4125_v23 }
 0xd7d   : > { %5864 = vmatprep.mubr.bf16.mxu0 %v4137_v10 }
 0xd7e   : > { %5865 = vmatmul.mubr.bf16.gmra.mxu0 %v4138_v29 }
 0xd9a   : > { %v4077_v32 = vpop.permute.xlu0 %4076 }
 0xd9b   : > { %4113 = vst.msk [vmem:[#allocation3 + $0x60] sm:$0xff] %vm4100_vm3, %v4077_v32 }
 0xd9e   : > { %v4081_v27 = vpop.permute.xlu0 %4080  ;;  %v4079_v1 = vpop.permute.xlu1 %4078 }
 0xd9f   : > { %4115 = vst.msk [vmem:[#allocation3 + $0x70] sm:$0xff] %vm4100_vm3, %v4081_v27  ;;  %4114 = vst.msk [vmem:[#allocation3 + $0x68] sm:$0xff] %vm4100_vm3, %v4079_v1 }
 0xda2   : > { %v4083_v12 = vpop.permute.xlu1 %4082  ;;  %v4129_v36 = vld [vmem:[#allocation3 + $0x60] sm:$0xff] }
 0xda3   : > { %4116 = vst.msk [vmem:[#allocation3 + $0x78] sm:$0xff] %vm4100_vm3, %v4083_v12 }
 0xda6   : > { %v4130_v9 = vld [vmem:[#allocation3 + $0x68] sm:$0xff]  ;;  %v4131_v49 = vld [vmem:[#allocation3 + $0x70] sm:$0xff] }
 0xda7   : > { %v4139_v34 = vpack.c.bf16 %v4130_v9, %v4129_v36 }
 0xda9   : > { %5868 = vmatprep.mubr.bf16.mxu0 %v4139_v34 }
 0xdaa   : > { %v4132_v57 = vld [vmem:[#allocation3 + $0x78] sm:$0xff] }
 0xdab   : > { %v4140_v7 = vpack.c.bf16 %v4132_v57, %v4131_v49 }
 0xdad   : > { %5869 = vmatmul.mubr.bf16.gmra.mxu0 %v4140_v7 }
 0xe2d   : > { %v5858_v35 = vpop.f32.mrf.mxu0 }
 0xe2e   : > { %v4255_v25 = vadd.f32 %v5858_v35, %v5292_v33 }
 0xe2f   : > { %v4246_v17 = vpop.f32.mrf.mxu0 }
 0xe30   : > { %v4247_v28 = vadd.f32 %v5292_v33, %v4246_v17  ;;  %v8166_v19 = vadd.f32 4.0, %v4255_v25 }
 0xe31   : > { %v5859_v53 = vpop.f32.mrf.mxu0 }
 0xe32   : > { %v8163_v4 = vadd.f32 4.0, %v4247_v28  ;;  %v4258_v47 = vadd.f32 %v5859_v53, %v5292_v33 }
 0xe33   : > { %v4249_v22 = vpop.f32.mrf.mxu0 }
 0xe34   : > { %v4250_v39 = vadd.f32 %v5292_v33, %v4249_v22  ;;  %4327 = vadd.xlane.f32.xlu0 %v8163_v4  ;;  %v8172_v6 = vadd.f32 4.0, %v4258_v47 }
 0xe35   : > { %v5862_v61 = vpop.f32.mrf.mxu0 }
 0xe36   : > { %v8168_v5 = vadd.f32 4.0, %v4250_v39  ;;  %v4271_v31 = vadd.f32 %v5862_v61, %v5292_v33 }
 0xe37   : > { %v4262_v48 = vpop.f32.mrf.mxu0 }
 0xe38   : > { %4329 = vadd.xlane.f32.xlu1 %v8168_v5  ;;  %4331 = vadd.xlane.f32.xlu0 %v8166_v19  ;;  %v4263_v18 = vadd.f32 %v5292_v33, %v4262_v48  ;;  %v8181_v60 = vadd.f32 4.0, %v4271_v31 }
 0xe39   : > { %v5863_v26 = vpop.f32.mrf.mxu0 }
 0xe3a   : > { %v8175_v24 = vadd.f32 4.0, %v4263_v18  ;;  %v4274_v63 = vadd.f32 %v5863_v26, %v5292_v33 }
 0xe3b   : > { %v4265_v0 = vpop.f32.mrf.mxu0 }
 0xe3c   : > { %v4266_v2 = vadd.f32 %v5292_v33, %v4265_v0  ;;  %4333 = vadd.xlane.f32.xlu0 %v8172_v6  ;;  %v8183_v44 = vadd.f32 4.0, %v4274_v63 }
 0xe3e   : > { %v5866_v13 = vpop.f32.mrf.mxu0  ;;  %v8177_v20 = vadd.f32 4.0, %v4266_v2 }
 0xe3f   : > { %v4287_v62 = vadd.f32 %v5866_v13, %v5292_v33 }
 0xe40   : > { %v4278_v37 = vpop.f32.mrf.mxu0  ;;  %4337 = vadd.xlane.f32.xlu1 %v8177_v20  ;;  %4335 = vadd.xlane.f32.xlu0 %v8175_v24 }
 0xe41   : > { %v4279_v40 = vadd.f32 %v5292_v33, %v4278_v37  ;;  %v8193_v42 = vadd.f32 4.0, %v4287_v62 }
 0xe42   : > { %v5867_v46 = vpop.f32.mrf.mxu0 }
 0xe43   : > { %v8187_v45 = vadd.f32 4.0, %v4279_v40  ;;  %v4290_v52 = vadd.f32 %v5867_v46, %v5292_v33 }
 0xe44   : > { %v4281_v15 = vpop.f32.mrf.mxu0  ;;  %4341 = vadd.xlane.f32.xlu1 %v8183_v44  ;;  %4339 = vadd.xlane.f32.xlu0 %v8181_v60 }
 0xe45   : > { %v4282_v56 = vadd.f32 %v5292_v33, %v4281_v15  ;;  %v8195_v51 = vadd.f32 4.0, %v4290_v52  ;;  %v6235_v15 = vld [vmem:[#allocation10 + $0x38] sm:$0xff]  }
 0xe46   : > { %5872 = vmatprep.subr.bf16.mxu1 %v6235_v15 }
 0xe47   : > { %v8189_v58 = vadd.f32 4.0, %v4282_v56  ;;  %5873 = vmatpush3.bf16.msra.mxu1 %v6235_v15  ;;  %v8307_v15 = vld [vmem:[#allocation12 + $0x18] sm:$0xff]  }
 0xe48   : > { %4343 = vadd.xlane.f32.xlu0 %v8187_v45 }
 0xe49   : > { %4345 = vadd.xlane.f32.xlu1 %v8189_v58 }
 0xe4c   : > { %4347 = vadd.xlane.f32.xlu0 %v8193_v42 }
 0xe4d   : > { %4349 = vadd.xlane.f32.xlu1 %v8195_v51 }
 0xe6d   : > { %v5870_v30 = vpop.f32.mrf.mxu0 }
 0xe6e   : > { %v4303_v21 = vadd.f32 %v5870_v30, %v5292_v33 }
 0xe6f   : > { %v4294_v38 = vpop.f32.mrf.mxu0 }
 0xe70   : > { %v4295_v11 = vadd.f32 %v5292_v33, %v4294_v38  ;;  %v8202_v16 = vadd.f32 4.0, %v4303_v21 }
 0xe71   : > { %v5871_v43 = vpop.f32.mrf.mxu0 }
 0xe72   : > { %v8199_v55 = vadd.f32 4.0, %v4295_v11  ;;  %v4306_v59 = vadd.f32 %v5871_v43, %v5292_v33 }
 0xe73   : > { %v4297_v3 = vpop.f32.mrf.mxu0 }
 0xe74   : > { %v4298_v8 = vadd.f32 %v5292_v33, %v4297_v3  ;;  %4351 = vadd.xlane.f32.xlu0 %v8199_v55  ;;  %v8208_v54 = vadd.f32 4.0, %v4306_v59 }
 0xe76   : > { %v8204_v41 = vadd.f32 4.0, %v4298_v8 }
 0xe78   : > { %4353 = vadd.xlane.f32.xlu1 %v8204_v41  ;;  %4355 = vadd.xlane.f32.xlu0 %v8202_v16 }
 0xe7c   : > { %4357 = vadd.xlane.f32.xlu1 %v8208_v54 }
 0xebd   : > { %v4328_v23 = vpop.xlane.xlu0 %4327 }
 0xebe   : > { %v4360_v14 = vmul.f32 0.0078125, %v4328_v23 }
 0xec0   : > { %v8212_v10 = vsub.f32 %v8163_v4, %v4360_v14  ;;  %v6236_v14 = vld [vmem:[#allocation10 + $0x30] sm:$0xff]  }
 0xec1   : > { %v4332_v50 = vpop.xlane.xlu0 %4331  ;;  %v4330_v29 = vpop.xlane.xlu1 %4329  ;;  %5874 = vmatprep.subr.bf16.mxu1 %v6236_v14 }
 0xec2   : > { %v4362_v32 = vmul.f32 0.0078125, %v4332_v50  ;;  %v4361_v27 = vmul.f32 0.0078125, %v4330_v29  ;;  %v4392_v1 = vmul.f32 %v8212_v10, %v8212_v10  ;;  %5875 = vmatpush3.bf16.msra.mxu1 %v6236_v14  ;;  %v6237_v50 = vld [vmem:[#allocation10 + $0x28] sm:$0xff]   ;;  %v6238_v29 = vld [vmem:[#allocation10 + $0x20] sm:$0xff]  }
 0xec3   : > { %5876 = vmatprep.subr.bf16.mxu1 %v6237_v50 }
 0xec4   : > { %v8217_v12 = vsub.f32 %v8166_v19, %v4362_v32  ;;  %v8220_v36 = vsub.f32 %v8168_v5, %v4361_v27  ;;  %4408 = vadd.xlane.f32.xlu0 %v4392_v1  ;;  %v6239_v32 = vld [vmem:[#allocation10 + $0x18] sm:$0xff]   ;;  %v6240_v27 = vld [vmem:[#allocation10 + $0x10] sm:$0xff]   ;;  %v6241_v1 = vld [vmem:[#allocation10 + $0x8] sm:$0xff]  }
 0xec5   : > { %v4334_v9 = vpop.xlane.xlu0 %4333 }
 0xec6   : > { %v4363_v34 = vmul.f32 0.0078125, %v4334_v9  ;;  %v4394_v49 = vmul.f32 %v8217_v12, %v8217_v12  ;;  %v4393_v57 = vmul.f32 %v8220_v36, %v8220_v36  ;;  %5877 = vmatpush3.bf16.msra.mxu1 %v6237_v50  ;;  %v6242_v9 = vld [vmem:[#allocation10] sm:$0xff]  }
 0xec7   : > { %5878 = vmatprep.subr.bf16.mxu1 %v6238_v29 }
 0xec8   : > { %v8227_v7 = vsub.f32 %v8172_v6, %v4363_v34  ;;  %4412 = vadd.xlane.f32.xlu0 %v4394_v49  ;;  %4410 = vadd.xlane.f32.xlu1 %v4393_v57 }
 0xec9   : > { %v4336_v35 = vpop.xlane.xlu0 %4335  ;;  %v4338_v33 = vpop.xlane.xlu1 %4337 }
 0xeca   : > { %v4364_v17 = vmul.f32 0.0078125, %v4336_v35  ;;  %v4365_v28 = vmul.f32 0.0078125, %v4338_v33  ;;  %v4395_v53 = vmul.f32 %v8227_v7, %v8227_v7  ;;  %5879 = vmatpush3.bf16.msra.mxu1 %v6238_v29 }
 0xecb   : > { %5880 = vmatprep.subr.bf16.mxu1 %v6239_v32 }
 0xecc   : > { %v8232_v25 = vsub.f32 %v8175_v24, %v4364_v17  ;;  %v8235_v22 = vsub.f32 %v8177_v20, %v4365_v28  ;;  %4414 = vadd.xlane.f32.xlu1 %v4395_v53 }
 0xecd   : > { %v4340_v39 = vpop.xlane.xlu0 %4339  ;;  %v4342_v61 = vpop.xlane.xlu1 %4341 }
 0xece   : > { %v4366_v47 = vmul.f32 0.0078125, %v4340_v39  ;;  %v4367_v48 = vmul.f32 0.0078125, %v4342_v61  ;;  %v4396_v26 = vmul.f32 %v8232_v25, %v8232_v25  ;;  %v4397_v18 = vmul.f32 %v8235_v22, %v8235_v22  ;;  %5881 = vmatpush3.bf16.msra.mxu1 %v6239_v32 }
 0xecf   : > { %5882 = vmatprep.subr.bf16.mxu1 %v6240_v27 }
 0xed0   : > { %v8242_v0 = vsub.f32 %v8181_v60, %v4366_v47  ;;  %v8245_v2 = vsub.f32 %v8183_v44, %v4367_v48  ;;  %4416 = vadd.xlane.f32.xlu0 %v4396_v26  ;;  %4418 = vadd.xlane.f32.xlu1 %v4397_v18 }
 0xed1   : > { %v4344_v13 = vpop.xlane.xlu0 %4343 }
 0xed2   : > { %v4346_v31 = vpop.xlane.xlu1 %4345  ;;  %v4368_v63 = vmul.f32 0.0078125, %v4344_v13  ;;  %v4398_v46 = vmul.f32 %v8242_v0, %v8242_v0  ;;  %v4399_v40 = vmul.f32 %v8245_v2, %v8245_v2  ;;  %5883 = vmatpush3.bf16.msra.mxu1 %v6240_v27 }
 0xed3   : > { %v4369_v37 = vmul.f32 0.0078125, %v4346_v31  ;;  %5884 = vmatprep.subr.bf16.mxu1 %v6241_v1 }
 0xed4   : > { %v8252_v56 = vsub.f32 %v8187_v45, %v4368_v63  ;;  %4420 = vadd.xlane.f32.xlu0 %v4398_v46  ;;  %4422 = vadd.xlane.f32.xlu1 %v4399_v40  ;;  %v8291_v63 = vld [vmem:[#allocation12 + $0x38] sm:$0xff]   ;;  %v8299_v46 = vld [vmem:[#allocation12 + $0x28] sm:$0xff]   ;;  %v8303_v40 = vld [vmem:[#allocation12 + $0x20] sm:$0xff]  }
 0xed5   : > { %v8255_v62 = vsub.f32 %v8189_v58, %v4369_v37  ;;  %v4348_v52 = vpop.xlane.xlu0 %4347  ;;  %v8293_v37 = vld [vmem:[#allocation12 + $0x30] sm:$0xff]   ;;  %5904 = vmatprep.subr.bf16.mxu0 %v8291_v63 }
 0xed6   : > { %v4350_v30 = vpop.xlane.xlu1 %4349  ;;  %v4370_v38 = vmul.f32 0.0078125, %v4348_v52  ;;  %v4400_v43 = vmul.f32 %v8252_v56, %v8252_v56  ;;  %5885 = vmatpush3.bf16.msra.mxu1 %v6241_v1  ;;  %5905 = vmatpush3.bf16.msra.mxu0 %v8291_v63 }
 0xed7   : > { %v4371_v11 = vmul.f32 0.0078125, %v4350_v30  ;;  %v4401_v21 = vmul.f32 %v8255_v62, %v8255_v62  ;;  %5886 = vmatprep.subr.bf16.mxu1 %v6242_v9  ;;  %5906 = vmatprep.subr.bf16.mxu0 %v8293_v37 }
 0xed8   : > { %v8262_v3 = vsub.f32 %v8193_v42, %v4370_v38  ;;  %4424 = vadd.xlane.f32.xlu0 %v4400_v43 }
 0xed9   : > { %v8265_v8 = vsub.f32 %v8195_v51, %v4371_v11  ;;  %4426 = vadd.xlane.f32.xlu1 %v4401_v21 }
 0xeda   : > { %v4402_v59 = vmul.f32 %v8262_v3, %v8262_v3  ;;  %5887 = vmatpush3.bf16.msra.mxu1 %v6242_v9  ;;  %5907 = vmatpush3.bf16.msra.mxu0 %v8293_v37 }
 0xedb   : > { %v4403_v23 = vmul.f32 %v8265_v8, %v8265_v8  ;;  %5936 = vmatprep.subr.bf16.mxu1 %v8291_v63  ;;  %5908 = vmatprep.subr.bf16.mxu0 %v8299_v46 }
 0xedc   : > { %4428 = vadd.xlane.f32.xlu0 %v4402_v59 }
 0xedd   : > { %4430 = vadd.xlane.f32.xlu1 %v4403_v23 }
 0xede   : > { %5909 = vmatpush3.bf16.msra.mxu0 %v8299_v46 }
 0xedf   : > { %5910 = vmatprep.subr.bf16.mxu0 %v8303_v40 }
 0xee2   : > { %5911 = vmatpush3.bf16.msra.mxu0 %v8303_v40 }
 0xee3   : > { %5912 = vmatprep.subr.bf16.mxu0 %v8307_v15 }
 0xee6   : > { %5913 = vmatpush3.bf16.msra.mxu0 %v8307_v15 }
 0xefd   : > { %v4352_v34 = vpop.xlane.xlu0 %4351 }
 0xefe   : > { %v4372_v49 = vmul.f32 0.0078125, %v4352_v34 }
 0xf00   : > { %v8272_v57 = vsub.f32 %v8199_v55, %v4372_v49 }
 0xf01   : > { %v4356_v35 = vpop.xlane.xlu0 %4355  ;;  %v4354_v33 = vpop.xlane.xlu1 %4353 }
 0xf02   : > { %v4374_v17 = vmul.f32 0.0078125, %v4356_v35  ;;  %v4373_v28 = vmul.f32 0.0078125, %v4354_v33  ;;  %v4404_v53 = vmul.f32 %v8272_v57, %v8272_v57 }
 0xf04   : > { %v8277_v39 = vsub.f32 %v8202_v16, %v4374_v17  ;;  %v8280_v61 = vsub.f32 %v8204_v41, %v4373_v28  ;;  %4432 = vadd.xlane.f32.xlu0 %v4404_v53 }
 0xf05   : > { %v4358_v47 = vpop.xlane.xlu1 %4357 }
 0xf06   : > { %v4375_v48 = vmul.f32 0.0078125, %v4358_v47  ;;  %v4406_v26 = vmul.f32 %v8277_v39, %v8277_v39  ;;  %v4405_v18 = vmul.f32 %v8280_v61, %v8280_v61 }
 0xf08   : > { %v8287_v13 = vsub.f32 %v8208_v54, %v4375_v48  ;;  %4436 = vadd.xlane.f32.xlu0 %v4406_v26  ;;  %4434 = vadd.xlane.f32.xlu1 %v4405_v18 }
 0xf0a   : > { %v4407_v31 = vmul.f32 %v8287_v13, %v8287_v13 }
 0xf0c   : > { %4438 = vadd.xlane.f32.xlu1 %v4407_v31 }
 0xf4d   : > { %v4409_v52 = vpop.xlane.xlu0 %4408 }
 0xf4e   : > { %v4440_v30 = vmul.f32 0.0078125, %v4409_v52 }
 0xf50   : > { %v4456_v38 = vadd.f32 1e-05, %v4440_v30 }
 0xf51   : > { %v4413_v11 = vpop.xlane.xlu0 %4412  ;;  %v4411_v43 = vpop.xlane.xlu1 %4410 }
 0xf52   : > { %6539 = vrsqrt.f32 %v4456_v38  ;;  %v4442_v21 = vmul.f32 0.0078125, %v4413_v11  ;;  %v4441_v59 = vmul.f32 0.0078125, %v4411_v43  ;;  %v8316_v11 = vld [vmem:[%s8501_s7] ss:$0 sm:$0xff] }
 0xf54   : > { %v4458_v23 = vadd.f32 1e-05, %v4442_v21  ;;  %v4457_v14 = vadd.f32 1e-05, %v4441_v59 }
 0xf55   : > { %v4415_v50 = vpop.xlane.xlu1 %4414 }
 0xf56   : > { %6541 = vrsqrt.f32 %v4458_v23  ;;  %v4443_v29 = vmul.f32 0.0078125, %v4415_v50 }
 0xf57   : > { %6543 = vrsqrt.f32 %v4457_v14 }
 0xf58   : > { %v4459_v32 = vadd.f32 1e-05, %v4443_v29 }
 0xf59   : > { %v4417_v27 = vpop.xlane.xlu0 %4416  ;;  %v4419_v1 = vpop.xlane.xlu1 %4418 }
 0xf5a   : > { %6545 = vrsqrt.f32 %v4459_v32  ;;  %v4444_v9 = vmul.f32 0.0078125, %v4417_v27  ;;  %v4445_v34 = vmul.f32 0.0078125, %v4419_v1 }
 0xf5c   : > { %v4460_v49 = vadd.f32 1e-05, %v4444_v9  ;;  %v4461_v35 = vadd.f32 1e-05, %v4445_v34  ;;  %v8324_v9 = vld [vmem:[%s8502_s8] ss:$0 sm:$0xff] }
 0xf5d   : > { %v4421_v33 = vpop.xlane.xlu0 %4420  ;;  %v4423_v17 = vpop.xlane.xlu1 %4422 }
 0xf5e   : > { %6547 = vrsqrt.f32 %v4460_v49  ;;  %v4446_v28 = vmul.f32 0.0078125, %v4421_v33  ;;  %v4447_v53 = vmul.f32 0.0078125, %v4423_v17 }
 0xf5f   : > { %v6540_v47 = vpop.eup %6539  ;;  %6549 = vrsqrt.f32 %v4461_v35 }
 0xf60   : > { %v4462_v48 = vadd.f32 1e-05, %v4446_v28  ;;  %v4463_v26 = vadd.f32 1e-05, %v4447_v53  ;;  %v4488_v52 = vmul.f32 %v6540_v47, %v8212_v10 }
 0xf61   : > { %v4425_v18 = vpop.xlane.xlu0 %4424 }
 0xf62   : > { %v4427_v31 = vpop.xlane.xlu1 %4426  ;;  %6551 = vrsqrt.f32 %v4462_v48  ;;  %v4448_v30 = vmul.f32 0.0078125, %v4425_v18  ;;  %v4510_v10 = vmul.f32 %v8316_v11, %v4488_v52 }
 0xf63   : > { %v4449_v38 = vmul.f32 0.0078125, %v4427_v31  ;;  %v6542_v43 = vpop.eup %6541  ;;  %6553 = vrsqrt.f32 %v4463_v26 }
 0xf64   : > { %v6544_v21 = vpop.eup %6543  ;;  %v4490_v59 = vmul.f32 %v6542_v43, %v8217_v12  ;;  %v4464_v23 = vadd.f32 1e-05, %v4448_v30  ;;  %v4532_v17 = vadd.f32 %v8324_v9, %v4510_v10 }
 0xf65   : > { %v4465_v14 = vadd.f32 1e-05, %v4449_v38  ;;  %v4429_v50 = vpop.xlane.xlu0 %4428  ;;  %v4489_v32 = vmul.f32 %v6544_v21, %v8220_v36 }
 0xf66   : > { %v4431_v29 = vpop.xlane.xlu1 %4430  ;;  %6555 = vrsqrt.f32 %v4464_v23  ;;  %v4450_v27 = vmul.f32 0.0078125, %v4429_v50  ;;  %v4512_v36 = vmul.f32 %v8316_v11, %v4490_v59 }
 0xf67   : > { %v4451_v1 = vmul.f32 0.0078125, %v4431_v29  ;;  %v6546_v34 = vpop.eup %6545  ;;  %6557 = vrsqrt.f32 %v4465_v14  ;;  %v4511_v12 = vmul.f32 %v8316_v11, %v4489_v32 }
 0xf68   : > { %v4491_v49 = vmul.f32 %v6546_v34, %v8227_v7  ;;  %v4466_v35 = vadd.f32 1e-05, %v4450_v27  ;;  %v4534_v18 = vadd.f32 %v8324_v9, %v4512_v36 }
 0xf69   : > { %v4467_v33 = vadd.f32 1e-05, %v4451_v1  ;;  %v4533_v28 = vadd.f32 %v8324_v9, %v4511_v12 }
 0xf6a   : > { %6559 = vrsqrt.f32 %v4466_v35  ;;  %v4513_v53 = vmul.f32 %v8316_v11, %v4491_v49 }
 0xf6b   : > { %v6548_v47 = vpop.eup %6547  ;;  %6561 = vrsqrt.f32 %v4467_v33  ;;  %v4548_v48 = vpack.c.bf16 %v4533_v28, %v4532_v17 }
 0xf6c   : > { %v6550_v26 = vpop.eup %6549  ;;  %v4535_v31 = vadd.f32 %v8324_v9, %v4513_v53  ;;  %v4492_v7 = vmul.f32 %v6548_v47, %v8232_v25 }
 0xf6d   : > { %5888 = vmatprep.mubr.bf16.mxu1 %v4548_v48  ;;  %v4493_v52 = vmul.f32 %v6550_v26, %v8235_v22 }
 0xf6e   : > { %v4549_v30 = vpack.c.bf16 %v4535_v31, %v4534_v18  ;;  %v4514_v38 = vmul.f32 %v8316_v11, %v4492_v7 }
 0xf6f   : > { %v6552_v43 = vpop.eup %6551  ;;  %v4515_v21 = vmul.f32 %v8316_v11, %v4493_v52 }
 0xf70   : > { %v6554_v59 = vpop.eup %6553  ;;  %5889 = vmatmul.mubr.bf16.vlgmr.msra.gmra.mxu1 %v4549_v30  ;;  %v4536_v23 = vadd.f32 %v8324_v9, %v4514_v38  ;;  %v4494_v14 = vmul.f32 %v6552_v43, %v8242_v0 }
 0xf71   : > { %v4537_v50 = vadd.f32 %v8324_v9, %v4515_v21  ;;  %v4495_v29 = vmul.f32 %v6554_v59, %v8245_v2  ;;  %5944 = vmatpush3.bf16.msra.mxu1 %v8291_v63 }
 0xf72   : > { %v4516_v25 = vmul.f32 %v8316_v11, %v4494_v14  ;;  %5937 = vmatprep.subr.bf16.mxu1 %v8293_v37 }
 0xf73   : > { %v6556_v22 = vpop.eup %6555  ;;  %v4550_v32 = vpack.c.bf16 %v4537_v50, %v4536_v23  ;;  %v4517_v10 = vmul.f32 %v8316_v11, %v4495_v29 }
 0xf74   : > { %v6558_v27 = vpop.eup %6557  ;;  %v4538_v1 = vadd.f32 %v8324_v9, %v4516_v25  ;;  %v4496_v34 = vmul.f32 %v6556_v22, %v8252_v56 }
 0xf75   : > { %5892 = vmatprep.mubr.bf16.mxu1 %v4550_v32  ;;  %v4539_v0 = vadd.f32 %v8324_v9, %v4517_v10  ;;  %v4497_v2 = vmul.f32 %v6558_v27, %v8255_v62  ;;  %5945 = vmatpush3.bf16.msra.mxu1 %v8293_v37 }
 0xf76   : > { %v4518_v63 = vmul.f32 %v8316_v11, %v4496_v34  ;;  %5938 = vmatprep.subr.bf16.mxu1 %v8299_v46 }
 0xf77   : > { %v6560_v12 = vpop.eup %6559  ;;  %v4551_v49 = vpack.c.bf16 %v4539_v0, %v4538_v1  ;;  %v4519_v35 = vmul.f32 %v8316_v11, %v4497_v2 }
 0xf78   : > { %v6562_v33 = vpop.eup %6561  ;;  %v4540_v36 = vadd.f32 %v8324_v9, %v4518_v63  ;;  %v4498_v56 = vmul.f32 %v6560_v12, %v8262_v3  ;;  %v6248_v63 = vld [vmem:[#allocation12 + $0x10] sm:$0xff]   ;;  %v6250_v12 = vld [vmem:[#allocation12] sm:$0xff]  }
 0xf79   : > { %5893 = vmatmul.mubr.bf16.gmra.mxu1 %v4551_v49  ;;  %v4541_v17 = vadd.f32 %v8324_v9, %v4519_v35  ;;  %v4499_v62 = vmul.f32 %v6562_v33, %v8265_v8  ;;  %5914 = vmatprep.subr.bf16.mxu0 %v6248_v63  ;;  %v5303_v49 = vld [vmem:[%s8536_s18] ss:$0 sm:$0xff]  ;;  %s6707_s18 = sshll.u32 %s6808_s16, 4  ;;  %s6708_s18 = int_to_ptr.vmem [resolvable:$false] %s6707_s18 }
 0xf7a   : > { %v4520_v37 = vmul.f32 %v8316_v11, %v4498_v56  ;;  %5946 = vmatpush3.bf16.msra.mxu1 %v8299_v46  ;;  %5915 = vmatpush3.bf16.msra.mxu0 %v6248_v63  ;;  %s6709_s20 = scalar_lea.vmem %s6708_s18, 4096  ;;  %p6710_p11 = scmp.lt.s32.totalorder %s8443_s15, %s6708_s18 }
 0xf7b   : > { %v4552_v28 = vpack.c.bf16 %v4541_v17, %v4540_v36  ;;  %v4521_v53 = vmul.f32 %v8316_v11, %v4499_v62  ;;  %5939 = vmatprep.subr.bf16.mxu1 %v8303_v40  ;;  %p6711_p2 = scmp.lt.s32.totalorder %s6709_s20, %s6703_s5 }
 0xf7c   : > { %v4542_v47 = vadd.f32 %v8324_v9, %v4520_v37 }
 0xf7d   : > { %5896 = vmatprep.mubr.bf16.mxu1 %v4552_v28  ;;  %v4543_v48 = vadd.f32 %v8324_v9, %v4521_v53  ;;  %p6712_p1 = por %p6711_p2, %p6710_p11 }
 0xf7e   : > { %5947 = vmatpush3.bf16.msra.mxu1 %v8303_v40 }
 0xf7f   : > { %v4553_v3 = vpack.c.bf16 %v4543_v48, %v4542_v47  ;;  %5940 = vmatprep.subr.bf16.mxu1 %v8307_v15  ;;  %p6713_p13 = pnand %p6712_p1, %p6706_p9 }
 0xf81   : > { %5897 = vmatmul.mubr.bf16.gmra.mxu1 %v4553_v3 }
 0xf82   : > { %5948 = vmatpush3.bf16.msra.mxu1 %v8307_v15 }
 0xf83   : > { %5941 = vmatprep.subr.bf16.mxu1 %v6248_v63 }
 0xf86   : > { %5949 = vmatpush3.bf16.msra.mxu1 %v6248_v63 }
 0xf8d   : > { %v4433_v8 = vpop.xlane.xlu0 %4432 }
 0xf8e   : > { %v4452_v46 = vmul.f32 0.0078125, %v4433_v8 }
 0xf90   : > { %v4468_v26 = vadd.f32 1e-05, %v4452_v46 }
 0xf91   : > { %v4437_v18 = vpop.xlane.xlu0 %4436  ;;  %v4435_v31 = vpop.xlane.xlu1 %4434 }
 0xf92   : > { %6563 = vrsqrt.f32 %v4468_v26  ;;  %v4454_v7 = vmul.f32 0.0078125, %v4437_v18  ;;  %v4453_v52 = vmul.f32 0.0078125, %v4435_v31 }
 0xf94   : > { %v4470_v30 = vadd.f32 1e-05, %v4454_v7  ;;  %v4469_v38 = vadd.f32 1e-05, %v4453_v52 }
 0xf95   : > { %v4439_v43 = vpop.xlane.xlu1 %4438 }
 0xf96   : > { %6565 = vrsqrt.f32 %v4470_v30  ;;  %v4455_v21 = vmul.f32 0.0078125, %v4439_v43 }
 0xf97   : > { %6567 = vrsqrt.f32 %v4469_v38 }
 0xf98   : > { %v4471_v40 = vadd.f32 1e-05, %v4455_v21 }
 0xf9a   : > { %6569 = vrsqrt.f32 %v4471_v40 }
 0xf9f   : > { %v6564_v59 = vpop.eup %6563 }
 0xfa0   : > { %v4500_v23 = vmul.f32 %v6564_v59, %v8272_v57 }
 0xfa2   : > { %v4522_v25 = vmul.f32 %v8316_v11, %v4500_v23 }
 0xfa3   : > { %v6566_v15 = vpop.eup %6565 }
 0xfa4   : > { %v6568_v14 = vpop.eup %6567  ;;  %v4502_v50 = vmul.f32 %v6566_v15, %v8277_v39  ;;  %v4544_v1 = vadd.f32 %v8324_v9, %v4522_v25 }
 0xfa5   : > { %v4501_v29 = vmul.f32 %v6568_v14, %v8280_v61 }
 0xfa6   : > { %v4524_v27 = vmul.f32 %v8316_v11, %v4502_v50 }
 0xfa7   : > { %v6570_v22 = vpop.eup %6569  ;;  %v4523_v32 = vmul.f32 %v8316_v11, %v4501_v29 }
 0xfa8   : > { %v4503_v10 = vmul.f32 %v6570_v22, %v8287_v13  ;;  %v4546_v39 = vadd.f32 %v8324_v9, %v4524_v27  ;;  %v6249_v13 = vld [vmem:[#allocation12 + $0x8] sm:$0xff]  }
 0xfa9   : > { %v4545_v34 = vadd.f32 %v8324_v9, %v4523_v32  ;;  %5916 = vmatprep.subr.bf16.mxu0 %v6249_v13  ;;  %5942 = vmatprep.subr.bf16.mxu1 %v6249_v13 }
 0xfaa   : > { %v4525_v57 = vmul.f32 %v8316_v11, %v4503_v10  ;;  %5917 = vmatpush3.bf16.msra.mxu0 %v6249_v13  ;;  %5950 = vmatpush3.bf16.msra.mxu1 %v6249_v13 }
 0xfab   : > { %v4554_v0 = vpack.c.bf16 %v4545_v34, %v4544_v1  ;;  %5918 = vmatprep.subr.bf16.mxu0 %v6250_v12  ;;  %5943 = vmatprep.subr.bf16.mxu1 %v6250_v12 }
 0xfac   : > { %v4547_v61 = vadd.f32 %v8324_v9, %v4525_v57 }
 0xfad   : > { %5900 = vmatprep.mubr.bf16.mxu1 %v4554_v0 }
 0xfae   : > { %v4555_v2 = vpack.c.bf16 %v4547_v61, %v4546_v39  ;;  %5919 = vmatpush3.bf16.msra.mxu0 %v6250_v12  ;;  %5951 = vmatpush3.bf16.msra.mxu1 %v6250_v12 }
 0xfb0   : > { %5901 = vmatmul.mubr.bf16.gmra.mxu1 %v4555_v2 }
0x1030   : > { %v5890_v11 = vpop.f32.mrf.mxu1 }
0x1031   : > { %v4670_v56 = vadd.f32 %v5890_v11, %v5303_v49 }
0x1032   : > { %v4661_v9 = vpop.f32.mrf.mxu1 }
0x1033   : > { %v4662_v33 = vadd.f32 %v5303_v49, %v4661_v9  ;;  %v4726_v48 = vmax.f32 %v4670_v56, 0.0 }
0x1034   : > { %v5891_v35 = vpop.f32.mrf.mxu1 }
0x1035   : > { %v4673_v36 = vadd.f32 %v5891_v35, %v5303_v49  ;;  %v4724_v28 = vmax.f32 %v4662_v33, 0.0 }
0x1036   : > { %v4664_v17 = vpop.f32.mrf.mxu1 }
0x1037   : > { %v4665_v62 = vadd.f32 %v5303_v49, %v4664_v17  ;;  %v4727_v37 = vmax.f32 %v4673_v36, 0.0 }
0x1039   : > { %v4725_v53 = vmax.f32 %v4665_v62, 0.0  ;;  %v5894_v47 = vpop.f32.mrf.mxu1  ;;  %v4741_v46 = vpack.c.bf16 %v4727_v37, %v4726_v48 }
0x103a   : > { %v4686_v7 = vadd.f32 %v5894_v47, %v5303_v49 }
0x103b   : > { %v4740_v3 = vpack.c.bf16 %v4725_v53, %v4724_v28  ;;  %v4677_v8 = vpop.f32.mrf.mxu1  ;;  %v8385_v28 = vld [vmem:[%s8537_s17] ss:$0 sm:$0xff] }
0x103c   : > { %v4678_v18 = vadd.f32 %v5303_v49, %v4677_v8  ;;  %v4730_v59 = vmax.f32 %v4686_v7, 0.0 }
0x103d   : > { %v5895_v26 = vpop.f32.mrf.mxu1  ;;  %5920 = vmatprep.mubr.bf16.mxu0 %v4740_v3 }
0x103e   : > { %v4689_v31 = vadd.f32 %v5895_v26, %v5303_v49  ;;  %5921 = vmatmul.mubr.bf16.vlgmr.msra.gmra.mxu0 %v4741_v46  ;;  %v4728_v21 = vmax.f32 %v4678_v18, 0.0 }
0x103f   : > { %v4680_v52 = vpop.f32.mrf.mxu1 }
0x1040   : > { %v4681_v30 = vadd.f32 %v5303_v49, %v4680_v52  ;;  %v4731_v38 = vmax.f32 %v4689_v31, 0.0 }
0x1041   : > { %v5898_v43 = vpop.f32.mrf.mxu1 }
0x1042   : > { %v4729_v40 = vmax.f32 %v4681_v30, 0.0  ;;  %v4743_v14 = vpack.c.bf16 %v4731_v38, %v4730_v59  ;;  %v4702_v22 = vadd.f32 %v5898_v43, %v5303_v49 }
0x1043   : > { %v4693_v23 = vpop.f32.mrf.mxu1 }
0x1044   : > { %v4742_v15 = vpack.c.bf16 %v4729_v40, %v4728_v21  ;;  %v4694_v29 = vadd.f32 %v5303_v49, %v4693_v23  ;;  %v4734_v57 = vmax.f32 %v4702_v22, 0.0 }
0x1045   : > { %v5899_v50 = vpop.f32.mrf.mxu1 }
0x1046   : > { %v4705_v25 = vadd.f32 %v5899_v50, %v5303_v49  ;;  %5924 = vmatprep.mubr.bf16.mxu0 %v4742_v15  ;;  %v4732_v1 = vmax.f32 %v4694_v29, 0.0 }
0x1047   : > { %v4696_v32 = vpop.f32.mrf.mxu1  ;;  %5925 = vmatmul.mubr.bf16.gmra.mxu0 %v4743_v14 }
0x1048   : > { %v4697_v10 = vadd.f32 %v5303_v49, %v4696_v32  ;;  %v4735_v27 = vmax.f32 %v4705_v25, 0.0 }
0x104a   : > { %v4733_v34 = vmax.f32 %v4697_v10, 0.0  ;;  %v4745_v39 = vpack.c.bf16 %v4735_v27, %v4734_v57 }
0x104c   : > { %v4744_v0 = vpack.c.bf16 %v4733_v34, %v4732_v1 }
0x104e   : > { %5928 = vmatprep.mubr.bf16.mxu1 %v4744_v0 }
0x104f   : > { %5929 = vmatmul.mubr.bf16.vlgmr.msra.gmra.mxu1 %v4745_v39 }
0x1070   : > { %v5902_v61 = vpop.f32.mrf.mxu1 }
0x1071   : > { %v4718_v11 = vadd.f32 %v5902_v61, %v5303_v49 }
0x1072   : > { %v4709_v2 = vpop.f32.mrf.mxu1 }
0x1073   : > { %v4710_v13 = vadd.f32 %v5303_v49, %v4709_v2  ;;  %v4738_v17 = vmax.f32 %v4718_v11, 0.0 }
0x1074   : > { %v5903_v63 = vpop.f32.mrf.mxu1 }
0x1075   : > { %v4721_v12 = vadd.f32 %v5903_v63, %v5303_v49  ;;  %v4736_v36 = vmax.f32 %v4710_v13, 0.0 }
0x1076   : > { %v4712_v9 = vpop.f32.mrf.mxu1 }
0x1077   : > { %v4713_v35 = vadd.f32 %v5303_v49, %v4712_v9  ;;  %v4739_v33 = vmax.f32 %v4721_v12, 0.0 }
0x1079   : > { %v4737_v56 = vmax.f32 %v4713_v35, 0.0  ;;  %v4747_v37 = vpack.c.bf16 %v4739_v33, %v4738_v17 }
0x107b   : > { %v4746_v62 = vpack.c.bf16 %v4737_v56, %v4736_v36 }
0x107d   : > { %5932 = vmatprep.mubr.bf16.mxu1 %v4746_v62 }
0x107e   : > { %5933 = vmatmul.mubr.bf16.gmra.mxu1 %v4747_v37 }
0x10fe   : > { %v5922_v53 = vpop.f32.mrf.mxu0 }
0x10ff   : > { %v4862_v47 = vadd.f32 %v5922_v53, %v8385_v28 }
0x1100   : > { %v4853_v48 = vpop.f32.mrf.mxu0 }
0x1101   : > { %v4918_v49 = vadd.f32 %v4862_v47, %v8166_v19  ;;  %v4854_v3 = vadd.f32 %v8385_v28, %v4853_v48 }
0x1102   : > { %v5923_v8 = vpop.f32.mrf.mxu0 }
0x1103   : > { %4934 = vst [vmem:[%s8392_s12 + $0x10] sm:$0xff] %v4918_v49  ;;  %v4916_v46 = vadd.f32 %v4854_v3, %v8163_v4  ;;  %v4865_v26 = vadd.f32 %v5923_v8, %v8385_v28 }
0x1104   : > { %v4856_v18 = vpop.f32.mrf.mxu0 }
0x1105   : > { %4932 = vst [vmem:[%s8392_s12] sm:$0xff] %v4916_v46  ;;  %v4919_v19 = vadd.f32 %v4865_v26, %v8172_v6  ;;  %v4857_v31 = vadd.f32 %v8385_v28, %v4856_v18 }
0x1107   : > { %4935 = vst [vmem:[%s8392_s12 + $0x18] sm:$0xff] %v4919_v19  ;;  %v4917_v7 = vadd.f32 %v4857_v31, %v8168_v5  ;;  %v5926_v52 = vpop.f32.mrf.mxu0 }
0x1108   : > { %v4878_v30 = vadd.f32 %v5926_v52, %v8385_v28 }
0x1109   : > { %4933 = vst [vmem:[%s8392_s12 + $0x8] sm:$0xff] %v4917_v7  ;;  %v4869_v38 = vpop.f32.mrf.mxu0 }
0x110a   : > { %v4922_v4 = vadd.f32 %v4878_v30, %v8181_v60  ;;  %v4870_v43 = vadd.f32 %v8385_v28, %v4869_v38 }
0x110b   : > { %v5927_v21 = vpop.f32.mrf.mxu0 }
0x110c   : > { %4938 = vst [vmem:[%s8392_s12 + $0x30] sm:$0xff] %v4922_v4  ;;  %v4920_v6 = vadd.f32 %v4870_v43, %v8175_v24  ;;  %v4881_v40 = vadd.f32 %v5927_v21, %v8385_v28 }
0x110d   : > { %v4872_v59 = vpop.f32.mrf.mxu0 }
0x110e   : > { %4936 = vst [vmem:[%s8392_s12 + $0x20] sm:$0xff] %v4920_v6  ;;  %v4923_v5 = vadd.f32 %v4881_v40, %v8183_v44  ;;  %v4873_v23 = vadd.f32 %v8385_v28, %v4872_v59 }
0x110f   : > { %v5930_v15 = vpop.f32.mrf.mxu1 }
0x1110   : > { %4939 = vst [vmem:[%s8392_s12 + $0x38] sm:$0xff] %v4923_v5  ;;  %v4921_v60 = vadd.f32 %v4873_v23, %v8177_v20  ;;  %v4894_v14 = vadd.f32 %v5930_v15, %v8385_v28 }
0x1111   : > { %v4885_v50 = vpop.f32.mrf.mxu1 }
0x1112   : > { %4937 = vst [vmem:[%s8392_s12 + $0x28] sm:$0xff] %v4921_v60  ;;  %v4926_v24 = vadd.f32 %v4894_v14, %v8193_v42  ;;  %v4886_v29 = vadd.f32 %v8385_v28, %v4885_v50 }
0x1113   : > { %v5931_v25 = vpop.f32.mrf.mxu1 }
0x1114   : > { %4942 = vst [vmem:[%s8392_s12 + $0x50] sm:$0xff] %v4926_v24  ;;  %v4924_v44 = vadd.f32 %v4886_v29, %v8187_v45  ;;  %v4897_v22 = vadd.f32 %v5931_v25, %v8385_v28 }
0x1115   : > { %v4888_v32 = vpop.f32.mrf.mxu1 }
0x1116   : > { %4940 = vst [vmem:[%s8392_s12 + $0x40] sm:$0xff] %v4924_v44  ;;  %v4927_v20 = vadd.f32 %v4897_v22, %v8195_v51  ;;  %v4889_v10 = vadd.f32 %v8385_v28, %v4888_v32 }
0x1118   : > { %4943 = vst [vmem:[%s8392_s12 + $0x58] sm:$0xff] %v4927_v20  ;;  %v4925_v42 = vadd.f32 %v4889_v10, %v8189_v58 }
0x111a   : > { %4941 = vst [vmem:[%s8392_s12 + $0x48] sm:$0xff] %v4925_v42 }
0x113e   : > { %v5934_v27 = vpop.f32.mrf.mxu1 }
0x113f   : > { %v4910_v1 = vadd.f32 %v5934_v27, %v8385_v28 }
0x1140   : > { %v4901_v45 = vpop.f32.mrf.mxu1 }
0x1141   : > { %v4930_v34 = vadd.f32 %v4910_v1, %v8202_v16  ;;  %v4902_v57 = vadd.f32 %v8385_v28, %v4901_v45 }
0x1142   : > { %v5935_v0 = vpop.f32.mrf.mxu1 }
0x1143   : > { %4946 = vst [vmem:[%s8392_s12 + $0x70] sm:$0xff] %v4930_v34  ;;  %v4928_v51 = vadd.f32 %v4902_v57, %v8199_v55  ;;  %v4913_v39 = vadd.f32 %v5935_v0, %v8385_v28 }
0x1144   : > { %v4904_v58 = vpop.f32.mrf.mxu1 }
0x1145   : > { %4944 = vst [vmem:[%s8392_s12 + $0x60] sm:$0xff] %v4928_v51  ;;  %v4931_v61 = vadd.f32 %v4913_v39, %v8208_v54  ;;  %v4905_v2 = vadd.f32 %v8385_v28, %v4904_v58 }
0x1147   : > { %4947 = vst [vmem:[%s8392_s12 + $0x78] sm:$0xff] %v4931_v61  ;;  %v4929_v55 = vadd.f32 %v4905_v2, %v8204_v41 }
0x1149   : > { %4945 = vst [vmem:[%s8392_s12 + $0x68] sm:$0xff] %v4929_v55 }
0x114a   : > { %6716 = shalt.err (!%p6713_p13)
}
0x114b   : > { %s6717_s25 = scalar_lea.hbm %s8441_s19, 2048  ;;  %s6721_s9 = scalar_lea.hbm %s8539_s24, 4096 }
0x114c   : > { %p6718_p10 = scmp.ne.s32.totalorder %s8441_s19, %s6717_s25  ;;  %p6722_p6 = scmp.lt.s32.totalorder %s8441_s19, %s8539_s24 }
0x114d   : > { %p6723_p3 = scmp.lt.s32.totalorder %s6721_s9, %s6717_s25 }
0x114e   : > { %p6719_p12 = pnand %p6718_p10, %p6992_p7 }
0x114f   : > { %p6724_p5 = por %p6723_p3, %p6722_p6 }
0x1150   : > { %p6720_p0 = pneg %p6719_p12 }
0x1152   : > { %p6725_p4 = pnand %p6724_p5, %p6720_p0 }
0x1154   : > { %6728 = shalt.err (!%p6725_p4)
}
0x1155   : > { %s6809_s21 = smov 128   ;;  %s6810_s5 = smov 8  }
0x1156   : > { %6002 = dma.vmem_to_hbm [thread:$0]  (%p6992_p7), %s8443_s15, 2048, %s8441_s19, %s4949_s3, %s6809_s21, %s6809_s21, %s6810_s5  }
0x1157 PF: > { %s8540_s16 = sld [smem:[#allocation18_spill]]  ;;  %p8543_p9 = scmp.ge.s32.totalorder %s6791_s30, 2 }
0x1158   : > { %s8541_s18 = sld [smem:[#allocation20_spill]] }
0x115d   : > { %s4979_s20 = sand.u32 1, %s8540_s16  }
0x115e   : > { %p8542_p8 = scmp.ne.s32.totalorder %s8541_s18, 0  ;;  %s4980_s25 = scalar_lea.sflag [#allocation6], %s4979_s20 }
0x1160   : > { %p6022_p11 = pnand %p8543_p9, %p8542_p8 }
0x1162   : > { %p6023_p2 = pneg %p6022_p11 }
0x1164   : > { %6766 = dma.done.wait (%p6023_p2), %s4980_s25, 2048  }
0x1165   : > { %6768 = vsyncadd (%p6023_p2), %s4980_s25, 4294965248  ;;  %s31_s30 = sadd.s32 1, %s6791_s30   ;;  %s8544_s23 = smov %s8551_s28 }
0x1166   : > { %p28_p1 = scmp.ge.s32.totalorder %s31_s30, 4   ;;  %s8545_s25 = smov %s6775_s26 }
0x1167   : > { %s8546_s26 = smov %s6779_s27  ;;  %s8547_s27 = smov %s7001_s14 }
0x1168   : > { %s8548_s28 = smov %s6787_s29  ;;  %s8549_s29 = smov %s8544_s23 }
0x1169   :  { %30 = sbr.rel (!%p28_p1) target bundleno = 15 (0xf), region = 138 }
0x116e   :  { %4985 = vsyncpa [#allocation5], 1 }
0x116f   :  { %4987 = vsyncpa [#allocation5 + $0x1], 1 }
0x1170   :  { %4988 = vsyncpa [#allocation8], 1 }
0x1171   :  { %4989 = vsyncpa [#allocation11], 1 }
0x1172   :  { %4990 = vsyncpa [#allocation6], 1 }
0x1173   :  { %4992 = vsyncpa [#allocation6 + $0x1], 1 }

</bundles_post_ra>
